<compile_context>
chip_gen: v7x
topology: tpu7x:2x2x1
jax: 0.10.0
libtpu: 0.0.40
codegen_flags: <defaults>
</compile_context>

<pallas_src>
import functools
import math

import jax
import jax.numpy as jnp
from jax.experimental import pallas as pl
from jax.experimental.pallas import tpu as pltpu


# -----------------------------------------------------------------------------
# Per-generation VMEM budget (v7x: 64 MiB/TC, v5e/v6e: 128 MiB/TC).
# -----------------------------------------------------------------------------
def _default_vmem_limit():
    try:
        cap = pltpu.get_tpu_info().vmem_capacity_bytes
    except Exception:
        cap = 64 * 1024 * 1024  # conservative: v7x per-TensorCore physical VMEM
    return int(min(cap * 3 // 4, 100 * 1024 * 1024))


_VMEM_LIMIT = _default_vmem_limit()


def _bytes_of(*arrs):
    return int(sum(a.size * a.dtype.itemsize for a in arrs))


# -----------------------------------------------------------------------------
# In-kernel helpers
# -----------------------------------------------------------------------------
def _layer_norm(x, gamma, beta, eps):
    """LayerNormalization over the last dim (biased variance), f32 statistics."""
    mean = jnp.mean(x, axis=-1, keepdims=True)
    var = jnp.mean((x - mean) ** 2, axis=-1, keepdims=True)
    return (x - mean) * jax.lax.rsqrt(var + eps) * gamma + beta


# -----------------------------------------------------------------------------
# Kernel 1: fused QKV projection, token-tiled, outputs (B, H, L, dh) layout
# -----------------------------------------------------------------------------
def _qkv_proj_kernel(x_ref, wqkv_ref, bqkv_ref, q_ref, k_ref, v_ref):
    _, TL, D = x_ref.shape
    H = q_ref.shape[1]
    dh = q_ref.shape[3]
    x = x_ref[0]                                             # (TL, D) bf16
    qkv = jnp.dot(x, wqkv_ref[...],
                  preferred_element_type=jnp.float32) + bqkv_ref[...]  # (TL,3D)
    # 1/sqrt(dh) is already folded into the Q columns of wqkv/bqkv at init.
    # Per-head writes are lane-aligned (dh is a multiple of 128) and produce
    # the (B, H, L, dh) layout so the attention kernel needs no relayout.
    for h in range(H):
        q_ref[0, h, :, :] = qkv[:, 0 * D + h * dh:0 * D + (h + 1) * dh].astype(jnp.bfloat16)
        k_ref[0, h, :, :] = qkv[:, 1 * D + h * dh:1 * D + (h + 1) * dh].astype(jnp.bfloat16)
        v_ref[0, h, :, :] = qkv[:, 2 * D + h * dh:2 * D + (h + 1) * dh].astype(jnp.bfloat16)


def qkv_project(x, lyr, nb_heads, tl):
    B, L, D = x.shape
    H = nb_heads
    dh = D // H
    assert L % tl == 0, "seq len must be a multiple of the token tile"
    grid = (B, L // tl)
    wqkv, bqkv = lyr["wqkv"], lyr["bqkv"]
    flops = 2 * B * L * D * 3 * D
    bytes_accessed = _bytes_of(x, wqkv, bqkv) + 3 * B * H * L * dh * 2
    out_shape = tuple(jax.ShapeDtypeStruct((B, H, L, dh), jnp.bfloat16)
                      for _ in range(3))
    out_specs = tuple(pl.BlockSpec((1, H, tl, dh), lambda b, i: (b, 0, i, 0))
                      for _ in range(3))
    return pl.pallas_call(
        _qkv_proj_kernel,
        grid=grid,
        in_specs=[pl.BlockSpec((1, tl, D), lambda b, i: (b, i, 0)),
                  pl.BlockSpec((D, 3 * D), lambda b, i: (0, 0)),
                  pl.BlockSpec((1, 3 * D), lambda b, i: (0, 0))],
        out_specs=out_specs,
        out_shape=out_shape,
        compiler_params=pltpu.CompilerParams(
            dimension_semantics=("parallel", "parallel"),
            vmem_limit_bytes=_VMEM_LIMIT),
        cost_estimate=pl.CostEstimate(flops=flops, transcendentals=0,
                                      bytes_accessed=bytes_accessed),
    )(x, wqkv, bqkv)


# -----------------------------------------------------------------------------
# Kernel 2: flash-style causal MHA + out-proj + add&LN + ReLU MLP + add&LN
# Grid: (batch, q_tiles, kv_tiles); kv is the reduction ("arbitrary") axis.
# -----------------------------------------------------------------------------
def _attn_ffn_kernel(x_ref, q_ref, k_ref, v_ref,
                     wo_ref, bo_ref, ln1_g_ref, ln1_b_ref,
                     w1_ref, b1_ref, w2_ref, b2_ref,
                     ln2_g_ref, ln2_b_ref,
                     o_ref,
                     m_sc, l_sc, acc_sc, *, eps):
    qi = pl.program_id(1)
    kv = pl.program_id(2)
    _, H, TQ, dh = q_ref.shape
    TKV = k_ref.shape[2]
    D = H * dh

    @pl.when(kv == 0)
    def _init():
        m_sc[...] = jnp.full_like(m_sc, -jnp.inf)
        l_sc[...] = jnp.zeros_like(l_sc)
        acc_sc[...] = jnp.zeros_like(acc_sc)

    q_start = qi * TQ
    k_start = kv * TKV

    # Skip KV tiles that lie entirely above the causal diagonal.
    @pl.when(k_start <= q_start + TQ - 1)
    def _update():
        q = q_ref[0]                                          # (H, TQ, dh) bf16
        k = k_ref[0]                                          # (H, TKV, dh)
        v = v_ref[0]                                          # (H, TKV, dh)
        s = jnp.einsum('hqd,hkd->hqk', q, k,
                       preferred_element_type=jnp.float32)    # (H, TQ, TKV) f32
        rows = q_start + jax.lax.broadcasted_iota(jnp.int32, (1, TQ, TKV), 1)
        cols = k_start + jax.lax.broadcasted_iota(jnp.int32, (1, TQ, TKV), 2)
        s = jnp.where(cols <= rows, s, -1e30)                 # scores stay f32
        m_prev = m_sc[...]                                    # (H, TQ, 1)
        m_new = jnp.maximum(m_prev, jnp.max(s, axis=-1, keepdims=True))
        alpha = jnp.exp(m_prev - m_new)
        p = jnp.exp(s - m_new)
        l_sc[...] = alpha * l_sc[...] + jnp.sum(p, axis=-1, keepdims=True)
        acc_sc[...] = alpha * acc_sc[...] + jnp.einsum(
            'hqk,hkd->hqd', p.astype(v.dtype), v,
            preferred_element_type=jnp.float32)
        m_sc[...] = m_new

    @pl.when(kv == pl.num_programs(2) - 1)
    def _finalize():
        inv_l = pl.reciprocal(l_sc[...], approx=True)         # (H, TQ, 1)
        # Out-projection folds the head axis as a lane-aligned K-split sum
        # ((TQ,dh)@(dh,D) per head) -> no (H,TQ,dh)->(TQ,D) relayout / concat.
        attn = jnp.zeros((TQ, D), jnp.float32)
        for h in range(H):
            ctx_h = (acc_sc[h] * inv_l[h]).astype(jnp.bfloat16)   # (TQ, dh)
            attn = attn + jnp.dot(ctx_h, wo_ref[h * dh:(h + 1) * dh, :],
                                  preferred_element_type=jnp.float32)
        attn = attn + bo_ref[...]

        x = x_ref[0].astype(jnp.float32)                      # (TQ, D)
        h1 = _layer_norm(x + attn, ln1_g_ref[...], ln1_b_ref[...], eps)
        f = jnp.dot(h1.astype(jnp.bfloat16), w1_ref[...],
                    preferred_element_type=jnp.float32) + b1_ref[...]
        f = jnp.maximum(f, 0.0)
        f = jnp.dot(f.astype(jnp.bfloat16), w2_ref[...],
                    preferred_element_type=jnp.float32) + b2_ref[...]
        out = _layer_norm(h1 + f, ln2_g_ref[...], ln2_b_ref[...], eps)
        o_ref[0] = out.astype(o_ref.dtype)


def attn_ffn(x, q, k, v, lyr, tq, tkv, eps=1e-5):
    B, L, D = x.shape
    H, dh = q.shape[1], q.shape[3]
    assert L % tq == 0 and L % tkv == 0
    grid = (B, L // tq, L // tkv)
    wm = lambda b, qi, kv: (0, 0)                 # resident (loaded-once) weights
    in_specs = [
        pl.BlockSpec((1, tq, D), lambda b, qi, kv: (b, qi, 0)),        # residual x
        pl.BlockSpec((1, H, tq, dh), lambda b, qi, kv: (b, 0, qi, 0)),  # q
        pl.BlockSpec((1, H, tkv, dh), lambda b, qi, kv: (b, 0, kv, 0)),  # k
        pl.BlockSpec((1, H, tkv, dh), lambda b, qi, kv: (b, 0, kv, 0)),  # v
        pl.BlockSpec((D, D), wm), pl.BlockSpec((1, D), wm),             # wo, bo
        pl.BlockSpec((1, D), wm), pl.BlockSpec((1, D), wm),             # ln1 g, b
        pl.BlockSpec((D, 4 * D), wm), pl.BlockSpec((1, 4 * D), wm),     # w1, b1
        pl.BlockSpec((4 * D, D), wm), pl.BlockSpec((1, D), wm),         # w2, b2
        pl.BlockSpec((1, D), wm), pl.BlockSpec((1, D), wm),             # ln2 g, b
    ]
    flops = (4 * B * H * L * L * dh        # QK^T + PV
             + 2 * B * L * D * D           # out projection
             + 4 * B * L * D * 4 * D)      # FFN
    transcendentals = B * H * L * L        # exp in online softmax
    bytes_accessed = (_bytes_of(x, q, k, v, lyr["wo"], lyr["w1"], lyr["w2"])
                      + x.size * 2)
    return pl.pallas_call(
        functools.partial(_attn_ffn_kernel, eps=eps),
        grid=grid,
        in_specs=in_specs,
        out_specs=pl.BlockSpec((1, tq, D), lambda b, qi, kv: (b, qi, 0)),
        out_shape=jax.ShapeDtypeStruct((B, L, D), jnp.bfloat16),
        scratch_shapes=[pltpu.VMEM((H, tq, 1), jnp.float32),    # m
                        pltpu.VMEM((H, tq, 1), jnp.float32),    # l
                        pltpu.VMEM((H, tq, dh), jnp.float32)],  # acc
        compiler_params=pltpu.CompilerParams(
            dimension_semantics=("parallel", "parallel", "arbitrary"),
            vmem_limit_bytes=_VMEM_LIMIT),
        cost_estimate=pl.CostEstimate(flops=flops,
                                      transcendentals=transcendentals,
                                      bytes_accessed=bytes_accessed),
    )(x, q, k, v, lyr["wo"], lyr["bo"], lyr["ln1_g"], lyr["ln1_b"],
      lyr["w1"], lyr["b1"], lyr["w2"], lyr["b2"], lyr["ln2_g"], lyr["ln2_b"])


# -----------------------------------------------------------------------------
# Kernel 3: fused final LayerNorm + vocab-tiled unembedding
# -----------------------------------------------------------------------------
def _final_ln_unembed_kernel(x_ref, g_ref, b_ref, wu_ref, bu_ref, o_ref, *, eps):
    h = _layer_norm(x_ref[...].astype(jnp.float32), g_ref[...], b_ref[...], eps)
    o_ref[...] = (jnp.dot(h.astype(jnp.bfloat16), wu_ref[...],
                          preferred_element_type=jnp.float32) + bu_ref[...])


def final_ln_unembed(x, gamma, beta, wu, bu, tm, tv, eps=1e-5):
    B, L, D = x.shape
    V = wu.shape[1]
    T = B * L
    assert T % tm == 0 and V % tv == 0
    x2 = x.reshape(T, D)
    grid = (T // tm, V // tv)
    flops = 2 * T * D * V
    bytes_accessed = _bytes_of(x2, wu, bu) + T * V * 4
    logits = pl.pallas_call(
        functools.partial(_final_ln_unembed_kernel, eps=eps),
        grid=grid,
        in_specs=[pl.BlockSpec((tm, D), lambda i, j: (i, 0)),
                  pl.BlockSpec((1, D), lambda i, j: (0, 0)),
                  pl.BlockSpec((1, D), lambda i, j: (0, 0)),
                  pl.BlockSpec((D, tv), lambda i, j: (0, j)),
                  pl.BlockSpec((1, tv), lambda i, j: (0, j))],
        out_specs=pl.BlockSpec((tm, tv), lambda i, j: (i, j)),
        out_shape=jax.ShapeDtypeStruct((T, V), jnp.float32),
        compiler_params=pltpu.CompilerParams(
            dimension_semantics=("parallel", "parallel"),
            vmem_limit_bytes=_VMEM_LIMIT),
        cost_estimate=pl.CostEstimate(flops=flops, transcendentals=0,
                                      bytes_accessed=bytes_accessed),
    )(x2, gamma, beta, wu, bu)
    return logits.reshape(B, L, V)


# -----------------------------------------------------------------------------
# Parameter construction (deterministic, synthetic)
# -----------------------------------------------------------------------------
def init_params(key, vocab_size, max_seq_len, model_size, nb_heads, nb_layers):
    D = model_size
    dh = D // nb_heads
    q_scale = 1.0 / math.sqrt(dh)
    keys = iter(jax.random.split(key, 4 + 6 * nb_layers))

    def nrm(shape, scale=0.02):
        return (scale * jax.random.normal(next(keys), shape)).astype(jnp.float32)

    params = {
        "tok_emb": nrm((vocab_size, D)),
        "pos_emb": nrm((max_seq_len, D)),
        "ln_f_g": jnp.ones((1, D), jnp.float32),
        "ln_f_b": jnp.zeros((1, D), jnp.float32),
        "unemb_w": nrm((D, vocab_size)).astype(jnp.bfloat16),
        "unemb_b": jnp.zeros((1, vocab_size), jnp.float32),
        "layers": [],
    }
    for _ in range(nb_layers):
        wq, wk, wv = nrm((D, D)), nrm((D, D)), nrm((D, D))
        # Fuse Q|K|V along the output axis and fold 1/sqrt(dh) into Q so the
        # kernel never scales the score matrix.
        wqkv = jnp.concatenate([wq * q_scale, wk, wv], axis=1).astype(jnp.bfloat16)
        bqkv = jnp.zeros((1, 3 * D), jnp.float32)
        params["layers"].append({
            "wqkv": wqkv, "bqkv": bqkv,
            "wo": nrm((D, D)).astype(jnp.bfloat16),
            "bo": jnp.zeros((1, D), jnp.float32),
            "w1": nrm((D, 4 * D)).astype(jnp.bfloat16),
            "b1": jnp.zeros((1, 4 * D), jnp.float32),
            "w2": nrm((4 * D, D)).astype(jnp.bfloat16),
            "b2": jnp.zeros((1, D), jnp.float32),
            "ln1_g": jnp.ones((1, D), jnp.float32),
            "ln1_b": jnp.zeros((1, D), jnp.float32),
            "ln2_g": jnp.ones((1, D), jnp.float32),
            "ln2_b": jnp.zeros((1, D), jnp.float32),
        })
    return params


# -----------------------------------------------------------------------------
# Forward pass (embedding gather + positional add are cheap XLA glue)
# -----------------------------------------------------------------------------
def decoder_transformer_forward(params, x_ids, nb_heads, tq=16, tkv=16, tv=128):
    B, L = x_ids.shape
    emb = jnp.take(params["tok_emb"], x_ids, axis=0)               # (B, L, D) f32
    x = (emb + params["pos_emb"][:L][None, :, :]).astype(jnp.bfloat16)  # dropout=0
    for lyr in params["layers"]:
        q, k, v = qkv_project(x, lyr, nb_heads, tl=tq)
        x = attn_ffn(x, q, k, v, lyr, tq=tq, tkv=tkv)
    return final_ln_unembed(x, params["ln_f_g"], params["ln_f_b"],
                            params["unemb_w"], params["unemb_b"],
                            tm=tq, tv=tv)


# -----------------------------------------------------------------------------
# Pure-JAX f32 reference (full-score attention) for validation
# -----------------------------------------------------------------------------
def reference_forward(params, x_ids, nb_heads, eps=1e-5):
    B, L = x_ids.shape
    D = params["tok_emb"].shape[1]
    H, dh = nb_heads, params["tok_emb"].shape[1] // nb_heads
    x = jnp.take(params["tok_emb"], x_ids, axis=0) + params["pos_emb"][:L][None]
    mask = jnp.tril(jnp.ones((L, L), dtype=bool))

    def ln(t, g, b):
        m = t.mean(-1, keepdims=True)
        var = ((t - m) ** 2).mean(-1, keepdims=True)
        return (t - m) / jnp.sqrt(var + eps) * g + b

    for lyr in params["layers"]:
        qkv = x @ lyr["wqkv"].astype(jnp.float32) + lyr["bqkv"]
        q, k, v = qkv[..., :D], qkv[..., D:2 * D], qkv[..., 2 * D:]
        q = q.reshape(B, L, H, dh).transpose(0, 2, 1, 3)
        k = k.reshape(B, L, H, dh).transpose(0, 2, 1, 3)
        v = v.reshape(B, L, H, dh).transpose(0, 2, 1, 3)
        s = jnp.einsum('bhqd,bhkd->bhqk', q, k)
        s = jnp.where(mask[None, None], s, -jnp.inf)
        p = jax.nn.softmax(s, axis=-1)
        ctx = jnp.einsum('bhqk,bhkd->bhqd', p, v).transpose(0, 2, 1, 3).reshape(B, L, D)
        attn = ctx @ lyr["wo"].astype(jnp.float32) + lyr["bo"]
        h1 = ln(x + attn, lyr["ln1_g"], lyr["ln1_b"])
        f = jnp.maximum(h1 @ lyr["w1"].astype(jnp.float32) + lyr["b1"], 0.0)
        f = f @ lyr["w2"].astype(jnp.float32) + lyr["b2"]
        x = ln(h1 + f, lyr["ln2_g"], lyr["ln2_b"])
    xf = ln(x, params["ln_f_g"], params["ln_f_b"])
    return xf @ params["unemb_w"].astype(jnp.float32) + params["unemb_b"]


# -----------------------------------------------------------------------------
if __name__ == "__main__":
    # Lane-dense small config: D, dh, V, FFN all multiples of 128.
    vocab_size = 128
    max_seq_len = 32
    model_size = 256
    nb_heads = 2          # dh = 128
    nb_layers = 2
    batch, seq = 2, 32

    key = jax.random.PRNGKey(0)
    k_params, k_ids = jax.random.split(key)
    params = init_params(k_params, vocab_size, max_seq_len, model_size,
                         nb_heads, nb_layers)
    x_ids = jax.random.randint(k_ids, (batch, seq), 0, vocab_size,
                               dtype=jnp.int32)

    fwd = jax.jit(functools.partial(decoder_transformer_forward,
                                    nb_heads=nb_heads, tq=16, tkv=16, tv=128))
    logits = jax.block_until_ready(fwd(params, x_ids))

    assert logits.shape == (batch, seq, vocab_size)
    assert logits.dtype == jnp.float32
    assert bool(jnp.all(jnp.isfinite(logits)))

    # Loose tolerance: the kernel carries a bf16 residual stream / bf16 MXU
    # operands while the reference is pure f32.
    ref = reference_forward(params, x_ids, nb_heads)
    assert bool(jnp.allclose(logits, ref, atol=1e-1, rtol=1e-1)), float(
        jnp.max(jnp.abs(logits - ref)))

    print("KERNEL_OK")
</pallas_src>

<mosaic_0001>
module attributes {stable_mosaic.version = 11 : i64} {
  func.func @_qkv_proj_kernel(%arg0: i32, %arg1: i32, %arg2: memref<1x16x256xbf16, #tpu.memory_space<vmem>>, %arg3: memref<256x768xbf16, #tpu.memory_space<vmem>>, %arg4: memref<1x768xf32, #tpu.memory_space<vmem>>, %arg5: memref<1x2x16x128xbf16, #tpu.memory_space<vmem>>, %arg6: memref<1x2x16x128xbf16, #tpu.memory_space<vmem>>, %arg7: memref<1x2x16x128xbf16, #tpu.memory_space<vmem>>) attributes {dimension_semantics = [#tpu.dimension_semantics<parallel>, #tpu.dimension_semantics<parallel>], iteration_bounds = array<i64: 2, 2>, scalar_prefetch = 0 : i64, scratch_operands = 0 : i64, tpu.core_type = #tpu.core_type<tc>, window_params = [{transform_indices = @transform_0, window_bounds = array<i64: 1, 16, 256>}, {pipeline_mode = #tpu.pipeline_mode<synchronous>, transform_indices = @transform_1, window_bounds = array<i64: 256, 768>}, {pipeline_mode = #tpu.pipeline_mode<synchronous>, transform_indices = @transform_2, window_bounds = array<i64: 1, 768>}, {transform_indices = @transform_3, window_bounds = array<i64: 1, 2, 16, 128>}, {transform_indices = @transform_4, window_bounds = array<i64: 1, 2, 16, 128>}, {transform_indices = @transform_5, window_bounds = array<i64: 1, 2, 16, 128>}]} {
    %c0 = arith.constant 0 : index
    %c0_0 = arith.constant 0 : index
    %c0_1 = arith.constant 0 : index
    %0 = vector.load %arg2[%c0, %c0_0, %c0_1] : memref<1x16x256xbf16, #tpu.memory_space<vmem>>, vector<1x16x256xbf16>
    %1 = vector.shape_cast %0 : vector<1x16x256xbf16> to vector<16x256xbf16>
    %c0_2 = arith.constant 0 : index
    %c0_3 = arith.constant 0 : index
    %2 = vector.load %arg3[%c0_2, %c0_3] : memref<256x768xbf16, #tpu.memory_space<vmem>>, vector<256x768xbf16>
    %cst = arith.constant dense<0.000000e+00> : vector<16x768xf32>
    %3 = tpu.matmul %1, %2, %cst {dimension_numbers = #tpu.dot_dimension_numbers<[1], [0], [0], [1], [0, 0, 1, 1], [], []>} : vector<16x256xbf16>, vector<256x768xbf16>, vector<16x768xf32> -> vector<16x768xf32>
    %c0_4 = arith.constant 0 : index
    %c0_5 = arith.constant 0 : index
    %4 = vector.load %arg4[%c0_4, %c0_5] : memref<1x768xf32, #tpu.memory_space<vmem>>, vector<1x768xf32>
    %5 = vector.broadcast %4 : vector<1x768xf32> to vector<16x768xf32>
    %6 = arith.addf %3, %5 : vector<16x768xf32>
    %7 = vector.extract_strided_slice %6 {offsets = [0, 0], sizes = [16, 128], strides = [1, 1]} : vector<16x768xf32> to vector<16x128xf32>
    %8 = arith.truncf %7 : vector<16x128xf32> to vector<16x128xbf16>
    %c0_6 = arith.constant 0 : index
    %c0_7 = arith.constant 0 : index
    %c0_8 = arith.constant 0 : index
    %c0_9 = arith.constant 0 : index
    %9 = vector.load %arg5[%c0_6, %c0_7, %c0_8, %c0_9] : memref<1x2x16x128xbf16, #tpu.memory_space<vmem>>, vector<1x1x16x128xbf16>
    %10 = vector.shape_cast %9 : vector<1x1x16x128xbf16> to vector<16x128xbf16>
    %11 = vector.shape_cast %8 : vector<16x128xbf16> to vector<1x1x16x128xbf16>
    tpu.vector_store %arg5[%c0_6, %c0_7, %c0_8, %c0_9], %11 {strides = array<i32>} : memref<1x2x16x128xbf16, #tpu.memory_space<vmem>>, vector<1x1x16x128xbf16>,
    %12 = vector.extract_strided_slice %6 {offsets = [0, 256], sizes = [16, 128], strides = [1, 1]} : vector<16x768xf32> to vector<16x128xf32>
    %13 = arith.truncf %12 : vector<16x128xf32> to vector<16x128xbf16>
    %c0_10 = arith.constant 0 : index
    %c0_11 = arith.constant 0 : index
    %c0_12 = arith.constant 0 : index
    %c0_13 = arith.constant 0 : index
    %14 = vector.load %arg6[%c0_10, %c0_11, %c0_12, %c0_13] : memref<1x2x16x128xbf16, #tpu.memory_space<vmem>>, vector<1x1x16x128xbf16>
    %15 = vector.shape_cast %14 : vector<1x1x16x128xbf16> to vector<16x128xbf16>
    %16 = vector.shape_cast %13 : vector<16x128xbf16> to vector<1x1x16x128xbf16>
    tpu.vector_store %arg6[%c0_10, %c0_11, %c0_12, %c0_13], %16 {strides = array<i32>} : memref<1x2x16x128xbf16, #tpu.memory_space<vmem>>, vector<1x1x16x128xbf16>,
    %17 = vector.extract_strided_slice %6 {offsets = [0, 512], sizes = [16, 128], strides = [1, 1]} : vector<16x768xf32> to vector<16x128xf32>
    %18 = arith.truncf %17 : vector<16x128xf32> to vector<16x128xbf16>
    %c0_14 = arith.constant 0 : index
    %c0_15 = arith.constant 0 : index
    %c0_16 = arith.constant 0 : index
    %c0_17 = arith.constant 0 : index
    %19 = vector.load %arg7[%c0_14, %c0_15, %c0_16, %c0_17] : memref<1x2x16x128xbf16, #tpu.memory_space<vmem>>, vector<1x1x16x128xbf16>
    %20 = vector.shape_cast %19 : vector<1x1x16x128xbf16> to vector<16x128xbf16>
    %21 = vector.shape_cast %18 : vector<16x128xbf16> to vector<1x1x16x128xbf16>
    tpu.vector_store %arg7[%c0_14, %c0_15, %c0_16, %c0_17], %21 {strides = array<i32>} : memref<1x2x16x128xbf16, #tpu.memory_space<vmem>>, vector<1x1x16x128xbf16>,
    %22 = vector.extract_strided_slice %6 {offsets = [0, 128], sizes = [16, 128], strides = [1, 1]} : vector<16x768xf32> to vector<16x128xf32>
    %23 = arith.truncf %22 : vector<16x128xf32> to vector<16x128xbf16>
    %c0_18 = arith.constant 0 : index
    %c1 = arith.constant 1 : index
    %c0_19 = arith.constant 0 : index
    %c0_20 = arith.constant 0 : index
    %24 = vector.load %arg5[%c0_18, %c1, %c0_19, %c0_20] : memref<1x2x16x128xbf16, #tpu.memory_space<vmem>>, vector<1x1x16x128xbf16>
    %25 = vector.shape_cast %24 : vector<1x1x16x128xbf16> to vector<16x128xbf16>
    %26 = vector.shape_cast %23 : vector<16x128xbf16> to vector<1x1x16x128xbf16>
    tpu.vector_store %arg5[%c0_18, %c1, %c0_19, %c0_20], %26 {strides = array<i32>} : memref<1x2x16x128xbf16, #tpu.memory_space<vmem>>, vector<1x1x16x128xbf16>,
    %27 = vector.extract_strided_slice %6 {offsets = [0, 384], sizes = [16, 128], strides = [1, 1]} : vector<16x768xf32> to vector<16x128xf32>
    %28 = arith.truncf %27 : vector<16x128xf32> to vector<16x128xbf16>
    %c0_21 = arith.constant 0 : index
    %c1_22 = arith.constant 1 : index
    %c0_23 = arith.constant 0 : index
    %c0_24 = arith.constant 0 : index
    %29 = vector.load %arg6[%c0_21, %c1_22, %c0_23, %c0_24] : memref<1x2x16x128xbf16, #tpu.memory_space<vmem>>, vector<1x1x16x128xbf16>
    %30 = vector.shape_cast %29 : vector<1x1x16x128xbf16> to vector<16x128xbf16>
    %31 = vector.shape_cast %28 : vector<16x128xbf16> to vector<1x1x16x128xbf16>
    tpu.vector_store %arg6[%c0_21, %c1_22, %c0_23, %c0_24], %31 {strides = array<i32>} : memref<1x2x16x128xbf16, #tpu.memory_space<vmem>>, vector<1x1x16x128xbf16>,
    %32 = vector.extract_strided_slice %6 {offsets = [0, 640], sizes = [16, 128], strides = [1, 1]} : vector<16x768xf32> to vector<16x128xf32>
    %33 = arith.truncf %32 : vector<16x128xf32> to vector<16x128xbf16>
    %c0_25 = arith.constant 0 : index
    %c1_26 = arith.constant 1 : index
    %c0_27 = arith.constant 0 : index
    %c0_28 = arith.constant 0 : index
    %34 = vector.load %arg7[%c0_25, %c1_26, %c0_27, %c0_28] : memref<1x2x16x128xbf16, #tpu.memory_space<vmem>>, vector<1x1x16x128xbf16>
    %35 = vector.shape_cast %34 : vector<1x1x16x128xbf16> to vector<16x128xbf16>
    %36 = vector.shape_cast %33 : vector<16x128xbf16> to vector<1x1x16x128xbf16>
    tpu.vector_store %arg7[%c0_25, %c1_26, %c0_27, %c0_28], %36 {strides = array<i32>} : memref<1x2x16x128xbf16, #tpu.memory_space<vmem>>, vector<1x1x16x128xbf16>,
    return
  }
  func.func @transform_0(%arg0: i32, %arg1: i32) -> (i32, i32, i32) {
    %c0_i32 = arith.constant 0 : i32
    %c0_i32_0 = arith.constant 0 : i32
    return %arg0, %arg1, %c0_i32 : i32, i32, i32
  }
  func.func @transform_1(%arg0: i32, %arg1: i32) -> (i32, i32) {
    %c0_i32 = arith.constant 0 : i32
    %c0_i32_0 = arith.constant 0 : i32
    %c0_i32_1 = arith.constant 0 : i32
    return %c0_i32, %c0_i32_0 : i32, i32
  }
  func.func @transform_2(%arg0: i32, %arg1: i32) -> (i32, i32) {
    %c0_i32 = arith.constant 0 : i32
    %c0_i32_0 = arith.constant 0 : i32
    %c0_i32_1 = arith.constant 0 : i32
    return %c0_i32, %c0_i32_0 : i32, i32
  }
  func.func @transform_3(%arg0: i32, %arg1: i32) -> (i32, i32, i32, i32) {
    %c0_i32 = arith.constant 0 : i32
    %c0_i32_0 = arith.constant 0 : i32
    %c0_i32_1 = arith.constant 0 : i32
    return %arg0, %c0_i32, %arg1, %c0_i32_0 : i32, i32, i32, i32
  }
  func.func @transform_4(%arg0: i32, %arg1: i32) -> (i32, i32, i32, i32) {
    %c0_i32 = arith.constant 0 : i32
    %c0_i32_0 = arith.constant 0 : i32
    %c0_i32_1 = arith.constant 0 : i32
    return %arg0, %c0_i32, %arg1, %c0_i32_0 : i32, i32, i32, i32
  }
  func.func @transform_5(%arg0: i32, %arg1: i32) -> (i32, i32, i32, i32) {
    %c0_i32 = arith.constant 0 : i32
    %c0_i32_0 = arith.constant 0 : i32
    %c0_i32_1 = arith.constant 0 : i32
    return %arg0, %c0_i32, %arg1, %c0_i32_0 : i32, i32, i32, i32
  }
}

module attributes {stable_mosaic.version = 11 : i64} {
  func.func @_qkv_proj_kernel(%arg0: i32, %arg1: i32, %arg2: memref<1x16x256xbf16, #tpu.memory_space<vmem>>, %arg3: memref<256x768xbf16, #tpu.memory_space<vmem>>, %arg4: memref<1x768xf32, #tpu.memory_space<vmem>>, %arg5: memref<1x2x16x128xbf16, #tpu.memory_space<vmem>>, %arg6: memref<1x2x16x128xbf16, #tpu.memory_space<vmem>>, %arg7: memref<1x2x16x128xbf16, #tpu.memory_space<vmem>>) attributes {dimension_semantics = [#tpu.dimension_semantics<parallel>, #tpu.dimension_semantics<parallel>], iteration_bounds = array<i64: 2, 2>, scalar_prefetch = 0 : i64, scratch_operands = 0 : i64, tpu.core_type = #tpu.core_type<tc>, window_params = [{transform_indices = @transform_0, window_bounds = array<i64: 1, 16, 256>}, {pipeline_mode = #tpu.pipeline_mode<synchronous>, transform_indices = @transform_1, window_bounds = array<i64: 256, 768>}, {pipeline_mode = #tpu.pipeline_mode<synchronous>, transform_indices = @transform_2, window_bounds = array<i64: 1, 768>}, {transform_indices = @transform_3, window_bounds = array<i64: 1, 2, 16, 128>}, {transform_indices = @transform_4, window_bounds = array<i64: 1, 2, 16, 128>}, {transform_indices = @transform_5, window_bounds = array<i64: 1, 2, 16, 128>}]} {
    %c0 = arith.constant 0 : index
    %c0_0 = arith.constant 0 : index
    %c0_1 = arith.constant 0 : index
    %0 = vector.load %arg2[%c0, %c0_0, %c0_1] : memref<1x16x256xbf16, #tpu.memory_space<vmem>>, vector<1x16x256xbf16>
    %1 = vector.shape_cast %0 : vector<1x16x256xbf16> to vector<16x256xbf16>
    %c0_2 = arith.constant 0 : index
    %c0_3 = arith.constant 0 : index
    %2 = vector.load %arg3[%c0_2, %c0_3] : memref<256x768xbf16, #tpu.memory_space<vmem>>, vector<256x768xbf16>
    %cst = arith.constant dense<0.000000e+00> : vector<16x768xf32>
    %3 = tpu.matmul %1, %2, %cst {dimension_numbers = #tpu.dot_dimension_numbers<[1], [0], [0], [1], [0, 0, 1, 1], [], []>} : vector<16x256xbf16>, vector<256x768xbf16>, vector<16x768xf32> -> vector<16x768xf32>
    %c0_4 = arith.constant 0 : index
    %c0_5 = arith.constant 0 : index
    %4 = vector.load %arg4[%c0_4, %c0_5] : memref<1x768xf32, #tpu.memory_space<vmem>>, vector<1x768xf32>
    %5 = vector.broadcast %4 : vector<1x768xf32> to vector<16x768xf32>
    %6 = arith.addf %3, %5 : vector<16x768xf32>
    %7 = vector.extract_strided_slice %6 {offsets = [0, 0], sizes = [16, 128], strides = [1, 1]} : vector<16x768xf32> to vector<16x128xf32>
    %8 = arith.truncf %7 : vector<16x128xf32> to vector<16x128xbf16>
    %c0_6 = arith.constant 0 : index
    %c0_7 = arith.constant 0 : index
    %c0_8 = arith.constant 0 : index
    %c0_9 = arith.constant 0 : index
    %9 = vector.load %arg5[%c0_6, %c0_7, %c0_8, %c0_9] : memref<1x2x16x128xbf16, #tpu.memory_space<vmem>>, vector<1x1x16x128xbf16>
    %10 = vector.shape_cast %9 : vector<1x1x16x128xbf16> to vector<16x128xbf16>
    %11 = vector.shape_cast %8 : vector<16x128xbf16> to vector<1x1x16x128xbf16>
    tpu.vector_store %arg5[%c0_6, %c0_7, %c0_8, %c0_9], %11 {strides = array<i32>} : memref<1x2x16x128xbf16, #tpu.memory_space<vmem>>, vector<1x1x16x128xbf16>,
    %12 = vector.extract_strided_slice %6 {offsets = [0, 256], sizes = [16, 128], strides = [1, 1]} : vector<16x768xf32> to vector<16x128xf32>
    %13 = arith.truncf %12 : vector<16x128xf32> to vector<16x128xbf16>
    %c0_10 = arith.constant 0 : index
    %c0_11 = arith.constant 0 : index
    %c0_12 = arith.constant 0 : index
    %c0_13 = arith.constant 0 : index
    %14 = vector.load %arg6[%c0_10, %c0_11, %c0_12, %c0_13] : memref<1x2x16x128xbf16, #tpu.memory_space<vmem>>, vector<1x1x16x128xbf16>
    %15 = vector.shape_cast %14 : vector<1x1x16x128xbf16> to vector<16x128xbf16>
    %16 = vector.shape_cast %13 : vector<16x128xbf16> to vector<1x1x16x128xbf16>
    tpu.vector_store %arg6[%c0_10, %c0_11, %c0_12, %c0_13], %16 {strides = array<i32>} : memref<1x2x16x128xbf16, #tpu.memory_space<vmem>>, vector<1x1x16x128xbf16>,
    %17 = vector.extract_strided_slice %6 {offsets = [0, 512], sizes = [16, 128], strides = [1, 1]} : vector<16x768xf32> to vector<16x128xf32>
    %18 = arith.truncf %17 : vector<16x128xf32> to vector<16x128xbf16>
    %c0_14 = arith.constant 0 : index
    %c0_15 = arith.constant 0 : index
    %c0_16 = arith.constant 0 : index
    %c0_17 = arith.constant 0 : index
    %19 = vector.load %arg7[%c0_14, %c0_15, %c0_16, %c0_17] : memref<1x2x16x128xbf16, #tpu.memory_space<vmem>>, vector<1x1x16x128xbf16>
    %20 = vector.shape_cast %19 : vector<1x1x16x128xbf16> to vector<16x128xbf16>
    %21 = vector.shape_cast %18 : vector<16x128xbf16> to vector<1x1x16x128xbf16>
    tpu.vector_store %arg7[%c0_14, %c0_15, %c0_16, %c0_17], %21 {strides = array<i32>} : memref<1x2x16x128xbf16, #tpu.memory_space<vmem>>, vector<1x1x16x128xbf16>,
    %22 = vector.extract_strided_slice %6 {offsets = [0, 128], sizes = [16, 128], strides = [1, 1]} : vector<16x768xf32> to vector<16x128xf32>
    %23 = arith.truncf %22 : vector<16x128xf32> to vector<16x128xbf16>
    %c0_18 = arith.constant 0 : index
    %c1 = arith.constant 1 : index
    %c0_19 = arith.constant 0 : index
    %c0_20 = arith.constant 0 : index
    %24 = vector.load %arg5[%c0_18, %c1, %c0_19, %c0_20] : memref<1x2x16x128xbf16, #tpu.memory_space<vmem>>, vector<1x1x16x128xbf16>
    %25 = vector.shape_cast %24 : vector<1x1x16x128xbf16> to vector<16x128xbf16>
    %26 = vector.shape_cast %23 : vector<16x128xbf16> to vector<1x1x16x128xbf16>
    tpu.vector_store %arg5[%c0_18, %c1, %c0_19, %c0_20], %26 {strides = array<i32>} : memref<1x2x16x128xbf16, #tpu.memory_space<vmem>>, vector<1x1x16x128xbf16>,
    %27 = vector.extract_strided_slice %6 {offsets = [0, 384], sizes = [16, 128], strides = [1, 1]} : vector<16x768xf32> to vector<16x128xf32>
    %28 = arith.truncf %27 : vector<16x128xf32> to vector<16x128xbf16>
    %c0_21 = arith.constant 0 : index
    %c1_22 = arith.constant 1 : index
    %c0_23 = arith.constant 0 : index
    %c0_24 = arith.constant 0 : index
    %29 = vector.load %arg6[%c0_21, %c1_22, %c0_23, %c0_24] : memref<1x2x16x128xbf16, #tpu.memory_space<vmem>>, vector<1x1x16x128xbf16>
    %30 = vector.shape_cast %29 : vector<1x1x16x128xbf16> to vector<16x128xbf16>
    %31 = vector.shape_cast %28 : vector<16x128xbf16> to vector<1x1x16x128xbf16>
    tpu.vector_store %arg6[%c0_21, %c1_22, %c0_23, %c0_24], %31 {strides = array<i32>} : memref<1x2x16x128xbf16, #tpu.memory_space<vmem>>, vector<1x1x16x128xbf16>,
    %32 = vector.extract_strided_slice %6 {offsets = [0, 640], sizes = [16, 128], strides = [1, 1]} : vector<16x768xf32> to vector<16x128xf32>
    %33 = arith.truncf %32 : vector<16x128xf32> to vector<16x128xbf16>
    %c0_25 = arith.constant 0 : index
    %c1_26 = arith.constant 1 : index
    %c0_27 = arith.constant 0 : index
    %c0_28 = arith.constant 0 : index
    %34 = vector.load %arg7[%c0_25, %c1_26, %c0_27, %c0_28] : memref<1x2x16x128xbf16, #tpu.memory_space<vmem>>, vector<1x1x16x128xbf16>
    %35 = vector.shape_cast %34 : vector<1x1x16x128xbf16> to vector<16x128xbf16>
    %36 = vector.shape_cast %33 : vector<16x128xbf16> to vector<1x1x16x128xbf16>
    tpu.vector_store %arg7[%c0_25, %c1_26, %c0_27, %c0_28], %36 {strides = array<i32>} : memref<1x2x16x128xbf16, #tpu.memory_space<vmem>>, vector<1x1x16x128xbf16>,
    return
  }
  func.func @transform_0(%arg0: i32, %arg1: i32) -> (i32, i32, i32) {
    %c0_i32 = arith.constant 0 : i32
    %c0_i32_0 = arith.constant 0 : i32
    return %arg0, %arg1, %c0_i32 : i32, i32, i32
  }
  func.func @transform_1(%arg0: i32, %arg1: i32) -> (i32, i32) {
    %c0_i32 = arith.constant 0 : i32
    %c0_i32_0 = arith.constant 0 : i32
    %c0_i32_1 = arith.constant 0 : i32
    return %c0_i32, %c0_i32_0 : i32, i32
  }
  func.func @transform_2(%arg0: i32, %arg1: i32) -> (i32, i32) {
    %c0_i32 = arith.constant 0 : i32
    %c0_i32_0 = arith.constant 0 : i32
    %c0_i32_1 = arith.constant 0 : i32
    return %c0_i32, %c0_i32_0 : i32, i32
  }
  func.func @transform_3(%arg0: i32, %arg1: i32) -> (i32, i32, i32, i32) {
    %c0_i32 = arith.constant 0 : i32
    %c0_i32_0 = arith.constant 0 : i32
    %c0_i32_1 = arith.constant 0 : i32
    return %arg0, %c0_i32, %arg1, %c0_i32_0 : i32, i32, i32, i32
  }
  func.func @transform_4(%arg0: i32, %arg1: i32) -> (i32, i32, i32, i32) {
    %c0_i32 = arith.constant 0 : i32
    %c0_i32_0 = arith.constant 0 : i32
    %c0_i32_1 = arith.constant 0 : i32
    return %arg0, %c0_i32, %arg1, %c0_i32_0 : i32, i32, i32, i32
  }
  func.func @transform_5(%arg0: i32, %arg1: i32) -> (i32, i32, i32, i32) {
    %c0_i32 = arith.constant 0 : i32
    %c0_i32_0 = arith.constant 0 : i32
    %c0_i32_1 = arith.constant 0 : i32
    return %arg0, %c0_i32, %arg1, %c0_i32_0 : i32, i32, i32, i32
  }
}

module attributes {stable_mosaic.version = 11 : i64} {
  func.func @_attn_ffn_kernel(%arg0: i32, %arg1: i32, %arg2: i32, %arg3: memref<1x16x256xbf16, #tpu.memory_space<vmem>>, %arg4: memref<1x2x16x128xbf16, #tpu.memory_space<vmem>>, %arg5: memref<1x2x16x128xbf16, #tpu.memory_space<vmem>>, %arg6: memref<1x2x16x128xbf16, #tpu.memory_space<vmem>>, %arg7: memref<256x256xbf16, #tpu.memory_space<vmem>>, %arg8: memref<1x256xf32, #tpu.memory_space<vmem>>, %arg9: memref<1x256xf32, #tpu.memory_space<vmem>>, %arg10: memref<1x256xf32, #tpu.memory_space<vmem>>, %arg11: memref<256x1024xbf16, #tpu.memory_space<vmem>>, %arg12: memref<1x1024xf32, #tpu.memory_space<vmem>>, %arg13: memref<1024x256xbf16, #tpu.memory_space<vmem>>, %arg14: memref<1x256xf32, #tpu.memory_space<vmem>>, %arg15: memref<1x256xf32, #tpu.memory_space<vmem>>, %arg16: memref<1x256xf32, #tpu.memory_space<vmem>>, %arg17: memref<1x16x256xbf16, #tpu.memory_space<vmem>>, %arg18: memref<2x16x1xf32, #tpu.memory_space<vmem>>, %arg19: memref<2x16x1xf32, #tpu.memory_space<vmem>>, %arg20: memref<2x16x128xf32, #tpu.memory_space<vmem>>) attributes {dimension_semantics = [#tpu.dimension_semantics<parallel>, #tpu.dimension_semantics<parallel>, #tpu.dimension_semantics<arbitrary>], iteration_bounds = array<i64: 2, 2, 2>, scalar_prefetch = 0 : i64, scratch_operands = 3 : i64, tpu.core_type = #tpu.core_type<tc>, window_params = [{transform_indices = @transform_0, window_bounds = array<i64: 1, 16, 256>}, {transform_indices = @transform_1, window_bounds = array<i64: 1, 2, 16, 128>}, {transform_indices = @transform_2, window_bounds = array<i64: 1, 2, 16, 128>}, {transform_indices = @transform_3, window_bounds = array<i64: 1, 2, 16, 128>}, {pipeline_mode = #tpu.pipeline_mode<synchronous>, transform_indices = @transform_4, window_bounds = array<i64: 256, 256>}, {pipeline_mode = #tpu.pipeline_mode<synchronous>, transform_indices = @transform_5, window_bounds = array<i64: 1, 256>}, {pipeline_mode = #tpu.pipeline_mode<synchronous>, transform_indices = @transform_6, window_bounds = array<i64: 1, 256>}, {pipeline_mode = #tpu.pipeline_mode<synchronous>, transform_indices = @transform_7, window_bounds = array<i64: 1, 256>}, {pipeline_mode = #tpu.pipeline_mode<synchronous>, transform_indices = @transform_8, window_bounds = array<i64: 256, 1024>}, {pipeline_mode = #tpu.pipeline_mode<synchronous>, transform_indices = @transform_9, window_bounds = array<i64: 1, 1024>}, {pipeline_mode = #tpu.pipeline_mode<synchronous>, transform_indices = @transform_10, window_bounds = array<i64: 1024, 256>}, {pipeline_mode = #tpu.pipeline_mode<synchronous>, transform_indices = @transform_11, window_bounds = array<i64: 1, 256>}, {pipeline_mode = #tpu.pipeline_mode<synchronous>, transform_indices = @transform_12, window_bounds = array<i64: 1, 256>}, {pipeline_mode = #tpu.pipeline_mode<synchronous>, transform_indices = @transform_13, window_bounds = array<i64: 1, 256>}, {transform_indices = @transform_14, window_bounds = array<i64: 1, 16, 256>}]} {
    %c0_i32 = arith.constant 0 : i32
    %0 = arith.cmpi eq, %arg2, %c0_i32 : i32
    %1 = arith.extui %0 : i1 to i32
    %c0_i32_0 = arith.constant 0 : i32
    %2 = arith.cmpi ne, %1, %c0_i32_0 : i32
    scf.if %2 {
      %cst = arith.constant 0xFF800000 : f32
      %13 = vector.broadcast %cst : f32 to vector<2x16x1xf32>
      %c0 = arith.constant 0 : index
      %c0_6 = arith.constant 0 : index
      %c0_7 = arith.constant 0 : index
      %14 = vector.load %arg18[%c0, %c0_6, %c0_7] : memref<2x16x1xf32, #tpu.memory_space<vmem>>, vector<2x16x1xf32>
      tpu.vector_store %arg18[%c0, %c0_6, %c0_7], %13 {strides = array<i32>} : memref<2x16x1xf32, #tpu.memory_space<vmem>>, vector<2x16x1xf32>,
      %cst_8 = arith.constant 0.000000e+00 : f32
      %15 = vector.broadcast %cst_8 : f32 to vector<2x16x1xf32>
      %c0_9 = arith.constant 0 : index
      %c0_10 = arith.constant 0 : index
      %c0_11 = arith.constant 0 : index
      %16 = vector.load %arg19[%c0_9, %c0_10, %c0_11] : memref<2x16x1xf32, #tpu.memory_space<vmem>>, vector<2x16x1xf32>
      tpu.vector_store %arg19[%c0_9, %c0_10, %c0_11], %15 {strides = array<i32>} : memref<2x16x1xf32, #tpu.memory_space<vmem>>, vector<2x16x1xf32>,
      %cst_12 = arith.constant 0.000000e+00 : f32
      %17 = vector.broadcast %cst_12 : f32 to vector<2x16x128xf32>
      %c0_13 = arith.constant 0 : index
      %c0_14 = arith.constant 0 : index
      %c0_15 = arith.constant 0 : index
      %18 = vector.load %arg20[%c0_13, %c0_14, %c0_15] : memref<2x16x128xf32, #tpu.memory_space<vmem>>, vector<2x16x128xf32>
      tpu.vector_store %arg20[%c0_13, %c0_14, %c0_15], %17 {strides = array<i32>} : memref<2x16x128xf32, #tpu.memory_space<vmem>>, vector<2x16x128xf32>,
    } else {
    }
    %c16_i32 = arith.constant 16 : i32
    %3 = arith.muli %arg1, %c16_i32 : i32
    %c16_i32_1 = arith.constant 16 : i32
    %4 = arith.muli %arg2, %c16_i32_1 : i32
    %c16_i32_2 = arith.constant 16 : i32
    %5 = arith.addi %3, %c16_i32_2 : i32
    %c1_i32 = arith.constant 1 : i32
    %6 = arith.subi %5, %c1_i32 : i32
    %7 = arith.cmpi sle, %4, %6 : i32
    %8 = arith.extui %7 : i1 to i32
    %c0_i32_3 = arith.constant 0 : i32
    %9 = arith.cmpi ne, %8, %c0_i32_3 : i32
    scf.if %9 {
      %c0 = arith.constant 0 : index
      %c0_6 = arith.constant 0 : index
      %c0_7 = arith.constant 0 : index
      %c0_8 = arith.constant 0 : index
      %13 = vector.load %arg4[%c0, %c0_6, %c0_7, %c0_8] : memref<1x2x16x128xbf16, #tpu.memory_space<vmem>>, vector<1x2x16x128xbf16>
      %14 = vector.shape_cast %13 : vector<1x2x16x128xbf16> to vector<2x16x128xbf16>
      %c0_9 = arith.constant 0 : index
      %c0_10 = arith.constant 0 : index
      %c0_11 = arith.constant 0 : index
      %c0_12 = arith.constant 0 : index
      %15 = vector.load %arg5[%c0_9, %c0_10, %c0_11, %c0_12] : memref<1x2x16x128xbf16, #tpu.memory_space<vmem>>, vector<1x2x16x128xbf16>
      %16 = vector.shape_cast %15 : vector<1x2x16x128xbf16> to vector<2x16x128xbf16>
      %c0_13 = arith.constant 0 : index
      %c0_14 = arith.constant 0 : index
      %c0_15 = arith.constant 0 : index
      %c0_16 = arith.constant 0 : index
      %17 = vector.load %arg6[%c0_13, %c0_14, %c0_15, %c0_16] : memref<1x2x16x128xbf16, #tpu.memory_space<vmem>>, vector<1x2x16x128xbf16>
      %18 = vector.shape_cast %17 : vector<1x2x16x128xbf16> to vector<2x16x128xbf16>
      "tpu.trace_start"() <{level = 10 : i32, message = "hqd,hkd->hqk"}> : () -> ()
      %cst = arith.constant dense<0.000000e+00> : vector<2x16x16xf32>
      %19 = tpu.matmul %14, %16, %cst {dimension_numbers = #tpu.dot_dimension_numbers<[2], [2], [1], [1], [0, 0, 0, 1, 1, 1], [0], [0]>} : vector<2x16x128xbf16>, vector<2x16x128xbf16>, vector<2x16x16xf32> -> vector<2x16x16xf32>
      "tpu.trace_stop"() : () -> ()
      %20 = tpu.iota {dimensions = array<i32: 1>} : vector<1x16x16xi32>
      %21 = vector.broadcast %3 : i32 to vector<1x16x16xi32>
      %22 = arith.addi %21, %20 : vector<1x16x16xi32>
      %23 = tpu.iota {dimensions = array<i32: 2>} : vector<1x16x16xi32>
      %24 = vector.broadcast %4 : i32 to vector<1x16x16xi32>
      %25 = arith.addi %24, %23 : vector<1x16x16xi32>
      %26 = arith.cmpi sle, %25, %22 : vector<1x16x16xi32>
      %cst_17 = arith.constant -1.000000e+30 : f32
      %27 = vector.shape_cast %26 : vector<1x16x16xi1> to vector<1x16x16xi1>
      %28 = vector.broadcast %27 : vector<1x16x16xi1> to vector<2x16x16xi1>
      %29 = vector.broadcast %cst_17 : f32 to vector<2x16x16xf32>
      %30 = arith.select %28, %19, %29 : vector<2x16x16xi1>, vector<2x16x16xf32>
      %c0_18 = arith.constant 0 : index
      %c0_19 = arith.constant 0 : index
      %c0_20 = arith.constant 0 : index
      %31 = vector.load %arg18[%c0_18, %c0_19, %c0_20] : memref<2x16x1xf32, #tpu.memory_space<vmem>>, vector<2x16x1xf32>
      %cst_21 = arith.constant dense<0xFF800000> : vector<2x16xf32>
      %32 = vector.multi_reduction <maximumf>, %30, %cst_21 [2] : vector<2x16x16xf32> to vector<2x16xf32>
      %33 = vector.shape_cast %32 : vector<2x16xf32> to vector<2x16x1xf32>
      %34 = arith.maximumf %31, %33 : vector<2x16x1xf32>
      %35 = arith.subf %31, %34 : vector<2x16x1xf32>
      %36 = math.exp %35 : vector<2x16x1xf32>
      %37 = vector.broadcast %34 : vector<2x16x1xf32> to vector<2x16x16xf32>
      %38 = arith.subf %30, %37 : vector<2x16x16xf32>
      %39 = math.exp %38 : vector<2x16x16xf32>
      %c0_22 = arith.constant 0 : index
      %c0_23 = arith.constant 0 : index
      %c0_24 = arith.constant 0 : index
      %40 = vector.load %arg19[%c0_22, %c0_23, %c0_24] : memref<2x16x1xf32, #tpu.memory_space<vmem>>, vector<2x16x1xf32>
      %41 = arith.mulf %36, %40 : vector<2x16x1xf32>
      %cst_25 = arith.constant dense<0.000000e+00> : vector<2x16xf32>
      %42 = vector.multi_reduction <add>, %39, %cst_25 [2] : vector<2x16x16xf32> to vector<2x16xf32>
      %43 = vector.shape_cast %42 : vector<2x16xf32> to vector<2x16x1xf32>
      %44 = arith.addf %41, %43 : vector<2x16x1xf32>
      %c0_26 = arith.constant 0 : index
      %c0_27 = arith.constant 0 : index
      %c0_28 = arith.constant 0 : index
      %45 = vector.load %arg19[%c0_26, %c0_27, %c0_28] : memref<2x16x1xf32, #tpu.memory_space<vmem>>, vector<2x16x1xf32>
      tpu.vector_store %arg19[%c0_26, %c0_27, %c0_28], %44 {strides = array<i32>} : memref<2x16x1xf32, #tpu.memory_space<vmem>>, vector<2x16x1xf32>,
      %c0_29 = arith.constant 0 : index
      %c0_30 = arith.constant 0 : index
      %c0_31 = arith.constant 0 : index
      %46 = vector.load %arg20[%c0_29, %c0_30, %c0_31] : memref<2x16x128xf32, #tpu.memory_space<vmem>>, vector<2x16x128xf32>
      %47 = vector.broadcast %36 : vector<2x16x1xf32> to vector<2x16x128xf32>
      %48 = arith.mulf %47, %46 : vector<2x16x128xf32>
      %49 = arith.truncf %39 : vector<2x16x16xf32> to vector<2x16x16xbf16>
      "tpu.trace_start"() <{level = 10 : i32, message = "hqk,hkd->hqd"}> : () -> ()
      %cst_32 = arith.constant dense<0.000000e+00> : vector<2x16x128xf32>
      %50 = tpu.matmul %49, %18, %cst_32 {dimension_numbers = #tpu.dot_dimension_numbers<[2], [1], [1], [2], [0, 0, 0, 1, 1, 2], [0], [0]>} : vector<2x16x16xbf16>, vector<2x16x128xbf16>, vector<2x16x128xf32> -> vector<2x16x128xf32>
      "tpu.trace_stop"() : () -> ()
      %51 = arith.addf %48, %50 : vector<2x16x128xf32>
      %c0_33 = arith.constant 0 : index
      %c0_34 = arith.constant 0 : index
      %c0_35 = arith.constant 0 : index
      %52 = vector.load %arg20[%c0_33, %c0_34, %c0_35] : memref<2x16x128xf32, #tpu.memory_space<vmem>>, vector<2x16x128xf32>
      tpu.vector_store %arg20[%c0_33, %c0_34, %c0_35], %51 {strides = array<i32>} : memref<2x16x128xf32, #tpu.memory_space<vmem>>, vector<2x16x128xf32>,
      %c0_36 = arith.constant 0 : index
      %c0_37 = arith.constant 0 : index
      %c0_38 = arith.constant 0 : index
      %53 = vector.load %arg18[%c0_36, %c0_37, %c0_38] : memref<2x16x1xf32, #tpu.memory_space<vmem>>, vector<2x16x1xf32>
      tpu.vector_store %arg18[%c0_36, %c0_37, %c0_38], %34 {strides = array<i32>} : memref<2x16x1xf32, #tpu.memory_space<vmem>>, vector<2x16x1xf32>,
    } else {
    }
    %c1_i32_4 = arith.constant 1 : i32
    %10 = arith.cmpi eq, %arg2, %c1_i32_4 : i32
    %11 = arith.extui %10 : i1 to i32
    %c0_i32_5 = arith.constant 0 : i32
    %12 = arith.cmpi ne, %11, %c0_i32_5 : i32
    scf.if %12 {
      %c0 = arith.constant 0 : index
      %c0_6 = arith.constant 0 : index
      %c0_7 = arith.constant 0 : index
      %13 = vector.load %arg19[%c0, %c0_6, %c0_7] : memref<2x16x1xf32, #tpu.memory_space<vmem>>, vector<2x16x1xf32>
      %14 = tpu.reciprocal %13 {approx = true} : vector<2x16x1xf32> -> vector<2x16x1xf32>
      %cst = arith.constant 0.000000e+00 : f32
      %15 = vector.broadcast %cst : f32 to vector<16x256xf32>
      %c0_8 = arith.constant 0 : index
      %c0_9 = arith.constant 0 : index
      %c0_10 = arith.constant 0 : index
      %16 = vector.load %arg20[%c0_8, %c0_9, %c0_10] : memref<2x16x128xf32, #tpu.memory_space<vmem>>, vector<1x16x128xf32>
      %17 = vector.shape_cast %16 : vector<1x16x128xf32> to vector<16x128xf32>
      %18 = vector.extract_strided_slice %14 {offsets = [0, 0, 0], sizes = [1, 16, 1], strides = [1, 1, 1]} : vector<2x16x1xf32> to vector<1x16x1xf32>
      %19 = vector.shape_cast %18 : vector<1x16x1xf32> to vector<16x1xf32>
      %20 = vector.broadcast %19 : vector<16x1xf32> to vector<16x128xf32>
      %21 = arith.mulf %17, %20 : vector<16x128xf32>
      %22 = arith.truncf %21 : vector<16x128xf32> to vector<16x128xbf16>
      %c0_11 = arith.constant 0 : index
      %c0_12 = arith.constant 0 : index
      %23 = vector.load %arg7[%c0_11, %c0_12] : memref<256x256xbf16, #tpu.memory_space<vmem>>, vector<128x256xbf16>
      %cst_13 = arith.constant dense<0.000000e+00> : vector<16x256xf32>
      %24 = tpu.matmul %22, %23, %cst_13 {dimension_numbers = #tpu.dot_dimension_numbers<[1], [0], [0], [1], [0, 0, 1, 1], [], []>} : vector<16x128xbf16>, vector<128x256xbf16>, vector<16x256xf32> -> vector<16x256xf32>
      %25 = arith.addf %15, %24 : vector<16x256xf32>
      %c1 = arith.constant 1 : index
      %c0_14 = arith.constant 0 : index
      %c0_15 = arith.constant 0 : index
      %26 = vector.load %arg20[%c1, %c0_14, %c0_15] : memref<2x16x128xf32, #tpu.memory_space<vmem>>, vector<1x16x128xf32>
      %27 = vector.shape_cast %26 : vector<1x16x128xf32> to vector<16x128xf32>
      %28 = vector.extract_strided_slice %14 {offsets = [1, 0, 0], sizes = [1, 16, 1], strides = [1, 1, 1]} : vector<2x16x1xf32> to vector<1x16x1xf32>
      %29 = vector.shape_cast %28 : vector<1x16x1xf32> to vector<16x1xf32>
      %30 = vector.broadcast %29 : vector<16x1xf32> to vector<16x128xf32>
      %31 = arith.mulf %27, %30 : vector<16x128xf32>
      %32 = arith.truncf %31 : vector<16x128xf32> to vector<16x128xbf16>
      %c128 = arith.constant 128 : index
      %c0_16 = arith.constant 0 : index
      %33 = vector.load %arg7[%c128, %c0_16] : memref<256x256xbf16, #tpu.memory_space<vmem>>, vector<128x256xbf16>
      %cst_17 = arith.constant dense<0.000000e+00> : vector<16x256xf32>
      %34 = tpu.matmul %32, %33, %cst_17 {dimension_numbers = #tpu.dot_dimension_numbers<[1], [0], [0], [1], [0, 0, 1, 1], [], []>} : vector<16x128xbf16>, vector<128x256xbf16>, vector<16x256xf32> -> vector<16x256xf32>
      %35 = arith.addf %25, %34 : vector<16x256xf32>
      %c0_18 = arith.constant 0 : index
      %c0_19 = arith.constant 0 : index
      %36 = vector.load %arg8[%c0_18, %c0_19] : memref<1x256xf32, #tpu.memory_space<vmem>>, vector<1x256xf32>
      %37 = vector.broadcast %36 : vector<1x256xf32> to vector<16x256xf32>
      %38 = arith.addf %35, %37 : vector<16x256xf32>
      %c0_20 = arith.constant 0 : index
      %c0_21 = arith.constant 0 : index
      %c0_22 = arith.constant 0 : index
      %39 = vector.load %arg3[%c0_20, %c0_21, %c0_22] : memref<1x16x256xbf16, #tpu.memory_space<vmem>>, vector<1x16x256xbf16>
      %40 = vector.shape_cast %39 : vector<1x16x256xbf16> to vector<16x256xbf16>
      %41 = arith.extf %40 : vector<16x256xbf16> to vector<16x256xf32>
      %42 = arith.addf %41, %38 : vector<16x256xf32>
      %c0_23 = arith.constant 0 : index
      %c0_24 = arith.constant 0 : index
      %43 = vector.load %arg9[%c0_23, %c0_24] : memref<1x256xf32, #tpu.memory_space<vmem>>, vector<1x256xf32>
      %c0_25 = arith.constant 0 : index
      %c0_26 = arith.constant 0 : index
      %44 = vector.load %arg10[%c0_25, %c0_26] : memref<1x256xf32, #tpu.memory_space<vmem>>, vector<1x256xf32>
      %cst_27 = arith.constant dense<0.000000e+00> : vector<16xf32>
      %45 = vector.multi_reduction <add>, %42, %cst_27 [1] : vector<16x256xf32> to vector<16xf32>
      %46 = vector.shape_cast %45 : vector<16xf32> to vector<16x1xf32>
      %cst_28 = arith.constant 2.560000e+02 : f32
      %47 = vector.broadcast %cst_28 : f32 to vector<16x1xf32>
      %48 = arith.divf %46, %47 : vector<16x1xf32>
      %49 = vector.broadcast %48 : vector<16x1xf32> to vector<16x256xf32>
      %50 = arith.subf %42, %49 : vector<16x256xf32>
      %51 = arith.mulf %50, %50 : vector<16x256xf32>
      %cst_29 = arith.constant dense<0.000000e+00> : vector<16xf32>
      %52 = vector.multi_reduction <add>, %51, %cst_29 [1] : vector<16x256xf32> to vector<16xf32>
      %53 = vector.shape_cast %52 : vector<16xf32> to vector<16x1xf32>
      %cst_30 = arith.constant 2.560000e+02 : f32
      %54 = vector.broadcast %cst_30 : f32 to vector<16x1xf32>
      %55 = arith.divf %53, %54 : vector<16x1xf32>
      %56 = vector.broadcast %48 : vector<16x1xf32> to vector<16x256xf32>
      %57 = arith.subf %42, %56 : vector<16x256xf32>
      %cst_31 = arith.constant 9.99999974E-6 : f32
      %58 = vector.broadcast %cst_31 : f32 to vector<16x1xf32>
      %59 = arith.addf %55, %58 : vector<16x1xf32>
      %60 = math.rsqrt %59 : vector<16x1xf32>
      %61 = vector.broadcast %60 : vector<16x1xf32> to vector<16x256xf32>
      %62 = arith.mulf %57, %61 : vector<16x256xf32>
      %63 = vector.broadcast %43 : vector<1x256xf32> to vector<16x256xf32>
      %64 = arith.mulf %62, %63 : vector<16x256xf32>
      %65 = vector.broadcast %44 : vector<1x256xf32> to vector<16x256xf32>
      %66 = arith.addf %64, %65 : vector<16x256xf32>
      %67 = arith.truncf %66 : vector<16x256xf32> to vector<16x256xbf16>
      %c0_32 = arith.constant 0 : index
      %c0_33 = arith.constant 0 : index
      %68 = vector.load %arg11[%c0_32, %c0_33] : memref<256x1024xbf16, #tpu.memory_space<vmem>>, vector<256x1024xbf16>
      %cst_34 = arith.constant dense<0.000000e+00> : vector<16x1024xf32>
      %69 = tpu.matmul %67, %68, %cst_34 {dimension_numbers = #tpu.dot_dimension_numbers<[1], [0], [0], [1], [0, 0, 1, 1], [], []>} : vector<16x256xbf16>, vector<256x1024xbf16>, vector<16x1024xf32> -> vector<16x1024xf32>
      %c0_35 = arith.constant 0 : index
      %c0_36 = arith.constant 0 : index
      %70 = vector.load %arg12[%c0_35, %c0_36] : memref<1x1024xf32, #tpu.memory_space<vmem>>, vector<1x1024xf32>
      %71 = vector.broadcast %70 : vector<1x1024xf32> to vector<16x1024xf32>
      %72 = arith.addf %69, %71 : vector<16x1024xf32>
      %cst_37 = arith.constant 0.000000e+00 : f32
      %73 = vector.broadcast %cst_37 : f32 to vector<16x1024xf32>
      %74 = arith.maximumf %72, %73 : vector<16x1024xf32>
      %75 = arith.truncf %74 : vector<16x1024xf32> to vector<16x1024xbf16>
      %c0_38 = arith.constant 0 : index
      %c0_39 = arith.constant 0 : index
      %76 = vector.load %arg13[%c0_38, %c0_39] : memref<1024x256xbf16, #tpu.memory_space<vmem>>, vector<1024x256xbf16>
      %cst_40 = arith.constant dense<0.000000e+00> : vector<16x256xf32>
      %77 = tpu.matmul %75, %76, %cst_40 {dimension_numbers = #tpu.dot_dimension_numbers<[1], [0], [0], [1], [0, 0, 1, 1], [], []>} : vector<16x1024xbf16>, vector<1024x256xbf16>, vector<16x256xf32> -> vector<16x256xf32>
      %c0_41 = arith.constant 0 : index
      %c0_42 = arith.constant 0 : index
      %78 = vector.load %arg14[%c0_41, %c0_42] : memref<1x256xf32, #tpu.memory_space<vmem>>, vector<1x256xf32>
      %79 = vector.broadcast %78 : vector<1x256xf32> to vector<16x256xf32>
      %80 = arith.addf %77, %79 : vector<16x256xf32>
      %81 = arith.addf %66, %80 : vector<16x256xf32>
      %c0_43 = arith.constant 0 : index
      %c0_44 = arith.constant 0 : index
      %82 = vector.load %arg15[%c0_43, %c0_44] : memref<1x256xf32, #tpu.memory_space<vmem>>, vector<1x256xf32>
      %c0_45 = arith.constant 0 : index
      %c0_46 = arith.constant 0 : index
      %83 = vector.load %arg16[%c0_45, %c0_46] : memref<1x256xf32, #tpu.memory_space<vmem>>, vector<1x256xf32>
      %cst_47 = arith.constant dense<0.000000e+00> : vector<16xf32>
      %84 = vector.multi_reduction <add>, %81, %cst_47 [1] : vector<16x256xf32> to vector<16xf32>
      %85 = vector.shape_cast %84 : vector<16xf32> to vector<16x1xf32>
      %cst_48 = arith.constant 2.560000e+02 : f32
      %86 = vector.broadcast %cst_48 : f32 to vector<16x1xf32>
      %87 = arith.divf %85, %86 : vector<16x1xf32>
      %88 = vector.broadcast %87 : vector<16x1xf32> to vector<16x256xf32>
      %89 = arith.subf %81, %88 : vector<16x256xf32>
      %90 = arith.mulf %89, %89 : vector<16x256xf32>
      %cst_49 = arith.constant dense<0.000000e+00> : vector<16xf32>
      %91 = vector.multi_reduction <add>, %90, %cst_49 [1] : vector<16x256xf32> to vector<16xf32>
      %92 = vector.shape_cast %91 : vector<16xf32> to vector<16x1xf32>
      %cst_50 = arith.constant 2.560000e+02 : f32
      %93 = vector.broadcast %cst_50 : f32 to vector<16x1xf32>
      %94 = arith.divf %92, %93 : vector<16x1xf32>
      %95 = vector.broadcast %87 : vector<16x1xf32> to vector<16x256xf32>
      %96 = arith.subf %81, %95 : vector<16x256xf32>
      %cst_51 = arith.constant 9.99999974E-6 : f32
      %97 = vector.broadcast %cst_51 : f32 to vector<16x1xf32>
      %98 = arith.addf %94, %97 : vector<16x1xf32>
      %99 = math.rsqrt %98 : vector<16x1xf32>
      %100 = vector.broadcast %99 : vector<16x1xf32> to vector<16x256xf32>
      %101 = arith.mulf %96, %100 : vector<16x256xf32>
      %102 = vector.broadcast %82 : vector<1x256xf32> to vector<16x256xf32>
      %103 = arith.mulf %101, %102 : vector<16x256xf32>
      %104 = vector.broadcast %83 : vector<1x256xf32> to vector<16x256xf32>
      %105 = arith.addf %103, %104 : vector<16x256xf32>
      %106 = arith.truncf %105 : vector<16x256xf32> to vector<16x256xbf16>
      %c0_52 = arith.constant 0 : index
      %c0_53 = arith.constant 0 : index
      %c0_54 = arith.constant 0 : index
      %107 = vector.load %arg17[%c0_52, %c0_53, %c0_54] : memref<1x16x256xbf16, #tpu.memory_space<vmem>>, vector<1x16x256xbf16>
      %108 = vector.shape_cast %107 : vector<1x16x256xbf16> to vector<16x256xbf16>
      %109 = vector.shape_cast %106 : vector<16x256xbf16> to vector<1x16x256xbf16>
      tpu.vector_store %arg17[%c0_52, %c0_53, %c0_54], %109 {strides = array<i32>} : memref<1x16x256xbf16, #tpu.memory_space<vmem>>, vector<1x16x256xbf16>,
    } else {
    }
    return
  }
  func.func @transform_0(%arg0: i32, %arg1: i32, %arg2: i32) -> (i32, i32, i32) {
    %c0_i32 = arith.constant 0 : i32
    %c0_i32_0 = arith.constant 0 : i32
    return %arg0, %arg1, %c0_i32 : i32, i32, i32
  }
  func.func @transform_1(%arg0: i32, %arg1: i32, %arg2: i32) -> (i32, i32, i32, i32) {
    %c0_i32 = arith.constant 0 : i32
    %c0_i32_0 = arith.constant 0 : i32
    %c0_i32_1 = arith.constant 0 : i32
    return %arg0, %c0_i32, %arg1, %c0_i32_0 : i32, i32, i32, i32
  }
  func.func @transform_2(%arg0: i32, %arg1: i32, %arg2: i32) -> (i32, i32, i32, i32) {
    %c0_i32 = arith.constant 0 : i32
    %c0_i32_0 = arith.constant 0 : i32
    %c0_i32_1 = arith.constant 0 : i32
    return %arg0, %c0_i32, %arg2, %c0_i32_0 : i32, i32, i32, i32
  }
  func.func @transform_3(%arg0: i32, %arg1: i32, %arg2: i32) -> (i32, i32, i32, i32) {
    %c0_i32 = arith.constant 0 : i32
    %c0_i32_0 = arith.constant 0 : i32
    %c0_i32_1 = arith.constant 0 : i32
    return %arg0, %c0_i32, %arg2, %c0_i32_0 : i32, i32, i32, i32
  }
  func.func @transform_4(%arg0: i32, %arg1: i32, %arg2: i32) -> (i32, i32) {
    %c0_i32 = arith.constant 0 : i32
    %c0_i32_0 = arith.constant 0 : i32
    %c0_i32_1 = arith.constant 0 : i32
    return %c0_i32, %c0_i32_0 : i32, i32
  }
  func.func @transform_5(%arg0: i32, %arg1: i32, %arg2: i32) -> (i32, i32) {
    %c0_i32 = arith.constant 0 : i32
    %c0_i32_0 = arith.constant 0 : i32
    %c0_i32_1 = arith.constant 0 : i32
    return %c0_i32, %c0_i32_0 : i32, i32
  }
  func.func @transform_6(%arg0: i32, %arg1: i32, %arg2: i32) -> (i32, i32) {
    %c0_i32 = arith.constant 0 : i32
    %c0_i32_0 = arith.constant 0 : i32
    %c0_i32_1 = arith.constant 0 : i32
    return %c0_i32, %c0_i32_0 : i32, i32
  }
  func.func @transform_7(%arg0: i32, %arg1: i32, %arg2: i32) -> (i32, i32) {
    %c0_i32 = arith.constant 0 : i32
    %c0_i32_0 = arith.constant 0 : i32
    %c0_i32_1 = arith.constant 0 : i32
    return %c0_i32, %c0_i32_0 : i32, i32
  }
  func.func @transform_8(%arg0: i32, %arg1: i32, %arg2: i32) -> (i32, i32) {
    %c0_i32 = arith.constant 0 : i32
    %c0_i32_0 = arith.constant 0 : i32
    %c0_i32_1 = arith.constant 0 : i32
    return %c0_i32, %c0_i32_0 : i32, i32
  }
  func.func @transform_9(%arg0: i32, %arg1: i32, %arg2: i32) -> (i32, i32) {
    %c0_i32 = arith.constant 0 : i32
    %c0_i32_0 = arith.constant 0 : i32
    %c0_i32_1 = arith.constant 0 : i32
    return %c0_i32, %c0_i32_0 : i32, i32
  }
  func.func @transform_10(%arg0: i32, %arg1: i32, %arg2: i32) -> (i32, i32) {
    %c0_i32 = arith.constant 0 : i32
    %c0_i32_0 = arith.constant 0 : i32
    %c0_i32_1 = arith.constant 0 : i32
    return %c0_i32, %c0_i32_0 : i32, i32
  }
  func.func @transform_11(%arg0: i32, %arg1: i32, %arg2: i32) -> (i32, i32) {
    %c0_i32 = arith.constant 0 : i32
    %c0_i32_0 = arith.constant 0 : i32
    %c0_i32_1 = arith.constant 0 : i32
    return %c0_i32, %c0_i32_0 : i32, i32
  }
  func.func @transform_12(%arg0: i32, %arg1: i32, %arg2: i32) -> (i32, i32) {
    %c0_i32 = arith.constant 0 : i32
    %c0_i32_0 = arith.constant 0 : i32
    %c0_i32_1 = arith.constant 0 : i32
    return %c0_i32, %c0_i32_0 : i32, i32
  }
  func.func @transform_13(%arg0: i32, %arg1: i32, %arg2: i32) -> (i32, i32) {
    %c0_i32 = arith.constant 0 : i32
    %c0_i32_0 = arith.constant 0 : i32
    %c0_i32_1 = arith.constant 0 : i32
    return %c0_i32, %c0_i32_0 : i32, i32
  }
  func.func @transform_14(%arg0: i32, %arg1: i32, %arg2: i32) -> (i32, i32, i32) {
    %c0_i32 = arith.constant 0 : i32
    %c0_i32_0 = arith.constant 0 : i32
    return %arg0, %arg1, %c0_i32 : i32, i32, i32
  }
}

module attributes {stable_mosaic.version = 11 : i64} {
  func.func @_attn_ffn_kernel(%arg0: i32, %arg1: i32, %arg2: i32, %arg3: memref<1x16x256xbf16, #tpu.memory_space<vmem>>, %arg4: memref<1x2x16x128xbf16, #tpu.memory_space<vmem>>, %arg5: memref<1x2x16x128xbf16, #tpu.memory_space<vmem>>, %arg6: memref<1x2x16x128xbf16, #tpu.memory_space<vmem>>, %arg7: memref<256x256xbf16, #tpu.memory_space<vmem>>, %arg8: memref<1x256xf32, #tpu.memory_space<vmem>>, %arg9: memref<1x256xf32, #tpu.memory_space<vmem>>, %arg10: memref<1x256xf32, #tpu.memory_space<vmem>>, %arg11: memref<256x1024xbf16, #tpu.memory_space<vmem>>, %arg12: memref<1x1024xf32, #tpu.memory_space<vmem>>, %arg13: memref<1024x256xbf16, #tpu.memory_space<vmem>>, %arg14: memref<1x256xf32, #tpu.memory_space<vmem>>, %arg15: memref<1x256xf32, #tpu.memory_space<vmem>>, %arg16: memref<1x256xf32, #tpu.memory_space<vmem>>, %arg17: memref<1x16x256xbf16, #tpu.memory_space<vmem>>, %arg18: memref<2x16x1xf32, #tpu.memory_space<vmem>>, %arg19: memref<2x16x1xf32, #tpu.memory_space<vmem>>, %arg20: memref<2x16x128xf32, #tpu.memory_space<vmem>>) attributes {dimension_semantics = [#tpu.dimension_semantics<parallel>, #tpu.dimension_semantics<parallel>, #tpu.dimension_semantics<arbitrary>], iteration_bounds = array<i64: 2, 2, 2>, scalar_prefetch = 0 : i64, scratch_operands = 3 : i64, tpu.core_type = #tpu.core_type<tc>, window_params = [{transform_indices = @transform_0, window_bounds = array<i64: 1, 16, 256>}, {transform_indices = @transform_1, window_bounds = array<i64: 1, 2, 16, 128>}, {transform_indices = @transform_2, window_bounds = array<i64: 1, 2, 16, 128>}, {transform_indices = @transform_3, window_bounds = array<i64: 1, 2, 16, 128>}, {pipeline_mode = #tpu.pipeline_mode<synchronous>, transform_indices = @transform_4, window_bounds = array<i64: 256, 256>}, {pipeline_mode = #tpu.pipeline_mode<synchronous>, transform_indices = @transform_5, window_bounds = array<i64: 1, 256>}, {pipeline_mode = #tpu.pipeline_mode<synchronous>, transform_indices = @transform_6, window_bounds = array<i64: 1, 256>}, {pipeline_mode = #tpu.pipeline_mode<synchronous>, transform_indices = @transform_7, window_bounds = array<i64: 1, 256>}, {pipeline_mode = #tpu.pipeline_mode<synchronous>, transform_indices = @transform_8, window_bounds = array<i64: 256, 1024>}, {pipeline_mode = #tpu.pipeline_mode<synchronous>, transform_indices = @transform_9, window_bounds = array<i64: 1, 1024>}, {pipeline_mode = #tpu.pipeline_mode<synchronous>, transform_indices = @transform_10, window_bounds = array<i64: 1024, 256>}, {pipeline_mode = #tpu.pipeline_mode<synchronous>, transform_indices = @transform_11, window_bounds = array<i64: 1, 256>}, {pipeline_mode = #tpu.pipeline_mode<synchronous>, transform_indices = @transform_12, window_bounds = array<i64: 1, 256>}, {pipeline_mode = #tpu.pipeline_mode<synchronous>, transform_indices = @transform_13, window_bounds = array<i64: 1, 256>}, {transform_indices = @transform_14, window_bounds = array<i64: 1, 16, 256>}]} {
    %c0_i32 = arith.constant 0 : i32
    %0 = arith.cmpi eq, %arg2, %c0_i32 : i32
    %1 = arith.extui %0 : i1 to i32
    %c0_i32_0 = arith.constant 0 : i32
    %2 = arith.cmpi ne, %1, %c0_i32_0 : i32
    scf.if %2 {
      %cst = arith.constant 0xFF800000 : f32
      %13 = vector.broadcast %cst : f32 to vector<2x16x1xf32>
      %c0 = arith.constant 0 : index
      %c0_6 = arith.constant 0 : index
      %c0_7 = arith.constant 0 : index
      %14 = vector.load %arg18[%c0, %c0_6, %c0_7] : memref<2x16x1xf32, #tpu.memory_space<vmem>>, vector<2x16x1xf32>
      tpu.vector_store %arg18[%c0, %c0_6, %c0_7], %13 {strides = array<i32>} : memref<2x16x1xf32, #tpu.memory_space<vmem>>, vector<2x16x1xf32>,
      %cst_8 = arith.constant 0.000000e+00 : f32
      %15 = vector.broadcast %cst_8 : f32 to vector<2x16x1xf32>
      %c0_9 = arith.constant 0 : index
      %c0_10 = arith.constant 0 : index
      %c0_11 = arith.constant 0 : index
      %16 = vector.load %arg19[%c0_9, %c0_10, %c0_11] : memref<2x16x1xf32, #tpu.memory_space<vmem>>, vector<2x16x1xf32>
      tpu.vector_store %arg19[%c0_9, %c0_10, %c0_11], %15 {strides = array<i32>} : memref<2x16x1xf32, #tpu.memory_space<vmem>>, vector<2x16x1xf32>,
      %cst_12 = arith.constant 0.000000e+00 : f32
      %17 = vector.broadcast %cst_12 : f32 to vector<2x16x128xf32>
      %c0_13 = arith.constant 0 : index
      %c0_14 = arith.constant 0 : index
      %c0_15 = arith.constant 0 : index
      %18 = vector.load %arg20[%c0_13, %c0_14, %c0_15] : memref<2x16x128xf32, #tpu.memory_space<vmem>>, vector<2x16x128xf32>
      tpu.vector_store %arg20[%c0_13, %c0_14, %c0_15], %17 {strides = array<i32>} : memref<2x16x128xf32, #tpu.memory_space<vmem>>, vector<2x16x128xf32>,
    } else {
    }
    %c16_i32 = arith.constant 16 : i32
    %3 = arith.muli %arg1, %c16_i32 : i32
    %c16_i32_1 = arith.constant 16 : i32
    %4 = arith.muli %arg2, %c16_i32_1 : i32
    %c16_i32_2 = arith.constant 16 : i32
    %5 = arith.addi %3, %c16_i32_2 : i32
    %c1_i32 = arith.constant 1 : i32
    %6 = arith.subi %5, %c1_i32 : i32
    %7 = arith.cmpi sle, %4, %6 : i32
    %8 = arith.extui %7 : i1 to i32
    %c0_i32_3 = arith.constant 0 : i32
    %9 = arith.cmpi ne, %8, %c0_i32_3 : i32
    scf.if %9 {
      %c0 = arith.constant 0 : index
      %c0_6 = arith.constant 0 : index
      %c0_7 = arith.constant 0 : index
      %c0_8 = arith.constant 0 : index
      %13 = vector.load %arg4[%c0, %c0_6, %c0_7, %c0_8] : memref<1x2x16x128xbf16, #tpu.memory_space<vmem>>, vector<1x2x16x128xbf16>
      %14 = vector.shape_cast %13 : vector<1x2x16x128xbf16> to vector<2x16x128xbf16>
      %c0_9 = arith.constant 0 : index
      %c0_10 = arith.constant 0 : index
      %c0_11 = arith.constant 0 : index
      %c0_12 = arith.constant 0 : index
      %15 = vector.load %arg5[%c0_9, %c0_10, %c0_11, %c0_12] : memref<1x2x16x128xbf16, #tpu.memory_space<vmem>>, vector<1x2x16x128xbf16>
      %16 = vector.shape_cast %15 : vector<1x2x16x128xbf16> to vector<2x16x128xbf16>
      %c0_13 = arith.constant 0 : index
      %c0_14 = arith.constant 0 : index
      %c0_15 = arith.constant 0 : index
      %c0_16 = arith.constant 0 : index
      %17 = vector.load %arg6[%c0_13, %c0_14, %c0_15, %c0_16] : memref<1x2x16x128xbf16, #tpu.memory_space<vmem>>, vector<1x2x16x128xbf16>
      %18 = vector.shape_cast %17 : vector<1x2x16x128xbf16> to vector<2x16x128xbf16>
      "tpu.trace_start"() <{level = 10 : i32, message = "hqd,hkd->hqk"}> : () -> ()
      %cst = arith.constant dense<0.000000e+00> : vector<2x16x16xf32>
      %19 = tpu.matmul %14, %16, %cst {dimension_numbers = #tpu.dot_dimension_numbers<[2], [2], [1], [1], [0, 0, 0, 1, 1, 1], [0], [0]>} : vector<2x16x128xbf16>, vector<2x16x128xbf16>, vector<2x16x16xf32> -> vector<2x16x16xf32>
      "tpu.trace_stop"() : () -> ()
      %20 = tpu.iota {dimensions = array<i32: 1>} : vector<1x16x16xi32>
      %21 = vector.broadcast %3 : i32 to vector<1x16x16xi32>
      %22 = arith.addi %21, %20 : vector<1x16x16xi32>
      %23 = tpu.iota {dimensions = array<i32: 2>} : vector<1x16x16xi32>
      %24 = vector.broadcast %4 : i32 to vector<1x16x16xi32>
      %25 = arith.addi %24, %23 : vector<1x16x16xi32>
      %26 = arith.cmpi sle, %25, %22 : vector<1x16x16xi32>
      %cst_17 = arith.constant -1.000000e+30 : f32
      %27 = vector.shape_cast %26 : vector<1x16x16xi1> to vector<1x16x16xi1>
      %28 = vector.broadcast %27 : vector<1x16x16xi1> to vector<2x16x16xi1>
      %29 = vector.broadcast %cst_17 : f32 to vector<2x16x16xf32>
      %30 = arith.select %28, %19, %29 : vector<2x16x16xi1>, vector<2x16x16xf32>
      %c0_18 = arith.constant 0 : index
      %c0_19 = arith.constant 0 : index
      %c0_20 = arith.constant 0 : index
      %31 = vector.load %arg18[%c0_18, %c0_19, %c0_20] : memref<2x16x1xf32, #tpu.memory_space<vmem>>, vector<2x16x1xf32>
      %cst_21 = arith.constant dense<0xFF800000> : vector<2x16xf32>
      %32 = vector.multi_reduction <maximumf>, %30, %cst_21 [2] : vector<2x16x16xf32> to vector<2x16xf32>
      %33 = vector.shape_cast %32 : vector<2x16xf32> to vector<2x16x1xf32>
      %34 = arith.maximumf %31, %33 : vector<2x16x1xf32>
      %35 = arith.subf %31, %34 : vector<2x16x1xf32>
      %36 = math.exp %35 : vector<2x16x1xf32>
      %37 = vector.broadcast %34 : vector<2x16x1xf32> to vector<2x16x16xf32>
      %38 = arith.subf %30, %37 : vector<2x16x16xf32>
      %39 = math.exp %38 : vector<2x16x16xf32>
      %c0_22 = arith.constant 0 : index
      %c0_23 = arith.constant 0 : index
      %c0_24 = arith.constant 0 : index
      %40 = vector.load %arg19[%c0_22, %c0_23, %c0_24] : memref<2x16x1xf32, #tpu.memory_space<vmem>>, vector<2x16x1xf32>
      %41 = arith.mulf %36, %40 : vector<2x16x1xf32>
      %cst_25 = arith.constant dense<0.000000e+00> : vector<2x16xf32>
      %42 = vector.multi_reduction <add>, %39, %cst_25 [2] : vector<2x16x16xf32> to vector<2x16xf32>
      %43 = vector.shape_cast %42 : vector<2x16xf32> to vector<2x16x1xf32>
      %44 = arith.addf %41, %43 : vector<2x16x1xf32>
      %c0_26 = arith.constant 0 : index
      %c0_27 = arith.constant 0 : index
      %c0_28 = arith.constant 0 : index
      %45 = vector.load %arg19[%c0_26, %c0_27, %c0_28] : memref<2x16x1xf32, #tpu.memory_space<vmem>>, vector<2x16x1xf32>
      tpu.vector_store %arg19[%c0_26, %c0_27, %c0_28], %44 {strides = array<i32>} : memref<2x16x1xf32, #tpu.memory_space<vmem>>, vector<2x16x1xf32>,
      %c0_29 = arith.constant 0 : index
      %c0_30 = arith.constant 0 : index
      %c0_31 = arith.constant 0 : index
      %46 = vector.load %arg20[%c0_29, %c0_30, %c0_31] : memref<2x16x128xf32, #tpu.memory_space<vmem>>, vector<2x16x128xf32>
      %47 = vector.broadcast %36 : vector<2x16x1xf32> to vector<2x16x128xf32>
      %48 = arith.mulf %47, %46 : vector<2x16x128xf32>
      %49 = arith.truncf %39 : vector<2x16x16xf32> to vector<2x16x16xbf16>
      "tpu.trace_start"() <{level = 10 : i32, message = "hqk,hkd->hqd"}> : () -> ()
      %cst_32 = arith.constant dense<0.000000e+00> : vector<2x16x128xf32>
      %50 = tpu.matmul %49, %18, %cst_32 {dimension_numbers = #tpu.dot_dimension_numbers<[2], [1], [1], [2], [0, 0, 0, 1, 1, 2], [0], [0]>} : vector<2x16x16xbf16>, vector<2x16x128xbf16>, vector<2x16x128xf32> -> vector<2x16x128xf32>
      "tpu.trace_stop"() : () -> ()
      %51 = arith.addf %48, %50 : vector<2x16x128xf32>
      %c0_33 = arith.constant 0 : index
      %c0_34 = arith.constant 0 : index
      %c0_35 = arith.constant 0 : index
      %52 = vector.load %arg20[%c0_33, %c0_34, %c0_35] : memref<2x16x128xf32, #tpu.memory_space<vmem>>, vector<2x16x128xf32>
      tpu.vector_store %arg20[%c0_33, %c0_34, %c0_35], %51 {strides = array<i32>} : memref<2x16x128xf32, #tpu.memory_space<vmem>>, vector<2x16x128xf32>,
      %c0_36 = arith.constant 0 : index
      %c0_37 = arith.constant 0 : index
      %c0_38 = arith.constant 0 : index
      %53 = vector.load %arg18[%c0_36, %c0_37, %c0_38] : memref<2x16x1xf32, #tpu.memory_space<vmem>>, vector<2x16x1xf32>
      tpu.vector_store %arg18[%c0_36, %c0_37, %c0_38], %34 {strides = array<i32>} : memref<2x16x1xf32, #tpu.memory_space<vmem>>, vector<2x16x1xf32>,
    } else {
    }
    %c1_i32_4 = arith.constant 1 : i32
    %10 = arith.cmpi eq, %arg2, %c1_i32_4 : i32
    %11 = arith.extui %10 : i1 to i32
    %c0_i32_5 = arith.constant 0 : i32
    %12 = arith.cmpi ne, %11, %c0_i32_5 : i32
    scf.if %12 {
      %c0 = arith.constant 0 : index
      %c0_6 = arith.constant 0 : index
      %c0_7 = arith.constant 0 : index
      %13 = vector.load %arg19[%c0, %c0_6, %c0_7] : memref<2x16x1xf32, #tpu.memory_space<vmem>>, vector<2x16x1xf32>
      %14 = tpu.reciprocal %13 {approx = true} : vector<2x16x1xf32> -> vector<2x16x1xf32>
      %cst = arith.constant 0.000000e+00 : f32
      %15 = vector.broadcast %cst : f32 to vector<16x256xf32>
      %c0_8 = arith.constant 0 : index
      %c0_9 = arith.constant 0 : index
      %c0_10 = arith.constant 0 : index
      %16 = vector.load %arg20[%c0_8, %c0_9, %c0_10] : memref<2x16x128xf32, #tpu.memory_space<vmem>>, vector<1x16x128xf32>
      %17 = vector.shape_cast %16 : vector<1x16x128xf32> to vector<16x128xf32>
      %18 = vector.extract_strided_slice %14 {offsets = [0, 0, 0], sizes = [1, 16, 1], strides = [1, 1, 1]} : vector<2x16x1xf32> to vector<1x16x1xf32>
      %19 = vector.shape_cast %18 : vector<1x16x1xf32> to vector<16x1xf32>
      %20 = vector.broadcast %19 : vector<16x1xf32> to vector<16x128xf32>
      %21 = arith.mulf %17, %20 : vector<16x128xf32>
      %22 = arith.truncf %21 : vector<16x128xf32> to vector<16x128xbf16>
      %c0_11 = arith.constant 0 : index
      %c0_12 = arith.constant 0 : index
      %23 = vector.load %arg7[%c0_11, %c0_12] : memref<256x256xbf16, #tpu.memory_space<vmem>>, vector<128x256xbf16>
      %cst_13 = arith.constant dense<0.000000e+00> : vector<16x256xf32>
      %24 = tpu.matmul %22, %23, %cst_13 {dimension_numbers = #tpu.dot_dimension_numbers<[1], [0], [0], [1], [0, 0, 1, 1], [], []>} : vector<16x128xbf16>, vector<128x256xbf16>, vector<16x256xf32> -> vector<16x256xf32>
      %25 = arith.addf %15, %24 : vector<16x256xf32>
      %c1 = arith.constant 1 : index
      %c0_14 = arith.constant 0 : index
      %c0_15 = arith.constant 0 : index
      %26 = vector.load %arg20[%c1, %c0_14, %c0_15] : memref<2x16x128xf32, #tpu.memory_space<vmem>>, vector<1x16x128xf32>
      %27 = vector.shape_cast %26 : vector<1x16x128xf32> to vector<16x128xf32>
      %28 = vector.extract_strided_slice %14 {offsets = [1, 0, 0], sizes = [1, 16, 1], strides = [1, 1, 1]} : vector<2x16x1xf32> to vector<1x16x1xf32>
      %29 = vector.shape_cast %28 : vector<1x16x1xf32> to vector<16x1xf32>
      %30 = vector.broadcast %29 : vector<16x1xf32> to vector<16x128xf32>
      %31 = arith.mulf %27, %30 : vector<16x128xf32>
      %32 = arith.truncf %31 : vector<16x128xf32> to vector<16x128xbf16>
      %c128 = arith.constant 128 : index
      %c0_16 = arith.constant 0 : index
      %33 = vector.load %arg7[%c128, %c0_16] : memref<256x256xbf16, #tpu.memory_space<vmem>>, vector<128x256xbf16>
      %cst_17 = arith.constant dense<0.000000e+00> : vector<16x256xf32>
      %34 = tpu.matmul %32, %33, %cst_17 {dimension_numbers = #tpu.dot_dimension_numbers<[1], [0], [0], [1], [0, 0, 1, 1], [], []>} : vector<16x128xbf16>, vector<128x256xbf16>, vector<16x256xf32> -> vector<16x256xf32>
      %35 = arith.addf %25, %34 : vector<16x256xf32>
      %c0_18 = arith.constant 0 : index
      %c0_19 = arith.constant 0 : index
      %36 = vector.load %arg8[%c0_18, %c0_19] : memref<1x256xf32, #tpu.memory_space<vmem>>, vector<1x256xf32>
      %37 = vector.broadcast %36 : vector<1x256xf32> to vector<16x256xf32>
      %38 = arith.addf %35, %37 : vector<16x256xf32>
      %c0_20 = arith.constant 0 : index
      %c0_21 = arith.constant 0 : index
      %c0_22 = arith.constant 0 : index
      %39 = vector.load %arg3[%c0_20, %c0_21, %c0_22] : memref<1x16x256xbf16, #tpu.memory_space<vmem>>, vector<1x16x256xbf16>
      %40 = vector.shape_cast %39 : vector<1x16x256xbf16> to vector<16x256xbf16>
      %41 = arith.extf %40 : vector<16x256xbf16> to vector<16x256xf32>
      %42 = arith.addf %41, %38 : vector<16x256xf32>
      %c0_23 = arith.constant 0 : index
      %c0_24 = arith.constant 0 : index
      %43 = vector.load %arg9[%c0_23, %c0_24] : memref<1x256xf32, #tpu.memory_space<vmem>>, vector<1x256xf32>
      %c0_25 = arith.constant 0 : index
      %c0_26 = arith.constant 0 : index
      %44 = vector.load %arg10[%c0_25, %c0_26] : memref<1x256xf32, #tpu.memory_space<vmem>>, vector<1x256xf32>
      %cst_27 = arith.constant dense<0.000000e+00> : vector<16xf32>
      %45 = vector.multi_reduction <add>, %42, %cst_27 [1] : vector<16x256xf32> to vector<16xf32>
      %46 = vector.shape_cast %45 : vector<16xf32> to vector<16x1xf32>
      %cst_28 = arith.constant 2.560000e+02 : f32
      %47 = vector.broadcast %cst_28 : f32 to vector<16x1xf32>
      %48 = arith.divf %46, %47 : vector<16x1xf32>
      %49 = vector.broadcast %48 : vector<16x1xf32> to vector<16x256xf32>
      %50 = arith.subf %42, %49 : vector<16x256xf32>
      %51 = arith.mulf %50, %50 : vector<16x256xf32>
      %cst_29 = arith.constant dense<0.000000e+00> : vector<16xf32>
      %52 = vector.multi_reduction <add>, %51, %cst_29 [1] : vector<16x256xf32> to vector<16xf32>
      %53 = vector.shape_cast %52 : vector<16xf32> to vector<16x1xf32>
      %cst_30 = arith.constant 2.560000e+02 : f32
      %54 = vector.broadcast %cst_30 : f32 to vector<16x1xf32>
      %55 = arith.divf %53, %54 : vector<16x1xf32>
      %56 = vector.broadcast %48 : vector<16x1xf32> to vector<16x256xf32>
      %57 = arith.subf %42, %56 : vector<16x256xf32>
      %cst_31 = arith.constant 9.99999974E-6 : f32
      %58 = vector.broadcast %cst_31 : f32 to vector<16x1xf32>
      %59 = arith.addf %55, %58 : vector<16x1xf32>
      %60 = math.rsqrt %59 : vector<16x1xf32>
      %61 = vector.broadcast %60 : vector<16x1xf32> to vector<16x256xf32>
      %62 = arith.mulf %57, %61 : vector<16x256xf32>
      %63 = vector.broadcast %43 : vector<1x256xf32> to vector<16x256xf32>
      %64 = arith.mulf %62, %63 : vector<16x256xf32>
      %65 = vector.broadcast %44 : vector<1x256xf32> to vector<16x256xf32>
      %66 = arith.addf %64, %65 : vector<16x256xf32>
      %67 = arith.truncf %66 : vector<16x256xf32> to vector<16x256xbf16>
      %c0_32 = arith.constant 0 : index
      %c0_33 = arith.constant 0 : index
      %68 = vector.load %arg11[%c0_32, %c0_33] : memref<256x1024xbf16, #tpu.memory_space<vmem>>, vector<256x1024xbf16>
      %cst_34 = arith.constant dense<0.000000e+00> : vector<16x1024xf32>
      %69 = tpu.matmul %67, %68, %cst_34 {dimension_numbers = #tpu.dot_dimension_numbers<[1], [0], [0], [1], [0, 0, 1, 1], [], []>} : vector<16x256xbf16>, vector<256x1024xbf16>, vector<16x1024xf32> -> vector<16x1024xf32>
      %c0_35 = arith.constant 0 : index
      %c0_36 = arith.constant 0 : index
      %70 = vector.load %arg12[%c0_35, %c0_36] : memref<1x1024xf32, #tpu.memory_space<vmem>>, vector<1x1024xf32>
      %71 = vector.broadcast %70 : vector<1x1024xf32> to vector<16x1024xf32>
      %72 = arith.addf %69, %71 : vector<16x1024xf32>
      %cst_37 = arith.constant 0.000000e+00 : f32
      %73 = vector.broadcast %cst_37 : f32 to vector<16x1024xf32>
      %74 = arith.maximumf %72, %73 : vector<16x1024xf32>
      %75 = arith.truncf %74 : vector<16x1024xf32> to vector<16x1024xbf16>
      %c0_38 = arith.constant 0 : index
      %c0_39 = arith.constant 0 : index
      %76 = vector.load %arg13[%c0_38, %c0_39] : memref<1024x256xbf16, #tpu.memory_space<vmem>>, vector<1024x256xbf16>
      %cst_40 = arith.constant dense<0.000000e+00> : vector<16x256xf32>
      %77 = tpu.matmul %75, %76, %cst_40 {dimension_numbers = #tpu.dot_dimension_numbers<[1], [0], [0], [1], [0, 0, 1, 1], [], []>} : vector<16x1024xbf16>, vector<1024x256xbf16>, vector<16x256xf32> -> vector<16x256xf32>
      %c0_41 = arith.constant 0 : index
      %c0_42 = arith.constant 0 : index
      %78 = vector.load %arg14[%c0_41, %c0_42] : memref<1x256xf32, #tpu.memory_space<vmem>>, vector<1x256xf32>
      %79 = vector.broadcast %78 : vector<1x256xf32> to vector<16x256xf32>
      %80 = arith.addf %77, %79 : vector<16x256xf32>
      %81 = arith.addf %66, %80 : vector<16x256xf32>
      %c0_43 = arith.constant 0 : index
      %c0_44 = arith.constant 0 : index
      %82 = vector.load %arg15[%c0_43, %c0_44] : memref<1x256xf32, #tpu.memory_space<vmem>>, vector<1x256xf32>
      %c0_45 = arith.constant 0 : index
      %c0_46 = arith.constant 0 : index
      %83 = vector.load %arg16[%c0_45, %c0_46] : memref<1x256xf32, #tpu.memory_space<vmem>>, vector<1x256xf32>
      %cst_47 = arith.constant dense<0.000000e+00> : vector<16xf32>
      %84 = vector.multi_reduction <add>, %81, %cst_47 [1] : vector<16x256xf32> to vector<16xf32>
      %85 = vector.shape_cast %84 : vector<16xf32> to vector<16x1xf32>
      %cst_48 = arith.constant 2.560000e+02 : f32
      %86 = vector.broadcast %cst_48 : f32 to vector<16x1xf32>
      %87 = arith.divf %85, %86 : vector<16x1xf32>
      %88 = vector.broadcast %87 : vector<16x1xf32> to vector<16x256xf32>
      %89 = arith.subf %81, %88 : vector<16x256xf32>
      %90 = arith.mulf %89, %89 : vector<16x256xf32>
      %cst_49 = arith.constant dense<0.000000e+00> : vector<16xf32>
      %91 = vector.multi_reduction <add>, %90, %cst_49 [1] : vector<16x256xf32> to vector<16xf32>
      %92 = vector.shape_cast %91 : vector<16xf32> to vector<16x1xf32>
      %cst_50 = arith.constant 2.560000e+02 : f32
      %93 = vector.broadcast %cst_50 : f32 to vector<16x1xf32>
      %94 = arith.divf %92, %93 : vector<16x1xf32>
      %95 = vector.broadcast %87 : vector<16x1xf32> to vector<16x256xf32>
      %96 = arith.subf %81, %95 : vector<16x256xf32>
      %cst_51 = arith.constant 9.99999974E-6 : f32
      %97 = vector.broadcast %cst_51 : f32 to vector<16x1xf32>
      %98 = arith.addf %94, %97 : vector<16x1xf32>
      %99 = math.rsqrt %98 : vector<16x1xf32>
      %100 = vector.broadcast %99 : vector<16x1xf32> to vector<16x256xf32>
      %101 = arith.mulf %96, %100 : vector<16x256xf32>
      %102 = vector.broadcast %82 : vector<1x256xf32> to vector<16x256xf32>
      %103 = arith.mulf %101, %102 : vector<16x256xf32>
      %104 = vector.broadcast %83 : vector<1x256xf32> to vector<16x256xf32>
      %105 = arith.addf %103, %104 : vector<16x256xf32>
      %106 = arith.truncf %105 : vector<16x256xf32> to vector<16x256xbf16>
      %c0_52 = arith.constant 0 : index
      %c0_53 = arith.constant 0 : index
      %c0_54 = arith.constant 0 : index
      %107 = vector.load %arg17[%c0_52, %c0_53, %c0_54] : memref<1x16x256xbf16, #tpu.memory_space<vmem>>, vector<1x16x256xbf16>
      %108 = vector.shape_cast %107 : vector<1x16x256xbf16> to vector<16x256xbf16>
      %109 = vector.shape_cast %106 : vector<16x256xbf16> to vector<1x16x256xbf16>
      tpu.vector_store %arg17[%c0_52, %c0_53, %c0_54], %109 {strides = array<i32>} : memref<1x16x256xbf16, #tpu.memory_space<vmem>>, vector<1x16x256xbf16>,
    } else {
    }
    return
  }
  func.func @transform_0(%arg0: i32, %arg1: i32, %arg2: i32) -> (i32, i32, i32) {
    %c0_i32 = arith.constant 0 : i32
    %c0_i32_0 = arith.constant 0 : i32
    return %arg0, %arg1, %c0_i32 : i32, i32, i32
  }
  func.func @transform_1(%arg0: i32, %arg1: i32, %arg2: i32) -> (i32, i32, i32, i32) {
    %c0_i32 = arith.constant 0 : i32
    %c0_i32_0 = arith.constant 0 : i32
    %c0_i32_1 = arith.constant 0 : i32
    return %arg0, %c0_i32, %arg1, %c0_i32_0 : i32, i32, i32, i32
  }
  func.func @transform_2(%arg0: i32, %arg1: i32, %arg2: i32) -> (i32, i32, i32, i32) {
    %c0_i32 = arith.constant 0 : i32
    %c0_i32_0 = arith.constant 0 : i32
    %c0_i32_1 = arith.constant 0 : i32
    return %arg0, %c0_i32, %arg2, %c0_i32_0 : i32, i32, i32, i32
  }
  func.func @transform_3(%arg0: i32, %arg1: i32, %arg2: i32) -> (i32, i32, i32, i32) {
    %c0_i32 = arith.constant 0 : i32
    %c0_i32_0 = arith.constant 0 : i32
    %c0_i32_1 = arith.constant 0 : i32
    return %arg0, %c0_i32, %arg2, %c0_i32_0 : i32, i32, i32, i32
  }
  func.func @transform_4(%arg0: i32, %arg1: i32, %arg2: i32) -> (i32, i32) {
    %c0_i32 = arith.constant 0 : i32
    %c0_i32_0 = arith.constant 0 : i32
    %c0_i32_1 = arith.constant 0 : i32
    return %c0_i32, %c0_i32_0 : i32, i32
  }
  func.func @transform_5(%arg0: i32, %arg1: i32, %arg2: i32) -> (i32, i32) {
    %c0_i32 = arith.constant 0 : i32
    %c0_i32_0 = arith.constant 0 : i32
    %c0_i32_1 = arith.constant 0 : i32
    return %c0_i32, %c0_i32_0 : i32, i32
  }
  func.func @transform_6(%arg0: i32, %arg1: i32, %arg2: i32) -> (i32, i32) {
    %c0_i32 = arith.constant 0 : i32
    %c0_i32_0 = arith.constant 0 : i32
    %c0_i32_1 = arith.constant 0 : i32
    return %c0_i32, %c0_i32_0 : i32, i32
  }
  func.func @transform_7(%arg0: i32, %arg1: i32, %arg2: i32) -> (i32, i32) {
    %c0_i32 = arith.constant 0 : i32
    %c0_i32_0 = arith.constant 0 : i32
    %c0_i32_1 = arith.constant 0 : i32
    return %c0_i32, %c0_i32_0 : i32, i32
  }
  func.func @transform_8(%arg0: i32, %arg1: i32, %arg2: i32) -> (i32, i32) {
    %c0_i32 = arith.constant 0 : i32
    %c0_i32_0 = arith.constant 0 : i32
    %c0_i32_1 = arith.constant 0 : i32
    return %c0_i32, %c0_i32_0 : i32, i32
  }
  func.func @transform_9(%arg0: i32, %arg1: i32, %arg2: i32) -> (i32, i32) {
    %c0_i32 = arith.constant 0 : i32
    %c0_i32_0 = arith.constant 0 : i32
    %c0_i32_1 = arith.constant 0 : i32
    return %c0_i32, %c0_i32_0 : i32, i32
  }
  func.func @transform_10(%arg0: i32, %arg1: i32, %arg2: i32) -> (i32, i32) {
    %c0_i32 = arith.constant 0 : i32
    %c0_i32_0 = arith.constant 0 : i32
    %c0_i32_1 = arith.constant 0 : i32
    return %c0_i32, %c0_i32_0 : i32, i32
  }
  func.func @transform_11(%arg0: i32, %arg1: i32, %arg2: i32) -> (i32, i32) {
    %c0_i32 = arith.constant 0 : i32
    %c0_i32_0 = arith.constant 0 : i32
    %c0_i32_1 = arith.constant 0 : i32
    return %c0_i32, %c0_i32_0 : i32, i32
  }
  func.func @transform_12(%arg0: i32, %arg1: i32, %arg2: i32) -> (i32, i32) {
    %c0_i32 = arith.constant 0 : i32
    %c0_i32_0 = arith.constant 0 : i32
    %c0_i32_1 = arith.constant 0 : i32
    return %c0_i32, %c0_i32_0 : i32, i32
  }
  func.func @transform_13(%arg0: i32, %arg1: i32, %arg2: i32) -> (i32, i32) {
    %c0_i32 = arith.constant 0 : i32
    %c0_i32_0 = arith.constant 0 : i32
    %c0_i32_1 = arith.constant 0 : i32
    return %c0_i32, %c0_i32_0 : i32, i32
  }
  func.func @transform_14(%arg0: i32, %arg1: i32, %arg2: i32) -> (i32, i32, i32) {
    %c0_i32 = arith.constant 0 : i32
    %c0_i32_0 = arith.constant 0 : i32
    return %arg0, %arg1, %c0_i32 : i32, i32, i32
  }
}

module attributes {stable_mosaic.version = 11 : i64} {
  func.func @_final_ln_unembed_kernel(%arg0: i32, %arg1: i32, %arg2: memref<16x256xbf16, #tpu.memory_space<vmem>>, %arg3: memref<1x256xf32, #tpu.memory_space<vmem>>, %arg4: memref<1x256xf32, #tpu.memory_space<vmem>>, %arg5: memref<256x128xbf16, #tpu.memory_space<vmem>>, %arg6: memref<1x128xf32, #tpu.memory_space<vmem>>, %arg7: memref<16x128xf32, #tpu.memory_space<vmem>>) attributes {dimension_semantics = [#tpu.dimension_semantics<parallel>, #tpu.dimension_semantics<parallel>], iteration_bounds = array<i64: 4, 1>, scalar_prefetch = 0 : i64, scratch_operands = 0 : i64, tpu.core_type = #tpu.core_type<tc>, window_params = [{transform_indices = @transform_0, window_bounds = array<i64: 16, 256>}, {pipeline_mode = #tpu.pipeline_mode<synchronous>, transform_indices = @transform_1, window_bounds = array<i64: 1, 256>}, {pipeline_mode = #tpu.pipeline_mode<synchronous>, transform_indices = @transform_2, window_bounds = array<i64: 1, 256>}, {transform_indices = @transform_3, window_bounds = array<i64: 256, 128>}, {transform_indices = @transform_4, window_bounds = array<i64: 1, 128>}, {transform_indices = @transform_5, window_bounds = array<i64: 16, 128>}]} {
    %c0 = arith.constant 0 : index
    %c0_0 = arith.constant 0 : index
    %0 = vector.load %arg2[%c0, %c0_0] : memref<16x256xbf16, #tpu.memory_space<vmem>>, vector<16x256xbf16>
    %1 = arith.extf %0 : vector<16x256xbf16> to vector<16x256xf32>
    %c0_1 = arith.constant 0 : index
    %c0_2 = arith.constant 0 : index
    %2 = vector.load %arg3[%c0_1, %c0_2] : memref<1x256xf32, #tpu.memory_space<vmem>>, vector<1x256xf32>
    %c0_3 = arith.constant 0 : index
    %c0_4 = arith.constant 0 : index
    %3 = vector.load %arg4[%c0_3, %c0_4] : memref<1x256xf32, #tpu.memory_space<vmem>>, vector<1x256xf32>
    %cst = arith.constant dense<0.000000e+00> : vector<16xf32>
    %4 = vector.multi_reduction <add>, %1, %cst [1] : vector<16x256xf32> to vector<16xf32>
    %5 = vector.shape_cast %4 : vector<16xf32> to vector<16x1xf32>
    %cst_5 = arith.constant 2.560000e+02 : f32
    %6 = vector.broadcast %cst_5 : f32 to vector<16x1xf32>
    %7 = arith.divf %5, %6 : vector<16x1xf32>
    %8 = vector.broadcast %7 : vector<16x1xf32> to vector<16x256xf32>
    %9 = arith.subf %1, %8 : vector<16x256xf32>
    %10 = arith.mulf %9, %9 : vector<16x256xf32>
    %cst_6 = arith.constant dense<0.000000e+00> : vector<16xf32>
    %11 = vector.multi_reduction <add>, %10, %cst_6 [1] : vector<16x256xf32> to vector<16xf32>
    %12 = vector.shape_cast %11 : vector<16xf32> to vector<16x1xf32>
    %cst_7 = arith.constant 2.560000e+02 : f32
    %13 = vector.broadcast %cst_7 : f32 to vector<16x1xf32>
    %14 = arith.divf %12, %13 : vector<16x1xf32>
    %15 = vector.broadcast %7 : vector<16x1xf32> to vector<16x256xf32>
    %16 = arith.subf %1, %15 : vector<16x256xf32>
    %cst_8 = arith.constant 9.99999974E-6 : f32
    %17 = vector.broadcast %cst_8 : f32 to vector<16x1xf32>
    %18 = arith.addf %14, %17 : vector<16x1xf32>
    %19 = math.rsqrt %18 : vector<16x1xf32>
    %20 = vector.broadcast %19 : vector<16x1xf32> to vector<16x256xf32>
    %21 = arith.mulf %16, %20 : vector<16x256xf32>
    %22 = vector.broadcast %2 : vector<1x256xf32> to vector<16x256xf32>
    %23 = arith.mulf %21, %22 : vector<16x256xf32>
    %24 = vector.broadcast %3 : vector<1x256xf32> to vector<16x256xf32>
    %25 = arith.addf %23, %24 : vector<16x256xf32>
    %26 = arith.truncf %25 : vector<16x256xf32> to vector<16x256xbf16>
    %c0_9 = arith.constant 0 : index
    %c0_10 = arith.constant 0 : index
    %27 = vector.load %arg5[%c0_9, %c0_10] : memref<256x128xbf16, #tpu.memory_space<vmem>>, vector<256x128xbf16>
    %cst_11 = arith.constant dense<0.000000e+00> : vector<16x128xf32>
    %28 = tpu.matmul %26, %27, %cst_11 {dimension_numbers = #tpu.dot_dimension_numbers<[1], [0], [0], [1], [0, 0, 1, 1], [], []>} : vector<16x256xbf16>, vector<256x128xbf16>, vector<16x128xf32> -> vector<16x128xf32>
    %c0_12 = arith.constant 0 : index
    %c0_13 = arith.constant 0 : index
    %29 = vector.load %arg6[%c0_12, %c0_13] : memref<1x128xf32, #tpu.memory_space<vmem>>, vector<1x128xf32>
    %30 = vector.broadcast %29 : vector<1x128xf32> to vector<16x128xf32>
    %31 = arith.addf %28, %30 : vector<16x128xf32>
    %c0_14 = arith.constant 0 : index
    %c0_15 = arith.constant 0 : index
    %32 = vector.load %arg7[%c0_14, %c0_15] : memref<16x128xf32, #tpu.memory_space<vmem>>, vector<16x128xf32>
    tpu.vector_store %arg7[%c0_14, %c0_15], %31 {strides = array<i32>} : memref<16x128xf32, #tpu.memory_space<vmem>>, vector<16x128xf32>,
    return
  }
  func.func @transform_0(%arg0: i32, %arg1: i32) -> (i32, i32) {
    %c0_i32 = arith.constant 0 : i32
    %c0_i32_0 = arith.constant 0 : i32
    return %arg0, %c0_i32 : i32, i32
  }
  func.func @transform_1(%arg0: i32, %arg1: i32) -> (i32, i32) {
    %c0_i32 = arith.constant 0 : i32
    %c0_i32_0 = arith.constant 0 : i32
    %c0_i32_1 = arith.constant 0 : i32
    return %c0_i32, %c0_i32_0 : i32, i32
  }
  func.func @transform_2(%arg0: i32, %arg1: i32) -> (i32, i32) {
    %c0_i32 = arith.constant 0 : i32
    %c0_i32_0 = arith.constant 0 : i32
    %c0_i32_1 = arith.constant 0 : i32
    return %c0_i32, %c0_i32_0 : i32, i32
  }
  func.func @transform_3(%arg0: i32, %arg1: i32) -> (i32, i32) {
    %c0_i32 = arith.constant 0 : i32
    %c0_i32_0 = arith.constant 0 : i32
    return %c0_i32, %arg1 : i32, i32
  }
  func.func @transform_4(%arg0: i32, %arg1: i32) -> (i32, i32) {
    %c0_i32 = arith.constant 0 : i32
    %c0_i32_0 = arith.constant 0 : i32
    return %c0_i32, %arg1 : i32, i32
  }
  func.func @transform_5(%arg0: i32, %arg1: i32) -> (i32, i32) {
    %c0_i32 = arith.constant 0 : i32
    return %arg0, %arg1 : i32, i32
  }
}

</mosaic_0001>

<bundles_post_ra>
// kernel: decoder_transformer_forward.7
= control target key start
LH: loop header
LB: loop body
LE: loop exit
PB: predicated region body
PF: predicated region fallthrough
CT: control target
= control target key end

     0   :  { %s1885_s18 = smov 0   ;;  %s1887_s19 = smov 0   ;;  %s2316_s0 = inlined_call_operand.vmem [shape: bf16[2,32,256], index: 0, kind: input, shape index: {}]   ;;  %s2317_s1 = inlined_call_operand.vmem [shape: bf16[256,768], index: 1, kind: input, shape index: {}]   ;;  %s2318_s2 = inlined_call_operand.vmem [shape: f32[1,768], index: 2, kind: input, shape index: {}]   ;;  %s2319_s3 = inlined_call_operand.vmem [shape: bf16[2,2,32,128], index: 3, kind: output, shape index: {0}]   ;;  %s2320_s4 = inlined_call_operand.vmem [shape: bf16[2,2,32,128], index: 4, kind: output, shape index: {1}]   ;;  %s2321_s5 = inlined_call_operand.vmem [shape: bf16[2,2,32,128], index: 5, kind: output, shape index: {2}]  }
   0x1   :  { %s1889_s20 = smov 0   ;;  %s1891_s21 = smov 0  }
   0x2   :  { %s1893_s22 = smov 0   ;;  %s1895_s23 = smov 0  }
   0x3   :  { %s1897_s24 = smov 0  }
   0x4 LB: > { %s25_s25 = sadd.s32 1, %s1845_s22  ;;  %s28_s26 = sadd.s32 1, %s1849_s23  ;;  %s1853_s24 = sphi %s1897_s24, %s16_s24   ;;  %s1849_s23 = sphi %s1895_s23, %s2328_s23   ;;  %s1845_s22 = sphi %s1893_s22, %s2327_s22   ;;  %s1841_s21 = sphi %s1891_s21, %s2326_s21   ;;  %s1837_s20 = sphi %s1889_s20, %s2325_s20   ;;  %s1833_s19 = sphi %s1887_s19, %s2324_s19   ;;  %s1829_s18 = sphi %s1885_s18, %s2323_s18  }
   0x5   : > { %p26_p0 = scmp.ge.s32.totalorder %s25_s25, 2  ;;  %s1409_s27 = sadd.s32 4294967295, %s1853_s24  }
   0x6   : > { %p117_p1 = scmp.ne.s32.totalorder %s1833_s19, %s1829_s18  ;;  %p118_p2 = scmp.eq.s32.totalorder %s1409_s27, 3 }
   0x7   : > { %s2330_s25 = smov (%p26_p0, %s25_s25), 0  ;;  %s2332_s26 = smov (!%p26_p0, %s28_s26), %s1849_s23 }
   0x8   : > { %s103_s28 = ssub.s32 %s1845_s22, %s2330_s25  ;;  %p30_p3 = scmp.ge.s32.totalorder %s2332_s26, 2 }
   0x9   : > { %p1413_p4 = scmp.ge.s32.totalorder %s1853_s24, 1  ;;  %p1929_p5 = por %p118_p2, %p117_p1 }
   0xa   : > { %p218_p6 = scmp.lt.s32.totalorder %s1853_s24, 5  ;;  %s2334_s26 = smov (%p30_p3, %s2332_s26), 0 }
   0xb   : > { %s102_s30 = ssub.s32 %s1849_s23, %s2334_s26  ;;  %s107_s7 = sadd.s32 1, %s1833_s19 }
   0xc   : > { %p219_p7 = pnand %p1413_p4, %p218_p6  ;;  %s104_s6 = sor.u32 %s103_s28, %s102_s30 }
   0xd   : > { %p105_p8 = scmp.eq.s32.totalorder %s104_s6, 0  ;;  %v1652_v0 = vld [vmem:[%s2317_s1 + $0x4] ss:$24 sps:$4 sm:$0xff] (!%p219_p7)   ;;  %s1945_s11 = sshll.u32 (!%p219_p7), %s1837_s20, 1  ;;  %v1654_v1 = vld [vmem:[%s2317_s1] ss:$24 sps:$4 sm:$0xff] (!%p219_p7)  }
   0xe   : > { %222 = sbr.rel (%p219_p7) target bundleno = 377 (0x179), region = 32  ;;  %892 = vmatprep.subr.bf16.mxu0 (!%p219_p7), %v1652_v0  ;;  %v1655_v2 = vld [vmem:[%s2317_s1 + $0x34] ss:$24 sps:$4 sm:$0xff] (!%p219_p7)   ;;  %p259_p9 = scmp.lt.s32.totalorder (!%p219_p7), %s1841_s21, 1  ;;  %v1657_v3 = vld [vmem:[%s2317_s1 + $0x30] ss:$24 sps:$4 sm:$0xff] (!%p219_p7)  }
   0xf   : > { %s1940_s8 = scalar_select %p105_p8, %s1833_s19, %s107_s7  }
  0x10   : > { %893 = vmatpush1.bf16.msra.mxu0 (!%p219_p7), %v1654_v1  ;;  %p261_p10 = scmp.lt.s32.totalorder (!%p219_p7), %s1945_s11, 3  ;;  %v1658_v4 = vld [vmem:[%s2317_s1 + $0x64] ss:$24 sps:$4 sm:$0xff] (!%p219_p7)   ;;  %v1660_v5 = vld [vmem:[%s2317_s1 + $0x60] ss:$24 sps:$4 sm:$0xff] (!%p219_p7)  }
  0x11   : > { %894 = vmatprep.subr.bf16.mxu0 (!%p219_p7), %v1655_v2  ;;  %v1661_v6 = vld [vmem:[%s2317_s1 + $0x94] ss:$24 sps:$4 sm:$0xff] (!%p219_p7)   ;;  %v1663_v7 = vld [vmem:[%s2317_s1 + $0x90] ss:$24 sps:$4 sm:$0xff] (!%p219_p7)   ;;  %v1664_v8 = vld [vmem:[%s2317_s1 + $0xc4] ss:$24 sps:$4 sm:$0xff] (!%p219_p7)  }
  0x12   : > { %v1666_v9 = vld [vmem:[%s2317_s1 + $0xc0] ss:$24 sps:$4 sm:$0xff] (!%p219_p7)   ;;  %v1667_v10 = vld [vmem:[%s2317_s1 + $0xf4] ss:$24 sps:$4 sm:$0xff] (!%p219_p7)   ;;  %v1669_v11 = vld [vmem:[%s2317_s1 + $0xf0] ss:$24 sps:$4 sm:$0xff] (!%p219_p7)  }
  0x13   : > { %v1670_v12 = vld [vmem:[%s2317_s1 + $0x124] ss:$24 sps:$4 sm:$0xff] (!%p219_p7)   ;;  %v1702_v14 = vld [vmem:[%s2317_s1 + $0x8] ss:$24 sps:$4 sm:$0xff] (!%p219_p7)   ;;  %v1673_v17 = vld [vmem:[%s2317_s1 + $0x154] ss:$24 sps:$4 sm:$0xff] (!%p219_p7)  }
  0x14   : > { %895 = vmatpush1.bf16.msra.mxu0 (!%p219_p7), %v1657_v3  ;;  %v1700_v13 = vld [vmem:[%s2317_s1 + $0xc] ss:$24 sps:$4 sm:$0xff] (!%p219_p7)   ;;  %v1672_v15 = vld [vmem:[%s2317_s1 + $0x120] ss:$24 sps:$4 sm:$0xff] (!%p219_p7)   ;;  %v1709_v18 = vld [vmem:[%s2317_s1 + $0x3c] ss:$24 sps:$4 sm:$0xff] (!%p219_p7)  }
  0x15   : > { %s260_s28 = scalar_select %p259_p9, %s1841_s21, 1  ;;  %896 = vmatprep.subr.bf16.mxu0 %v1658_v4  ;;  %935 = vmatprep.subr.bf16.mxu1 %v1700_v13  ;;  %v1711_v19 = vld [vmem:[%s2317_s1 + $0x38] ss:$24 sps:$4 sm:$0xff]   ;;  %v1676_v21 = vld [vmem:[%s2317_s1 + $0x184] ss:$24 sps:$4 sm:$0xff]  }
  0x16   : > { %s262_s7 = scalar_select %p261_p10, %s1945_s11, 3  ;;  %936 = vmatpush1.bf16.msra.mxu1 %v1702_v14  ;;  %v1675_v20 = vld [vmem:[%s2317_s1 + $0x150] ss:$24 sps:$4 sm:$0xff]   ;;  %v1715_v22 = vld [vmem:[%s2317_s1 + $0x6c] ss:$24 sps:$4 sm:$0xff]  }
  0x17   : > { %s1419_s15 = sshll.u32 %s260_s28, 3  ;;  %937 = vmatprep.subr.bf16.mxu1 %v1709_v18  ;;  %v1717_v23 = vld [vmem:[%s2317_s1 + $0x68] ss:$24 sps:$4 sm:$0xff]   ;;  %v1721_v25 = vld [vmem:[%s2317_s1 + $0x9c] ss:$24 sps:$4 sm:$0xff]   ;;  %s1541_s13 = sshll.u32 (%p1929_p5), %s1841_s21, 3 }
  0x18   : > { %897 = vmatpush1.bf16.msra.mxu0 %v1660_v5  ;;  %s1418_s14 = sshll.u32 %s262_s7, 1  ;;  %v1678_v24 = vld [vmem:[%s2317_s1 + $0x180] ss:$24 sps:$4 sm:$0xff]   ;;  %v1679_v26 = vld [vmem:[%s2317_s1 + $0x1b4] ss:$24 sps:$4 sm:$0xff]   ;;  %s243_s7 = sand.u32 1, %s1829_s18  }
  0x19   : > { %898 = vmatprep.subr.bf16.mxu0 %v1661_v6  ;;  %s265_s20 = sadd.s32 %s1419_s15, %s1418_s14  ;;  %v1723_v27 = vld [vmem:[%s2317_s1 + $0x98] ss:$24 sps:$4 sm:$0xff]   ;;  %v1727_v28 = vld [vmem:[%s2317_s1 + $0xcc] ss:$24 sps:$4 sm:$0xff]   ;;  %v1729_v31 = vld [vmem:[%s2317_s1 + $0xc8] ss:$24 sps:$4 sm:$0xff]   ;;  %s1101_s14 = sadd.s32 (%p1929_p5), %s1541_s13, %s1945_s11 }
  0x1a   : > { %s1420_s10 = sshll.u32 %s265_s20, 2  ;;  %938 = vmatpush1.bf16.msra.mxu1 %v1711_v19  ;;  %v1681_v29 = vld [vmem:[%s2317_s1 + $0x1b0] ss:$24 sps:$4 sm:$0xff]   ;;  %v1682_v30 = vld [vmem:[%s2317_s1 + $0x1e4] ss:$24 sps:$4 sm:$0xff]   ;;  %s1542_s15 = sshll.u32 (%p1929_p5), %s1101_s14, 2 }
  0x1b   : > { %s1990_s16 = scalar_lea.vmem %s2316_s0, %s1420_s10  ;;  %939 = vmatprep.subr.bf16.mxu1 %v1715_v22  ;;  %v1733_v32 = vld [vmem:[%s2317_s1 + $0xfc] ss:$24 sps:$4 sm:$0xff]   ;;  %v1684_v33 = vld [vmem:[%s2317_s1 + $0x1e0] ss:$24 sps:$4 sm:$0xff]   ;;  %v1739_v36 = vld [vmem:[%s2317_s1 + $0x12c] ss:$24 sps:$4 sm:$0xff]   ;;  %s1103_s27 = scalar_lea.vmem (%p1929_p5), %s2319_s3, %s1542_s15 }
  0x1c   : > { %899 = vmatpush1.bf16.msra.mxu0 %v1663_v7  ;;  %v2002_v16 = vld [vmem:[%s1990_s16 + $0x4] ss:$8 sps:$4 sm:$0xff]   ;;  %v1735_v35 = vld [vmem:[%s2317_s1 + $0xf8] ss:$24 sps:$4 sm:$0xff]   ;;  %v1741_v39 = vld [vmem:[%s2317_s1 + $0x128] ss:$24 sps:$4 sm:$0xff]  }
  0x1d   : > { %900 = vmatprep.subr.bf16.mxu0 %v1664_v8  ;;  %924 = vmatprep.mubr.bf16.mxu0 %v2002_v16  ;;  %v1685_v34 = vld [vmem:[%s2317_s1 + $0x214] ss:$24 sps:$4 sm:$0xff]   ;;  %v1687_v37 = vld [vmem:[%s2317_s1 + $0x210] ss:$24 sps:$4 sm:$0xff]   ;;  %v1688_v38 = vld [vmem:[%s2317_s1 + $0x244] ss:$24 sps:$4 sm:$0xff]  }
  0x1e   : > { %967 = vmatprep.mubr.bf16.mxu1 %v2002_v16  ;;  %940 = vmatpush1.bf16.msra.mxu1 %v1717_v23  ;;  %v1745_v40 = vld [vmem:[%s2317_s1 + $0x15c] ss:$24 sps:$4 sm:$0xff]   ;;  %v1690_v41 = vld [vmem:[%s2317_s1 + $0x240] ss:$24 sps:$4 sm:$0xff]   ;;  %v1751_v44 = vld [vmem:[%s2317_s1 + $0x18c] ss:$24 sps:$4 sm:$0xff]  }
  0x1f   : > { %941 = vmatprep.subr.bf16.mxu1 %v1721_v25  ;;  %v1691_v42 = vld [vmem:[%s2317_s1 + $0x274] ss:$24 sps:$4 sm:$0xff]   ;;  %v1747_v43 = vld [vmem:[%s2317_s1 + $0x158] ss:$24 sps:$4 sm:$0xff]   ;;  %v1694_v46 = vld [vmem:[%s2317_s1 + $0x2a4] ss:$24 sps:$4 sm:$0xff]  }
  0x20   : > { %901 = vmatpush1.bf16.msra.mxu0 %v1666_v9  ;;  %v1693_v45 = vld [vmem:[%s2317_s1 + $0x270] ss:$24 sps:$4 sm:$0xff]   ;;  %v1757_v48 = vld [vmem:[%s2317_s1 + $0x1bc] ss:$24 sps:$4 sm:$0xff]   ;;  %v1696_v49 = vld [vmem:[%s2317_s1 + $0x2a0] ss:$24 sps:$4 sm:$0xff]  }
  0x21   : > { %902 = vmatprep.subr.bf16.mxu0 %v1667_v10  ;;  %v1753_v47 = vld [vmem:[%s2317_s1 + $0x188] ss:$24 sps:$4 sm:$0xff]   ;;  %v1697_v50 = vld [vmem:[%s2317_s1 + $0x2d4] ss:$24 sps:$4 sm:$0xff]   ;;  %v1759_v51 = vld [vmem:[%s2317_s1 + $0x1b8] ss:$24 sps:$4 sm:$0xff]  }
  0x22   : > { %942 = vmatpush1.bf16.msra.mxu1 %v1723_v27  ;;  %v1763_v52 = vld [vmem:[%s2317_s1 + $0x1ec] ss:$24 sps:$4 sm:$0xff]   ;;  %v1699_v53 = vld [vmem:[%s2317_s1 + $0x2d0] ss:$24 sps:$4 sm:$0xff]   ;;  %v1769_v57 = vld [vmem:[%s2317_s1 + $0x21c] ss:$24 sps:$4 sm:$0xff]  }
  0x23   : > { %943 = vmatprep.subr.bf16.mxu1 %v1727_v28  ;;  %v1708_v54 = vld [vmem:[%s2317_s1 + $0x14] ss:$24 sps:$4 sm:$0xff]   ;;  %v1765_v55 = vld [vmem:[%s2317_s1 + $0x1e8] ss:$24 sps:$4 sm:$0xff]   ;;  %v1714_v59 = vld [vmem:[%s2317_s1 + $0x44] ss:$24 sps:$4 sm:$0xff]  }
  0x24   : > { %903 = vmatpush1.bf16.msra.mxu0 %v1669_v11  ;;  %v2124_v56 = vld [vmem:[%s1990_s16] ss:$8 sps:$4 sm:$0xff]   ;;  %v1771_v60 = vld [vmem:[%s2317_s1 + $0x218] ss:$24 sps:$4 sm:$0xff]   ;;  %v1775_v61 = vld [vmem:[%s2317_s1 + $0x24c] ss:$24 sps:$4 sm:$0xff]  }
  0x25   : > { %904 = vmatprep.subr.bf16.mxu0 %v1670_v12  ;;  %v1706_v58 = vld [vmem:[%s2317_s1 + $0x10] ss:$24 sps:$4 sm:$0xff]   ;;  %v1712_v62 = vld [vmem:[%s2317_s1 + $0x40] ss:$24 sps:$4 sm:$0xff]   ;;  %v1720_v63 = vld [vmem:[%s2317_s1 + $0x74] ss:$24 sps:$4 sm:$0xff]  }
  0x26   : > { %944 = vmatpush1.bf16.msra.mxu1 %v1729_v31  ;;  %v1777_v0 = vld [vmem:[%s2317_s1 + $0x248] ss:$24 sps:$4 sm:$0xff]   ;;  %v1781_v1 = vld [vmem:[%s2317_s1 + $0x27c] ss:$24 sps:$4 sm:$0xff]   ;;  %v1783_v4 = vld [vmem:[%s2317_s1 + $0x278] ss:$24 sps:$4 sm:$0xff]  }
  0x27   : > { %945 = vmatprep.subr.bf16.mxu1 %v1733_v32  ;;  %v1718_v2 = vld [vmem:[%s2317_s1 + $0x70] ss:$24 sps:$4 sm:$0xff]   ;;  %v1726_v3 = vld [vmem:[%s2317_s1 + $0xa4] ss:$24 sps:$4 sm:$0xff]   ;;  %v1724_v6 = vld [vmem:[%s2317_s1 + $0xa0] ss:$24 sps:$4 sm:$0xff]  }
  0x28   : > { %905 = vmatpush1.bf16.msra.mxu0 %v1672_v15  ;;  %v1787_v5 = vld [vmem:[%s2317_s1 + $0x2ac] ss:$24 sps:$4 sm:$0xff]   ;;  %v1789_v8 = vld [vmem:[%s2317_s1 + $0x2a8] ss:$24 sps:$4 sm:$0xff]   ;;  %v1793_v9 = vld [vmem:[%s2317_s1 + $0x2dc] ss:$24 sps:$4 sm:$0xff]  }
  0x29   : > { %906 = vmatprep.subr.bf16.mxu0 %v1673_v17  ;;  %v1732_v7 = vld [vmem:[%s2317_s1 + $0xd4] ss:$24 sps:$4 sm:$0xff]   ;;  %v1730_v10 = vld [vmem:[%s2317_s1 + $0xd0] ss:$24 sps:$4 sm:$0xff]   ;;  %v1738_v11 = vld [vmem:[%s2317_s1 + $0x104] ss:$24 sps:$4 sm:$0xff]  }
  0x2a   : > { %946 = vmatpush1.bf16.msra.mxu1 %v1735_v35  ;;  %v1795_v12 = vld [vmem:[%s2317_s1 + $0x2d8] ss:$24 sps:$4 sm:$0xff]   ;;  %v1744_v14 = vld [vmem:[%s2317_s1 + $0x134] ss:$24 sps:$4 sm:$0xff]   ;;  %v1786_v28 = vld [vmem:[%s2317_s1 + $0x284] ss:$24 sps:$4 sm:$0xff]  }
  0x2b   : > { %947 = vmatprep.subr.bf16.mxu1 %v1739_v36  ;;  %v1736_v13 = vld [vmem:[%s2317_s1 + $0x100] ss:$24 sps:$4 sm:$0xff]   ;;  %v1742_v15 = vld [vmem:[%s2317_s1 + $0x130] ss:$24 sps:$4 sm:$0xff]   ;;  %v1756_v18 = vld [vmem:[%s2317_s1 + $0x194] ss:$24 sps:$4 sm:$0xff]  }
  0x2c   : > { %907 = vmatpush1.bf16.msra.mxu0 %v1675_v20  ;;  %v1748_v17 = vld [vmem:[%s2317_s1 + $0x160] ss:$24 sps:$4 sm:$0xff]   ;;  %v1754_v19 = vld [vmem:[%s2317_s1 + $0x190] ss:$24 sps:$4 sm:$0xff]   ;;  %v1762_v20 = vld [vmem:[%s2317_s1 + $0x1c4] ss:$24 sps:$4 sm:$0xff]  }
  0x2d   : > { %908 = vmatprep.subr.bf16.mxu0 %v1676_v21  ;;  %v1760_v21 = vld [vmem:[%s2317_s1 + $0x1c0] ss:$24 sps:$4 sm:$0xff]   ;;  %v1768_v22 = vld [vmem:[%s2317_s1 + $0x1f4] ss:$24 sps:$4 sm:$0xff]   ;;  %v1766_v23 = vld [vmem:[%s2317_s1 + $0x1f0] ss:$24 sps:$4 sm:$0xff]  }
  0x2e   : > { %948 = vmatpush1.bf16.msra.mxu1 %v1741_v39  ;;  %v1772_v25 = vld [vmem:[%s2317_s1 + $0x220] ss:$24 sps:$4 sm:$0xff]   ;;  %v1778_v27 = vld [vmem:[%s2317_s1 + $0x250] ss:$24 sps:$4 sm:$0xff]   ;;  %v1798_v32 = vld [vmem:[%s2317_s1 + $0x2e4] ss:$24 sps:$4 sm:$0xff]  }
  0x2f   : > { %949 = vmatprep.subr.bf16.mxu1 %v1745_v40  ;;  %v1790_v31 = vld [vmem:[%s2317_s1 + $0x2b0] ss:$24 sps:$4 sm:$0xff]   ;;  %s2257_s10 = sshll.u32 %s243_s7, 4 }
  0x30   : > { %909 = vmatpush1.bf16.msra.mxu0 %v1678_v24  ;;  %v1774_v24 = vld [vmem:[%s2317_s1 + $0x224] ss:$24 sps:$4 sm:$0xff]   ;;  %s2260_s28 = scalar_lea.vmem [#allocation2], %s2257_s10  ;;  %s2265_s18 = scalar_lea.vmem [#allocation3], %s2257_s10 }
  0x31   : > { %910 = vmatprep.subr.bf16.mxu0 %v1679_v26  ;;  %v1780_v26 = vld [vmem:[%s2317_s1 + $0x254] ss:$24 sps:$4 sm:$0xff]   ;;  %s257_s12 = scalar_lea.vmem [#allocation4], %s2257_s10 }
  0x32   : > { %950 = vmatpush1.bf16.msra.mxu1 %v1747_v43 }
  0x33   : > { %951 = vmatprep.subr.bf16.mxu1 %v1751_v44 }
  0x34   : > { %911 = vmatpush1.bf16.msra.mxu0 %v1681_v29  ;;  %v1784_v29 = vld [vmem:[%s2317_s1 + $0x280] ss:$24 sps:$4 sm:$0xff]  }
  0x35   : > { %912 = vmatprep.subr.bf16.mxu0 %v1682_v30  ;;  %v1792_v30 = vld [vmem:[%s2317_s1 + $0x2b4] ss:$24 sps:$4 sm:$0xff]  }
  0x36   : > { %952 = vmatpush1.bf16.msra.mxu1 %v1753_v47 }
  0x37   : > { %953 = vmatprep.subr.bf16.mxu1 %v1757_v48 }
  0x38   : > { %913 = vmatpush1.bf16.msra.mxu0 %v1684_v33  ;;  %v1796_v33 = vld [vmem:[%s2317_s1 + $0x2e0] ss:$24 sps:$4 sm:$0xff]  }
  0x39   : > { %914 = vmatprep.subr.bf16.mxu0 %v1685_v34  ;;  %v372_v34 = vlaneseq }
  0x3a   : > { %954 = vmatpush1.bf16.msra.mxu1 %v1759_v51 }
  0x3b   : > { %955 = vmatprep.subr.bf16.mxu1 %v1763_v52  ;;  %v373_v35 = vshrl.u32 %v372_v34, 7 }
  0x3c   : > { %915 = vmatpush1.bf16.msra.mxu0 %v1687_v37  ;;  %v370_v37 = vld [vmem:[%s2318_s2] sm:$0x3f] }
  0x3d   : > { %916 = vmatprep.subr.bf16.mxu0 %v1688_v38  ;;  %v374_v36 = vsub.s32 0, %v373_v35  ;;  %v378_v38 = vsub.s32 1, %v373_v35  ;;  %v382_v51 = vsub.s32 2, %v373_v35  ;;  %v386_v52 = vsub.s32 3, %v373_v35 }
  0x3e   : > { %956 = vmatpush1.bf16.msra.mxu1 %v1765_v55 }
  0x3f   : > { %957 = vmatprep.subr.bf16.mxu1 %v1769_v57  ;;  %v375_v39 = vrot.slane %v370_v37, %v374_v36 }
  0x40   : > { %917 = vmatpush1.bf16.msra.mxu0 %v1690_v41  ;;  %v379_v41 = vrot.slane %v370_v37, %v378_v38 }
  0x41   : > { %918 = vmatprep.subr.bf16.mxu0 %v1691_v42 }
  0x42   : > { %958 = vmatpush1.bf16.msra.mxu1 %v1771_v60 }
  0x43   : > { %959 = vmatprep.subr.bf16.mxu1 %v1775_v61 }
  0x44   : > { %919 = vmatpush1.bf16.msra.mxu0 %v1693_v45 }
  0x45   : > { %920 = vmatprep.subr.bf16.mxu0 %v1694_v46 }
  0x46   : > { %960 = vmatpush1.bf16.msra.mxu1 %v1777_v0 }
  0x47   : > { %961 = vmatprep.subr.bf16.mxu1 %v1781_v1  ;;  %v390_v1 = vsub.s32 4, %v373_v35 }
  0x48   : > { %921 = vmatpush1.bf16.msra.mxu0 %v1696_v49 }
  0x49   : > { %922 = vmatprep.subr.bf16.mxu0 %v1697_v50 }
  0x4a   : > { %962 = vmatpush1.bf16.msra.mxu1 %v1783_v4 }
  0x4b   : > { %963 = vmatprep.subr.bf16.mxu1 %v1787_v5 }
  0x4c   : > { %923 = vmatpush1.bf16.msra.mxu0 %v1699_v53  ;;  %v383_v53 = vrot.slane %v370_v37, %v382_v51 }
  0x4d   : > { %978 = vmatprep.subr.bf16.mxu0 %v1708_v54  ;;  %v387_v54 = vrot.slane %v370_v37, %v386_v52 }
  0x4e   : > { %964 = vmatpush1.bf16.msra.mxu1 %v1789_v8 }
  0x4f   : > { %925 = vmatmul.mubr.bf16.vlgmr.msra.gmra.mrb[0].mxu0 %v2124_v56  ;;  %965 = vmatprep.subr.bf16.mxu1 %v1793_v9 }
  0x50   : > { %979 = vmatpush1.bf16.msra.mxu0 %v1706_v58  ;;  %1010 = vmatprep.mubr.bf16.mxu0 %v2002_v16  ;;  %v1750_v16 = vld [vmem:[%s2317_s1 + $0x164] ss:$24 sps:$4 sm:$0xff]  }
  0x51   : > { %980 = vmatprep.subr.bf16.mxu0 %v1714_v59 }
  0x52   : > { %966 = vmatpush1.bf16.msra.mxu1 %v1795_v12 }
  0x54   : > { %981 = vmatpush1.bf16.msra.mxu0 %v1712_v62 }
  0x55   : > { %982 = vmatprep.subr.bf16.mxu0 %v1720_v63  ;;  %968 = vmatmul.mubr.bf16.vlgmr.msra.gmra.mrb[0].mxu1 %v2124_v56 }
  0x58   : > { %983 = vmatpush1.bf16.msra.mxu0 %v1718_v2  ;;  %v394_v2 = vsub.s32 5, %v373_v35 }
  0x59   : > { %984 = vmatprep.subr.bf16.mxu0 %v1726_v3  ;;  %v391_v3 = vrot.slane %v370_v37, %v390_v1 }
  0x5a   : > { %v395_v5 = vrot.slane %v370_v37, %v394_v2 }
  0x5c   : > { %985 = vmatpush1.bf16.msra.mxu0 %v1724_v6 }
  0x5d   : > { %986 = vmatprep.subr.bf16.mxu0 %v1732_v7 }
  0x60   : > { %987 = vmatpush1.bf16.msra.mxu0 %v1730_v10 }
  0x61   : > { %988 = vmatprep.subr.bf16.mxu0 %v1738_v11 }
  0x64   : > { %989 = vmatpush1.bf16.msra.mxu0 %v1736_v13 }
  0x65   : > { %990 = vmatprep.subr.bf16.mxu0 %v1744_v14 }
  0x68   : > { %991 = vmatpush1.bf16.msra.mxu0 %v1742_v15 }
  0x69   : > { %992 = vmatprep.subr.bf16.mxu0 %v1750_v16 }
  0x6c   : > { %993 = vmatpush1.bf16.msra.mxu0 %v1748_v17 }
  0x6d   : > { %994 = vmatprep.subr.bf16.mxu0 %v1756_v18 }
  0x70   : > { %995 = vmatpush1.bf16.msra.mxu0 %v1754_v19 }
  0x71   : > { %996 = vmatprep.subr.bf16.mxu0 %v1762_v20 }
  0x74   : > { %997 = vmatpush1.bf16.msra.mxu0 %v1760_v21 }
  0x75   : > { %998 = vmatprep.subr.bf16.mxu0 %v1768_v22 }
  0x78   : > { %999 = vmatpush1.bf16.msra.mxu0 %v1766_v23 }
  0x79   : > { %1000 = vmatprep.subr.bf16.mxu0 %v1774_v24 }
  0x7c   : > { %1001 = vmatpush1.bf16.msra.mxu0 %v1772_v25 }
  0x7d   : > { %1002 = vmatprep.subr.bf16.mxu0 %v1780_v26 }
  0x80   : > { %1003 = vmatpush1.bf16.msra.mxu0 %v1778_v27 }
  0x81   : > { %1004 = vmatprep.subr.bf16.mxu0 %v1786_v28 }
  0x84   : > { %1005 = vmatpush1.bf16.msra.mxu0 %v1784_v29 }
  0x85   : > { %1006 = vmatprep.subr.bf16.mxu0 %v1792_v30 }
  0x88   : > { %1007 = vmatpush1.bf16.msra.mxu0 %v1790_v31 }
  0x89   : > { %1008 = vmatprep.subr.bf16.mxu0 %v1798_v32 }
  0x8c   : > { %1009 = vmatpush1.bf16.msra.mxu0 %v1796_v33 }
  0x8f   : > { %1011 = vmatmul.mubr.bf16.vlgmr.msra.gmra.mrb[4].mxu0 %v2124_v56 }
 0x122   : > { %v926_v40 = vpop.f32.mrb[0].mxu0 }
 0x123   : > { %v927_v42 = vadd.f32 %v926_v40, %v375_v39  ;;  %v928_v43 = vpop.f32.mrb[1].mxu0 }
 0x124   : > { %v930_v44 = vpop.f32.mrb[2].mxu0  ;;  %v929_v47 = vadd.f32 %v928_v43, %v379_v41 }
 0x125   : > { %v931_v45 = vadd.f32 %v930_v44, %v375_v39  ;;  %v932_v46 = vpop.f32.mrb[3].mxu0 }
 0x126   : > { %v933_v48 = vadd.f32 %v932_v46, %v379_v41 }
 0x127   : > { %v1566_v49 = vpack.c.bf16 %v931_v45, %v927_v42 }
 0x128   : > { %v1581_v50 = vpack.c.bf16 %v933_v48, %v929_v47  ;;  %v969_v55 = vpop.f32.mrb[0].mxu1 }
 0x129   : > { %1567 = vst [vmem:[%s2260_s28] sm:$0xff] %v1566_v49   ;;  %v970_v56 = vadd.f32 %v969_v55, %v383_v53  ;;  %v971_v57 = vpop.f32.mrb[1].mxu1 }
 0x12a   : > { %1593 = vst [vmem:[%s2260_s28 + $0x8] sm:$0xff] %v1581_v50   ;;  %v972_v58 = vadd.f32 %v971_v57, %v387_v54  ;;  %v973_v59 = vpop.f32.mrb[2].mxu1 }
 0x12b   : > { %v974_v60 = vadd.f32 %v973_v59, %v383_v53  ;;  %v975_v61 = vpop.f32.mrb[3].mxu1 }
 0x12c   : > { %v976_v62 = vadd.f32 %v975_v61, %v387_v54 }
 0x12d   : > { %v1571_v63 = vpack.c.bf16 %v974_v60, %v970_v56 }
 0x12e   : > { %v1586_v0 = vpack.c.bf16 %v976_v62, %v972_v58 }
 0x12f   : > { %1572 = vst [vmem:[%s2265_s18] sm:$0xff] %v1571_v63  }
 0x130   : > { %1594 = vst [vmem:[%s2265_s18 + $0x8] sm:$0xff] %v1586_v0   ;;  %v1119_v15 = vld [vmem:[%s2260_s28] sm:$0xff] (%p1929_p5)  }
 0x131   : > { %v1123_v16 = vld [vmem:[%s2260_s28 + $0x8] sm:$0xff] (%p1929_p5)   ;;  %1120 = vst [vmem:[%s1103_s27] sm:$0xff] (%p1929_p5), %v1119_v15  }
 0x132   : > { %1124 = vst [vmem:[%s1103_s27 + $0x10] sm:$0xff] (%p1929_p5), %v1123_v16  }
 0x162   : > { %v1012_v4 = vpop.f32.mrb[4].mxu0 }
 0x163   : > { %v1014_v6 = vpop.f32.mrb[5].mxu0  ;;  %v1013_v8 = vadd.f32 %v1012_v4, %v391_v3 }
 0x164   : > { %v1016_v7 = vpop.f32.mrb[6].mxu0  ;;  %v1015_v11 = vadd.f32 %v1014_v6, %v395_v5  ;;  %1098 = sbr.rel (!%p1929_p5) target bundleno = 363 (0x16b), region = 36 }
 0x165   : > { %v1017_v9 = vadd.f32 %v1016_v7, %v391_v3  ;;  %v1018_v10 = vpop.f32.mrb[7].mxu0 }
 0x166   : > { %v1019_v12 = vadd.f32 %v1018_v10, %v395_v5 }
 0x167   : > { %v1576_v13 = vpack.c.bf16 %v1017_v9, %v1013_v8 }
 0x168   : > { %v1591_v14 = vpack.c.bf16 %v1019_v12, %v1015_v11 }
 0x169   : > { %1577 = vst [vmem:[%s257_s12] sm:$0xff] %v1576_v13  }
 0x16a   : > { %1595 = vst [vmem:[%s257_s12 + $0x8] sm:$0xff] %v1591_v14  }
 0x16b PF: > { %1157 = sbr.rel (!%p1929_p5) target bundleno = 370 (0x172), region = 77  ;;  %s1544_s20 = sshll.u32 (%p1929_p5), %s1841_s21, 3  ;;  %v1178_v17 = vld [vmem:[%s2265_s18] sm:$0xff] (%p1929_p5)   ;;  %v1182_v18 = vld [vmem:[%s2265_s18 + $0x8] sm:$0xff] (%p1929_p5)  }
 0x16c   : > { %s1160_s30 = sadd.s32 (%p1929_p5), %s1544_s20, %s1945_s11 }
 0x16d   : > { %s1545_s6 = sshll.u32 (%p1929_p5), %s1160_s30, 2 }
 0x16e   : > { %s1162_s10 = scalar_lea.vmem (%p1929_p5), %s2320_s4, %s1545_s6 }
 0x16f   : > { %1179 = vst [vmem:[%s1162_s10] sm:$0xff] (%p1929_p5), %v1178_v17   ;;  %1183 = vst [vmem:[%s1162_s10 + $0x10] sm:$0xff] (%p1929_p5), %v1182_v18  }
 0x172 PF: > { %1216 = sbr.rel (!%p1929_p5) target bundleno = 377 (0x179), region = 118  ;;  %s1547_s28 = sshll.u32 (%p1929_p5), %s1841_s21, 3  ;;  %v1237_v19 = vld [vmem:[%s257_s12] sm:$0xff] (%p1929_p5)   ;;  %v1241_v20 = vld [vmem:[%s257_s12 + $0x8] sm:$0xff] (%p1929_p5)  }
 0x173   : > { %s1219_s13 = sadd.s32 (%p1929_p5), %s1547_s28, %s1945_s11 }
 0x174   : > { %s1548_s14 = sshll.u32 (%p1929_p5), %s1219_s13, 2 }
 0x175   : > { %s1221_s17 = scalar_lea.vmem (%p1929_p5), %s2321_s5, %s1548_s14 }
 0x176   : > { %1238 = vst [vmem:[%s1221_s17] sm:$0xff] (%p1929_p5), %v1237_v19   ;;  %1242 = vst [vmem:[%s1221_s17 + $0x10] sm:$0xff] (%p1929_p5), %v1241_v20  }
 0x179 PF: > { %s16_s24 = sadd.s32 1, %s1853_s24   ;;  %s2323_s18 = smov %s1833_s19 }
 0x17a   : > { %p13_p11 = scmp.ge.s32.totalorder %s16_s24, 6   ;;  %s2324_s19 = smov %s1940_s8 }
 0x17b   : > { %s2325_s20 = smov %s1845_s22  ;;  %s2326_s21 = smov %s1849_s23 }
 0x17c   : > { %s2327_s22 = smov %s2330_s25  ;;  %s2328_s23 = smov %s2334_s26 }
 0x17d   :  { %15 = sbr.rel (!%p13_p11) target bundleno = 4 (0x4), region = 212 }

// kernel: decoder_transformer_forward.5
= control target key start
LH: loop header
LB: loop body
LE: loop exit
PB: predicated region body
PF: predicated region fallthrough
CT: control target
= control target key end

     0   :  { %11 = vsyncpa [#allocation3], 0  ;;  %s2241_s0 = inlined_call_operand.vmem [shape: bf16[2,32,256], index: 0, kind: input, shape index: {}]   ;;  %s2242_s1 = inlined_call_operand.hbm [shape: bf16[256,768], index: 1, kind: input, shape index: {}]   ;;  %s2243_s2 = inlined_call_operand.hbm [shape: f32[1,768], index: 2, kind: input, shape index: {}]   ;;  %s2244_s3 = inlined_call_operand.vmem [shape: bf16[2,2,32,128], index: 3, kind: output, shape index: {0}]   ;;  %s2245_s4 = inlined_call_operand.vmem [shape: bf16[2,2,32,128], index: 4, kind: output, shape index: {1}]   ;;  %s2246_s5 = inlined_call_operand.vmem [shape: bf16[2,2,32,128], index: 5, kind: output, shape index: {2}]  }
   0x1   :  { %12 = vsyncpa [#allocation5], 0  ;;  %s2030_s18 = smov 0   ;;  %s2032_s19 = smov 0  }
   0x2   :  { %s2034_s20 = smov 0   ;;  %s2036_s21 = smov 0  }
   0x3   :  { %s2038_s22 = smov 0   ;;  %s2040_s23 = smov 0  }
   0x4   :  { %s2042_s24 = smov 0  }
   0x5 LB: > { %2253 = sst [smem:[#allocation11_spill]] %s1990_s23  ;;  %s1459_s25 = sadd.s32 4294967295, %s1994_s24   ;;  %s1994_s24 = sphi %s2042_s24, %s18_s24   ;;  %s1990_s23 = sphi %s2040_s23, %s2267_s23   ;;  %s1986_s22 = sphi %s2038_s22, %s2271_s22   ;;  %s1982_s21 = sphi %s2036_s21, %s2265_s21   ;;  %s1978_s20 = sphi %s2034_s20, %s2270_s20   ;;  %s1974_s19 = sphi %s2032_s19, %s2269_s19   ;;  %s1970_s18 = sphi %s2030_s18, %s2268_s18  }
   0x6   : > { %s27_s26 = sadd.s32 1, %s1986_s22  ;;  %s30_s27 = sadd.s32 1, %s1990_s23 }
   0x7   : > { %p28_p0 = scmp.ge.s32.totalorder %s27_s26, 2  ;;  %s109_s28 = sadd.s32 1, %s1974_s19 }
   0x8   : > { %p119_p1 = scmp.ne.s32.totalorder %s1974_s19, %s1970_s18  ;;  %p120_p2 = scmp.eq.s32.totalorder %s1459_s25, 3 }
   0x9   : > { %s2273_s26 = smov (%p28_p0, %s27_s26), 0  ;;  %s2275_s27 = smov (!%p28_p0, %s30_s27), %s1990_s23 }
   0xa   : > { %2254 = sst [smem:[#allocation12_spill]] %s2273_s26  ;;  %s105_s29 = ssub.s32 %s1986_s22, %s2273_s26 }
   0xb   : > { %p32_p3 = scmp.ge.s32.totalorder %s2275_s27, 2  ;;  %p1461_p4 = scmp.ge.s32.totalorder %s1994_s24, 1 }
   0xc   : > { %p2077_p5 = por %p120_p2, %p119_p1  ;;  %p189_p6 = scmp.lt.s32.totalorder %s1994_s24, 5 }
   0xd   : > { %s2277_s27 = smov (%p32_p3, %s2275_s27), 0  ;;  %p2090_p8 = scmp.eq.s32.totalorder %s1459_s25, 0 }
   0xe   : > { %s2255_s30 = scalar_select %p2077_p5, 1, 0 }
   0xf   : > { %2256 = sst [smem:[#allocation13_spill]] %s2277_s27  ;;  %p2084_p7 = pnand %p1461_p4, %p189_p6 }
  0x10   : > { %s104_s7 = ssub.s32 %s1990_s23, %s2277_s27  ;;  %s1996_s10 = smov [#allocation2]  }
  0x11   : > { %s2257_s6 = scalar_select %p2084_p7, 1, 0 }
  0x12   : > { %s2258_s8 = scalar_select %p2090_p8, 1, 0 }
  0x13   : > { %s106_s9 = sor.u32 %s105_s29, %s104_s7  ;;  %p1658_p9 = pneg %p2084_p7 }
  0x14   : > { %p107_p10 = scmp.eq.s32.totalorder %s106_s9, 0  ;;  %s201_s11 = sshll.u32 %s1996_s10, 4  ;;  %s202_s11 = int_to_ptr.vmem [resolvable:$true] %s201_s11 }
  0x15   : > { %p2098_p11 = pnand %p2090_p8, %p1658_p9  ;;  %s1876_s16 = scalar_lea.hbm %s2242_s1, 12288 }
  0x16   : > { %s2103_s13 = scalar_select %p107_p10, %s1974_s19, %s109_s28  }
  0x17   : > { %p1877_p12 = scmp.ne.s32.totalorder %s2242_s1, %s1876_s16  ;;  %p1878_p13 = pneg %p2098_p11 }
  0x18   : > { %p1883_p2 = scmp.lt.u32.totalorder %s1876_s16, %s2242_s1 }
  0x19   : > { %p1879_p0 = pnand %p1878_p13, %p1877_p12 }
  0x1b   : > { %p1880_p1 = pneg %p1879_p0 }
  0x1d   : > { %p1885_p3 = pnand %p1883_p2, %p1880_p1 }
  0x1f   : > { %1888 = shalt.err (!%p1885_p3)
}
  0x20   : > { %s1889_s28 = scalar_lea.vmem %s202_s11, 12288  ;;  %p1897_p10 = scmp.lt.s32.totalorder %s202_s11, %s202_s11 }
  0x21   : > { %p1890_p4 = scmp.ne.s32.totalorder %s202_s11, %s1889_s28  ;;  %p1898_p5 = scmp.lt.s32.totalorder %s1889_s28, %s1889_s28 }
  0x23   : > { %p1892_p6 = pnand %p1890_p4, %p1878_p13  ;;  %p1899_p8 = por %p1898_p5, %p1897_p10 }
  0x25   : > { %p1893_p9 = pneg %p1892_p6 }
  0x27   : > { %p1900_p7 = pnand %p1899_p8, %p1893_p9 }
  0x29   : > { %1903 = shalt.err (!%p1900_p7)
}
  0x2a   : > { %s1997_s9 = smov 384   ;;  %s1998_s10 = smov 24  }
  0x2b   : > { %1661 = dma.hbm_to_vmem [thread:$0]  (!%p2098_p11), %s2242_s1, 12288, %s202_s11, [#allocation3], %s1997_s9, %s1997_s9, %s1998_s10  }
  0x2c   : > { %s1999_s16 = smov [#allocation4]   ;;  %s1904_s7 = scalar_lea.hbm %s2243_s2, 96 }
  0x2d   : > { %s215_s17 = sshll.u32 %s1999_s16, 4  ;;  %p1905_p5 = scmp.ne.s32.totalorder %s2243_s2, %s1904_s7  ;;  %s216_s17 = int_to_ptr.vmem [resolvable:$true] %s215_s17 }
  0x2e   : > { %p1911_p12 = scmp.lt.u32.totalorder %s1904_s7, %s2243_s2 }
  0x2f   : > { %p1907_p7 = pnand %p1905_p5, %p1878_p13 }
  0x31   : > { %p1908_p8 = pneg %p1907_p7 }
  0x33   : > { %p1913_p0 = pnand %p1911_p12, %p1908_p8 }
  0x35   : > { %1916 = shalt.err (!%p1913_p0)
}
  0x36   : > { %s1917_s11 = scalar_lea.vmem %s216_s17, 96  ;;  %p1925_p4 = scmp.lt.s32.totalorder %s216_s17, %s216_s17 }
  0x37   : > { %p1918_p1 = scmp.ne.s32.totalorder %s216_s17, %s1917_s11  ;;  %p1926_p6 = scmp.lt.s32.totalorder %s1917_s11, %s1917_s11 }
  0x39   : > { %p1920_p2 = pnand %p1918_p1, %p1878_p13  ;;  %p1927_p9 = por %p1926_p6, %p1925_p4 }
  0x3b   : > { %p1921_p3 = pneg %p1920_p2 }
  0x3d   : > { %p1928_p10 = pnand %p1927_p9, %p1921_p3 }
  0x3f   : > { %1931 = shalt.err (!%p1928_p10)
}
  0x40   : > { %1664 = dma.hbm_to_vmem [thread:$0]  (!%p2098_p11), %s2243_s2, 96, %s216_s17, [#allocation5]  }
  0x41   : > { %p2260_p5 = scmp.ne.s32.totalorder %s2257_s6, 0 }
  0x42   : > { %p2261_p7 = scmp.ne.s32.totalorder (!%p2260_p5), %s2258_s8, 0 }
  0x43   : > { %242 = sbr.rel (%p2260_p5) target bundleno = 444 (0x1bc), region = 32 }
  0x4a   : > { %1961 = dma.done.wait (%p2261_p7), [#allocation3], 12288  }
  0x4b   : > { %1963 = vsyncadd (%p2261_p7), [#allocation3], 4294955008 }
  0x4c   : > { %1965 = dma.done.wait (%p2261_p7), [#allocation5], 96  }
  0x4d   : > { %1967 = vsyncadd (%p2261_p7), [#allocation5], 4294967200  ;;  %v1729_v0 = vld [vmem:[#allocation2 + $0x4] ss:$24 sps:$4 sm:$0xff]   ;;  %s2158_s23 = sshll.u32 %s1978_s20, 1  ;;  %p287_p11 = scmp.lt.s32.totalorder %s1982_s21, 1 }
  0x4e   : > { %v1731_v1 = vld [vmem:[#allocation2] ss:$24 sps:$4 sm:$0xff]   ;;  %920 = vmatprep.subr.bf16.mxu0 %v1729_v0  ;;  %v1732_v2 = vld [vmem:[#allocation2 + $0x34] ss:$24 sps:$4 sm:$0xff]   ;;  %v1734_v3 = vld [vmem:[#allocation2 + $0x30] ss:$24 sps:$4 sm:$0xff]  }
  0x4f   : > { %921 = vmatpush1.bf16.msra.mxu0 %v1731_v1  ;;  %p289_p13 = scmp.lt.s32.totalorder %s2158_s23, 3  ;;  %v1735_v4 = vld [vmem:[#allocation2 + $0x64] ss:$24 sps:$4 sm:$0xff]   ;;  %v1737_v5 = vld [vmem:[#allocation2 + $0x60] ss:$24 sps:$4 sm:$0xff]   ;;  %s271_s17 = sand.u32 1, %s1970_s18  }
  0x50   : > { %922 = vmatprep.subr.bf16.mxu0 %v1732_v2  ;;  %s288_s26 = scalar_select %p287_p11, %s1982_s21, 1  ;;  %v1738_v6 = vld [vmem:[#allocation2 + $0x94] ss:$24 sps:$4 sm:$0xff]   ;;  %v1740_v7 = vld [vmem:[#allocation2 + $0x90] ss:$24 sps:$4 sm:$0xff]  }
  0x51   : > { %s290_s6 = scalar_select %p289_p13, %s2158_s23, 3  ;;  %v1741_v8 = vld [vmem:[#allocation2 + $0xc4] ss:$24 sps:$4 sm:$0xff]   ;;  %v1743_v9 = vld [vmem:[#allocation2 + $0xc0] ss:$24 sps:$4 sm:$0xff]  }
  0x52   : > { %s1473_s8 = sshll.u32 %s288_s26, 3  ;;  %v1744_v10 = vld [vmem:[#allocation2 + $0xf4] ss:$24 sps:$4 sm:$0xff]   ;;  %v1746_v11 = vld [vmem:[#allocation2 + $0xf0] ss:$24 sps:$4 sm:$0xff]   ;;  %s2182_s25 = sshll.u32 %s271_s17, 4 }
  0x53   : > { %923 = vmatpush1.bf16.msra.mxu0 %v1734_v3  ;;  %s1472_s20 = sshll.u32 %s290_s6, 1  ;;  %v1747_v12 = vld [vmem:[#allocation2 + $0x124] ss:$24 sps:$4 sm:$0xff]   ;;  %v1779_v14 = vld [vmem:[#allocation2 + $0x8] ss:$24 sps:$4 sm:$0xff]   ;;  %s2185_s29 = scalar_lea.vmem [#allocation6], %s2182_s25 }
  0x54   : > { %924 = vmatprep.subr.bf16.mxu0 %v1735_v4  ;;  %s293_s12 = sadd.s32 %s1473_s8, %s1472_s20  ;;  %v1777_v13 = vld [vmem:[#allocation2 + $0xc] ss:$24 sps:$4 sm:$0xff]   ;;  %v1749_v15 = vld [vmem:[#allocation2 + $0x120] ss:$24 sps:$4 sm:$0xff]   ;;  %v1786_v18 = vld [vmem:[#allocation2 + $0x3c] ss:$24 sps:$4 sm:$0xff]  }
  0x55   : > { %s1474_s10 = sshll.u32 %s293_s12, 2  ;;  %v1750_v17 = vld [vmem:[#allocation2 + $0x154] ss:$24 sps:$4 sm:$0xff]   ;;  %963 = vmatprep.subr.bf16.mxu1 %v1777_v13  ;;  %v1788_v19 = vld [vmem:[#allocation2 + $0x38] ss:$24 sps:$4 sm:$0xff]   ;;  %s2190_s18 = scalar_lea.vmem [#allocation7], %s2182_s25 }
  0x56   : > { %s2167_s16 = scalar_lea.vmem %s2241_s0, %s1474_s10  ;;  %964 = vmatpush1.bf16.msra.mxu1 %v1779_v14  ;;  %v1752_v20 = vld [vmem:[#allocation2 + $0x150] ss:$24 sps:$4 sm:$0xff]   ;;  %v1753_v21 = vld [vmem:[#allocation2 + $0x184] ss:$24 sps:$4 sm:$0xff]   ;;  %v1755_v24 = vld [vmem:[#allocation2 + $0x180] ss:$24 sps:$4 sm:$0xff]  }
  0x57   : > { %925 = vmatpush1.bf16.msra.mxu0 %v1737_v5  ;;  %v2170_v16 = vld [vmem:[%s2167_s16 + $0x4] ss:$8 sps:$4 sm:$0xff]   ;;  %965 = vmatprep.subr.bf16.mxu1 %v1786_v18  ;;  %v1794_v23 = vld [vmem:[#allocation2 + $0x68] ss:$24 sps:$4 sm:$0xff]   ;;  %v1798_v25 = vld [vmem:[#allocation2 + $0x9c] ss:$24 sps:$4 sm:$0xff]  }
  0x58   : > { %926 = vmatprep.subr.bf16.mxu0 %v1738_v6  ;;  %952 = vmatprep.mubr.bf16.mxu0 %v2170_v16  ;;  %v1792_v22 = vld [vmem:[#allocation2 + $0x6c] ss:$24 sps:$4 sm:$0xff]   ;;  %v1800_v27 = vld [vmem:[#allocation2 + $0x98] ss:$24 sps:$4 sm:$0xff]   ;;  %v1806_v31 = vld [vmem:[#allocation2 + $0xc8] ss:$24 sps:$4 sm:$0xff]  }
  0x59   : > { %995 = vmatprep.mubr.bf16.mxu1 %v2170_v16  ;;  %v1756_v26 = vld [vmem:[#allocation2 + $0x1b4] ss:$24 sps:$4 sm:$0xff]   ;;  %v1758_v29 = vld [vmem:[#allocation2 + $0x1b0] ss:$24 sps:$4 sm:$0xff]   ;;  %v1759_v30 = vld [vmem:[#allocation2 + $0x1e4] ss:$24 sps:$4 sm:$0xff]  }
  0x5a   : > { %966 = vmatpush1.bf16.msra.mxu1 %v1788_v19  ;;  %v1804_v28 = vld [vmem:[#allocation2 + $0xcc] ss:$24 sps:$4 sm:$0xff]   ;;  %v1810_v32 = vld [vmem:[#allocation2 + $0xfc] ss:$24 sps:$4 sm:$0xff]   ;;  %v1761_v33 = vld [vmem:[#allocation2 + $0x1e0] ss:$24 sps:$4 sm:$0xff]  }
  0x5b   : > { %927 = vmatpush1.bf16.msra.mxu0 %v1740_v7  ;;  %967 = vmatprep.subr.bf16.mxu1 %v1792_v22  ;;  %v1762_v34 = vld [vmem:[#allocation2 + $0x214] ss:$24 sps:$4 sm:$0xff]   ;;  %v1812_v35 = vld [vmem:[#allocation2 + $0xf8] ss:$24 sps:$4 sm:$0xff]   ;;  %v1765_v38 = vld [vmem:[#allocation2 + $0x244] ss:$24 sps:$4 sm:$0xff]  }
  0x5c   : > { %928 = vmatprep.subr.bf16.mxu0 %v1741_v8  ;;  %v1816_v36 = vld [vmem:[#allocation2 + $0x12c] ss:$24 sps:$4 sm:$0xff]   ;;  %v1764_v37 = vld [vmem:[#allocation2 + $0x210] ss:$24 sps:$4 sm:$0xff]   ;;  %v1822_v40 = vld [vmem:[#allocation2 + $0x15c] ss:$24 sps:$4 sm:$0xff]  }
  0x5d   : > { %v1818_v39 = vld [vmem:[#allocation2 + $0x128] ss:$24 sps:$4 sm:$0xff]   ;;  %v1768_v42 = vld [vmem:[#allocation2 + $0x274] ss:$24 sps:$4 sm:$0xff]   ;;  %v1824_v43 = vld [vmem:[#allocation2 + $0x158] ss:$24 sps:$4 sm:$0xff]  }
  0x5e   : > { %968 = vmatpush1.bf16.msra.mxu1 %v1794_v23  ;;  %v1767_v41 = vld [vmem:[#allocation2 + $0x240] ss:$24 sps:$4 sm:$0xff]   ;;  %v1828_v44 = vld [vmem:[#allocation2 + $0x18c] ss:$24 sps:$4 sm:$0xff]   ;;  %v1770_v45 = vld [vmem:[#allocation2 + $0x270] ss:$24 sps:$4 sm:$0xff]  }
  0x5f   : > { %929 = vmatpush1.bf16.msra.mxu0 %v1743_v9  ;;  %969 = vmatprep.subr.bf16.mxu1 %v1798_v25  ;;  %v1771_v46 = vld [vmem:[#allocation2 + $0x2a4] ss:$24 sps:$4 sm:$0xff]   ;;  %v1830_v47 = vld [vmem:[#allocation2 + $0x188] ss:$24 sps:$4 sm:$0xff]   ;;  %v1774_v50 = vld [vmem:[#allocation2 + $0x2d4] ss:$24 sps:$4 sm:$0xff]  }
  0x60   : > { %930 = vmatprep.subr.bf16.mxu0 %v1744_v10  ;;  %v1834_v48 = vld [vmem:[#allocation2 + $0x1bc] ss:$24 sps:$4 sm:$0xff]   ;;  %v1773_v49 = vld [vmem:[#allocation2 + $0x2a0] ss:$24 sps:$4 sm:$0xff]   ;;  %v1840_v52 = vld [vmem:[#allocation2 + $0x1ec] ss:$24 sps:$4 sm:$0xff]  }
  0x61   : > { %v1836_v51 = vld [vmem:[#allocation2 + $0x1b8] ss:$24 sps:$4 sm:$0xff]   ;;  %v1785_v54 = vld [vmem:[#allocation2 + $0x14] ss:$24 sps:$4 sm:$0xff]   ;;  %v1842_v55 = vld [vmem:[#allocation2 + $0x1e8] ss:$24 sps:$4 sm:$0xff]  }
  0x62   : > { %970 = vmatpush1.bf16.msra.mxu1 %v1800_v27  ;;  %v1776_v53 = vld [vmem:[#allocation2 + $0x2d0] ss:$24 sps:$4 sm:$0xff]   ;;  %v1846_v57 = vld [vmem:[#allocation2 + $0x21c] ss:$24 sps:$4 sm:$0xff]   ;;  %v1852_v61 = vld [vmem:[#allocation2 + $0x24c] ss:$24 sps:$4 sm:$0xff]  }
  0x63   : > { %931 = vmatpush1.bf16.msra.mxu0 %v1746_v11  ;;  %971 = vmatprep.subr.bf16.mxu1 %v1804_v28  ;;  %v2175_v56 = vld [vmem:[%s2167_s16] ss:$8 sps:$4 sm:$0xff]   ;;  %v1791_v59 = vld [vmem:[#allocation2 + $0x44] ss:$24 sps:$4 sm:$0xff]   ;;  %v1848_v60 = vld [vmem:[#allocation2 + $0x218] ss:$24 sps:$4 sm:$0xff]  }
  0x64   : > { %932 = vmatprep.subr.bf16.mxu0 %v1747_v12  ;;  %v1783_v58 = vld [vmem:[#allocation2 + $0x10] ss:$24 sps:$4 sm:$0xff]   ;;  %v1789_v62 = vld [vmem:[#allocation2 + $0x40] ss:$24 sps:$4 sm:$0xff]   ;;  %v1797_v63 = vld [vmem:[#allocation2 + $0x74] ss:$24 sps:$4 sm:$0xff]  }
  0x65   : > { %v1854_v0 = vld [vmem:[#allocation2 + $0x248] ss:$24 sps:$4 sm:$0xff]   ;;  %v1858_v1 = vld [vmem:[#allocation2 + $0x27c] ss:$24 sps:$4 sm:$0xff]   ;;  %v1860_v4 = vld [vmem:[#allocation2 + $0x278] ss:$24 sps:$4 sm:$0xff]  }
  0x66   : > { %972 = vmatpush1.bf16.msra.mxu1 %v1806_v31  ;;  %v1795_v2 = vld [vmem:[#allocation2 + $0x70] ss:$24 sps:$4 sm:$0xff]   ;;  %v1803_v3 = vld [vmem:[#allocation2 + $0xa4] ss:$24 sps:$4 sm:$0xff]   ;;  %v1801_v6 = vld [vmem:[#allocation2 + $0xa0] ss:$24 sps:$4 sm:$0xff]  }
  0x67   : > { %933 = vmatpush1.bf16.msra.mxu0 %v1749_v15  ;;  %973 = vmatprep.subr.bf16.mxu1 %v1810_v32  ;;  %v1864_v5 = vld [vmem:[#allocation2 + $0x2ac] ss:$24 sps:$4 sm:$0xff]   ;;  %v1866_v8 = vld [vmem:[#allocation2 + $0x2a8] ss:$24 sps:$4 sm:$0xff]   ;;  %v1870_v9 = vld [vmem:[#allocation2 + $0x2dc] ss:$24 sps:$4 sm:$0xff]  }
  0x68   : > { %934 = vmatprep.subr.bf16.mxu0 %v1750_v17  ;;  %v1809_v7 = vld [vmem:[#allocation2 + $0xd4] ss:$24 sps:$4 sm:$0xff]   ;;  %v1807_v10 = vld [vmem:[#allocation2 + $0xd0] ss:$24 sps:$4 sm:$0xff]   ;;  %v1815_v11 = vld [vmem:[#allocation2 + $0x104] ss:$24 sps:$4 sm:$0xff]  }
  0x69   : > { %v1872_v12 = vld [vmem:[#allocation2 + $0x2d8] ss:$24 sps:$4 sm:$0xff]   ;;  %v1821_v14 = vld [vmem:[#allocation2 + $0x134] ss:$24 sps:$4 sm:$0xff]   ;;  %v1863_v28 = vld [vmem:[#allocation2 + $0x284] ss:$24 sps:$4 sm:$0xff]  }
  0x6a   : > { %974 = vmatpush1.bf16.msra.mxu1 %v1812_v35  ;;  %v1813_v13 = vld [vmem:[#allocation2 + $0x100] ss:$24 sps:$4 sm:$0xff]   ;;  %v1819_v15 = vld [vmem:[#allocation2 + $0x130] ss:$24 sps:$4 sm:$0xff]   ;;  %v1833_v18 = vld [vmem:[#allocation2 + $0x194] ss:$24 sps:$4 sm:$0xff]  }
  0x6b   : > { %935 = vmatpush1.bf16.msra.mxu0 %v1752_v20  ;;  %975 = vmatprep.subr.bf16.mxu1 %v1816_v36  ;;  %v1825_v17 = vld [vmem:[#allocation2 + $0x160] ss:$24 sps:$4 sm:$0xff]   ;;  %v1831_v19 = vld [vmem:[#allocation2 + $0x190] ss:$24 sps:$4 sm:$0xff]   ;;  %v1839_v20 = vld [vmem:[#allocation2 + $0x1c4] ss:$24 sps:$4 sm:$0xff]  }
  0x6c   : > { %936 = vmatprep.subr.bf16.mxu0 %v1753_v21  ;;  %v1837_v21 = vld [vmem:[#allocation2 + $0x1c0] ss:$24 sps:$4 sm:$0xff]   ;;  %v1845_v22 = vld [vmem:[#allocation2 + $0x1f4] ss:$24 sps:$4 sm:$0xff]   ;;  %v1843_v23 = vld [vmem:[#allocation2 + $0x1f0] ss:$24 sps:$4 sm:$0xff]  }
  0x6d   : > { %v1849_v25 = vld [vmem:[#allocation2 + $0x220] ss:$24 sps:$4 sm:$0xff]   ;;  %v1855_v27 = vld [vmem:[#allocation2 + $0x250] ss:$24 sps:$4 sm:$0xff]   ;;  %v1875_v32 = vld [vmem:[#allocation2 + $0x2e4] ss:$24 sps:$4 sm:$0xff]  }
  0x6e   : > { %976 = vmatpush1.bf16.msra.mxu1 %v1818_v39  ;;  %v1867_v31 = vld [vmem:[#allocation2 + $0x2b0] ss:$24 sps:$4 sm:$0xff]   ;;  %s285_s7 = scalar_lea.vmem [#allocation8], %s2182_s25  ;;  %p2262_p8 = scmp.ne.s32.totalorder %s2255_s30, 0 }
  0x6f   : > { %937 = vmatpush1.bf16.msra.mxu0 %v1755_v24  ;;  %977 = vmatprep.subr.bf16.mxu1 %v1822_v40  ;;  %v1851_v24 = vld [vmem:[#allocation2 + $0x224] ss:$24 sps:$4 sm:$0xff]   ;;  %s1595_s28 = sshll.u32 (%p2262_p8), %s1982_s21, 3 }
  0x70   : > { %938 = vmatprep.subr.bf16.mxu0 %v1756_v26  ;;  %v1857_v26 = vld [vmem:[#allocation2 + $0x254] ss:$24 sps:$4 sm:$0xff]   ;;  %s1129_s11 = sadd.s32 (%p2262_p8), %s1595_s28, %s2158_s23 }
  0x71   : > { %s1596_s27 = sshll.u32 (%p2262_p8), %s1129_s11, 2 }
  0x72   : > { %978 = vmatpush1.bf16.msra.mxu1 %v1824_v43  ;;  %s1131_s6 = scalar_lea.vmem (%p2262_p8), %s2244_s3, %s1596_s27 }
  0x73   : > { %939 = vmatpush1.bf16.msra.mxu0 %v1758_v29  ;;  %979 = vmatprep.subr.bf16.mxu1 %v1828_v44  ;;  %v1861_v29 = vld [vmem:[#allocation2 + $0x280] ss:$24 sps:$4 sm:$0xff]  }
  0x74   : > { %940 = vmatprep.subr.bf16.mxu0 %v1759_v30  ;;  %v1869_v30 = vld [vmem:[#allocation2 + $0x2b4] ss:$24 sps:$4 sm:$0xff]  }
  0x76   : > { %980 = vmatpush1.bf16.msra.mxu1 %v1830_v47 }
  0x77   : > { %941 = vmatpush1.bf16.msra.mxu0 %v1761_v33  ;;  %981 = vmatprep.subr.bf16.mxu1 %v1834_v48  ;;  %v1873_v33 = vld [vmem:[#allocation2 + $0x2e0] ss:$24 sps:$4 sm:$0xff]  }
  0x78   : > { %942 = vmatprep.subr.bf16.mxu0 %v1762_v34  ;;  %v400_v34 = vlaneseq }
  0x7a   : > { %982 = vmatpush1.bf16.msra.mxu1 %v1836_v51  ;;  %v401_v35 = vshrl.u32 %v400_v34, 7 }
  0x7b   : > { %943 = vmatpush1.bf16.msra.mxu0 %v1764_v37  ;;  %983 = vmatprep.subr.bf16.mxu1 %v1840_v52  ;;  %v398_v37 = vld [vmem:[#allocation4] sm:$0x3f] }
  0x7c   : > { %944 = vmatprep.subr.bf16.mxu0 %v1765_v38  ;;  %v402_v36 = vsub.s32 0, %v401_v35  ;;  %v406_v38 = vsub.s32 1, %v401_v35  ;;  %v410_v51 = vsub.s32 2, %v401_v35  ;;  %v414_v52 = vsub.s32 3, %v401_v35 }
  0x7e   : > { %984 = vmatpush1.bf16.msra.mxu1 %v1842_v55  ;;  %v403_v39 = vrot.slane %v398_v37, %v402_v36 }
  0x7f   : > { %945 = vmatpush1.bf16.msra.mxu0 %v1767_v41  ;;  %985 = vmatprep.subr.bf16.mxu1 %v1846_v57  ;;  %v407_v41 = vrot.slane %v398_v37, %v406_v38 }
  0x80   : > { %946 = vmatprep.subr.bf16.mxu0 %v1768_v42 }
  0x82   : > { %986 = vmatpush1.bf16.msra.mxu1 %v1848_v60 }
  0x83   : > { %947 = vmatpush1.bf16.msra.mxu0 %v1770_v45  ;;  %987 = vmatprep.subr.bf16.mxu1 %v1852_v61 }
  0x84   : > { %948 = vmatprep.subr.bf16.mxu0 %v1771_v46 }
  0x86   : > { %988 = vmatpush1.bf16.msra.mxu1 %v1854_v0 }
  0x87   : > { %949 = vmatpush1.bf16.msra.mxu0 %v1773_v49  ;;  %989 = vmatprep.subr.bf16.mxu1 %v1858_v1  ;;  %v418_v1 = vsub.s32 4, %v401_v35 }
  0x88   : > { %950 = vmatprep.subr.bf16.mxu0 %v1774_v50 }
  0x8a   : > { %990 = vmatpush1.bf16.msra.mxu1 %v1860_v4 }
  0x8b   : > { %951 = vmatpush1.bf16.msra.mxu0 %v1776_v53  ;;  %991 = vmatprep.subr.bf16.mxu1 %v1864_v5  ;;  %v411_v53 = vrot.slane %v398_v37, %v410_v51 }
  0x8c   : > { %1006 = vmatprep.subr.bf16.mxu0 %v1785_v54  ;;  %v415_v54 = vrot.slane %v398_v37, %v414_v52 }
  0x8e   : > { %953 = vmatmul.mubr.bf16.vlgmr.msra.gmra.mrb[0].mxu0 %v2175_v56  ;;  %992 = vmatpush1.bf16.msra.mxu1 %v1866_v8 }
  0x8f   : > { %1007 = vmatpush1.bf16.msra.mxu0 %v1783_v58  ;;  %1038 = vmatprep.mubr.bf16.mxu0 %v2170_v16  ;;  %v1827_v16 = vld [vmem:[#allocation2 + $0x164] ss:$24 sps:$4 sm:$0xff]  }
  0x90   : > { %1008 = vmatprep.subr.bf16.mxu0 %v1791_v59  ;;  %993 = vmatprep.subr.bf16.mxu1 %v1870_v9 }
  0x92   : > { %994 = vmatpush1.bf16.msra.mxu1 %v1872_v12 }
  0x93   : > { %1009 = vmatpush1.bf16.msra.mxu0 %v1789_v62 }
  0x94   : > { %1010 = vmatprep.subr.bf16.mxu0 %v1797_v63 }
  0x95   : > { %996 = vmatmul.mubr.bf16.vlgmr.msra.gmra.mrb[0].mxu1 %v2175_v56 }
  0x97   : > { %1011 = vmatpush1.bf16.msra.mxu0 %v1795_v2  ;;  %v422_v2 = vsub.s32 5, %v401_v35 }
  0x98   : > { %1012 = vmatprep.subr.bf16.mxu0 %v1803_v3  ;;  %v419_v3 = vrot.slane %v398_v37, %v418_v1 }
  0x99   : > { %v423_v5 = vrot.slane %v398_v37, %v422_v2 }
  0x9b   : > { %1013 = vmatpush1.bf16.msra.mxu0 %v1801_v6 }
  0x9c   : > { %1014 = vmatprep.subr.bf16.mxu0 %v1809_v7 }
  0x9f   : > { %1015 = vmatpush1.bf16.msra.mxu0 %v1807_v10 }
  0xa0   : > { %1016 = vmatprep.subr.bf16.mxu0 %v1815_v11 }
  0xa3   : > { %1017 = vmatpush1.bf16.msra.mxu0 %v1813_v13 }
  0xa4   : > { %1018 = vmatprep.subr.bf16.mxu0 %v1821_v14 }
  0xa7   : > { %1019 = vmatpush1.bf16.msra.mxu0 %v1819_v15 }
  0xa8   : > { %1020 = vmatprep.subr.bf16.mxu0 %v1827_v16 }
  0xab   : > { %1021 = vmatpush1.bf16.msra.mxu0 %v1825_v17 }
  0xac   : > { %1022 = vmatprep.subr.bf16.mxu0 %v1833_v18 }
  0xaf   : > { %1023 = vmatpush1.bf16.msra.mxu0 %v1831_v19 }
  0xb0   : > { %1024 = vmatprep.subr.bf16.mxu0 %v1839_v20 }
  0xb3   : > { %1025 = vmatpush1.bf16.msra.mxu0 %v1837_v21 }
  0xb4   : > { %1026 = vmatprep.subr.bf16.mxu0 %v1845_v22 }
  0xb7   : > { %1027 = vmatpush1.bf16.msra.mxu0 %v1843_v23 }
  0xb8   : > { %1028 = vmatprep.subr.bf16.mxu0 %v1851_v24 }
  0xbb   : > { %1029 = vmatpush1.bf16.msra.mxu0 %v1849_v25 }
  0xbc   : > { %1030 = vmatprep.subr.bf16.mxu0 %v1857_v26 }
  0xbf   : > { %1031 = vmatpush1.bf16.msra.mxu0 %v1855_v27 }
  0xc0   : > { %1032 = vmatprep.subr.bf16.mxu0 %v1863_v28 }
  0xc3   : > { %1033 = vmatpush1.bf16.msra.mxu0 %v1861_v29 }
  0xc4   : > { %1034 = vmatprep.subr.bf16.mxu0 %v1869_v30 }
  0xc7   : > { %1035 = vmatpush1.bf16.msra.mxu0 %v1867_v31 }
  0xc8   : > { %1036 = vmatprep.subr.bf16.mxu0 %v1875_v32 }
  0xcb   : > { %1037 = vmatpush1.bf16.msra.mxu0 %v1873_v33 }
  0xce   : > { %1039 = vmatmul.mubr.bf16.vlgmr.msra.gmra.mrb[4].mxu0 %v2175_v56 }
 0x161   : > { %v954_v40 = vpop.f32.mrb[0].mxu0 }
 0x162   : > { %v955_v42 = vadd.f32 %v954_v40, %v403_v39  ;;  %v956_v43 = vpop.f32.mrb[1].mxu0 }
 0x163   : > { %v958_v44 = vpop.f32.mrb[2].mxu0  ;;  %v957_v47 = vadd.f32 %v956_v43, %v407_v41 }
 0x164   : > { %v959_v45 = vadd.f32 %v958_v44, %v403_v39  ;;  %v960_v46 = vpop.f32.mrb[3].mxu0 }
 0x165   : > { %v961_v48 = vadd.f32 %v960_v46, %v407_v41 }
 0x166   : > { %v1620_v49 = vpack.c.bf16 %v959_v45, %v955_v42 }
 0x167   : > { %v1635_v50 = vpack.c.bf16 %v961_v48, %v957_v47 }
 0x168   : > { %1621 = vst [vmem:[%s2185_s29] sm:$0xff] %v1620_v49   ;;  %v997_v55 = vpop.f32.mrb[0].mxu1 }
 0x169   : > { %1647 = vst [vmem:[%s2185_s29 + $0x8] sm:$0xff] %v1635_v50   ;;  %v998_v56 = vadd.f32 %v997_v55, %v411_v53  ;;  %v999_v57 = vpop.f32.mrb[1].mxu1 }
 0x16a   : > { %v1000_v58 = vadd.f32 %v999_v57, %v415_v54  ;;  %v1001_v59 = vpop.f32.mrb[2].mxu1 }
 0x16b   : > { %v1002_v60 = vadd.f32 %v1001_v59, %v411_v53  ;;  %v1003_v61 = vpop.f32.mrb[3].mxu1 }
 0x16c   : > { %v1004_v62 = vadd.f32 %v1003_v61, %v415_v54 }
 0x16d   : > { %v1625_v63 = vpack.c.bf16 %v1002_v60, %v998_v56 }
 0x16e   : > { %v1640_v0 = vpack.c.bf16 %v1004_v62, %v1000_v58 }
 0x16f   : > { %1626 = vst [vmem:[%s2190_s18] sm:$0xff] %v1625_v63   ;;  %v1147_v15 = vld [vmem:[%s2185_s29] sm:$0xff] (%p2262_p8)  }
 0x170   : > { %1648 = vst [vmem:[%s2190_s18 + $0x8] sm:$0xff] %v1640_v0   ;;  %v1151_v16 = vld [vmem:[%s2185_s29 + $0x8] sm:$0xff] (%p2262_p8)   ;;  %1148 = vst [vmem:[%s1131_s6] sm:$0xff] (%p2262_p8), %v1147_v15  }
 0x171   : > { %1152 = vst [vmem:[%s1131_s6 + $0x10] sm:$0xff] (%p2262_p8), %v1151_v16  }
 0x1a1   : > { %v1040_v4 = vpop.f32.mrb[4].mxu0 }
 0x1a2   : > { %v1042_v6 = vpop.f32.mrb[5].mxu0  ;;  %v1041_v8 = vadd.f32 %v1040_v4, %v419_v3 }
 0x1a3   : > { %v1044_v7 = vpop.f32.mrb[6].mxu0  ;;  %v1043_v11 = vadd.f32 %v1042_v6, %v423_v5  ;;  %1126 = sbr.rel (!%p2262_p8) target bundleno = 426 (0x1aa), region = 44 }
 0x1a4   : > { %v1045_v9 = vadd.f32 %v1044_v7, %v419_v3  ;;  %v1046_v10 = vpop.f32.mrb[7].mxu0 }
 0x1a5   : > { %v1047_v12 = vadd.f32 %v1046_v10, %v423_v5 }
 0x1a6   : > { %v1630_v13 = vpack.c.bf16 %v1045_v9, %v1041_v8 }
 0x1a7   : > { %v1645_v14 = vpack.c.bf16 %v1047_v12, %v1043_v11 }
 0x1a8   : > { %1631 = vst [vmem:[%s285_s7] sm:$0xff] %v1630_v13  }
 0x1a9   : > { %1649 = vst [vmem:[%s285_s7 + $0x8] sm:$0xff] %v1645_v14  }
 0x1aa PF: > { %p2263_p12 = scmp.ne.s32.totalorder %s2255_s30, 0 }
 0x1ab   : > { %s1598_s20 = sshll.u32 (%p2263_p12), %s1982_s21, 3  ;;  %v1206_v17 = vld [vmem:[%s2190_s18] sm:$0xff] (%p2263_p12)   ;;  %v1210_v18 = vld [vmem:[%s2190_s18 + $0x8] sm:$0xff] (%p2263_p12)  }
 0x1ac   : > { %1185 = sbr.rel (!%p2263_p12) target bundleno = 435 (0x1b3), region = 85  ;;  %s1188_s8 = sadd.s32 (%p2263_p12), %s1598_s20, %s2158_s23 }
 0x1ad   : > { %s1599_s12 = sshll.u32 (%p2263_p12), %s1188_s8, 2 }
 0x1ae   : > { %s1190_s15 = scalar_lea.vmem (%p2263_p12), %s2245_s4, %s1599_s12 }
 0x1af   : > { %1207 = vst [vmem:[%s1190_s15] sm:$0xff] (%p2263_p12), %v1206_v17   ;;  %1211 = vst [vmem:[%s1190_s15 + $0x10] sm:$0xff] (%p2263_p12), %v1210_v18  }
 0x1b3 PF: > { %p2264_p0 = scmp.ne.s32.totalorder %s2255_s30, 0 }
 0x1b4   : > { %s1601_s16 = sshll.u32 (%p2264_p0), %s1982_s21, 3  ;;  %v1265_v19 = vld [vmem:[%s285_s7] sm:$0xff] (%p2264_p0)   ;;  %v1269_v20 = vld [vmem:[%s285_s7 + $0x8] sm:$0xff] (%p2264_p0)  }
 0x1b5   : > { %1244 = sbr.rel (!%p2264_p0) target bundleno = 444 (0x1bc), region = 126  ;;  %s1247_s17 = sadd.s32 (%p2264_p0), %s1601_s16, %s2158_s23 }
 0x1b6   : > { %s1602_s25 = sshll.u32 (%p2264_p0), %s1247_s17, 2 }
 0x1b7   : > { %s1249_s28 = scalar_lea.vmem (%p2264_p0), %s2246_s5, %s1602_s25 }
 0x1b8   : > { %1266 = vst [vmem:[%s1249_s28] sm:$0xff] (%p2264_p0), %v1265_v19   ;;  %1270 = vst [vmem:[%s1249_s28 + $0x10] sm:$0xff] (%p2264_p0), %v1269_v20  }
 0x1bc PF: > { %s18_s24 = sadd.s32 1, %s1994_s24   ;;  %s2265_s21 = sld [smem:[#allocation11_spill]] }
 0x1bd   : > { %p15_p1 = scmp.ge.s32.totalorder %s18_s24, 6   ;;  %s2266_s30 = sld [smem:[#allocation12_spill]] }
 0x1be   : > { %s2267_s23 = sld [smem:[#allocation13_spill]]  ;;  %s2268_s18 = smov %s1974_s19 }
 0x1bf   : > { %s2269_s19 = smov %s2103_s13  ;;  %s2270_s20 = smov %s1986_s22 }
 0x1c0   :  { %17 = sbr.rel (!%p15_p1) target bundleno = 5 (0x5), region = 221 }
 0x1c3   : > { %s2271_s22 = smov %s2266_s30 }
 0x1c7   :  { %1327 = vsyncpa [#allocation3], 1 }
 0x1c8   :  { %1329 = vsyncpa [#allocation3 + $0x1], 1 }
 0x1c9   :  { %1330 = vsyncpa [#allocation5], 1 }

// kernel: decoder_transformer_forward.9
= control target key start
LH: loop header
LB: loop body
LE: loop exit
PB: predicated region body
PF: predicated region fallthrough
CT: control target
= control target key end

     0   :  { %10 = vsyncpa [#allocation3], 0  ;;  %s1058_s0 = inlined_call_operand.vmem [shape: bf16[64,256], index: 0, kind: input, shape index: {}]   ;;  %s1059_s1 = inlined_call_operand.vmem [shape: f32[1,256], index: 1, kind: input, shape index: {}]   ;;  %s1060_s2 = inlined_call_operand.vmem [shape: f32[1,256], index: 2, kind: input, shape index: {}]   ;;  %s1061_s3 = inlined_call_operand.vmem [shape: bf16[256,128], index: 3, kind: input, shape index: {}]   ;;  %s1062_s4 = inlined_call_operand.vmem [shape: f32[1,128], index: 4, kind: input, shape index: {}]   ;;  %s1063_s5 = inlined_call_operand.hbm [shape: f32[64,128], index: 5, kind: output, shape index: {}]  }
   0x1   :  { %12 = vsyncpa [#allocation3 + $0x1], 0  ;;  %s887_s18 = smov 0   ;;  %s889_s19 = smov 0  }
   0x2   :  { %s891_s20 = smov 0   ;;  %s893_s21 = smov 0  }
   0x3   :  { %s895_s22 = smov 0   ;;  %s897_s23 = smov 0  }
   0x4 LB: > { %s640_s24 = sadd.s32 4294967295, %s852_s23   ;;  %s641_s25 = sadd.s32 4294967294, %s852_s23   ;;  %s852_s23 = sphi %s897_s23, %s18_s23   ;;  %s848_s22 = sphi %s895_s22, %s1070_s22   ;;  %s844_s21 = sphi %s893_s21, %s1069_s21   ;;  %s840_s20 = sphi %s891_s20, %s1068_s20   ;;  %s836_s19 = sphi %s889_s19, %s1067_s19   ;;  %s832_s18 = sphi %s887_s18, %s1066_s18  }
   0x5   : > { %s30_s26 = sadd.s32 1, %s848_s22  ;;  %s159_s27 = sadd.s32 1, %s840_s20 }
   0x6   : > { %p32_p0 = scmp.ge.s32.totalorder %s30_s26, 4  ;;  %p169_p1 = scmp.ne.s32.totalorder %s840_s20, %s836_s19 }
   0x7   : > { %p170_p2 = scmp.eq.s32.totalorder %s640_s24, 3  ;;  %p175_p3 = scmp.ne.s32.totalorder %s836_s19, %s832_s18 }
   0x8   : > { %s1072_s26 = smov (%p32_p0, %s30_s26), 0  ;;  %p176_p5 = scmp.eq.s32.totalorder %s641_s25, 3 }
   0x9   : > { %p927_p4 = por %p170_p2, %p169_p1  ;;  %s154_s29 = ssub.s32 %s848_s22, %s1072_s26 }
   0xa   : > { %p646_p6 = scmp.ge.s32.totalorder %s852_s23, 1  ;;  %p157_p7 = scmp.eq.s32.totalorder %s154_s29, 0 }
   0xb   : > { %p934_p8 = por %p176_p5, %p175_p3  ;;  %p223_p9 = scmp.lt.s32.totalorder %s852_s23, 5 }
   0xc   : > { %s940_s6 = scalar_select %p157_p7, %s840_s20, %s159_s27  }
   0xd   : > { %p224_p10 = pnand %p646_p6, %p223_p9 }
   0xe   : > { %s648_s7 = sshll.u32 (!%p224_p10), %s844_s21, 1  ;;  %v754_v8 = vld [vmem:[%s1061_s3 + $0x40] sm:$0xff] (!%p224_p10)   ;;  %v756_v24 = vld [vmem:[%s1061_s3 + $0x48] sm:$0xff] (!%p224_p10)   ;;  %v758_v26 = vld [vmem:[%s1061_s3 + $0x50] sm:$0xff] (!%p224_p10)   ;;  %v317_v42 = vlaneseq (!%p224_p10)  ;;  %s256_s24 = sand.u32 (!%p224_p10), 1, %s836_s19  }
   0xf   : > { %227 = sbr.rel (%p224_p10) target bundleno = 584 (0x248), region = 40  ;;  %p260_p11 = scmp.lt.s32.totalorder (!%p224_p10), %s648_s7, 7  ;;  %v755_v9 = vld [vmem:[%s1061_s3] sm:$0xff] (!%p224_p10)   ;;  %675 = vmatprep.subr.bf16.mxu0 (!%p224_p10), %v754_v8  ;;  %v757_v25 = vld [vmem:[%s1061_s3 + $0x8] sm:$0xff] (!%p224_p10)   ;;  %v759_v27 = vld [vmem:[%s1061_s3 + $0x10] sm:$0xff] (!%p224_p10)  }
  0x10   : > { %676 = vmatpush3.bf16.msra.mxu0 (!%p224_p10), %v755_v9  ;;  %v760_v28 = vld [vmem:[%s1061_s3 + $0x58] sm:$0xff] (!%p224_p10)   ;;  %v762_v30 = vld [vmem:[%s1061_s3 + $0x60] sm:$0xff] (!%p224_p10)   ;;  %v764_v32 = vld [vmem:[%s1061_s3 + $0x68] sm:$0xff] (!%p224_p10)   ;;  %v318_v45 = vshrl.u32 (!%p224_p10), %v317_v42, 7  ;;  %s647_s25 = sshll.u32 (!%p224_p10), %s256_s24, 4  ;;  %s674_s9 = sshll.u32 (!%p224_p10), %s844_s21, 8 }
  0x11   : > { %677 = vmatprep.subr.bf16.mxu0 (!%p224_p10), %v756_v24  ;;  %v761_v29 = vld [vmem:[%s1061_s3 + $0x18] sm:$0xff] (!%p224_p10)   ;;  %v763_v31 = vld [vmem:[%s1061_s3 + $0x20] sm:$0xff] (!%p224_p10)   ;;  %v765_v33 = vld [vmem:[%s1061_s3 + $0x28] sm:$0xff] (!%p224_p10)   ;;  %s1010_s12 = scalar_lea.hbm (!%p224_p10), %s1063_s5, %s674_s9  ;;  %s1012_s13 = scalar_lea.sflag (!%p224_p10), [#allocation3], %s256_s24 }
  0x12   : > { %v766_v34 = vld [vmem:[%s1061_s3 + $0x70] sm:$0xff] (!%p224_p10)   ;;  %v768_v36 = vld [vmem:[%s1061_s3 + $0x78] sm:$0xff] (!%p224_p10)   ;;  %v319_v46 = vsub.s32 (!%p224_p10), 0, %v318_v45  ;;  %v323_v47 = vsub.s32 (!%p224_p10), 1, %v318_v45  ;;  %v281_v48 = vld [vmem:[%s1059_s1] sm:$0x3] (!%p224_p10) }
  0x13   : > { %v767_v35 = vld [vmem:[%s1061_s3 + $0x30] sm:$0xff] (!%p224_p10)   ;;  %v769_v37 = vld [vmem:[%s1061_s3 + $0x38] sm:$0xff] (!%p224_p10)   ;;  %v282_v50 = vld [vmem:[%s1060_s2] sm:$0x3] (!%p224_p10)  ;;  %s854_s21 = smov (!%p224_p10), [#allocation2]  }
  0x14   : > { %678 = vmatpush3.bf16.msra.mxu0 (!%p224_p10), %v757_v25  ;;  %v320_v52 = vrot.slane (!%p224_p10), %v281_v48, %v319_v46  ;;  %v324_v53 = vrot.slane (!%p224_p10), %v281_v48, %v323_v47  ;;  %v335_v56 = vrot.slane (!%p224_p10), %v282_v50, %v319_v46  ;;  %v339_v57 = vrot.slane (!%p224_p10), %v282_v50, %v323_v47  ;;  %s778_s15 = sshll.u32 (!%p224_p10), %s854_s21, 4  ;;  %s779_s15 = int_to_ptr.vmem [resolvable:$false] %s778_s15 }
  0x15   : > { %679 = vmatprep.subr.bf16.mxu0 (!%p224_p10), %v758_v26  ;;  %s780_s16 = scalar_lea.vmem (!%p224_p10), %s779_s15, 512 }
  0x16   : > { %s1074_s7 = smov (!%p260_p11, %s648_s7), 7 }
  0x17   : > { %s673_s8 = sshll.u32 %s1074_s7, 3  ;;  %s258_s7 = scalar_lea.vmem [#allocation2], %s647_s25 }
  0x18   : > { %s264_s11 = scalar_lea.vmem %s1058_s0, %s673_s8  ;;  %680 = vmatpush3.bf16.msra.mxu0 %v759_v27  ;;  %s541_s8 = sshll.u32 %s258_s7, 4  ;;  %s1005_s8 = int_to_ptr.vmem [resolvable:$true] %s541_s8 }
  0x19   : > { %v275_v0 = vld [vmem:[%s264_s11] sm:$0xff]  ;;  %v276_v1 = vld [vmem:[%s264_s11 + $0x8] sm:$0xff]  ;;  %681 = vmatprep.subr.bf16.mxu0 %v760_v28  ;;  %s774_s14 = scalar_lea.vmem %s1005_s8, 256  ;;  %p781_p1 = scmp.lt.s32.totalorder %s1005_s8, %s779_s15 }
  0x1a   : > { %v277_v2 = vunpack.c.l.bf16 %v275_v0  ;;  %v278_v3 = vunpack.c.h.bf16 %v275_v0  ;;  %v279_v4 = vunpack.c.l.bf16 %v276_v1  ;;  %v280_v5 = vunpack.c.h.bf16 %v276_v1  ;;  %p775_p12 = scmp.ne.s32.totalorder %s1005_s8, %s774_s14  ;;  %p782_p2 = scmp.lt.s32.totalorder %s780_s16, %s774_s14 }
  0x1c   : > { %v283_v6 = vadd.f32 %v278_v3, %v277_v2  ;;  %v286_v7 = vadd.f32 %v280_v5, %v279_v4  ;;  %682 = vmatpush3.bf16.msra.mxu0 %v761_v29  ;;  %p776_p13 = pnand %p775_p12, %p927_p4  ;;  %p783_p3 = por %p782_p2, %p781_p1 }
  0x1d   : > { %683 = vmatprep.subr.bf16.mxu0 %v762_v30 }
  0x1e   : > { %284 = vadd.xlane.f32.xlu0 %v283_v6  ;;  %p777_p0 = pneg %p776_p13 }
  0x20   : > { %684 = vmatpush3.bf16.msra.mxu0 %v763_v31  ;;  %p784_p5 = pnand %p783_p3, %p777_p0 }
  0x21   : > { %685 = vmatprep.subr.bf16.mxu0 %v764_v32 }
  0x22   : > { %287 = vadd.xlane.f32.xlu0 %v286_v7  ;;  %v651_v7 = vld [vmem:[%s1062_s4] ss:$0 sm:$0xff] }
  0x24   : > { %686 = vmatpush3.bf16.msra.mxu0 %v765_v33 }
  0x25   : > { %687 = vmatprep.subr.bf16.mxu0 %v766_v34 }
  0x28   : > { %688 = vmatpush3.bf16.msra.mxu0 %v767_v35 }
  0x29   : > { %689 = vmatprep.subr.bf16.mxu0 %v768_v36 }
  0x2c   : > { %690 = vmatpush3.bf16.msra.mxu0 %v769_v37 }
  0xab   : > { %v285_v10 = vpop.xlane.xlu0 %284 }
  0xac   : > { %v290_v11 = vmul.f32 0.00390625, %v285_v10 }
  0xae   : > { %v292_v12 = vsub.f32 %v277_v2, %v290_v11  ;;  %v293_v13 = vsub.f32 %v278_v3, %v290_v11 }
  0xaf   : > { %v288_v14 = vpop.xlane.xlu0 %287 }
  0xb0   : > { %v291_v15 = vmul.f32 0.00390625, %v288_v14  ;;  %v296_v16 = vmul.f32 %v292_v12, %v292_v12  ;;  %v297_v17 = vmul.f32 %v293_v13, %v293_v13 }
  0xb2   : > { %v294_v18 = vsub.f32 %v279_v4, %v291_v15  ;;  %v295_v19 = vsub.f32 %v280_v5, %v291_v15  ;;  %v300_v20 = vadd.f32 %v297_v17, %v296_v16 }
  0xb4   : > { %301 = vadd.xlane.f32.xlu1 %v300_v20  ;;  %v298_v21 = vmul.f32 %v294_v18, %v294_v18  ;;  %v299_v22 = vmul.f32 %v295_v19, %v295_v19 }
  0xb6   : > { %v303_v23 = vadd.f32 %v299_v22, %v298_v21 }
  0xb8   : > { %304 = vadd.xlane.f32.xlu1 %v303_v23 }
 0x141   : > { %v302_v38 = vpop.xlane.xlu1 %301 }
 0x142   : > { %v306_v39 = vmul.f32 0.00390625, %v302_v38 }
 0x144   : > { %v308_v40 = vadd.f32 1e-05, %v306_v39 }
 0x145   : > { %v305_v41 = vpop.xlane.xlu1 %304 }
 0x146   : > { %770 = vrsqrt.f32 %v308_v40  ;;  %v307_v43 = vmul.f32 0.00390625, %v305_v41 }
 0x148   : > { %v309_v44 = vadd.f32 1e-05, %v307_v43 }
 0x14a   : > { %772 = vrsqrt.f32 %v309_v44 }
 0x150   : > { %v771_v49 = vpop.eup %770 }
 0x151   : > { %v313_v51 = vmul.f32 %v771_v49, %v293_v13  ;;  %v312_v54 = vmul.f32 %v771_v49, %v292_v12 }
 0x153   : > { %v328_v59 = vmul.f32 %v324_v53, %v313_v51  ;;  %v327_v61 = vmul.f32 %v320_v52, %v312_v54 }
 0x154   : > { %v773_v55 = vpop.eup %772 }
 0x155   : > { %v315_v58 = vmul.f32 %v773_v55, %v295_v19  ;;  %v314_v60 = vmul.f32 %v773_v55, %v294_v18  ;;  %v343_v0 = vadd.f32 %v339_v57, %v328_v59  ;;  %v342_v2 = vadd.f32 %v335_v56, %v327_v61 }
 0x157   : > { %v330_v62 = vmul.f32 %v324_v53, %v315_v58  ;;  %v329_v63 = vmul.f32 %v320_v52, %v314_v60 }
 0x159   : > { %v345_v1 = vadd.f32 %v339_v57, %v330_v62  ;;  %v344_v3 = vadd.f32 %v335_v56, %v329_v63 }
 0x15b   : > { %v347_v4 = vpack.c.bf16 %v345_v1, %v343_v0  ;;  %v346_v5 = vpack.c.bf16 %v344_v3, %v342_v2 }
 0x15d   : > { %515 = vmatprep.mubr.bf16.mxu0 %v347_v4 }
 0x15e   : > { %516 = vmatmul.mubr.bf16.vlgmr.msra.gmra.mrb[0].mxu0 %v346_v5 }
 0x231   : > { %v691_v6 = vpop.f32.mrb[0].mxu0 }
 0x232   : > { %v692_v8 = vpop.f32.mrb[1].mxu0 }
 0x233   : > { %v693_v9 = vadd.f32 %v692_v8, %v691_v6  ;;  %v694_v10 = vpop.f32.mrb[2].mxu0 }
 0x234   : > { %v695_v11 = vpop.f32.mrb[3].mxu0 }
 0x235   : > { %v518_v12 = vadd.f32 %v693_v9, %v651_v7  ;;  %v696_v13 = vadd.f32 %v695_v11, %v694_v10 }
 0x237   : > { %524 = vst [vmem:[%s258_s7] sm:$0xff] %v518_v12  ;;  %v521_v14 = vadd.f32 %v696_v13, %v651_v7 }
 0x239   : > { %525 = vst [vmem:[%s258_s7 + $0x8] sm:$0xff] %v521_v14 }
 0x23a   : > { %787 = shalt.err (!%p784_p5)
}
 0x23b   : > { %s788_s17 = scalar_lea.hbm %s1010_s12, 256  ;;  %s792_s27 = scalar_lea.hbm %s1063_s5, 1024 }
 0x23c   : > { %p789_p6 = scmp.ne.s32.totalorder %s1010_s12, %s788_s17  ;;  %p793_p10 = scmp.lt.u32.totalorder %s1010_s12, %s1063_s5 }
 0x23d   : > { %p794_p11 = scmp.lt.u32.totalorder %s792_s27, %s788_s17  ;;  %p796_p13 = scmp.lt.u32.totalorder %s788_s17, %s1010_s12 }
 0x23e   : > { %p790_p7 = pnand %p789_p6, %p927_p4 }
 0x23f   : > { %p795_p12 = por %p794_p11, %p793_p10 }
 0x240   : > { %p791_p9 = pneg %p790_p7 }
 0x241   : > { %p797_p0 = por %p796_p13, %p795_p12 }
 0x243   : > { %p798_p1 = pnand %p797_p0, %p791_p9 }
 0x245   : > { %801 = shalt.err (!%p798_p1)
}
 0x246   : > { %s855_s9 = smov 128   ;;  %s856_s10 = smov 8  }
 0x247   : > { %697 = dma.vmem_to_hbm [thread:$0]  (%p927_p4), %s1005_s8, 256, %s1010_s12, %s1012_s13, %s855_s9, %s855_s9, %s856_s10  }
 0x248 PF: > { %p703_p2 = scmp.ge.s32.totalorder %s852_s23, 2  ;;  %s556_s11 = sand.u32 1, %s832_s18  }
 0x249   : > { %s557_s14 = scalar_lea.sflag [#allocation3], %s556_s11 }
 0x24a   : > { %p700_p3 = pnand %p703_p2, %p934_p8 }
 0x24c   : > { %827 = dma.done.wait (!%p700_p3), %s557_s14, 256  }
 0x24d   : > { %829 = vsyncadd (!%p700_p3), %s557_s14, 4294967040  ;;  %s18_s23 = sadd.s32 1, %s852_s23   ;;  %s1066_s18 = smov %s836_s19 }
 0x24e   : > { %p15_p5 = scmp.ge.s32.totalorder %s18_s23, 6   ;;  %s1067_s19 = smov %s840_s20 }
 0x24f   : > { %s1068_s20 = smov %s940_s6  ;;  %s1069_s21 = smov %s848_s22 }
 0x250   : > { %s1070_s22 = smov %s1072_s26  ;;  %17 = sbr.rel (!%p15_p5) target bundleno = 4 (0x4), region = 81 }
 0x257   :  { %562 = vsyncpa [#allocation3], 1 }
 0x258   :  { %564 = vsyncpa [#allocation3 + $0x1], 1 }

// kernel: decoder_transformer_forward.6
= control target key start
LH: loop header
LB: loop body
LE: loop exit
PB: predicated region body
PF: predicated region fallthrough
CT: control target
= control target key end

     0   :  { %s6361_s0 = inlined_call_operand.vmem [shape: bf16[2,32,256], index: 0, kind: input, shape index: {}]   ;;  %s6362_s1 = inlined_call_operand.vmem [shape: bf16[2,2,32,128], index: 1, kind: input, shape index: {}]   ;;  %s6363_s2 = inlined_call_operand.vmem [shape: bf16[2,2,32,128], index: 2, kind: input, shape index: {}]   ;;  %s6364_s3 = inlined_call_operand.vmem [shape: bf16[2,2,32,128], index: 3, kind: input, shape index: {}]   ;;  %s6365_s4 = inlined_call_operand.vmem [shape: bf16[256,256], index: 4, kind: input, shape index: {}]   ;;  %s6366_s5 = inlined_call_operand.vmem [shape: f32[1,256], index: 5, kind: input, shape index: {}]   ;;  %s6367_s6 = inlined_call_operand.hbm [shape: f32[1,256], index: 6, kind: input, shape index: {}]   ;;  %s6368_s7 = inlined_call_operand.hbm [shape: f32[1,256], index: 7, kind: input, shape index: {}]   ;;  %s6369_s8 = inlined_call_operand.vmem [shape: bf16[256,1024], index: 8, kind: input, shape index: {}]   ;;  %s6370_s9 = inlined_call_operand.vmem [shape: f32[1,1024], index: 9, kind: input, shape index: {}]   ;;  %s6371_s10 = inlined_call_operand.vmem [shape: bf16[1024,256], index: 10, kind: input, shape index: {}]   ;;  %s6372_s11 = inlined_call_operand.hbm [shape: f32[1,256], index: 11, kind: input, shape index: {}]   ;;  %s6373_s12 = inlined_call_operand.hbm [shape: f32[1,256], index: 12, kind: input, shape index: {}]   ;;  %s6374_s13 = inlined_call_operand.hbm [shape: f32[1,256], index: 13, kind: input, shape index: {}]   ;;  %s6375_s14 = inlined_call_operand.vmem [shape: bf16[2,32,256], index: 14, kind: output, shape index: {}]  }
   0x1   :  { %6390 = sst [smem:[#allocation30_spill]] %s6361_s0 }
   0x2   :  { %6391 = sst [smem:[#allocation31_spill]] %s6365_s4 }
   0x3   :  { %6392 = sst [smem:[#allocation32_spill]] %s6366_s5 }
   0x4   :  { %6393 = sst [smem:[#allocation33_spill]] %s6368_s7 }
   0x5   :  { %6394 = sst [smem:[#allocation34_spill]] %s6369_s8 }
   0x6   :  { %6395 = sst [smem:[#allocation35_spill]] %s6370_s9 }
   0x7   :  { %6396 = sst [smem:[#allocation36_spill]] %s6371_s10 }
   0x8   :  { %6397 = sst [smem:[#allocation37_spill]] %s6375_s14 }
   0x9   :  { %19 = vsyncpa [#allocation9], 0 }
   0xa   :  { %20 = vsyncpa [#allocation11], 0 }
   0xb   :  { %21 = vsyncpa [#allocation14], 0  ;;  %s5040_s29 = smov 0   ;;  %s5042_s30 = smov 0  }
   0xc   :  { %s5044_s15 = smov 0   ;;  %s5046_s16 = smov 0  }
   0xd   :  { %s5048_s17 = smov 0   ;;  %s5050_s18 = smov 0  }
   0xe   :  { %s5052_s19 = smov 0   ;;  %s5054_s20 = smov 0  }
   0xf   :  { %s5056_s21 = smov 0   ;;  %s5058_s22 = smov 0  }
  0x10   :  { %s5060_s23 = smov 0  }
  0x11 LB: > { %6398 = sst [smem:[#allocation19_spill]] %s4912_s29  ;;  %s3890_s24 = sadd.s32 4294967295, %s4952_s23   ;;  %s4952_s23 = sphi %s5060_s23, %s27_s23   ;;  %s4948_s22 = sphi %s5058_s22, %s6457_s22   ;;  %s4944_s21 = sphi %s5056_s21, %s6456_s21   ;;  %s4940_s20 = sphi %s5054_s20, %s6455_s20   ;;  %s4936_s19 = sphi %s5052_s19, %s6454_s19   ;;  %s4932_s18 = sphi %s5050_s18, %s6453_s18   ;;  %s4928_s17 = sphi %s5048_s17, %s6452_s17   ;;  %s4924_s16 = sphi %s5046_s16, %s6451_s16   ;;  %s4920_s15 = sphi %s5044_s15, %s6450_s15   ;;  %s4916_s30 = sphi %s5042_s30, %s6449_s30   ;;  %s4912_s29 = sphi %s5040_s29, %s6448_s29  }
  0x12   : > { %6399 = sst [smem:[#allocation20_spill]] %s4920_s15  ;;  %s39_s25 = sadd.s32 1, %s4940_s20 }
  0x13   : > { %6400 = sst [smem:[#allocation21_spill]] %s4928_s17  ;;  %p40_p0 = scmp.ge.s32.totalorder %s39_s25, 2 }
  0x14   : > { %6401 = sst [smem:[#allocation22_spill]] %s4932_s18  ;;  %s42_s26 = sadd.s32 1, %s4944_s21 }
  0x15   : > { %6402 = sst [smem:[#allocation23_spill]] %s4936_s19  ;;  %s46_s27 = sadd.s32 1, %s4948_s22 }
  0x16   : > { %s83_s28 = sadd.s32 1, %s4924_s16  ;;  %s6459_s25 = smov (%p40_p0, %s39_s25), 0 }
  0x17   : > { %6403 = sst [smem:[#allocation24_spill]] %s6459_s25  ;;  %s6461_s26 = smov (!%p40_p0, %s42_s26), %s4944_s21 }
  0x18   : > { %p90_p1 = scmp.ne.s32.totalorder %s4924_s16, %s4920_s15  ;;  %p91_p2 = scmp.eq.s32.totalorder %s4952_s23, 0 }
  0x19   : > { %p44_p3 = scmp.ge.s32.totalorder %s6461_s26, 2  ;;  %s107_s9 = ssub.s32 %s4940_s20, %s6459_s25 }
  0x1a   : > { %p5108_p4 = por %p91_p2, %p90_p1  ;;  %s111_s8 = sadd.s32 1, %s4916_s30 }
  0x1b   : > { %s6463_s26 = smov (%p44_p3, %s6461_s26), 0  ;;  %s6465_s27 = smov (!%p44_p3, %s46_s27), %s4948_s22 }
  0x1c   : > { %s6404_s10 = scalar_select %p5108_p4, 1, 0 }
  0x1d   : > { %6405 = sst [smem:[#allocation25_spill]] %s6463_s26  ;;  %s79_s5 = ssub.s32 %s4944_s21, %s6463_s26 }
  0x1e   : > { %p118_p5 = scmp.ne.s32.totalorder %s4916_s30, %s4912_s29  ;;  %p48_p6 = scmp.ge.s32.totalorder %s6465_s27, 2 }
  0x1f   : > { %p3892_p7 = scmp.ge.s32.totalorder %s4952_s23, 1  ;;  %p401_p9 = scmp.lt.s32.totalorder %s4952_s23, 9 }
  0x20   : > { %p5121_p8 = por %p118_p5, %p91_p2  ;;  %s6467_s27 = smov (%p48_p6, %s6465_s27), 0 }
  0x21   : > { %6407 = sst [smem:[#allocation26_spill]] %s6467_s27  ;;  %p5128_p10 = pnand %p3892_p7, %p401_p9 }
  0x22   : > { %s6406_s4 = scalar_select %p5121_p8, 1, 0 }
  0x23   : > { %s6408_s25 = scalar_select %p5128_p10, 1, 0 }
  0x24   : > { %s78_s17 = ssub.s32 %s4948_s22, %s6467_s27  ;;  %p5134_p11 = scmp.eq.s32.totalorder %s3890_s24, 0 }
  0x25   : > { %s80_s14 = sor.u32 %s79_s5, %s78_s17  ;;  %s108_s0 = sor.u32 %s107_s9, %s78_s17 }
  0x26   : > { %s6409_s26 = scalar_select %p5134_p11, 1, 0 }
  0x27   : > { %p81_p12 = scmp.eq.s32.totalorder %s80_s14, 0  ;;  %p109_p13 = scmp.eq.s32.totalorder %s108_s0, 0 }
  0x28   : > { %6410 = sst [smem:[#allocation27_spill]] %s6409_s26  ;;  %p4307_p0 = pneg %p5128_p10 }
  0x29   : > { %s5141_s19 = scalar_select %p81_p12, %s4924_s16, %s83_s28  }
  0x2a   : > { %s5144_s18 = scalar_select %p109_p13, %s4916_s30, %s111_s8  }
  0x2b   : > { %6411 = sst [smem:[#allocation28_spill]] %s5141_s19  ;;  %p5148_p1 = pnand %p5134_p11, %p4307_p0 }
  0x2c   : > { %6412 = sst [smem:[#allocation29_spill]] %s5144_s18  ;;  %s4954_s24 = smov [#allocation10]  }
  0x2d   : > { %s431_s27 = sshll.u32 %s4954_s24, 4  ;;  %s4955_s15 = smov [#allocation13]   ;;  %s432_s27 = int_to_ptr.vmem [resolvable:$true] %s431_s27 }
  0x2e   : > { %s462_s5 = sshll.u32 %s4955_s15, 4  ;;  %s6414_s7 = sld [smem:[#allocation33_spill]]  ;;  %s463_s5 = int_to_ptr.vmem [resolvable:$true] %s462_s5 }
  0x2f   : > { %p5160_p3 = pneg %p5148_p1 }
  0x34   : > { %s4714_s0 = scalar_lea.hbm %s6414_s7, 32 }
  0x35   : > { %p4715_p2 = scmp.ne.s32.totalorder %s6414_s7, %s4714_s0  ;;  %p4721_p7 = scmp.lt.u32.totalorder %s4714_s0, %s6414_s7 }
  0x37   : > { %p4717_p5 = pnand %p5160_p3, %p4715_p2 }
  0x39   : > { %p4718_p6 = pneg %p4717_p5 }
  0x3b   : > { %p4723_p9 = pnand %p4721_p7, %p4718_p6 }
  0x3d   : > { %4726 = shalt.err (!%p4723_p9)
}
  0x3e   : > { %s4727_s15 = scalar_lea.vmem %s432_s27, 32  ;;  %p4735_p11 = scmp.lt.s32.totalorder %s432_s27, %s432_s27 }
  0x3f   : > { %p4728_p12 = scmp.ne.s32.totalorder %s432_s27, %s4727_s15  ;;  %p4736_p10 = scmp.lt.s32.totalorder %s4727_s15, %s4727_s15 }
  0x41   : > { %p4730_p13 = pnand %p4728_p12, %p5160_p3  ;;  %p4737_p8 = por %p4736_p10, %p4735_p11 }
  0x43   : > { %p4731_p0 = pneg %p4730_p13 }
  0x45   : > { %p4738_p4 = pnand %p4737_p8, %p4731_p0 }
  0x47   : > { %4741 = shalt.err (!%p4738_p4)
}
  0x48   : > { %4313 = dma.hbm_to_vmem [thread:$0]  (!%p5148_p1), %s6414_s7, 32, %s432_s27, [#allocation11]  }
  0x49   : > { %s4742_s17 = scalar_lea.hbm %s6373_s12, 32 }
  0x4a   : > { %p4743_p2 = scmp.ne.s32.totalorder %s6373_s12, %s4742_s17  ;;  %p4749_p4 = scmp.lt.u32.totalorder %s4742_s17, %s6373_s12 }
  0x4c   : > { %p4745_p10 = pnand %p4743_p2, %p5160_p3 }
  0x4e   : > { %p4746_p8 = pneg %p4745_p10 }
  0x50   : > { %p4751_p11 = pnand %p4749_p4, %p4746_p8 }
  0x52   : > { %4754 = shalt.err (!%p4751_p11)
}
  0x53   : > { %s4755_s9 = scalar_lea.vmem %s463_s5, 32  ;;  %p4763_p9 = scmp.lt.s32.totalorder %s463_s5, %s463_s5 }
  0x54   : > { %p4756_p5 = scmp.ne.s32.totalorder %s463_s5, %s4755_s9  ;;  %p4764_p12 = scmp.lt.s32.totalorder %s4755_s9, %s4755_s9 }
  0x56   : > { %p4758_p6 = pnand %p4756_p5, %p5160_p3  ;;  %p4765_p13 = por %p4764_p12, %p4763_p9 }
  0x58   : > { %p4759_p7 = pneg %p4758_p6 }
  0x5a   : > { %p4766_p0 = pnand %p4765_p13, %p4759_p7 }
  0x5c   : > { %4769 = shalt.err (!%p4766_p0)
}
  0x5d   : > { %4319 = dma.hbm_to_vmem [thread:$0]  (!%p5148_p1), %s6373_s12, 32, %s463_s5, [#allocation14]  }
  0x5e   : > { %s4956_s18 = smov [#allocation8]   ;;  %s4957_s0 = smov [#allocation12]  }
  0x5f   : > { %s420_s19 = sshll.u32 %s4956_s18, 4  ;;  %s451_s17 = sshll.u32 %s4957_s0, 4  ;;  %s421_s19 = int_to_ptr.vmem [resolvable:$true] %s420_s19  ;;  %s452_s17 = int_to_ptr.vmem [resolvable:$true] %s451_s17 }
  0x60   : > { %s4770_s15 = scalar_lea.hbm %s6367_s6, 32 }
  0x61   : > { %p4771_p2 = scmp.ne.s32.totalorder %s6367_s6, %s4770_s15  ;;  %p4777_p4 = scmp.lt.u32.totalorder %s4770_s15, %s6367_s6 }
  0x63   : > { %p4773_p10 = pnand %p4771_p2, %p5160_p3 }
  0x65   : > { %p4774_p8 = pneg %p4773_p10 }
  0x67   : > { %p4779_p11 = pnand %p4777_p4, %p4774_p8 }
  0x69   : > { %4782 = shalt.err (!%p4779_p11)
}
  0x6a   : > { %s4783_s5 = scalar_lea.vmem %s421_s19, 32  ;;  %p4791_p9 = scmp.lt.s32.totalorder %s421_s19, %s421_s19 }
  0x6b   : > { %p4784_p5 = scmp.ne.s32.totalorder %s421_s19, %s4783_s5  ;;  %p4792_p12 = scmp.lt.s32.totalorder %s4783_s5, %s4783_s5 }
  0x6d   : > { %p4786_p6 = pnand %p4784_p5, %p5160_p3  ;;  %p4793_p13 = por %p4792_p12, %p4791_p9 }
  0x6f   : > { %p4787_p7 = pneg %p4786_p6 }
  0x71   : > { %p4794_p0 = pnand %p4793_p13, %p4787_p7 }
  0x73   : > { %4797 = shalt.err (!%p4794_p0)
}
  0x74   : > { %4310 = dma.hbm_to_vmem [thread:$0]  (!%p5148_p1), %s6367_s6, 32, %s421_s19, [#allocation9]  }
  0x75   : > { %s4798_s0 = scalar_lea.hbm %s6372_s11, 32 }
  0x76   : > { %p4799_p2 = scmp.ne.s32.totalorder %s6372_s11, %s4798_s0  ;;  %p4805_p4 = scmp.lt.u32.totalorder %s4798_s0, %s6372_s11 }
  0x78   : > { %p4801_p10 = pnand %p4799_p2, %p5160_p3 }
  0x7a   : > { %p4802_p8 = pneg %p4801_p10 }
  0x7c   : > { %p4807_p11 = pnand %p4805_p4, %p4802_p8 }
  0x7e   : > { %4810 = shalt.err (!%p4807_p11)
}
  0x7f   : > { %s4811_s27 = scalar_lea.vmem %s452_s17, 32  ;;  %p4819_p9 = scmp.lt.s32.totalorder %s452_s17, %s452_s17 }
  0x80   : > { %p4812_p5 = scmp.ne.s32.totalorder %s452_s17, %s4811_s27  ;;  %p4820_p12 = scmp.lt.s32.totalorder %s4811_s27, %s4811_s27 }
  0x82   : > { %p4814_p6 = pnand %p4812_p5, %p5160_p3  ;;  %p4821_p13 = por %p4820_p12, %p4819_p9 }
  0x84   : > { %p4815_p7 = pneg %p4814_p6 }
  0x86   : > { %p4822_p0 = pnand %p4821_p13, %p4815_p7 }
  0x88   : > { %4825 = shalt.err (!%p4822_p0)
}
  0x89   : > { %4316 = dma.hbm_to_vmem [thread:$0]  (!%p5148_p1), %s6372_s11, 32, %s452_s17, [#allocation11]  }
  0x8a   : > { %s4958_s7 = smov [#allocation15]   ;;  %s4826_s0 = scalar_lea.hbm %s6374_s13, 32 }
  0x8b   : > { %s473_s14 = sshll.u32 %s4958_s7, 4  ;;  %p4827_p2 = scmp.ne.s32.totalorder %s6374_s13, %s4826_s0  ;;  %s474_s14 = int_to_ptr.vmem [resolvable:$true] %s473_s14 }
  0x8c   : > { %p4833_p4 = scmp.lt.u32.totalorder %s4826_s0, %s6374_s13 }
  0x8d   : > { %p4829_p10 = pnand %p4827_p2, %p5160_p3 }
  0x8f   : > { %p4830_p8 = pneg %p4829_p10 }
  0x91   : > { %p4835_p11 = pnand %p4833_p4, %p4830_p8 }
  0x93   : > { %4838 = shalt.err (!%p4835_p11)
}
  0x94   : > { %s4839_s17 = scalar_lea.vmem %s474_s14, 32  ;;  %p4847_p9 = scmp.lt.s32.totalorder %s474_s14, %s474_s14 }
  0x95   : > { %p4840_p5 = scmp.ne.s32.totalorder %s474_s14, %s4839_s17  ;;  %p4848_p12 = scmp.lt.s32.totalorder %s4839_s17, %s4839_s17 }
  0x97   : > { %p4842_p6 = pnand %p4840_p5, %p5160_p3  ;;  %p4849_p13 = por %p4848_p12, %p4847_p9 }
  0x99   : > { %p4843_p7 = pneg %p4842_p6 }
  0x9b   : > { %p4850_p0 = pnand %p4849_p13, %p4843_p7 }
  0x9d   : > { %4853 = shalt.err (!%p4850_p0)
}
  0x9e   : > { %4322 = dma.hbm_to_vmem [thread:$0]  (!%p5148_p1), %s6374_s13, 32, %s474_s14, [#allocation14]  }
  0x9f   : > { %p3898_p2 = scmp.ge.s32.totalorder %s4952_s23, 8 }
  0xa0   : > { %p6416_p10 = scmp.ne.s32.totalorder (!%p3898_p2), %s6404_s10, 0 }
  0xa1   : > { %480 = sbr.rel (%p3898_p2) target bundleno = 194 (0xc2), region = 56 }
  0xa8   : > { %497 = sbr.rel (!%p6416_p10) target bundleno = 176 (0xb0), region = 64  ;;  %s499_s8 = sand.u32 (%p6416_p10), 1, %s4924_s16  }
  0xa9   : > { %s3900_s5 = sshll.u32 (%p6416_p10), %s4944_s21, 1  ;;  %s3899_s7 = sshll.u32 (%p6416_p10), %s499_s8, 4 }
  0xaa   : > { %s3901_s26 = sshll.u32 (%p6416_p10), %s4948_s22, 3  ;;  %s501_s14 = scalar_lea.vmem (%p6416_p10), [#allocation5], %s3899_s7 }
  0xab   : > { %s504_s18 = sadd.s32 (%p6416_p10), %s3901_s26, %s3900_s5 }
  0xac   : > { %s3902_s0 = sshll.u32 (%p6416_p10), %s504_s18, 2 }
  0xad   : > { %s506_s24 = scalar_lea.vmem (%p6416_p10), %s6362_s1, %s3902_s0 }
  0xae   : > { %v522_v0 = vld [vmem:[%s506_s24] sm:$0xff] (%p6416_p10)   ;;  %v526_v1 = vld [vmem:[%s506_s24 + $0x10] sm:$0xff] (%p6416_p10)  }
  0xaf   : > { %523 = vst [vmem:[%s501_s14] sm:$0xff] %v522_v0   ;;  %527 = vst [vmem:[%s501_s14 + $0x8] sm:$0xff] %v526_v1  }
  0xb0 PF: > { %p6417_p1 = scmp.ne.s32.totalorder %s6406_s4, 0 }
  0xb1   : > { %s562_s10 = sand.u32 (%p6417_p1), 1, %s4916_s30   ;;  %s3904_s15 = sshll.u32 (%p6417_p1), %s4940_s20, 1 }
  0xb2   : > { %560 = sbr.rel (!%p6417_p1) target bundleno = 185 (0xb9), region = 105  ;;  %s3903_s9 = sshll.u32 (%p6417_p1), %s562_s10, 4 }
  0xb3   : > { %s3905_s17 = sshll.u32 (%p6417_p1), %s4948_s22, 3  ;;  %s564_s7 = scalar_lea.vmem (%p6417_p1), [#allocation6], %s3903_s9 }
  0xb4   : > { %s567_s27 = sadd.s32 (%p6417_p1), %s3905_s17, %s3904_s15 }
  0xb5   : > { %s3906_s19 = sshll.u32 (%p6417_p1), %s567_s27, 2 }
  0xb6   : > { %s569_s26 = scalar_lea.vmem (%p6417_p1), %s6363_s2, %s3906_s19 }
  0xb7   : > { %v585_v2 = vld [vmem:[%s569_s26] sm:$0xff] (%p6417_p1)   ;;  %v589_v3 = vld [vmem:[%s569_s26 + $0x10] sm:$0xff] (%p6417_p1)  }
  0xb8   : > { %586 = vst [vmem:[%s564_s7] sm:$0xff] (%p6417_p1), %v585_v2   ;;  %590 = vst [vmem:[%s564_s7 + $0x8] sm:$0xff] (%p6417_p1), %v589_v3  }
  0xb9 PF: > { %p6418_p3 = scmp.ne.s32.totalorder %s6406_s4, 0 }
  0xba   : > { %s625_s18 = sand.u32 (%p6418_p3), 1, %s4916_s30   ;;  %s3908_s0 = sshll.u32 (%p6418_p3), %s4940_s20, 1 }
  0xbb   : > { %623 = sbr.rel (!%p6418_p3) target bundleno = 194 (0xc2), region = 146  ;;  %s3907_s29 = sshll.u32 (%p6418_p3), %s625_s18, 4 }
  0xbc   : > { %s3909_s28 = sshll.u32 (%p6418_p3), %s4948_s22, 3  ;;  %s627_s9 = scalar_lea.vmem (%p6418_p3), [#allocation7], %s3907_s29 }
  0xbd   : > { %s630_s24 = sadd.s32 (%p6418_p3), %s3909_s28, %s3908_s0 }
  0xbe   : > { %s3910_s14 = sshll.u32 (%p6418_p3), %s630_s24, 2 }
  0xbf   : > { %s632_s17 = scalar_lea.vmem (%p6418_p3), %s6364_s3, %s3910_s14 }
  0xc0   : > { %v648_v4 = vld [vmem:[%s632_s17] sm:$0xff] (%p6418_p3)   ;;  %v652_v5 = vld [vmem:[%s632_s17 + $0x10] sm:$0xff] (%p6418_p3)  }
  0xc1   : > { %649 = vst [vmem:[%s627_s9] sm:$0xff] (%p6418_p3), %v648_v4   ;;  %653 = vst [vmem:[%s627_s9 + $0x8] sm:$0xff] (%p6418_p3), %v652_v5  }
  0xc2 PF: > { %p6419_p8 = scmp.ne.s32.totalorder %s6408_s25, 0 }
  0xc3   : > { %s6420_s4 = sld [smem:[#allocation20_spill]] (!%p6419_p8)  ;;  %s6421_s27 = sld [smem:[#allocation19_spill]] (!%p6419_p8) }
  0xc4   : > { %689 = sbr.rel (%p6419_p8) target bundleno = 2651 (0xa5b), region = 187  ;;  %s6422_s19 = sld [smem:[#allocation27_spill]] (!%p6419_p8) }
  0xc9   : > { %s692_s8 = sand.u32 (!%p6419_p8), 1, %s6420_s4   ;;  %s699_s5 = sand.u32 (!%p6419_p8), 1, %s6421_s27  }
  0xca   : > { %s5277_s26 = sshll.u32 (!%p6419_p8), %s692_s8, 4  ;;  %s5279_s7 = sshll.u32 (!%p6419_p8), %s699_s5, 4 }
  0xcb   : > { %p6423_p4 = scmp.ne.s32.totalorder %s6422_s19, 0 }
  0xcd   : > { %4899 = dma.done.wait (%p6423_p4), [#allocation9], 32  }
  0xce   : > { %4901 = vsyncadd (%p6423_p4), [#allocation9], 4294967264 }
  0xcf   : > { %4903 = dma.done.wait (%p6423_p4), [#allocation11], 64  }
  0xd0   : > { %4905 = vsyncadd (%p6423_p4), [#allocation11], 4294967232 }
  0xd1   : > { %4907 = dma.done.wait (%p6423_p4), [#allocation14], 64  }
  0xd2   : > { %4909 = vsyncadd (%p6423_p4), [#allocation14], 4294967232  ;;  %s6424_s25 = sld [smem:[#allocation22_spill]]  ;;  %s6425_s28 = sld [smem:[#allocation23_spill]] }
  0xd3   : > { %s6426_s27 = sld [smem:[#allocation30_spill]]  ;;  %s6427_s29 = sld [smem:[#allocation37_spill]] }
  0xd4   : > { %s6428_s0 = sld [smem:[#allocation21_spill]] }
  0xd8   : > { %s3920_s24 = sshll.u32 %s6424_s25, 1  ;;  %p795_p11 = scmp.lt.s32.totalorder %s6425_s28, 1 }
  0xd9   : > { %p797_p5 = scmp.lt.s32.totalorder %s3920_s24, 3 }
  0xda   : > { %s6469_s28 = smov (!%p795_p11, %s6425_s28), 1  ;;  %p3928_p6 = scmp.ne.s32.totalorder %s6428_s0, 0 }
  0xdb   : > { %s6471_s24 = smov (!%p797_p5, %s3920_s24), 3  ;;  %s3922_s14 = sshll.u32 %s6469_s28, 3  ;;  %vm824_vm0 = vcmask (!%p3928_p6), 7168   ;;  %v4959_v6 = vmov (!%p3928_p6), -inf   ;;  %v4960_v7 = vmov (!%p3928_p6), 0.0  }
  0xdc   : > { %s3921_s10 = sshll.u32 %s6471_s24, 1  ;;  %823 = sbr.rel (%p3928_p6) target bundleno = 227 (0xe3), region = 223  ;;  %825 = vst.msk [vmem:[#allocation2] sm:$0xff] (!%p3928_p6), %vm824_vm0, %v4959_v6  ;;  %826 = vst.msk [vmem:[#allocation2 + $0x8] sm:$0xff] (!%p3928_p6), %vm824_vm0, %v4959_v6 }
  0xdd   : > { %s801_s15 = sadd.s32 %s3922_s14, %s3921_s10  ;;  %827 = vst.msk [vmem:[#allocation2 + $0x10] sm:$0xff] (!%p3928_p6), %vm824_vm0, %v4959_v6  ;;  %828 = vst.msk [vmem:[#allocation2 + $0x18] sm:$0xff] (!%p3928_p6), %vm824_vm0, %v4959_v6 }
  0xde   : > { %s3923_s17 = sshll.u32 %s801_s15, 2  ;;  %829 = vst.msk [vmem:[#allocation3] sm:$0xff] (!%p3928_p6), %vm824_vm0, %v4960_v7  ;;  %830 = vst.msk [vmem:[#allocation3 + $0x8] sm:$0xff] (!%p3928_p6), %vm824_vm0, %v4960_v7 }
  0xdf   : > { %s5302_s8 = scalar_lea.vmem %s6426_s27, %s3923_s17  ;;  %s5307_s18 = scalar_lea.vmem %s6427_s29, %s3923_s17  ;;  %831 = vst.msk [vmem:[#allocation3 + $0x10] sm:$0xff] (!%p3928_p6), %vm824_vm0, %v4960_v7  ;;  %832 = vst.msk [vmem:[#allocation3 + $0x18] sm:$0xff] (!%p3928_p6), %vm824_vm0, %v4960_v7 }
  0xe0   : > { %833 = vst [vmem:[#allocation4] sm:$0xff] (!%p3928_p6), %v4960_v7  ;;  %834 = vst [vmem:[#allocation4 + $0x8] sm:$0xff] (!%p3928_p6), %v4960_v7 }
  0xe1   : > { %835 = vst [vmem:[#allocation4 + $0x10] sm:$0xff] (!%p3928_p6), %v4960_v7  ;;  %836 = vst [vmem:[#allocation4 + $0x18] sm:$0xff] (!%p3928_p6), %v4960_v7 }
  0xe3 PF: > { %s6429_s29 = sld [smem:[#allocation22_spill]]  ;;  %s6430_s25 = sld [smem:[#allocation21_spill]] }
  0xe9   : > { %s3929_s0 = sshll.u32 %s6429_s29, 4  ;;  %s3930_s28 = sshll.u32 %s6430_s25, 4 }
  0xea   : > { %s839_s24 = sadd.s32 15, %s3929_s0 }
  0xeb   : > { %p3931_p7 = scmp.gt.s32.totalorder %s3930_s28, %s839_s24 }
  0xec   : > { %s6431_s14 = scalar_lea.vmem (!%p3931_p7), [#allocation6], %s5279_s7  ;;  %v4961_v9 = vmov (!%p3931_p7), 0.0   ;;  %vm4962_vm1 = vmmov (!%p3931_p7), 0   ;;  %s6433_s15 = scalar_lea.vmem (!%p3931_p7), [#allocation5], %s5277_s26  ;;  %v962_v13 = vlaneseq (!%p3931_p7)  ;;  %v965_v16 = vstv (!%p3931_p7), %s3929_s0  ;;  %v982_v39 = vld [vmem:[#allocation2] sm:$0xff] (!%p3931_p7)  ;;  %v984_v40 = vld [vmem:[#allocation2 + $0x10] sm:$0xff] (!%p3931_p7) }
  0xed   : > { %843 = sbr.rel (%p3931_p7) target bundleno = 974 (0x3ce), region = 227  ;;  %v4434_v8 = vld [vmem:[%s6431_s14] sm:$0xff] (!%p3931_p7)   ;;  %4243 = vmatprep.subr.bf16.mxu0 (!%p3931_p7), %v4961_v9  ;;  %4249 = vmatprep.subr.bf16.mxu1 (!%p3931_p7), %v4961_v9  ;;  %s6432_s10 = smov (!%p3931_p7), %s6431_s14  ;;  %v970_v17 = vstv (!%p3931_p7), %s3930_s28  ;;  %vm986_vm3 = vcmask (!%p3931_p7), 130048   ;;  %v4963_v38 = vmov (!%p3931_p7), 0   ;;  %vm1071_vm5 = vcmask (!%p3931_p7), 7168   ;;  %v983_v45 = vld [vmem:[#allocation2 + $0x8] sm:$0xff] (!%p3931_p7) }
  0xee   : > { %v4435_v10 = vld [vmem:[%s6432_s10 + $0x8] sm:$0xff] (!%p3931_p7)   ;;  %4244 = vmatpush3.bf16.xpose.msra.mxu0 (!%p3931_p7), %v4434_v8  ;;  %4245 = vmatprep.mubr.msk.bf16.mxu0 (!%p3931_p7), %vm4962_vm1, %v4961_v9  ;;  %v4436_v11 = vld [vmem:[%s6433_s15] sm:$0xff] (!%p3931_p7)   ;;  %s6434_s17 = smov (!%p3931_p7), %s6433_s15  ;;  %v963_v14 = vshrl.u32 (!%p3931_p7), %v962_v13, 7  ;;  %v969_v15 = vand.u32 (!%p3931_p7), 127, %v962_v13  ;;  %v985_v47 = vld [vmem:[#allocation2 + $0x18] sm:$0xff] (!%p3931_p7)  ;;  %s6435_s26 = scalar_lea.vmem (!%p3931_p7), [#allocation7], %s5279_s7 }
  0xef   : > { %4250 = vmatpush3.bf16.xpose.msra.mxu1 (!%p3931_p7), %v4435_v10  ;;  %4251 = vmatprep.mubr.msk.bf16.mxu1 (!%p3931_p7), %vm4962_vm1, %v4961_v9  ;;  %v4437_v12 = vld [vmem:[%s6434_s17 + $0x8] sm:$0xff] (!%p3931_p7)   ;;  %v4438_v57 = vld [vmem:[%s6435_s26] sm:$0xff] (!%p3931_p7)   ;;  %s6436_s9 = smov (!%p3931_p7), %s6435_s26 }
  0xf0   : > { %4255 = vmatprep.subr.bf16.mxu0 (!%p3931_p7), %v4961_v9  ;;  %4261 = vmatprep.subr.bf16.mxu1 (!%p3931_p7), %v4961_v9  ;;  %v964_v18 = vadd.s32 (!%p3931_p7), 8, %v963_v14  ;;  %v966_v19 = vadd.s32 (!%p3931_p7), %v965_v16, %v963_v14  ;;  %v971_v20 = vadd.s32 (!%p3931_p7), %v970_v17, %v969_v15  ;;  %v4439_v58 = vld [vmem:[%s6436_s9 + $0x8] sm:$0xff] (!%p3931_p7)  }
  0xf1   : > { %4433 = vset.pattern.permute.xlu1 (!%p3931_p7), %v4963_v38  ;;  %4432 = vset.pattern.permute.xlu0 (!%p3931_p7), %v4963_v38 }
  0xf2   : > { %v967_v21 = vadd.s32 (!%p3931_p7), %v965_v16, %v964_v18  ;;  %vm972_vm2 = vcmp.le.s32.totalorder (!%p3931_p7), %v971_v20, %v966_v19 }
  0xf4   : > { %vm973_vm4 = vcmp.le.s32.totalorder %v971_v20, %v967_v21 }
  0xf5   : > { %4246 = vmatmul.mubr.bf16.vlgmr.msra.gmra.mrb[0].mxu0 %v4436_v11 }
  0xf6   : > { %4252 = vmatmul.mubr.bf16.vlgmr.msra.gmra.mrb[0].mxu1 %v4437_v12  ;;  %4257 = vmatprep.mubr.msk.bf16.mxu0 %vm4962_vm1, %v4961_v9 }
  0xf7   : > { %4263 = vmatprep.mubr.msk.bf16.mxu1 %vm4962_vm1, %v4961_v9  ;;  %4256 = vmatpush3.bf16.msra.mxu0 %v4438_v57 }
  0xf8   : > { %4262 = vmatpush3.bf16.msra.mxu1 %v4439_v58 }
 0x1c8   : > { %v902_v22 = vpop.f32.mrb[0].mxu0 }
 0x1c9   : > { %v978_v23 = vsel %vm972_vm2, %v902_v22, -1e+30  ;;  %v955_v24 = vpop.f32.mrb[0].mxu1  ;;  %v4247_v25 = vpop.f32.mrb[1].mxu0 }
 0x1ca   : > { %v980_v26 = vsel %vm972_vm2, %v955_v24, -1e+30  ;;  %v4253_v27 = vpop.f32.mrb[1].mxu1  ;;  %v905_v28 = vpop.f32.mrb[2].mxu0  ;;  %v987_v29 = vsel %vm986_vm3, %v978_v23, -inf  ;;  %v1047_v24 = vld [vmem:[#allocation3] sm:$0xff] }
 0x1cb   : > { %v979_v30 = vsel %vm973_vm4, %v905_v28, -1e+30  ;;  %v958_v31 = vpop.f32.mrb[2].mxu1  ;;  %v993_v32 = vsel %vm986_vm3, %v980_v26, -inf  ;;  %988 = vmax.xlane.f32.xlu0 %v987_v29  ;;  %v4248_v33 = vpop.f32.mrb[3].mxu0  ;;  %v1049_v27 = vld [vmem:[#allocation3 + $0x10] sm:$0xff] }
 0x1cc   : > { %v981_v34 = vsel %vm973_vm4, %v958_v31, -1e+30  ;;  %994 = vmax.xlane.f32.xlu1 %v993_v32  ;;  %v4254_v35 = vpop.f32.mrb[3].mxu1  ;;  %v990_v36 = vsel %vm986_vm3, %v979_v30, -inf  ;;  %v1048_v29 = vld [vmem:[#allocation3 + $0x8] sm:$0xff] }
 0x1cd   : > { %v996_v37 = vsel %vm986_vm3, %v981_v34, -inf }
 0x1cf   : > { %991 = vmax.xlane.f32.xlu0 %v990_v36 }
 0x1d0   : > { %997 = vmax.xlane.f32.xlu1 %v996_v37  ;;  %v1050_v37 = vld [vmem:[#allocation3 + $0x18] sm:$0xff] }
 0x258   : > { %v989_v41 = vpop.xlane.xlu0 %988 }
 0x259   : > { %v995_v42 = vpop.xlane.xlu1 %994  ;;  %v999_v43 = vmax.f32 %v982_v39, %v989_v41  ;;  %v1076_v41 = vld [vmem:[#allocation4] sm:$0xff] }
 0x25a   : > { %v1001_v44 = vmax.f32 %v984_v40, %v995_v42  ;;  %v1077_v42 = vld [vmem:[#allocation4 + $0x8] sm:$0xff] }
 0x25b   : > { %v1003_v46 = vsub.f32 %v982_v39, %v999_v43  ;;  %1214 = vst.msk [vmem:[#allocation2] sm:$0xff] %vm1071_vm5, %v999_v43  ;;  %1017 = vperm.xlu0 %4432, %v999_v43  }
 0x25c   : > { %v1005_v48 = vsub.f32 %v984_v40, %v1001_v44  ;;  %1216 = vst.msk [vmem:[#allocation2 + $0x10] sm:$0xff] %vm1071_vm5, %v1001_v44  ;;  %1027 = vperm.xlu1 %4433, %v1001_v44   ;;  %v992_v49 = vpop.xlane.xlu0 %991 }
 0x25d   : > { %v1007_v50 = vmul.f32 1.442695, %v1003_v46  ;;  %v998_v51 = vpop.xlane.xlu1 %997  ;;  %v1000_v52 = vmax.f32 %v983_v45, %v992_v49 }
 0x25e   : > { %v1002_v53 = vmax.f32 %v985_v47, %v998_v51  ;;  %v1011_v14 = vmul.f32 1.442695, %v1005_v48 }
 0x25f   : > { %4440 = vpow2.f32 %v1007_v50  ;;  %v1004_v54 = vsub.f32 %v983_v45, %v1000_v52  ;;  %1215 = vst.msk [vmem:[#allocation2 + $0x8] sm:$0xff] %vm1071_vm5, %v1000_v52  ;;  %v1078_v45 = vld [vmem:[#allocation4 + $0x10] sm:$0xff]  ;;  %v1079_v50 = vld [vmem:[#allocation4 + $0x18] sm:$0xff] }
 0x260   : > { %v1006_v55 = vsub.f32 %v985_v47, %v1002_v53  ;;  %1217 = vst.msk [vmem:[#allocation2 + $0x18] sm:$0xff] %vm1071_vm5, %v1002_v53  ;;  %1022 = vperm.xlu1 %4433, %v1000_v52  }
 0x261   : > { %v1009_v17 = vmul.f32 1.442695, %v1004_v54 }
 0x262   : > { %v1013_v21 = vmul.f32 1.442695, %v1006_v55 }
 0x264   : > { %1032 = vperm.xlu1 %4433, %v1002_v53  }
 0x269   : > { %v4441_v56 = vpop.eup %4440 }
 0x26a   : > { %1082 = vperm.xlu1 %4433, %v4441_v56   ;;  %v1051_v25 = vmul.f32 %v4441_v56, %v1047_v24 }
 0x2da   : > { %v1018_v59 = vpop.permute.xlu0 %1017 }
 0x2db   : > { %v1028_v60 = vpop.permute.xlu1 %1027  ;;  %v1035_v61 = vsub.f32 %v978_v23, %v1018_v59 }
 0x2dc   : > { %v1037_v62 = vsub.f32 %v980_v26, %v1028_v60 }
 0x2dd   : > { %v1039_v63 = vmul.f32 1.442695, %v1035_v61 }
 0x2de   : > { %v1043_v0 = vmul.f32 1.442695, %v1037_v62 }
 0x2df   : > { %4442 = vpow2.f32 %v1039_v63  ;;  %v1023_v1 = vpop.permute.xlu1 %1022 }
 0x2e0   : > { %v1036_v2 = vsub.f32 %v979_v30, %v1023_v1  ;;  %4444 = vpow2.f32 %v1043_v0 }
 0x2e2   : > { %v1041_v3 = vmul.f32 1.442695, %v1036_v2 }
 0x2e3   : > { %v1033_v4 = vpop.permute.xlu1 %1032 }
 0x2e4   : > { %4446 = vpow2.f32 %v1041_v3  ;;  %v1038_v5 = vsub.f32 %v981_v34, %v1033_v4 }
 0x2e6   : > { %v1045_v6 = vmul.f32 1.442695, %v1038_v5 }
 0x2e8   : > { %4448 = vpow2.f32 %v1045_v6 }
 0x2e9   : > { %v4443_v7 = vpop.eup %4442  ;;  %4450 = vpow2.f32 %v1011_v14  ;;  %v1083_v23 = vpop.permute.xlu1 %1082 }
 0x2ea   : > { %v1055_v8 = vsel %vm986_vm3, %v4443_v7, 0.0  ;;  %v4445_v9 = vpop.eup %4444  ;;  %4452 = vpow2.f32 %v1009_v17  ;;  %v1100_v44 = vmul.f32 %v1083_v23, %v1076_v41 }
 0x2eb   : > { %1056 = vadd.xlane.f32.xlu1 %v1055_v8  ;;  %v1061_v11 = vsel %vm986_vm3, %v4445_v9, 0.0  ;;  %4454 = vpow2.f32 %v1013_v21 }
 0x2ee   : > { %v4447_v10 = vpop.eup %4446 }
 0x2ef   : > { %v1058_v12 = vsel %vm986_vm3, %v4447_v10, 0.0  ;;  %1062 = vadd.xlane.f32.xlu1 %v1061_v11  ;;  %v1104_v13 = vpack.c.bf16 %v4447_v10, %v4443_v7 }
 0x2f0   : > { %1059 = vadd.xlane.f32.xlu0 %v1058_v12 }
 0x2f1   : > { %4258 = vmatmul.mubr.msk.bf16.vlgmr.msra.gmra.mrb[4].mxu0 %vm986_vm3, %v1104_v13 }
 0x2f2   : > { %v4449_v15 = vpop.eup %4448 }
 0x2f3   : > { %v1105_v16 = vpack.c.bf16 %v4449_v15, %v4445_v9  ;;  %v4451_v18 = vpop.eup %4450  ;;  %v1064_v20 = vsel %vm986_vm3, %v4449_v15, 0.0 }
 0x2f4   : > { %v4453_v19 = vpop.eup %4452  ;;  %v1053_v30 = vmul.f32 %v4451_v18, %v1049_v27 }
 0x2f5   : > { %4264 = vmatmul.mubr.msk.bf16.vlgmr.msra.gmra.mrb[4].mxu1 %vm986_vm3, %v1105_v16  ;;  %v4455_v22 = vpop.eup %4454  ;;  %v1052_v32 = vmul.f32 %v4453_v19, %v1048_v29 }
 0x2f6   : > { %v1054_v38 = vmul.f32 %v4455_v22, %v1050_v37 }
 0x300   : > { %1092 = vperm.xlu1 %4433, %v4451_v18  }
 0x306   : > { %1087 = vperm.xlu0 %4432, %v4453_v19  }
 0x324   : > { %1065 = vadd.xlane.f32.xlu1 %v1064_v20 }
 0x335   : > { %1097 = vperm.xlu1 %4433, %v4455_v22  }
 0x378   : > { %v1057_v26 = vpop.xlane.xlu1 %1056 }
 0x379   : > { %v1067_v28 = vadd.f32 %v1057_v26, %v1051_v25 }
 0x37b   : > { %1072 = vst.msk [vmem:[#allocation3] sm:$0xff] %vm1071_vm5, %v1067_v28 }
 0x37c   : > { %v1063_v31 = vpop.xlane.xlu1 %1062 }
 0x37d   : > { %v1069_v33 = vadd.f32 %v1063_v31, %v1053_v30  ;;  %v1060_v34 = vpop.xlane.xlu0 %1059 }
 0x37e   : > { %v1068_v35 = vadd.f32 %v1060_v34, %v1052_v32 }
 0x37f   : > { %1074 = vst.msk [vmem:[#allocation3 + $0x10] sm:$0xff] %vm1071_vm5, %v1069_v33 }
 0x380   : > { %1073 = vst.msk [vmem:[#allocation3 + $0x8] sm:$0xff] %vm1071_vm5, %v1068_v35  ;;  %v1093_v36 = vpop.permute.xlu1 %1092 }
 0x381   : > { %v1102_v53 = vmul.f32 %v1093_v36, %v1078_v45 }
 0x385   : > { %v1088_v43 = vpop.permute.xlu0 %1087 }
 0x386   : > { %v1101_v47 = vmul.f32 %v1088_v43, %v1077_v42 }
 0x3b1   : > { %v1066_v39 = vpop.xlane.xlu1 %1065 }
 0x3b2   : > { %v1070_v40 = vadd.f32 %v1066_v39, %v1054_v38 }
 0x3b4   : > { %1075 = vst.msk [vmem:[#allocation3 + $0x18] sm:$0xff] %vm1071_vm5, %v1070_v40 }
 0x3b5   : > { %v1098_v51 = vpop.permute.xlu1 %1097 }
 0x3b6   : > { %v1103_v57 = vmul.f32 %v1098_v51, %v1079_v50 }
 0x3c4   : > { %v1149_v46 = vpop.f32.mrb[4].mxu0 }
 0x3c5   : > { %v1206_v48 = vadd.f32 %v1149_v46, %v1100_v44  ;;  %v4259_v49 = vpop.f32.mrb[5].mxu0 }
 0x3c6   : > { %v1152_v52 = vpop.f32.mrb[6].mxu0 }
 0x3c7   : > { %1210 = vst [vmem:[#allocation4] sm:$0xff] %v1206_v48  ;;  %v1207_v54 = vadd.f32 %v1152_v52, %v1101_v47  ;;  %v4260_v55 = vpop.f32.mrb[7].mxu0 }
 0x3c8   : > { %v1199_v56 = vpop.f32.mrb[4].mxu1 }
 0x3c9   : > { %1211 = vst [vmem:[#allocation4 + $0x8] sm:$0xff] %v1207_v54  ;;  %v1208_v58 = vadd.f32 %v1199_v56, %v1102_v53  ;;  %v4265_v59 = vpop.f32.mrb[5].mxu1 }
 0x3ca   : > { %v1202_v60 = vpop.f32.mrb[6].mxu1 }
 0x3cb   : > { %1212 = vst [vmem:[#allocation4 + $0x10] sm:$0xff] %v1208_v58  ;;  %v1209_v61 = vadd.f32 %v1202_v60, %v1103_v57  ;;  %v4266_v62 = vpop.f32.mrb[7].mxu1 }
 0x3cd   : > { %1213 = vst [vmem:[#allocation4 + $0x18] sm:$0xff] %v1209_v61 }
 0x3ce PF: > { %s6437_s7 = sld [smem:[#allocation21_spill]] }
 0x3d4   : > { %p3940_p9 = scmp.ne.s32.totalorder %s6437_s7, 1 }
 0x3d5   : > { %v1224_v63 = vld [vmem:[#allocation3 + $0x10] sm:$0xff] (!%p3940_p9)  ;;  %v1225_v0 = vld [vmem:[#allocation3 + $0x18] sm:$0xff] (!%p3940_p9)  ;;  %v1222_v1 = vld [vmem:[#allocation3] sm:$0xff] (!%p3940_p9)  ;;  %v4964_v2 = vmov (!%p3940_p9), 0   ;;  %s6438_s5 = sld [smem:[#allocation31_spill]] (!%p3940_p9)  ;;  %v1541_v54 = vlaneseq (!%p3940_p9)  ;;  %s6439_s28 = sld [smem:[#allocation32_spill]] (!%p3940_p9) }
 0x3d6   : > { %1221 = sbr.rel (%p3940_p9) target bundleno = 2651 (0xa5b), region = 231  ;;  %4456 = vset.pattern.permute.xlu0 (!%p3940_p9), %v4964_v2  ;;  %4698 = vrcp.f32 (!%p3940_p9), %v1224_v63  ;;  %4457 = vset.pattern.permute.xlu1 (!%p3940_p9), %v4964_v2  ;;  %v1223_v3 = vld [vmem:[#allocation3 + $0x8] sm:$0xff] (!%p3940_p9)  ;;  %v1262_v26 = vld [vmem:[#allocation4 + $0x10] sm:$0xff] (!%p3940_p9)  ;;  %v1263_v27 = vld [vmem:[#allocation4 + $0x18] sm:$0xff] (!%p3940_p9)  ;;  %s6440_s14 = sld [smem:[#allocation34_spill]] (!%p3940_p9) }
 0x3d7   : > { %4700 = vrcp.f32 (!%p3940_p9), %v1225_v0  ;;  %1405 = vmatprep.mubr.bf16.mxu0 (!%p3940_p9), %v4964_v2  ;;  %v1230_v47 = vld [vmem:[#allocation4] sm:$0xff] (!%p3940_p9)  ;;  %v1231_v48 = vld [vmem:[#allocation4 + $0x8] sm:$0xff] (!%p3940_p9)  ;;  %v5439_v55 = vshrl.u32 (!%p3940_p9), %v1541_v54, 7  ;;  %s6441_s7 = sld [smem:[#allocation36_spill]] (!%p3940_p9)  ;;  %s6442_s4 = sld [smem:[#allocation35_spill]] (!%p3940_p9) }
 0x3d8   : > { %4702 = vrcp.f32 (!%p3940_p9), %v1222_v1  ;;  %v1555_v59 = vld [vmem:[%s5302_s8] sm:$0xff] (!%p3940_p9)  ;;  %v1556_v62 = vld [vmem:[%s5302_s8 + $0x8] sm:$0xff] (!%p3940_p9) }
 0x3d9   : > { %4704 = vrcp.f32 (!%p3940_p9), %v1223_v3  ;;  %v5442_v56 = vsub.s32 (!%p3940_p9), 0, %v5439_v55  ;;  %v5448_v58 = vsub.s32 (!%p3940_p9), 1, %v5439_v55  ;;  %v1557_v63 = vunpack.c.l.bf16 (!%p3940_p9), %v1555_v59 }
 0x3da   : > { %v1558_v1 = vunpack.c.h.bf16 (!%p3940_p9), %v1555_v59 }
 0x3db   : > { %v4458_v4 = vld [vmem:[%s6438_s5 + $0x84] ss:$8 sps:$4 sm:$0xff] (!%p3940_p9)   ;;  %v4460_v5 = vld [vmem:[%s6438_s5 + $0x80] ss:$8 sps:$4 sm:$0xff] (!%p3940_p9)   ;;  %v4461_v6 = vld [vmem:[%s6438_s5 + $0x94] ss:$8 sps:$4 sm:$0xff] (!%p3940_p9)  }
 0x3dc   : > { %1373 = vmatprep.subr.bf16.mxu0 (!%p3940_p9), %v4458_v4  ;;  %v4463_v7 = vld [vmem:[%s6438_s5 + $0x90] ss:$8 sps:$4 sm:$0xff] (!%p3940_p9)   ;;  %v4464_v8 = vld [vmem:[%s6438_s5 + $0xa4] ss:$8 sps:$4 sm:$0xff] (!%p3940_p9)   ;;  %v4466_v9 = vld [vmem:[%s6438_s5 + $0xa0] ss:$8 sps:$4 sm:$0xff] (!%p3940_p9)   ;;  %v1559_v4 = vunpack.c.l.bf16 (!%p3940_p9), %v1556_v62 }
 0x3dd   : > { %1374 = vmatpush1.bf16.msra.mxu0 %v4460_v5  ;;  %v4467_v10 = vld [vmem:[%s6438_s5 + $0xb4] ss:$8 sps:$4 sm:$0xff]   ;;  %v4469_v13 = vld [vmem:[%s6438_s5 + $0xb0] ss:$8 sps:$4 sm:$0xff]   ;;  %v4470_v15 = vld [vmem:[%s6438_s5 + $0xc4] ss:$8 sps:$4 sm:$0xff]  }
 0x3de   : > { %1375 = vmatprep.subr.bf16.mxu0 %v4461_v6  ;;  %v4472_v17 = vld [vmem:[%s6438_s5 + $0xc0] ss:$8 sps:$4 sm:$0xff]   ;;  %v4473_v18 = vld [vmem:[%s6438_s5 + $0xd4] ss:$8 sps:$4 sm:$0xff]   ;;  %v4475_v19 = vld [vmem:[%s6438_s5 + $0xd0] ss:$8 sps:$4 sm:$0xff]  }
 0x3df   : > { %v4476_v20 = vld [vmem:[%s6438_s5 + $0xe4] ss:$8 sps:$4 sm:$0xff]   ;;  %v4478_v21 = vld [vmem:[%s6438_s5 + $0xe0] ss:$8 sps:$4 sm:$0xff]   ;;  %v4479_v22 = vld [vmem:[%s6438_s5 + $0xf4] ss:$8 sps:$4 sm:$0xff]  }
 0x3e0   : > { %v4699_v11 = vpop.eup %4698  ;;  %v4481_v23 = vld [vmem:[%s6438_s5 + $0xf0] ss:$8 sps:$4 sm:$0xff]   ;;  %v4484_v24 = vld [vmem:[%s6438_s5 + $0x4] ss:$8 sps:$4 sm:$0xff]   ;;  %v4482_v31 = vld [vmem:[%s6438_s5] ss:$8 sps:$4 sm:$0xff]  }
 0x3e1   : > { %1376 = vmatpush1.bf16.msra.mxu0 %v4463_v7  ;;  %v4701_v12 = vpop.eup %4700  ;;  %1266 = vperm.xlu0 %4456, %v4699_v11   ;;  %v4487_v33 = vld [vmem:[%s6438_s5 + $0x14] ss:$8 sps:$4 sm:$0xff]   ;;  %v4485_v34 = vld [vmem:[%s6438_s5 + $0x10] ss:$8 sps:$4 sm:$0xff]   ;;  %v4490_v35 = vld [vmem:[%s6438_s5 + $0x24] ss:$8 sps:$4 sm:$0xff]   ;;  %v1560_v7 = vunpack.c.h.bf16 %v1556_v62 }
 0x3e2   : > { %1377 = vmatprep.subr.bf16.mxu0 %v4464_v8  ;;  %v4703_v14 = vpop.eup %4702  ;;  %v4488_v36 = vld [vmem:[%s6438_s5 + $0x20] ss:$8 sps:$4 sm:$0xff]   ;;  %v4493_v37 = vld [vmem:[%s6438_s5 + $0x34] ss:$8 sps:$4 sm:$0xff]   ;;  %v4491_v38 = vld [vmem:[%s6438_s5 + $0x30] ss:$8 sps:$4 sm:$0xff]  }
 0x3e3   : > { %1234 = vperm.xlu1 %4457, %v4703_v14   ;;  %v4705_v16 = vpop.eup %4704  ;;  %v4496_v39 = vld [vmem:[%s6438_s5 + $0x44] ss:$8 sps:$4 sm:$0xff]   ;;  %v4494_v40 = vld [vmem:[%s6438_s5 + $0x40] ss:$8 sps:$4 sm:$0xff]   ;;  %v4499_v41 = vld [vmem:[%s6438_s5 + $0x54] ss:$8 sps:$4 sm:$0xff]  }
 0x3e4   : > { %v4497_v43 = vld [vmem:[%s6438_s5 + $0x50] ss:$8 sps:$4 sm:$0xff]   ;;  %v4502_v44 = vld [vmem:[%s6438_s5 + $0x64] ss:$8 sps:$4 sm:$0xff]   ;;  %v4500_v45 = vld [vmem:[%s6438_s5 + $0x60] ss:$8 sps:$4 sm:$0xff]  }
 0x3e5   : > { %1378 = vmatpush1.bf16.msra.mxu0 %v4466_v9  ;;  %1271 = vperm.xlu0 %4456, %v4701_v12   ;;  %v4505_v46 = vld [vmem:[%s6438_s5 + $0x74] ss:$8 sps:$4 sm:$0xff]   ;;  %v4503_v50 = vld [vmem:[%s6438_s5 + $0x70] ss:$8 sps:$4 sm:$0xff]   ;;  %v1539_v57 = vld [vmem:[%s6439_s28] sm:$0x3] }
 0x3e6   : > { %1379 = vmatprep.subr.bf16.mxu0 %v4467_v10  ;;  %v1544_v60 = vrot.slane %v1539_v57, %v5442_v56  ;;  %v1548_v61 = vrot.slane %v1539_v57, %v5448_v58  ;;  %v1672_v57 = vld [vmem:[%s6440_s14 + $0x140] sm:$0xff] }
 0x3e7   : > { %1239 = vperm.xlu1 %4457, %v4705_v16   ;;  %v1676_v59 = vld [vmem:[%s6440_s14 + $0x160] sm:$0xff] }
 0x3e9   : > { %1380 = vmatpush1.bf16.msra.mxu0 %v4469_v13 }
 0x3ea   : > { %1381 = vmatprep.subr.bf16.mxu0 %v4470_v15 }
 0x3ed   : > { %1382 = vmatpush1.bf16.msra.mxu0 %v4472_v17  ;;  %v1632_v17 = vld [vmem:[%s6440_s14] sm:$0xff] }
 0x3ee   : > { %1383 = vmatprep.subr.bf16.mxu0 %v4473_v18  ;;  %v1636_v18 = vld [vmem:[%s6440_s14 + $0x20] sm:$0xff] }
 0x3f1   : > { %1384 = vmatpush1.bf16.msra.mxu0 %v4475_v19  ;;  %v1634_v19 = vld [vmem:[%s6440_s14 + $0x10] sm:$0xff] }
 0x3f2   : > { %1385 = vmatprep.subr.bf16.mxu0 %v4476_v20  ;;  %v3973_v20 = vcombine.low %v1632_v17, %v1636_v18 }
 0x3f5   : > { %1386 = vmatpush1.bf16.msra.mxu0 %v4478_v21  ;;  %v3974_v21 = vcombine.high %v1632_v17, %v1636_v18  ;;  %v1694_v17 = vld [vmem:[%s6440_s14 + $0x1f0] sm:$0xff] }
 0x3f6   : > { %1387 = vmatprep.subr.bf16.mxu0 %v4479_v22  ;;  %v1638_v22 = vld [vmem:[%s6440_s14 + $0x30] sm:$0xff] }
 0x3f9   : > { %1388 = vmatpush1.bf16.msra.mxu0 %v4481_v23  ;;  %v1640_v23 = vld [vmem:[%s6440_s14 + $0x40] sm:$0xff] }
 0x3fa   : > { %1496 = vmatprep.subr.bf16.mxu0 %v4484_v24  ;;  %v1644_v24 = vld [vmem:[%s6440_s14 + $0x60] sm:$0xff] }
 0x460   : > { %v1267_v25 = vpop.permute.xlu0 %1266 }
 0x461   : > { %v1274_v29 = vmul.f32 %v1267_v25, %v1262_v26  ;;  %v3978_v25 = vcombine.high %v1634_v19, %v1638_v22  ;;  %v3977_v26 = vcombine.low %v1634_v19, %v1638_v22  ;;  %v1696_v22 = vld [vmem:[%s6440_s14 + $0x200] sm:$0xff] }
 0x462   : > { %v1235_v42 = vpop.permute.xlu1 %1234 }
 0x463   : > { %v1242_v51 = vmul.f32 %v1235_v42, %v1230_v47  ;;  %2528 = vmatprep.subr.bf16.mxu1 %v3978_v25  ;;  %v1662_v42 = vld [vmem:[%s6440_s14 + $0xf0] sm:$0xff]  ;;  %v1664_v47 = vld [vmem:[%s6440_s14 + $0x100] sm:$0xff] }
 0x464   : > { %v1272_v28 = vpop.permute.xlu0 %1271  ;;  %2529 = vmatpush1.bf16.msra.mxu1 %v3977_v26  ;;  %v1702_v25 = vld [vmem:[%s6440_s14 + $0x230] sm:$0xff] }
 0x465   : > { %v1275_v30 = vmul.f32 %v1272_v28, %v1263_v27  ;;  %v3982_v27 = vcombine.high %v1640_v23, %v1644_v24  ;;  %v1642_v28 = vld [vmem:[%s6440_s14 + $0x50] sm:$0xff] }
 0x466   : > { %v1240_v49 = vpop.permute.xlu1 %1239 }
 0x467   : > { %v1276_v32 = vpack.c.bf16 %v1275_v30, %v1274_v29  ;;  %v1243_v52 = vmul.f32 %v1240_v49, %v1231_v48  ;;  %v1646_v29 = vld [vmem:[%s6440_s14 + $0x70] sm:$0xff]  ;;  %v1648_v30 = vld [vmem:[%s6440_s14 + $0x80] sm:$0xff] }
 0x468   : > { %v1668_v48 = vld [vmem:[%s6440_s14 + $0x120] sm:$0xff]  ;;  %v1666_v49 = vld [vmem:[%s6440_s14 + $0x110] sm:$0xff] }
 0x469   : > { %1406 = vmatmul.mubr.bf16.vlgmr.msra.gmra.mrb[0].mxu0 %v1276_v32  ;;  %v1244_v53 = vpack.c.bf16 %v1243_v52, %v1242_v51  ;;  %v1652_v32 = vld [vmem:[%s6440_s14 + $0xa0] sm:$0xff]  ;;  %v4005_v62 = vcombine.low %v1664_v47, %v1668_v48 }
 0x46a   : > { %1497 = vmatpush1.bf16.msra.mxu0 %v4482_v31  ;;  %1528 = vmatprep.mubr.bf16.mxu0 %v4964_v2  ;;  %v3986_v31 = vcombine.high %v1642_v28, %v1646_v29 }
 0x46b   : > { %1498 = vmatprep.subr.bf16.mxu0 %v4487_v33  ;;  %v1650_v33 = vld [vmem:[%s6440_s14 + $0x90] sm:$0xff] }
 0x46c   : > { %2530 = vmatprep.subr.bf16.mxu1 %v3986_v31  ;;  %v1708_v31 = vld [vmem:[%s6440_s14 + $0x260] sm:$0xff] }
 0x46e   : > { %1499 = vmatpush1.bf16.msra.mxu0 %v4485_v34  ;;  %v1654_v34 = vld [vmem:[%s6440_s14 + $0xb0] sm:$0xff] }
 0x46f   : > { %1500 = vmatprep.subr.bf16.mxu0 %v4490_v35  ;;  %v3981_v35 = vcombine.low %v1640_v23, %v1644_v24  ;;  %v1700_v23 = vld [vmem:[%s6440_s14 + $0x220] sm:$0xff]  ;;  %v1698_v24 = vld [vmem:[%s6440_s14 + $0x210] sm:$0xff] }
 0x472   : > { %1501 = vmatpush1.bf16.msra.mxu0 %v4488_v36  ;;  %v3985_v36 = vcombine.low %v1642_v28, %v1646_v29  ;;  %v4038_v28 = vcombine.high %v1696_v22, %v1700_v23  ;;  %v4042_v29 = vcombine.high %v1698_v24, %v1702_v25 }
 0x473   : > { %1502 = vmatprep.subr.bf16.mxu0 %v4493_v37  ;;  %v3990_v37 = vcombine.high %v1648_v30, %v1652_v32 }
 0x474   : > { %2531 = vmatpush1.bf16.msra.mxu1 %v3985_v36 }
 0x476   : > { %1503 = vmatpush1.bf16.msra.mxu0 %v4491_v38  ;;  %v3994_v38 = vcombine.high %v1650_v33, %v1654_v34 }
 0x477   : > { %1504 = vmatprep.subr.bf16.mxu0 %v4496_v39  ;;  %v1656_v39 = vld [vmem:[%s6440_s14 + $0xc0] sm:$0xff] }
 0x478   : > { %2532 = vmatprep.subr.bf16.mxu1 %v3994_v38 }
 0x47a   : > { %1505 = vmatpush1.bf16.msra.mxu0 %v4494_v40  ;;  %v1660_v40 = vld [vmem:[%s6440_s14 + $0xe0] sm:$0xff] }
 0x47b   : > { %1506 = vmatprep.subr.bf16.mxu0 %v4499_v41  ;;  %v1658_v41 = vld [vmem:[%s6440_s14 + $0xd0] sm:$0xff]  ;;  %v3997_v51 = vcombine.low %v1656_v39, %v1660_v40 }
 0x47c   : > { %v4001_v52 = vcombine.low %v1658_v41, %v1662_v42 }
 0x47e   : > { %1507 = vmatpush1.bf16.msra.mxu0 %v4497_v43  ;;  %v3989_v43 = vcombine.low %v1648_v30, %v1652_v32  ;;  %v1704_v30 = vld [vmem:[%s6440_s14 + $0x240] sm:$0xff]  ;;  %v4037_v32 = vcombine.low %v1696_v22, %v1700_v23 }
 0x47f   : > { %1508 = vmatprep.subr.bf16.mxu0 %v4502_v44  ;;  %v3993_v44 = vcombine.low %v1650_v33, %v1654_v34  ;;  %v4041_v33 = vcombine.low %v1698_v24, %v1702_v25  ;;  %v4046_v34 = vcombine.high %v1704_v30, %v1708_v31  ;;  %v1744_v25 = vld [vmem:[%s6440_s14 + $0x380] sm:$0xff] }
 0x481   : > { %2533 = vmatpush1.bf16.msra.mxu1 %v3993_v44 }
 0x482   : > { %1509 = vmatpush1.bf16.msra.mxu0 %v4500_v45  ;;  %v3998_v45 = vcombine.high %v1656_v39, %v1660_v40 }
 0x483   : > { %1510 = vmatprep.subr.bf16.mxu0 %v4505_v46  ;;  %v4002_v46 = vcombine.high %v1658_v41, %v1662_v42 }
 0x485   : > { %2534 = vmatprep.subr.bf16.mxu1 %v4002_v46 }
 0x486   : > { %1511 = vmatpush1.bf16.msra.mxu0 %v4503_v50  ;;  %v1670_v50 = vld [vmem:[%s6440_s14 + $0x130] sm:$0xff]  ;;  %2535 = vmatpush1.bf16.msra.mxu1 %v4001_v52 }
 0x487   : > { %2442 = vmatprep.subr.bf16.mxu0 %v3974_v21  ;;  %v4010_v54 = vcombine.high %v1666_v49, %v1670_v50 }
 0x489   : > { %1529 = vmatmul.mubr.bf16.vlgmr.msra.gmra.mrb[0].mxu0 %v1244_v53  ;;  %v4006_v53 = vcombine.high %v1664_v47, %v1668_v48  ;;  %2536 = vmatprep.subr.bf16.mxu1 %v4010_v54  ;;  %v1718_v54 = vld [vmem:[%s6440_s14 + $0x2b0] sm:$0xff] }
 0x48a   : > { %2443 = vmatpush1.bf16.msra.mxu0 %v3973_v20 }
 0x48b   : > { %2444 = vmatprep.subr.bf16.mxu0 %v3982_v27 }
 0x48e   : > { %2445 = vmatpush1.bf16.msra.mxu0 %v3981_v35  ;;  %v4045_v35 = vcombine.low %v1704_v30, %v1708_v31 }
 0x48f   : > { %2446 = vmatprep.subr.bf16.mxu0 %v3990_v37 }
 0x492   : > { %2447 = vmatpush1.bf16.msra.mxu0 %v3989_v43 }
 0x493   : > { %2448 = vmatprep.subr.bf16.mxu0 %v3998_v45 }
 0x496   : > { %2449 = vmatpush1.bf16.msra.mxu0 %v3997_v51  ;;  %v1716_v51 = vld [vmem:[%s6440_s14 + $0x2a0] sm:$0xff] }
 0x497   : > { %2450 = vmatprep.subr.bf16.mxu0 %v4006_v53  ;;  %v1714_v53 = vld [vmem:[%s6440_s14 + $0x290] sm:$0xff] }
 0x49a   : > { %2451 = vmatpush1.bf16.msra.mxu0 %v4005_v62  ;;  %v1724_v62 = vld [vmem:[%s6440_s14 + $0x2e0] sm:$0xff] }
 0x55c   : > { %v1530_v0 = vpop.f32.mrb[0].mxu0 }
 0x55d   : > { %v1551_v2 = vadd.f32 %v1544_v60, %v1530_v0  ;;  %v1532_v3 = vpop.f32.mrb[1].mxu0  ;;  %v4014_v0 = vcombine.high %v1672_v57, %v1676_v59 }
 0x55e   : > { %v1552_v5 = vadd.f32 %v1548_v61, %v1532_v3  ;;  %v1534_v6 = vpop.f32.mrb[2].mxu0  ;;  %v1684_v3 = vld [vmem:[%s6440_s14 + $0x1a0] sm:$0xff] }
 0x55f   : > { %v5454_v8 = vadd.f32 %v1557_v63, %v1551_v2  ;;  %v1553_v9 = vadd.f32 %v1544_v60, %v1534_v6  ;;  %v1536_v10 = vpop.f32.mrb[3].mxu0  ;;  %v1674_v60 = vld [vmem:[%s6440_s14 + $0x150] sm:$0xff]  ;;  %v4009_v63 = vcombine.low %v1666_v49, %v1670_v50  ;;  %v1680_v2 = vld [vmem:[%s6440_s14 + $0x180] sm:$0xff]  ;;  %v4013_v6 = vcombine.low %v1672_v57, %v1676_v59  ;;  %2452 = vmatprep.subr.bf16.mxu0 %v4014_v0 }
 0x560   : > { %v5456_v11 = vadd.f32 %v1558_v1, %v1552_v5  ;;  %v1554_v12 = vadd.f32 %v1548_v61, %v1536_v10  ;;  %v1678_v61 = vld [vmem:[%s6440_s14 + $0x170] sm:$0xff]  ;;  %v4021_v18 = vcombine.low %v1680_v2, %v1684_v3  ;;  %v1712_v50 = vld [vmem:[%s6440_s14 + $0x280] sm:$0xff]  ;;  %v4058_v59 = vcombine.high %v1714_v53, %v1718_v54 }
 0x561   : > { %v5458_v13 = vadd.f32 %v1559_v4, %v1553_v9  ;;  %v4018_v1 = vcombine.high %v1674_v60, %v1678_v61  ;;  %v1682_v4 = vld [vmem:[%s6440_s14 + $0x190] sm:$0xff]  ;;  %2537 = vmatpush1.bf16.msra.mxu1 %v4009_v63  ;;  %v4022_v9 = vcombine.high %v1680_v2, %v1684_v3  ;;  %2453 = vmatpush1.bf16.msra.mxu0 %v4013_v6  ;;  %v1732_v6 = vld [vmem:[%s6440_s14 + $0x320] sm:$0xff] }
 0x562   : > { %v5460_v14 = vadd.f32 %v1560_v7, %v1554_v12  ;;  %v1567_v15 = vadd.f32 %v5456_v11, %v5454_v8  ;;  %v1686_v5 = vld [vmem:[%s6440_s14 + $0x1b0] sm:$0xff]  ;;  %v4017_v7 = vcombine.low %v1674_v60, %v1678_v61  ;;  %v1688_v12 = vld [vmem:[%s6440_s14 + $0x1c0] sm:$0xff]  ;;  %v4054_v52 = vcombine.high %v1712_v50, %v1716_v51 }
 0x563   : > { %2538 = vmatprep.subr.bf16.mxu1 %v4018_v1  ;;  %v4026_v10 = vcombine.high %v1682_v4, %v1686_v5  ;;  %2454 = vmatprep.subr.bf16.mxu0 %v4022_v9  ;;  %v4025_v19 = vcombine.low %v1682_v4, %v1686_v5  ;;  %v4053_v57 = vcombine.low %v1712_v50, %v1716_v51  ;;  %v1720_v61 = vld [vmem:[%s6440_s14 + $0x2c0] sm:$0xff]  ;;  %v1722_v0 = vld [vmem:[%s6440_s14 + $0x2d0] sm:$0xff] }
 0x564   : > { %1568 = vadd.xlane.f32.xlu0 %v1567_v15  ;;  %v1570_v16 = vadd.f32 %v5460_v14, %v5458_v13  ;;  %v1692_v15 = vld [vmem:[%s6440_s14 + $0x1e0] sm:$0xff]  ;;  %v4057_v60 = vcombine.low %v1714_v53, %v1718_v54  ;;  %v4062_v63 = vcombine.high %v1720_v61, %v1724_v62  ;;  %v1726_v1 = vld [vmem:[%s6440_s14 + $0x2f0] sm:$0xff]  ;;  %v4061_v2 = vcombine.low %v1720_v61, %v1724_v62 }
 0x565   : > { %2539 = vmatpush1.bf16.msra.mxu1 %v4017_v7  ;;  %v4030_v20 = vcombine.high %v1688_v12, %v1692_v15  ;;  %2455 = vmatpush1.bf16.msra.mxu0 %v4021_v18  ;;  %v4029_v26 = vcombine.low %v1688_v12, %v1692_v15  ;;  %v4066_v3 = vcombine.high %v1722_v0, %v1726_v1  ;;  %v1728_v5 = vld [vmem:[%s6440_s14 + $0x300] sm:$0xff]  ;;  %v1730_v9 = vld [vmem:[%s6440_s14 + $0x310] sm:$0xff] }
 0x566   : > { %1571 = vadd.xlane.f32.xlu1 %v1570_v16  ;;  %v1690_v16 = vld [vmem:[%s6440_s14 + $0x1d0] sm:$0xff]  ;;  %2540 = vmatprep.subr.bf16.mxu1 %v4026_v10  ;;  %v4065_v4 = vcombine.low %v1722_v0, %v1726_v1  ;;  %v4070_v7 = vcombine.high %v1728_v5, %v1732_v6  ;;  %v4069_v12 = vcombine.low %v1728_v5, %v1732_v6  ;;  %v1740_v18 = vld [vmem:[%s6440_s14 + $0x360] sm:$0xff] }
 0x567   : > { %v4034_v21 = vcombine.high %v1690_v16, %v1694_v17  ;;  %2456 = vmatprep.subr.bf16.mxu0 %v4030_v20  ;;  %v4033_v27 = vcombine.low %v1690_v16, %v1694_v17  ;;  %v1734_v10 = vld [vmem:[%s6440_s14 + $0x330] sm:$0xff]  ;;  %v1736_v17 = vld [vmem:[%s6440_s14 + $0x340] sm:$0xff] }
 0x568   : > { %v4074_v15 = vcombine.high %v1730_v9, %v1734_v10  ;;  %v4073_v16 = vcombine.low %v1730_v9, %v1734_v10  ;;  %v1738_v20 = vld [vmem:[%s6440_s14 + $0x350] sm:$0xff]  ;;  %v4077_v22 = vcombine.low %v1736_v17, %v1740_v18  ;;  %v1565_v51 = vld [vmem:[#allocation8] sm:$0x3]  ;;  %v1641_v9 = vld [vmem:[%s6440_s14 + $0x48] sm:$0xff] }
 0x569   : > { %2541 = vmatpush1.bf16.msra.mxu1 %v4025_v19  ;;  %2457 = vmatpush1.bf16.msra.mxu0 %v4029_v26  ;;  %v4078_v19 = vcombine.high %v1736_v17, %v1740_v18  ;;  %v1748_v26 = vld [vmem:[%s6440_s14 + $0x3a0] sm:$0xff] }
 0x56a   : > { %2542 = vmatprep.subr.bf16.mxu1 %v4034_v21  ;;  %2458 = vmatprep.subr.bf16.mxu0 %v4038_v28  ;;  %v1742_v21 = vld [vmem:[%s6440_s14 + $0x370] sm:$0xff]  ;;  %v4085_v30 = vcombine.low %v1744_v25, %v1748_v26  ;;  %v4506_v17 = vld [vmem:[%s6441_s7] ss:$8 sps:$4 sm:$0xff]   ;;  %v4508_v18 = vld [vmem:[%s6441_s7 + $0x4] ss:$8 sps:$4 sm:$0xff]  }
 0x56b   : > { %v4082_v23 = vcombine.high %v1738_v20, %v1742_v21  ;;  %v4081_v24 = vcombine.low %v1738_v20, %v1742_v21  ;;  %v1746_v28 = vld [vmem:[%s6440_s14 + $0x390] sm:$0xff] }
 0x56c   : > { %v4511_v20 = vld [vmem:[%s6441_s7 + $0x14] ss:$8 sps:$4 sm:$0xff]  }
 0x56d   : > { %2543 = vmatpush1.bf16.msra.mxu1 %v4033_v27  ;;  %2459 = vmatpush1.bf16.msra.mxu0 %v4037_v32  ;;  %v4086_v27 = vcombine.high %v1744_v25, %v1748_v26  ;;  %v4514_v25 = vld [vmem:[%s6441_s7 + $0x24] ss:$8 sps:$4 sm:$0xff]  }
 0x56e   : > { %2544 = vmatprep.subr.bf16.mxu1 %v4042_v29  ;;  %2460 = vmatprep.subr.bf16.mxu0 %v4046_v34  ;;  %v1750_v29 = vld [vmem:[%s6440_s14 + $0x3b0] sm:$0xff]  ;;  %v1756_v34 = vld [vmem:[%s6440_s14 + $0x3e0] sm:$0xff] }
 0x56f   : > { %v4090_v31 = vcombine.high %v1746_v28, %v1750_v29  ;;  %v4089_v32 = vcombine.low %v1746_v28, %v1750_v29  ;;  %v1665_v28 = vld [vmem:[%s6440_s14 + $0x108] sm:$0xff] }
 0x570   : > { %v1669_v29 = vld [vmem:[%s6440_s14 + $0x128] sm:$0xff] }
 0x571   : > { %2545 = vmatpush1.bf16.msra.mxu1 %v4041_v33  ;;  %2461 = vmatpush1.bf16.msra.mxu0 %v4045_v35  ;;  %v1752_v33 = vld [vmem:[%s6440_s14 + $0x3c0] sm:$0xff]  ;;  %v1754_v35 = vld [vmem:[%s6440_s14 + $0x3d0] sm:$0xff] }
 0x572   : > { %2462 = vmatprep.subr.bf16.mxu0 %v4054_v52 }
 0x575   : > { %2463 = vmatpush1.bf16.msra.mxu0 %v4053_v57  ;;  %v1566_v57 = vld [vmem:[#allocation10] sm:$0x3] }
 0x576   : > { %2464 = vmatprep.subr.bf16.mxu0 %v4062_v63  ;;  %v1623_v62 = vrot.slane %v1566_v57, %v5448_v58  ;;  %v1619_v63 = vrot.slane %v1566_v57, %v5442_v56  ;;  %v4529_v57 = vld [vmem:[%s6441_s7 + $0x74] ss:$8 sps:$4 sm:$0xff]  }
 0x579   : > { %2465 = vmatpush1.bf16.msra.mxu0 %v4061_v2 }
 0x57a   : > { %2466 = vmatprep.subr.bf16.mxu0 %v4070_v7 }
 0x57d   : > { %2467 = vmatpush1.bf16.msra.mxu0 %v4069_v12 }
 0x57e   : > { %2468 = vmatprep.subr.bf16.mxu0 %v4078_v19 }
 0x581   : > { %2469 = vmatpush1.bf16.msra.mxu0 %v4077_v22  ;;  %v1657_v22 = vld [vmem:[%s6440_s14 + $0xc8] sm:$0xff] }
 0x582   : > { %2470 = vmatprep.subr.bf16.mxu0 %v4086_v27 }
 0x585   : > { %2471 = vmatpush1.bf16.msra.mxu0 %v4085_v30  ;;  %v4512_v30 = vld [vmem:[%s6441_s7 + $0x20] ss:$8 sps:$4 sm:$0xff]  }
 0x5f1   : > { %v1569_v36 = vpop.xlane.xlu0 %1568 }
 0x5f2   : > { %v1574_v37 = vmul.f32 0.00390625, %v1569_v36  ;;  %v4093_v36 = vcombine.low %v1752_v33, %v1756_v34 }
 0x5f3   : > { %v1572_v38 = vpop.xlane.xlu1 %1571 }
 0x5f4   : > { %v5581_v39 = vsub.f32 %v5454_v8, %v1574_v37  ;;  %v5584_v40 = vsub.f32 %v5456_v11, %v1574_v37  ;;  %v1575_v41 = vmul.f32 0.00390625, %v1572_v38  ;;  %v4094_v37 = vcombine.high %v1752_v33, %v1756_v34  ;;  %v1758_v38 = vld [vmem:[%s6440_s14 + $0x3f0] sm:$0xff]  ;;  %v1673_v34 = vld [vmem:[%s6440_s14 + $0x148] sm:$0xff] }
 0x5f5   : > { %v4008_v33 = vcombine.high %v1665_v28, %v1669_v29 }
 0x5f6   : > { %v5587_v42 = vsub.f32 %v5458_v13, %v1575_v41  ;;  %v5590_v43 = vsub.f32 %v5460_v14, %v1575_v41  ;;  %v1580_v44 = vmul.f32 %v5581_v39, %v5581_v39  ;;  %v1581_v45 = vmul.f32 %v5584_v40, %v5584_v40  ;;  %v1706_v13 = vld [vmem:[%s6440_s14 + $0x250] sm:$0xff]  ;;  %2472 = vmatprep.subr.bf16.mxu0 %v4094_v37  ;;  %v4520_v37 = vld [vmem:[%s6441_s7 + $0x44] ss:$8 sps:$4 sm:$0xff]  }
 0x5f7   : > { %v1710_v14 = vld [vmem:[%s6440_s14 + $0x270] sm:$0xff]  ;;  %v4098_v41 = vcombine.high %v1754_v35, %v1758_v38  ;;  %2473 = vmatpush1.bf16.msra.mxu0 %v4093_v36 }
 0x5f8   : > { %v1584_v46 = vadd.f32 %v1581_v45, %v1580_v44  ;;  %v1582_v8 = vmul.f32 %v5587_v42, %v5587_v42  ;;  %v1583_v11 = vmul.f32 %v5590_v43, %v5590_v43  ;;  %v4050_v48 = vcombine.high %v1706_v13, %v1710_v14  ;;  %v1633_v45 = vld [vmem:[%s6440_s14 + $0x8] sm:$0xff]  ;;  %v4515_v36 = vld [vmem:[%s6441_s7 + $0x30] ss:$8 sps:$4 sm:$0xff]  }
 0x5f9   : > { %v4049_v49 = vcombine.low %v1706_v13, %v1710_v14  ;;  %v4097_v44 = vcombine.low %v1754_v35, %v1758_v38  ;;  %v1677_v35 = vld [vmem:[%s6440_s14 + $0x168] sm:$0xff]  ;;  %v4007_v38 = vcombine.low %v1665_v28, %v1669_v29  ;;  %v4539_v29 = vld [vmem:[%s6441_s7 + $0xb0] ss:$8 sps:$4 sm:$0xff]  }
 0x5fa   : > { %1585 = vadd.xlane.f32.xlu0 %v1584_v46  ;;  %v1587_v47 = vadd.f32 %v1583_v11, %v1582_v8  ;;  %2546 = vmatprep.subr.bf16.mxu1 %v4050_v48  ;;  %v1637_v46 = vld [vmem:[%s6440_s14 + $0x28] sm:$0xff] }
 0x5fb   : > { %2547 = vmatpush1.bf16.msra.mxu1 %v4049_v49  ;;  %v3976_v8 = vcombine.high %v1633_v45, %v1637_v46  ;;  %v3975_v11 = vcombine.low %v1633_v45, %v1637_v46  ;;  %v1685_v45 = vld [vmem:[%s6440_s14 + $0x1a8] sm:$0xff] }
 0x5fc   : > { %2548 = vmatprep.subr.bf16.mxu1 %v4058_v59  ;;  %v1608_v59 = vrot.slane %v1565_v51, %v5448_v58  ;;  %v4518_v46 = vld [vmem:[%s6441_s7 + $0x40] ss:$8 sps:$4 sm:$0xff]  }
 0x5fd   : > { %2485 = vmatprep.subr.bf16.mxu0 %v3976_v8  ;;  %v4523_v8 = vld [vmem:[%s6441_s7 + $0x54] ss:$8 sps:$4 sm:$0xff]   ;;  %v1741_v28 = vld [vmem:[%s6440_s14 + $0x368] sm:$0xff] }
 0x5fe   : > { %1588 = vadd.xlane.f32.xlu0 %v1587_v47 }
 0x5ff   : > { %2549 = vmatpush1.bf16.msra.mxu1 %v4057_v60  ;;  %v1604_v60 = vrot.slane %v1565_v51, %v5442_v56 }
 0x600   : > { %2550 = vmatprep.subr.bf16.mxu1 %v4066_v3 }
 0x603   : > { %2551 = vmatpush1.bf16.msra.mxu1 %v4065_v4 }
 0x604   : > { %2552 = vmatprep.subr.bf16.mxu1 %v4074_v15  ;;  %v1649_v15 = vld [vmem:[%s6440_s14 + $0x88] sm:$0xff] }
 0x607   : > { %2553 = vmatpush1.bf16.msra.mxu1 %v4073_v16  ;;  %v1653_v16 = vld [vmem:[%s6440_s14 + $0xa8] sm:$0xff] }
 0x608   : > { %2554 = vmatprep.subr.bf16.mxu1 %v4082_v23  ;;  %v3992_v21 = vcombine.high %v1649_v15, %v1653_v16  ;;  %v1661_v23 = vld [vmem:[%s6440_s14 + $0xe8] sm:$0xff]  ;;  %v3991_v26 = vcombine.low %v1649_v15, %v1653_v16 }
 0x609   : > { %v4000_v27 = vcombine.high %v1657_v22, %v1661_v23  ;;  %v1721_v15 = vld [vmem:[%s6440_s14 + $0x2c8] sm:$0xff] }
 0x60a   : > { %v1725_v16 = vld [vmem:[%s6440_s14 + $0x2e8] sm:$0xff] }
 0x60b   : > { %2555 = vmatpush1.bf16.msra.mxu1 %v4081_v24  ;;  %v4509_v24 = vld [vmem:[%s6441_s7 + $0x10] ss:$8 sps:$4 sm:$0xff]  }
 0x60c   : > { %2556 = vmatprep.subr.bf16.mxu1 %v4090_v31  ;;  %v4517_v31 = vld [vmem:[%s6441_s7 + $0x34] ss:$8 sps:$4 sm:$0xff]  }
 0x60f   : > { %2557 = vmatpush1.bf16.msra.mxu1 %v4089_v32  ;;  %v3999_v32 = vcombine.low %v1657_v22, %v1661_v23  ;;  %v1733_v22 = vld [vmem:[%s6440_s14 + $0x328] sm:$0xff] }
 0x610   : > { %2558 = vmatprep.subr.bf16.mxu1 %v4098_v41  ;;  %v4016_v41 = vcombine.high %v1673_v34, %v1677_v35  ;;  %v4536_v23 = vld [vmem:[%s6441_s7 + $0xa0] ss:$8 sps:$4 sm:$0xff]  }
 0x613   : > { %2559 = vmatpush1.bf16.msra.mxu1 %v4097_v44  ;;  %v1681_v44 = vld [vmem:[%s6440_s14 + $0x188] sm:$0xff] }
 0x614   : > { %3418 = vmatprep.subr.bf16.mxu1 %v4508_v18  ;;  %v4538_v18 = vld [vmem:[%s6441_s7 + $0xa4] ss:$8 sps:$4 sm:$0xff]  }
 0x687   : > { %v1586_v47 = vpop.xlane.xlu0 %1585 }
 0x688   : > { %v1590_v13 = vmul.f32 0.00390625, %v1586_v47  ;;  %v4024_v47 = vcombine.high %v1681_v44, %v1685_v45 }
 0x68a   : > { %v1592_v14 = vadd.f32 1e-05, %v1590_v13  ;;  %v1689_v13 = vld [vmem:[%s6440_s14 + $0x1c8] sm:$0xff] }
 0x68b   : > { %v1589_v48 = vpop.xlane.xlu0 %1588 }
 0x68c   : > { %4706 = vrsqrt.f32 %v1592_v14  ;;  %v1591_v49 = vmul.f32 0.00390625, %v1589_v48  ;;  %v1693_v14 = vld [vmem:[%s6440_s14 + $0x1e8] sm:$0xff]  ;;  %v4521_v48 = vld [vmem:[%s6441_s7 + $0x50] ss:$8 sps:$4 sm:$0xff]  }
 0x68d   : > { %v4032_v51 = vcombine.high %v1689_v13, %v1693_v14 }
 0x68e   : > { %v1593_v50 = vadd.f32 1e-05, %v1591_v49  ;;  %v4526_v49 = vld [vmem:[%s6441_s7 + $0x64] ss:$8 sps:$4 sm:$0xff]  }
 0x690   : > { %4708 = vrsqrt.f32 %v1593_v50  ;;  %v4023_v50 = vcombine.low %v1681_v44, %v1685_v45  ;;  %v1757_v44 = vld [vmem:[%s6440_s14 + $0x3e8] sm:$0xff]  ;;  %v4545_v45 = vld [vmem:[%s6441_s7 + $0xd0] ss:$8 sps:$4 sm:$0xff]  }
 0x696   : > { %v4707_v52 = vpop.eup %4706 }
 0x697   : > { %v1596_v53 = vmul.f32 %v4707_v52, %v5581_v39  ;;  %v1597_v54 = vmul.f32 %v4707_v52, %v5584_v40  ;;  %v1697_v52 = vld [vmem:[%s6440_s14 + $0x208] sm:$0xff] }
 0x699   : > { %v1612_v2 = vmul.f32 %v1608_v59, %v1597_v54  ;;  %v1611_v3 = vmul.f32 %v1604_v60, %v1596_v53  ;;  %v1701_v53 = vld [vmem:[%s6440_s14 + $0x228] sm:$0xff] }
 0x69a   : > { %v4709_v61 = vpop.eup %4708  ;;  %v4524_v54 = vld [vmem:[%s6441_s7 + $0x60] ss:$8 sps:$4 sm:$0xff]  }
 0x69b   : > { %v1598_v0 = vmul.f32 %v4709_v61, %v5587_v42  ;;  %v1599_v1 = vmul.f32 %v4709_v61, %v5590_v43  ;;  %v5692_v5 = vadd.f32 %v1623_v62, %v1612_v2  ;;  %v5696_v6 = vadd.f32 %v1619_v63, %v1611_v3  ;;  %v1645_v42 = vld [vmem:[%s6440_s14 + $0x68] sm:$0xff] }
 0x69c   : > { %v3984_v12 = vcombine.high %v1641_v9, %v1645_v42  ;;  %v3983_v19 = vcombine.low %v1641_v9, %v1645_v42  ;;  %v1705_v61 = vld [vmem:[%s6440_s14 + $0x248] sm:$0xff]  ;;  %v4535_v9 = vld [vmem:[%s6441_s7 + $0x94] ss:$8 sps:$4 sm:$0xff]  }
 0x69d   : > { %v1614_v4 = vmul.f32 %v1608_v59, %v1599_v1  ;;  %v1613_v39 = vmul.f32 %v1604_v60, %v1598_v0  ;;  %v4031_v59 = vcombine.low %v1689_v13, %v1693_v14  ;;  %v4040_v60 = vcombine.high %v1697_v52, %v1701_v53  ;;  %v4532_v0 = vld [vmem:[%s6441_s7 + $0x84] ss:$8 sps:$4 sm:$0xff]  }
 0x69e   : > { %v4039_v1 = vcombine.low %v1697_v52, %v1701_v53  ;;  %v1713_v3 = vld [vmem:[%s6440_s14 + $0x288] sm:$0xff]  ;;  %v1651_v52 = vld [vmem:[%s6440_s14 + $0x98] sm:$0xff] }
 0x69f   : > { %v5694_v40 = vadd.f32 %v1623_v62, %v1614_v4  ;;  %v5698_v7 = vadd.f32 %v1619_v63, %v1613_v39  ;;  %v1709_v62 = vld [vmem:[%s6440_s14 + $0x268] sm:$0xff]  ;;  %v4527_v63 = vld [vmem:[%s6441_s7 + $0x70] ss:$8 sps:$4 sm:$0xff]  }
 0x6a0   : > { %v4048_v2 = vcombine.high %v1705_v61, %v1709_v62  ;;  %v1717_v4 = vld [vmem:[%s6440_s14 + $0x2a8] sm:$0xff]  ;;  %v4047_v42 = vcombine.low %v1705_v61, %v1709_v62  ;;  %v1655_v53 = vld [vmem:[%s6440_s14 + $0xb8] sm:$0xff] }
 0x6a1   : > { %v5708_v43 = vpack.c.bf16 %v5694_v40, %v5692_v5  ;;  %v5712_v10 = vpack.c.bf16 %v5698_v7, %v5696_v6  ;;  %v4530_v39 = vld [vmem:[%s6441_s7 + $0x80] ss:$8 sps:$4 sm:$0xff]   ;;  %v3995_v61 = vcombine.low %v1651_v52, %v1655_v53 }
 0x6a3   : > { %2474 = vmatprep.mubr.bf16.mxu0 %v5708_v43  ;;  %2560 = vmatprep.mubr.bf16.mxu1 %v5708_v43 }
 0x6a4   : > { %2475 = vmatmul.mubr.bf16.vlgmr.msra.gmra.mrb[4].mxu0 %v5712_v10  ;;  %2561 = vmatmul.mubr.bf16.vlgmr.msra.gmra.mrb[0].mxu1 %v5712_v10 }
 0x6a5   : > { %2486 = vmatpush1.bf16.msra.mxu0 %v3975_v11  ;;  %2517 = vmatprep.mubr.bf16.mxu0 %v5708_v43  ;;  %v4015_v11 = vcombine.low %v1673_v34, %v1677_v35  ;;  %v1749_v34 = vld [vmem:[%s6440_s14 + $0x3a8] sm:$0xff] }
 0x6a6   : > { %2487 = vmatprep.subr.bf16.mxu0 %v3984_v12  ;;  %3419 = vmatpush1.bf16.msra.mxu1 %v4506_v17  ;;  %v4056_v12 = vcombine.high %v1713_v3, %v1717_v4  ;;  %v4533_v17 = vld [vmem:[%s6441_s7 + $0x90] ss:$8 sps:$4 sm:$0xff]   ;;  %v4542_v35 = vld [vmem:[%s6441_s7 + $0xc0] ss:$8 sps:$4 sm:$0xff]  }
 0x6a7   : > { %3420 = vmatprep.subr.bf16.mxu1 %v4511_v20  ;;  %v4064_v20 = vcombine.high %v1721_v15, %v1725_v16 }
 0x6a9   : > { %2488 = vmatpush1.bf16.msra.mxu0 %v3983_v19  ;;  %v4055_v19 = vcombine.low %v1713_v3, %v1717_v4  ;;  %v1679_v3 = vld [vmem:[%s6440_s14 + $0x178] sm:$0xff] }
 0x6aa   : > { %2489 = vmatprep.subr.bf16.mxu0 %v3992_v21  ;;  %3421 = vmatpush1.bf16.msra.mxu1 %v4509_v24  ;;  %v1729_v21 = vld [vmem:[%s6440_s14 + $0x308] sm:$0xff]  ;;  %v4541_v24 = vld [vmem:[%s6441_s7 + $0xb4] ss:$8 sps:$4 sm:$0xff]  }
 0x6ab   : > { %3422 = vmatprep.subr.bf16.mxu1 %v4514_v25  ;;  %v4063_v25 = vcombine.low %v1721_v15, %v1725_v16  ;;  %v1691_v16 = vld [vmem:[%s6440_s14 + $0x1d8] sm:$0xff] }
 0x6ad   : > { %2490 = vmatpush1.bf16.msra.mxu0 %v3991_v26  ;;  %v4072_v26 = vcombine.high %v1729_v21, %v1733_v22 }
 0x6ae   : > { %2491 = vmatprep.subr.bf16.mxu0 %v4000_v27  ;;  %3423 = vmatpush1.bf16.msra.mxu1 %v4512_v30  ;;  %v1737_v27 = vld [vmem:[%s6440_s14 + $0x348] sm:$0xff] }
 0x6af   : > { %3424 = vmatprep.subr.bf16.mxu1 %v4517_v31  ;;  %v4544_v30 = vld [vmem:[%s6441_s7 + $0xc4] ss:$8 sps:$4 sm:$0xff]   ;;  %v4071_v31 = vcombine.low %v1729_v21, %v1733_v22  ;;  %v1699_v22 = vld [vmem:[%s6440_s14 + $0x218] sm:$0xff] }
 0x6b1   : > { %2492 = vmatpush1.bf16.msra.mxu0 %v3999_v32  ;;  %v4080_v32 = vcombine.high %v1737_v27, %v1741_v28 }
 0x6b2   : > { %2493 = vmatprep.subr.bf16.mxu0 %v4008_v33  ;;  %3425 = vmatpush1.bf16.msra.mxu1 %v4515_v36  ;;  %v1745_v33 = vld [vmem:[%s6440_s14 + $0x388] sm:$0xff]  ;;  %v4547_v36 = vld [vmem:[%s6441_s7 + $0xd4] ss:$8 sps:$4 sm:$0xff]  }
 0x6b3   : > { %3426 = vmatprep.subr.bf16.mxu1 %v4520_v37  ;;  %v4079_v37 = vcombine.low %v1737_v27, %v1741_v28  ;;  %v1707_v28 = vld [vmem:[%s6440_s14 + $0x258] sm:$0xff] }
 0x6b5   : > { %2494 = vmatpush1.bf16.msra.mxu0 %v4007_v38  ;;  %v4088_v38 = vcombine.high %v1745_v33, %v1749_v34 }
 0x6b6   : > { %2495 = vmatprep.subr.bf16.mxu0 %v4016_v41  ;;  %3427 = vmatpush1.bf16.msra.mxu1 %v4518_v46  ;;  %v1753_v41 = vld [vmem:[%s6440_s14 + $0x3c8] sm:$0xff]  ;;  %v4087_v46 = vcombine.low %v1745_v33, %v1749_v34  ;;  %v1715_v33 = vld [vmem:[%s6440_s14 + $0x298] sm:$0xff] }
 0x6b7   : > { %3428 = vmatprep.subr.bf16.mxu1 %v4523_v8  ;;  %v4096_v8 = vcombine.high %v1753_v41, %v1757_v44  ;;  %v4095_v13 = vcombine.low %v1753_v41, %v1757_v44  ;;  %v1719_v34 = vld [vmem:[%s6440_s14 + $0x2b8] sm:$0xff] }
 0x6b8   : > { %v4059_v41 = vcombine.low %v1715_v33, %v1719_v34 }
 0x6b9   : > { %2496 = vmatpush1.bf16.msra.mxu0 %v4015_v11  ;;  %v1635_v11 = vld [vmem:[%s6440_s14 + $0x18] sm:$0xff] }
 0x6ba   : > { %2497 = vmatprep.subr.bf16.mxu0 %v4024_v47  ;;  %3429 = vmatpush1.bf16.msra.mxu1 %v4521_v48  ;;  %v1639_v47 = vld [vmem:[%s6440_s14 + $0x38] sm:$0xff] }
 0x6bb   : > { %3430 = vmatprep.subr.bf16.mxu1 %v4526_v49  ;;  %v3980_v14 = vcombine.high %v1635_v11, %v1639_v47  ;;  %v1643_v48 = vld [vmem:[%s6440_s14 + $0x58] sm:$0xff] }
 0x6bc   : > { %v1647_v49 = vld [vmem:[%s6440_s14 + $0x78] sm:$0xff] }
 0x6bd   : > { %2498 = vmatpush1.bf16.msra.mxu0 %v4023_v50  ;;  %v3979_v50 = vcombine.low %v1635_v11, %v1639_v47  ;;  %v1739_v47 = vld [vmem:[%s6440_s14 + $0x358] sm:$0xff] }
 0x6be   : > { %2499 = vmatprep.subr.bf16.mxu0 %v4032_v51  ;;  %3431 = vmatpush1.bf16.msra.mxu1 %v4524_v54  ;;  %v3988_v51 = vcombine.high %v1643_v48, %v1647_v49  ;;  %v3987_v54 = vcombine.low %v1643_v48, %v1647_v49  ;;  %v1747_v49 = vld [vmem:[%s6440_s14 + $0x398] sm:$0xff] }
 0x6bf   : > { %3432 = vmatprep.subr.bf16.mxu1 %v4529_v57  ;;  %v3996_v57 = vcombine.high %v1651_v52, %v1655_v53  ;;  %v1755_v53 = vld [vmem:[%s6440_s14 + $0x3d8] sm:$0xff] }
 0x6c1   : > { %2500 = vmatpush1.bf16.msra.mxu0 %v4031_v59  ;;  %v1659_v59 = vld [vmem:[%s6440_s14 + $0xd8] sm:$0xff] }
 0x6c2   : > { %2501 = vmatprep.subr.bf16.mxu0 %v4040_v60  ;;  %3433 = vmatpush1.bf16.msra.mxu1 %v4527_v63  ;;  %v1663_v60 = vld [vmem:[%s6440_s14 + $0xf8] sm:$0xff] }
 0x6c3   : > { %3434 = vmatprep.subr.bf16.mxu1 %v4532_v0  ;;  %v4004_v62 = vcombine.high %v1659_v59, %v1663_v60  ;;  %v1667_v63 = vld [vmem:[%s6440_s14 + $0x118] sm:$0xff]  ;;  %v4003_v0 = vcombine.low %v1659_v59, %v1663_v60 }
 0x6c5   : > { %2502 = vmatpush1.bf16.msra.mxu0 %v4039_v1 }
 0x6c6   : > { %2503 = vmatprep.subr.bf16.mxu0 %v4048_v2  ;;  %3435 = vmatpush1.bf16.msra.mxu1 %v4530_v39  ;;  %v1675_v2 = vld [vmem:[%s6440_s14 + $0x158] sm:$0xff] }
 0x6c7   : > { %3436 = vmatprep.subr.bf16.mxu1 %v4535_v9  ;;  %v4020_v39 = vcombine.high %v1675_v2, %v1679_v3  ;;  %v1683_v9 = vld [vmem:[%s6440_s14 + $0x198] sm:$0xff] }
 0x6c9   : > { %2504 = vmatpush1.bf16.msra.mxu0 %v4047_v42  ;;  %v1687_v42 = vld [vmem:[%s6440_s14 + $0x1b8] sm:$0xff] }
 0x6ca   : > { %2505 = vmatprep.subr.bf16.mxu0 %v4056_v12  ;;  %3437 = vmatpush1.bf16.msra.mxu1 %v4533_v17  ;;  %v4019_v12 = vcombine.low %v1675_v2, %v1679_v3  ;;  %v4028_v15 = vcombine.high %v1683_v9, %v1687_v42  ;;  %v1695_v17 = vld [vmem:[%s6440_s14 + $0x1f8] sm:$0xff] }
 0x6cb   : > { %3438 = vmatprep.subr.bf16.mxu1 %v4538_v18  ;;  %v4550_v18 = vld [vmem:[%s6441_s7 + $0xe4] ss:$8 sps:$4 sm:$0xff]   ;;  %v4036_v21 = vcombine.high %v1691_v16, %v1695_v17 }
 0x6cd   : > { %2506 = vmatpush1.bf16.msra.mxu0 %v4055_v19  ;;  %v4027_v19 = vcombine.low %v1683_v9, %v1687_v42 }
 0x6ce   : > { %2507 = vmatprep.subr.bf16.mxu0 %v4064_v20  ;;  %3439 = vmatpush1.bf16.msra.mxu1 %v4536_v23  ;;  %v4548_v20 = vld [vmem:[%s6441_s7 + $0xe0] ss:$8 sps:$4 sm:$0xff]   ;;  %v1703_v23 = vld [vmem:[%s6440_s14 + $0x238] sm:$0xff] }
 0x6cf   : > { %3440 = vmatprep.subr.bf16.mxu1 %v4541_v24  ;;  %v4553_v24 = vld [vmem:[%s6441_s7 + $0xf4] ss:$8 sps:$4 sm:$0xff]   ;;  %v4044_v27 = vcombine.high %v1699_v22, %v1703_v23 }
 0x6d1   : > { %2508 = vmatpush1.bf16.msra.mxu0 %v4063_v25  ;;  %v4035_v25 = vcombine.low %v1691_v16, %v1695_v17 }
 0x6d2   : > { %2509 = vmatprep.subr.bf16.mxu0 %v4072_v26  ;;  %3441 = vmatpush1.bf16.msra.mxu1 %v4539_v29  ;;  %v4551_v26 = vld [vmem:[%s6441_s7 + $0xf0] ss:$8 sps:$4 sm:$0xff]  }
 0x6d3   : > { %3442 = vmatprep.subr.bf16.mxu1 %v4544_v30  ;;  %v1711_v29 = vld [vmem:[%s6440_s14 + $0x278] sm:$0xff]  ;;  %v4556_v30 = vld [vmem:[%s6441_s7 + $0x104] ss:$8 sps:$4 sm:$0xff]  }
 0x6d5   : > { %2510 = vmatpush1.bf16.msra.mxu0 %v4071_v31  ;;  %v4043_v31 = vcombine.low %v1699_v22, %v1703_v23 }
 0x6d6   : > { %2511 = vmatprep.subr.bf16.mxu0 %v4080_v32  ;;  %3443 = vmatpush1.bf16.msra.mxu1 %v4542_v35  ;;  %v4052_v32 = vcombine.high %v1707_v28, %v1711_v29  ;;  %v4051_v35 = vcombine.low %v1707_v28, %v1711_v29 }
 0x6d7   : > { %3444 = vmatprep.subr.bf16.mxu1 %v4547_v36  ;;  %v4060_v36 = vcombine.high %v1715_v33, %v1719_v34 }
 0x6d9   : > { %2512 = vmatpush1.bf16.msra.mxu0 %v4079_v37  ;;  %v1723_v37 = vld [vmem:[%s6440_s14 + $0x2d8] sm:$0xff] }
 0x6da   : > { %2513 = vmatprep.subr.bf16.mxu0 %v4088_v38  ;;  %3445 = vmatpush1.bf16.msra.mxu1 %v4545_v45  ;;  %v1727_v38 = vld [vmem:[%s6440_s14 + $0x2f8] sm:$0xff] }
 0x6db   : > { %3446 = vmatprep.subr.bf16.mxu1 %v4550_v18  ;;  %v4068_v44 = vcombine.high %v1723_v37, %v1727_v38  ;;  %v1731_v45 = vld [vmem:[%s6440_s14 + $0x318] sm:$0xff] }
 0x6dd   : > { %2514 = vmatpush1.bf16.msra.mxu0 %v4087_v46  ;;  %v1735_v46 = vld [vmem:[%s6440_s14 + $0x338] sm:$0xff] }
 0x6de   : > { %2515 = vmatprep.subr.bf16.mxu0 %v4096_v8  ;;  %3447 = vmatpush1.bf16.msra.mxu1 %v4548_v20  ;;  %v4067_v8 = vcombine.low %v1723_v37, %v1727_v38  ;;  %v4076_v11 = vcombine.high %v1731_v45, %v1735_v46  ;;  %v4559_v37 = vld [vmem:[%s6441_s7 + $0x114] ss:$8 sps:$4 sm:$0xff]   ;;  %v4557_v38 = vld [vmem:[%s6441_s7 + $0x110] ss:$8 sps:$4 sm:$0xff]  }
 0x6df   : > { %3448 = vmatprep.subr.bf16.mxu1 %v4553_v24 }
 0x6e1   : > { %2516 = vmatpush1.bf16.msra.mxu0 %v4095_v13  ;;  %v1743_v13 = vld [vmem:[%s6440_s14 + $0x378] sm:$0xff] }
 0x6e2   : > { %2571 = vmatprep.subr.bf16.mxu0 %v3980_v14  ;;  %3449 = vmatpush1.bf16.msra.mxu1 %v4551_v26  ;;  %v4075_v14 = vcombine.low %v1731_v45, %v1735_v46  ;;  %v4084_v48 = vcombine.high %v1739_v47, %v1743_v13  ;;  %v4565_v45 = vld [vmem:[%s6441_s7 + $0x134] ss:$8 sps:$4 sm:$0xff]   ;;  %v4563_v46 = vld [vmem:[%s6441_s7 + $0x130] ss:$8 sps:$4 sm:$0xff]  }
 0x6e3   : > { %3461 = vmatprep.subr.bf16.mxu1 %v4556_v30 }
 0x6e4   : > { %2518 = vmatmul.mubr.bf16.vlgmr.msra.gmra.mrb[8].mxu0 %v5712_v10 }
 0x6e5   : > { %2572 = vmatpush1.bf16.msra.mxu0 %v3979_v50  ;;  %2603 = vmatprep.mubr.bf16.mxu0 %v5708_v43  ;;  %v1671_v43 = vld [vmem:[%s6440_s14 + $0x138] sm:$0xff] }
 0x6e6   : > { %2573 = vmatprep.subr.bf16.mxu0 %v3988_v51  ;;  %v4012_v1 = vcombine.high %v1667_v63, %v1671_v43  ;;  %v4011_v4 = vcombine.low %v1667_v63, %v1671_v43  ;;  %v1751_v50 = vld [vmem:[%s6440_s14 + $0x3b8] sm:$0xff]  ;;  %v4083_v51 = vcombine.low %v1739_v47, %v1743_v13  ;;  %v1784_v63 = vsub.s32 5, %v5439_v55 }
 0x6e7   : > { %v4092_v52 = vcombine.high %v1747_v49, %v1751_v50  ;;  %v4571_v47 = vld [vmem:[%s6441_s7 + $0x154] ss:$8 sps:$4 sm:$0xff]   ;;  %v4569_v13 = vld [vmem:[%s6441_s7 + $0x150] ss:$8 sps:$4 sm:$0xff]  }
 0x6e9   : > { %2574 = vmatpush1.bf16.msra.mxu0 %v3987_v54  ;;  %v1759_v54 = vld [vmem:[%s6440_s14 + $0x3f8] sm:$0xff] }
 0x6ea   : > { %2575 = vmatprep.subr.bf16.mxu0 %v3996_v57  ;;  %v4091_v57 = vcombine.low %v1747_v49, %v1751_v50  ;;  %v4100_v59 = vcombine.high %v1755_v53, %v1759_v54  ;;  %v4099_v60 = vcombine.low %v1755_v53, %v1759_v54  ;;  %v4577_v49 = vld [vmem:[%s6441_s7 + $0x174] ss:$8 sps:$4 sm:$0xff]   ;;  %v4575_v50 = vld [vmem:[%s6441_s7 + $0x170] ss:$8 sps:$4 sm:$0xff]  }
 0x6eb   : > { %v4583_v53 = vld [vmem:[%s6441_s7 + $0x194] ss:$8 sps:$4 sm:$0xff]   ;;  %v4581_v54 = vld [vmem:[%s6441_s7 + $0x190] ss:$8 sps:$4 sm:$0xff]  }
 0x6ed   : > { %2576 = vmatpush1.bf16.msra.mxu0 %v3995_v61  ;;  %v1780_v61 = vsub.s32 4, %v5439_v55 }
 0x6ee   : > { %2577 = vmatprep.subr.bf16.mxu0 %v4004_v62  ;;  %v6005_v62 = vld [vmem:[%s6442_s4] sm:$0xff] }
 0x6ef   : > { %v1765_v43 = vrot.slane %v6005_v62, %v5442_v56  ;;  %v1785_v2 = vrot.slane %v6005_v62, %v1784_v63  ;;  %v4592_v63 = vld [vmem:[%s6441_s7 + $0x1c4] ss:$8 sps:$4 sm:$0xff]  }
 0x6f1   : > { %2578 = vmatpush1.bf16.msra.mxu0 %v4003_v0  ;;  %v1781_v0 = vrot.slane %v6005_v62, %v1780_v61  ;;  %v4587_v61 = vld [vmem:[%s6441_s7 + $0x1b0] ss:$8 sps:$4 sm:$0xff]  }
 0x6f2   : > { %2579 = vmatprep.subr.bf16.mxu0 %v4012_v1  ;;  %v1769_v1 = vrot.slane %v6005_v62, %v5448_v58 }
 0x6f5   : > { %2580 = vmatpush1.bf16.msra.mxu0 %v4011_v4 }
 0x6f6   : > { %2581 = vmatprep.subr.bf16.mxu0 %v4020_v39 }
 0x6f9   : > { %2582 = vmatpush1.bf16.msra.mxu0 %v4019_v12 }
 0x6fa   : > { %2583 = vmatprep.subr.bf16.mxu0 %v4028_v15 }
 0x6fd   : > { %2584 = vmatpush1.bf16.msra.mxu0 %v4027_v19 }
 0x6fe   : > { %2585 = vmatprep.subr.bf16.mxu0 %v4036_v21 }
 0x701   : > { %2586 = vmatpush1.bf16.msra.mxu0 %v4035_v25 }
 0x702   : > { %2587 = vmatprep.subr.bf16.mxu0 %v4044_v27 }
 0x705   : > { %2588 = vmatpush1.bf16.msra.mxu0 %v4043_v31 }
 0x706   : > { %2589 = vmatprep.subr.bf16.mxu0 %v4052_v32 }
 0x709   : > { %2590 = vmatpush1.bf16.msra.mxu0 %v4051_v35 }
 0x70a   : > { %2591 = vmatprep.subr.bf16.mxu0 %v4060_v36  ;;  %v4554_v36 = vld [vmem:[%s6441_s7 + $0x100] ss:$8 sps:$4 sm:$0xff]  }
 0x70d   : > { %2592 = vmatpush1.bf16.msra.mxu0 %v4059_v41  ;;  %v4562_v41 = vld [vmem:[%s6441_s7 + $0x124] ss:$8 sps:$4 sm:$0xff]  }
 0x70e   : > { %2593 = vmatprep.subr.bf16.mxu0 %v4068_v44  ;;  %v4560_v44 = vld [vmem:[%s6441_s7 + $0x120] ss:$8 sps:$4 sm:$0xff]  }
 0x711   : > { %2594 = vmatpush1.bf16.msra.mxu0 %v4067_v8  ;;  %v4568_v8 = vld [vmem:[%s6441_s7 + $0x144] ss:$8 sps:$4 sm:$0xff]  }
 0x712   : > { %2595 = vmatprep.subr.bf16.mxu0 %v4076_v11  ;;  %v4566_v11 = vld [vmem:[%s6441_s7 + $0x140] ss:$8 sps:$4 sm:$0xff]  }
 0x715   : > { %2596 = vmatpush1.bf16.msra.mxu0 %v4075_v14  ;;  %v4574_v14 = vld [vmem:[%s6441_s7 + $0x164] ss:$8 sps:$4 sm:$0xff]  }
 0x716   : > { %2597 = vmatprep.subr.bf16.mxu0 %v4084_v48  ;;  %v4572_v48 = vld [vmem:[%s6441_s7 + $0x160] ss:$8 sps:$4 sm:$0xff]  }
 0x719   : > { %2598 = vmatpush1.bf16.msra.mxu0 %v4083_v51  ;;  %v4580_v51 = vld [vmem:[%s6441_s7 + $0x184] ss:$8 sps:$4 sm:$0xff]  }
 0x71a   : > { %2599 = vmatprep.subr.bf16.mxu0 %v4092_v52  ;;  %v4578_v52 = vld [vmem:[%s6441_s7 + $0x180] ss:$8 sps:$4 sm:$0xff]  }
 0x71d   : > { %2600 = vmatpush1.bf16.msra.mxu0 %v4091_v57  ;;  %v4586_v57 = vld [vmem:[%s6441_s7 + $0x1a4] ss:$8 sps:$4 sm:$0xff]  }
 0x71e   : > { %2601 = vmatprep.subr.bf16.mxu0 %v4100_v59  ;;  %v4584_v59 = vld [vmem:[%s6441_s7 + $0x1a0] ss:$8 sps:$4 sm:$0xff]  }
 0x721   : > { %2602 = vmatpush1.bf16.msra.mxu0 %v4099_v60  ;;  %v4589_v60 = vld [vmem:[%s6441_s7 + $0x1b4] ss:$8 sps:$4 sm:$0xff]  }
 0x724   : > { %2604 = vmatmul.mubr.bf16.vlgmr.msra.gmra.mrb[12].mxu0 %v5712_v10 }
 0x777   : > { %v2476_v10 = vpop.f32.mrb[4].mxu0  ;;  %v2562_v3 = vpop.f32.mrb[0].mxu1 }
 0x778   : > { %v2477_v4 = vadd.f32 %v2476_v10, %v1765_v43  ;;  %v2563_v39 = vadd.f32 %v2562_v3, %v1781_v0  ;;  %v2478_v9 = vpop.f32.mrb[5].mxu0  ;;  %v2564_v42 = vpop.f32.mrb[1].mxu1  ;;  %v4593_v10 = vld [vmem:[%s6441_s7 + $0x1d0] ss:$8 sps:$4 sm:$0xff]  }
 0x779   : > { %v2479_v12 = vadd.f32 %v2478_v9, %v1769_v1  ;;  %v2565_v15 = vadd.f32 %v2564_v42, %v1785_v2  ;;  %v2480_v16 = vpop.f32.mrb[6].mxu0  ;;  %v2566_v17 = vpop.f32.mrb[2].mxu1  ;;  %v4596_v42 = vld [vmem:[%s6441_s7 + $0x1e0] ss:$8 sps:$4 sm:$0xff]  }
 0x77a   : > { %v2481_v18 = vadd.f32 %v2480_v16, %v1765_v43  ;;  %v2567_v19 = vadd.f32 %v2566_v17, %v1781_v0  ;;  %v2482_v20 = vpop.f32.mrb[7].mxu0  ;;  %v2568_v21 = vpop.f32.mrb[3].mxu1  ;;  %v2614_v24 = vmax.f32 %v2477_v4, 0.0  ;;  %v2618_v25 = vmax.f32 %v2563_v39, 0.0  ;;  %v4590_v43 = vld [vmem:[%s6441_s7 + $0x1c0] ss:$8 sps:$4 sm:$0xff]  }
 0x77b   : > { %v2483_v22 = vadd.f32 %v2482_v20, %v1769_v1  ;;  %v2569_v23 = vadd.f32 %v2568_v21, %v1785_v2  ;;  %v2615_v28 = vmax.f32 %v2479_v12, 0.0  ;;  %v2619_v29 = vmax.f32 %v2565_v15, 0.0  ;;  %v4595_v0 = vld [vmem:[%s6441_s7 + $0x1d4] ss:$8 sps:$4 sm:$0xff]   ;;  %v4598_v4 = vld [vmem:[%s6441_s7 + $0x1e4] ss:$8 sps:$4 sm:$0xff]  }
 0x77c   : > { %v2622_v26 = vmax.f32 %v2481_v18, 0.0  ;;  %v2626_v27 = vmax.f32 %v2567_v19, 0.0  ;;  %v1772_v1 = vsub.s32 2, %v5439_v55  ;;  %v1776_v2 = vsub.s32 3, %v5439_v55  ;;  %v4601_v16 = vld [vmem:[%s6441_s7 + $0x1f4] ss:$8 sps:$4 sm:$0xff]  }
 0x77d   : > { %v2623_v30 = vmax.f32 %v2483_v22, 0.0  ;;  %v2627_v31 = vmax.f32 %v2569_v23, 0.0  ;;  %v4599_v22 = vld [vmem:[%s6441_s7 + $0x1f0] ss:$8 sps:$4 sm:$0xff]  }
 0x77e   : > { %v2630_v32 = vpack.c.bf16 %v2622_v26, %v2614_v24  ;;  %v6014_v33 = vpack.c.bf16 %v2626_v27, %v2618_v25  ;;  %v1773_v3 = vrot.slane %v6005_v62, %v1772_v1  ;;  %v1777_v39 = vrot.slane %v6005_v62, %v1776_v2  ;;  %v4604_v25 = vld [vmem:[%s6441_s7 + $0x204] ss:$8 sps:$4 sm:$0xff]  }
 0x77f   : > { %v2631_v34 = vpack.c.bf16 %v2623_v30, %v2615_v28  ;;  %v6016_v35 = vpack.c.bf16 %v2627_v31, %v2619_v29  ;;  %v4602_v30 = vld [vmem:[%s6441_s7 + $0x200] ss:$8 sps:$4 sm:$0xff]   ;;  %v4607_v31 = vld [vmem:[%s6441_s7 + $0x214] ss:$8 sps:$4 sm:$0xff]  }
 0x781   : > { %3450 = vmatprep.mubr.bf16.mxu1 %v2631_v34  ;;  %v4610_v34 = vld [vmem:[%s6441_s7 + $0x224] ss:$8 sps:$4 sm:$0xff]  }
 0x782   : > { %3451 = vmatmul.mubr.bf16.vlgmr.msra.gmra.mrb[4].mxu1 %v2630_v32  ;;  %v4605_v32 = vld [vmem:[%s6441_s7 + $0x210] ss:$8 sps:$4 sm:$0xff]  }
 0x783   : > { %3462 = vmatpush1.bf16.msra.mxu1 %v4554_v36  ;;  %v4608_v36 = vld [vmem:[%s6441_s7 + $0x220] ss:$8 sps:$4 sm:$0xff]  }
 0x784   : > { %3463 = vmatprep.subr.bf16.mxu1 %v4559_v37  ;;  %v4613_v37 = vld [vmem:[%s6441_s7 + $0x234] ss:$8 sps:$4 sm:$0xff]  }
 0x787   : > { %3464 = vmatpush1.bf16.msra.mxu1 %v4557_v38  ;;  %v4616_v38 = vld [vmem:[%s6441_s7 + $0x244] ss:$8 sps:$4 sm:$0xff]  }
 0x788   : > { %3465 = vmatprep.subr.bf16.mxu1 %v4562_v41  ;;  %v4614_v41 = vld [vmem:[%s6441_s7 + $0x240] ss:$8 sps:$4 sm:$0xff]  }
 0x78b   : > { %3466 = vmatpush1.bf16.msra.mxu1 %v4560_v44  ;;  %v4619_v44 = vld [vmem:[%s6441_s7 + $0x254] ss:$8 sps:$4 sm:$0xff]  }
 0x78c   : > { %3467 = vmatprep.subr.bf16.mxu1 %v4565_v45  ;;  %v4617_v45 = vld [vmem:[%s6441_s7 + $0x250] ss:$8 sps:$4 sm:$0xff]  }
 0x78f   : > { %3468 = vmatpush1.bf16.msra.mxu1 %v4563_v46  ;;  %v4622_v46 = vld [vmem:[%s6441_s7 + $0x264] ss:$8 sps:$4 sm:$0xff]  }
 0x790   : > { %3469 = vmatprep.subr.bf16.mxu1 %v4568_v8  ;;  %v4620_v8 = vld [vmem:[%s6441_s7 + $0x260] ss:$8 sps:$4 sm:$0xff]  }
 0x793   : > { %3470 = vmatpush1.bf16.msra.mxu1 %v4566_v11  ;;  %v4625_v11 = vld [vmem:[%s6441_s7 + $0x274] ss:$8 sps:$4 sm:$0xff]  }
 0x794   : > { %3471 = vmatprep.subr.bf16.mxu1 %v4571_v47  ;;  %v4623_v47 = vld [vmem:[%s6441_s7 + $0x270] ss:$8 sps:$4 sm:$0xff]  }
 0x797   : > { %3472 = vmatpush1.bf16.msra.mxu1 %v4569_v13  ;;  %v4628_v13 = vld [vmem:[%s6441_s7 + $0x284] ss:$8 sps:$4 sm:$0xff]  }
 0x798   : > { %3473 = vmatprep.subr.bf16.mxu1 %v4574_v14  ;;  %v4626_v14 = vld [vmem:[%s6441_s7 + $0x280] ss:$8 sps:$4 sm:$0xff]  }
 0x79b   : > { %3474 = vmatpush1.bf16.msra.mxu1 %v4572_v48  ;;  %v4631_v48 = vld [vmem:[%s6441_s7 + $0x294] ss:$8 sps:$4 sm:$0xff]  }
 0x79c   : > { %3475 = vmatprep.subr.bf16.mxu1 %v4577_v49  ;;  %v4629_v49 = vld [vmem:[%s6441_s7 + $0x290] ss:$8 sps:$4 sm:$0xff]  }
 0x79f   : > { %3476 = vmatpush1.bf16.msra.mxu1 %v4575_v50  ;;  %v4634_v50 = vld [vmem:[%s6441_s7 + $0x2a4] ss:$8 sps:$4 sm:$0xff]  }
 0x7a0   : > { %3477 = vmatprep.subr.bf16.mxu1 %v4580_v51  ;;  %v4632_v51 = vld [vmem:[%s6441_s7 + $0x2a0] ss:$8 sps:$4 sm:$0xff]  }
 0x7a3   : > { %3478 = vmatpush1.bf16.msra.mxu1 %v4578_v52  ;;  %v4637_v52 = vld [vmem:[%s6441_s7 + $0x2b4] ss:$8 sps:$4 sm:$0xff]  }
 0x7a4   : > { %3479 = vmatprep.subr.bf16.mxu1 %v4583_v53  ;;  %v4635_v53 = vld [vmem:[%s6441_s7 + $0x2b0] ss:$8 sps:$4 sm:$0xff]  }
 0x7a7   : > { %3480 = vmatpush1.bf16.msra.mxu1 %v4581_v54  ;;  %v4640_v54 = vld [vmem:[%s6441_s7 + $0x2c4] ss:$8 sps:$4 sm:$0xff]  }
 0x7a8   : > { %3481 = vmatprep.subr.bf16.mxu1 %v4586_v57  ;;  %v4638_v57 = vld [vmem:[%s6441_s7 + $0x2c0] ss:$8 sps:$4 sm:$0xff]  }
 0x7ab   : > { %3482 = vmatpush1.bf16.msra.mxu1 %v4584_v59  ;;  %v4643_v59 = vld [vmem:[%s6441_s7 + $0x2d4] ss:$8 sps:$4 sm:$0xff]  }
 0x7ac   : > { %3483 = vmatprep.subr.bf16.mxu1 %v4589_v60  ;;  %v1788_v60 = vsub.s32 6, %v5439_v55 }
 0x7af   : > { %3484 = vmatpush1.bf16.msra.mxu1 %v4587_v61  ;;  %v1792_v61 = vsub.s32 7, %v5439_v55  ;;  %v4644_v55 = vld [vmem:[%s6441_s7 + $0x2e0] ss:$8 sps:$4 sm:$0xff]  }
 0x7b0   : > { %3485 = vmatprep.subr.bf16.mxu1 %v4592_v63  ;;  %v4641_v63 = vld [vmem:[%s6441_s7 + $0x2d0] ss:$8 sps:$4 sm:$0xff]  }
 0x7b1   : > { %v1793_v1 = vrot.slane %v6005_v62, %v1792_v61 }
 0x7b3   : > { %3486 = vmatpush1.bf16.msra.mxu1 %v4590_v43  ;;  %v1789_v43 = vrot.slane %v6005_v62, %v1788_v60  ;;  %v4647_v62 = vld [vmem:[%s6441_s7 + $0x2f0] ss:$8 sps:$4 sm:$0xff]  }
 0x7b4   : > { %3487 = vmatprep.subr.bf16.mxu1 %v4595_v0  ;;  %v4646_v0 = vld [vmem:[%s6441_s7 + $0x2e4] ss:$8 sps:$4 sm:$0xff]  }
 0x7b7   : > { %v2519_v9 = vpop.f32.mrb[8].mxu0  ;;  %3488 = vmatpush1.bf16.msra.mxu1 %v4593_v10 }
 0x7b8   : > { %v2520_v12 = vadd.f32 %v2519_v9, %v1773_v3  ;;  %v2521_v15 = vpop.f32.mrb[9].mxu0  ;;  %3489 = vmatprep.subr.bf16.mxu1 %v4598_v4  ;;  %v4649_v4 = vld [vmem:[%s6441_s7 + $0x2f4] ss:$8 sps:$4 sm:$0xff]  }
 0x7b9   : > { %v2522_v17 = vadd.f32 %v2521_v15, %v1777_v39  ;;  %v2523_v18 = vpop.f32.mrb[10].mxu0 }
 0x7ba   : > { %v2524_v19 = vadd.f32 %v2523_v18, %v1773_v3  ;;  %v2525_v20 = vpop.f32.mrb[11].mxu0  ;;  %v2616_v23 = vmax.f32 %v2520_v12, 0.0  ;;  %v4652_v18 = vld [vmem:[%s6441_s7 + $0x304] ss:$8 sps:$4 sm:$0xff]  }
 0x7bb   : > { %v2526_v21 = vadd.f32 %v2525_v20, %v1777_v39  ;;  %3490 = vmatpush1.bf16.msra.mxu1 %v4596_v42  ;;  %v2617_v26 = vmax.f32 %v2522_v17, 0.0 }
 0x7bc   : > { %v2624_v24 = vmax.f32 %v2524_v19, 0.0  ;;  %3491 = vmatprep.subr.bf16.mxu1 %v4601_v16 }
 0x7bd   : > { %v2625_v27 = vmax.f32 %v2526_v21, 0.0 }
 0x7be   : > { %v2632_v28 = vpack.c.bf16 %v2624_v24, %v2616_v23  ;;  %v4650_v23 = vld [vmem:[%s6441_s7 + $0x300] ss:$8 sps:$4 sm:$0xff]   ;;  %v4655_v24 = vld [vmem:[%s6441_s7 + $0x314] ss:$8 sps:$4 sm:$0xff]  }
 0x7bf   : > { %v2633_v29 = vpack.c.bf16 %v2625_v27, %v2617_v26  ;;  %3492 = vmatpush1.bf16.msra.mxu1 %v4599_v22  ;;  %v4658_v26 = vld [vmem:[%s6441_s7 + $0x324] ss:$8 sps:$4 sm:$0xff]   ;;  %v4656_v27 = vld [vmem:[%s6441_s7 + $0x320] ss:$8 sps:$4 sm:$0xff]  }
 0x7c0   : > { %3504 = vmatprep.subr.bf16.mxu1 %v4604_v25  ;;  %v4653_v25 = vld [vmem:[%s6441_s7 + $0x310] ss:$8 sps:$4 sm:$0xff]  }
 0x7c1   : > { %3493 = vmatprep.mubr.bf16.mxu1 %v2633_v29  ;;  %v4664_v29 = vld [vmem:[%s6441_s7 + $0x344] ss:$8 sps:$4 sm:$0xff]  }
 0x7c2   : > { %3494 = vmatmul.mubr.bf16.vlgmr.msra.gmra.mrb[4].mxu1 %v2632_v28  ;;  %v4659_v28 = vld [vmem:[%s6441_s7 + $0x330] ss:$8 sps:$4 sm:$0xff]  }
 0x7c3   : > { %3505 = vmatpush1.bf16.msra.mxu1 %v4602_v30  ;;  %3536 = vmatprep.mubr.bf16.mxu1 %v6016_v35  ;;  %v4611_v35 = vld [vmem:[%s6441_s7 + $0x230] ss:$8 sps:$4 sm:$0xff]   ;;  %v4662_v30 = vld [vmem:[%s6441_s7 + $0x340] ss:$8 sps:$4 sm:$0xff]  }
 0x7c4   : > { %3506 = vmatprep.subr.bf16.mxu1 %v4607_v31  ;;  %v4667_v31 = vld [vmem:[%s6441_s7 + $0x354] ss:$8 sps:$4 sm:$0xff]  }
 0x7c7   : > { %3507 = vmatpush1.bf16.msra.mxu1 %v4605_v32  ;;  %v4665_v32 = vld [vmem:[%s6441_s7 + $0x350] ss:$8 sps:$4 sm:$0xff]  }
 0x7c8   : > { %3508 = vmatprep.subr.bf16.mxu1 %v4610_v34  ;;  %v4670_v34 = vld [vmem:[%s6441_s7 + $0x364] ss:$8 sps:$4 sm:$0xff]  }
 0x7cb   : > { %3509 = vmatpush1.bf16.msra.mxu1 %v4608_v36  ;;  %v4668_v36 = vld [vmem:[%s6441_s7 + $0x360] ss:$8 sps:$4 sm:$0xff]  }
 0x7cc   : > { %3510 = vmatprep.subr.bf16.mxu1 %v4613_v37  ;;  %v4673_v37 = vld [vmem:[%s6441_s7 + $0x374] ss:$8 sps:$4 sm:$0xff]  }
 0x7cf   : > { %3511 = vmatpush1.bf16.msra.mxu1 %v4611_v35  ;;  %v4671_v35 = vld [vmem:[%s6441_s7 + $0x370] ss:$8 sps:$4 sm:$0xff]  }
 0x7d0   : > { %3512 = vmatprep.subr.bf16.mxu1 %v4616_v38  ;;  %v4676_v38 = vld [vmem:[%s6441_s7 + $0x384] ss:$8 sps:$4 sm:$0xff]  }
 0x7d3   : > { %3513 = vmatpush1.bf16.msra.mxu1 %v4614_v41  ;;  %v4674_v41 = vld [vmem:[%s6441_s7 + $0x380] ss:$8 sps:$4 sm:$0xff]  }
 0x7d4   : > { %3514 = vmatprep.subr.bf16.mxu1 %v4619_v44  ;;  %v4679_v44 = vld [vmem:[%s6441_s7 + $0x394] ss:$8 sps:$4 sm:$0xff]  }
 0x7d7   : > { %3515 = vmatpush1.bf16.msra.mxu1 %v4617_v45  ;;  %v4677_v45 = vld [vmem:[%s6441_s7 + $0x390] ss:$8 sps:$4 sm:$0xff]  }
 0x7d8   : > { %3516 = vmatprep.subr.bf16.mxu1 %v4622_v46  ;;  %v4682_v46 = vld [vmem:[%s6441_s7 + $0x3a4] ss:$8 sps:$4 sm:$0xff]  }
 0x7db   : > { %3517 = vmatpush1.bf16.msra.mxu1 %v4620_v8  ;;  %v4680_v8 = vld [vmem:[%s6441_s7 + $0x3a0] ss:$8 sps:$4 sm:$0xff]  }
 0x7dc   : > { %3518 = vmatprep.subr.bf16.mxu1 %v4625_v11  ;;  %v4685_v11 = vld [vmem:[%s6441_s7 + $0x3b4] ss:$8 sps:$4 sm:$0xff]  }
 0x7df   : > { %3519 = vmatpush1.bf16.msra.mxu1 %v4623_v47  ;;  %v4683_v47 = vld [vmem:[%s6441_s7 + $0x3b0] ss:$8 sps:$4 sm:$0xff]  }
 0x7e0   : > { %3520 = vmatprep.subr.bf16.mxu1 %v4628_v13  ;;  %v4688_v13 = vld [vmem:[%s6441_s7 + $0x3c4] ss:$8 sps:$4 sm:$0xff]  }
 0x7e3   : > { %3521 = vmatpush1.bf16.msra.mxu1 %v4626_v14  ;;  %v4686_v14 = vld [vmem:[%s6441_s7 + $0x3c0] ss:$8 sps:$4 sm:$0xff]  }
 0x7e4   : > { %3522 = vmatprep.subr.bf16.mxu1 %v4631_v48  ;;  %v4691_v48 = vld [vmem:[%s6441_s7 + $0x3d4] ss:$8 sps:$4 sm:$0xff]  }
 0x7e7   : > { %3523 = vmatpush1.bf16.msra.mxu1 %v4629_v49  ;;  %v4689_v49 = vld [vmem:[%s6441_s7 + $0x3d0] ss:$8 sps:$4 sm:$0xff]  }
 0x7e8   : > { %3524 = vmatprep.subr.bf16.mxu1 %v4634_v50  ;;  %v4694_v50 = vld [vmem:[%s6441_s7 + $0x3e4] ss:$8 sps:$4 sm:$0xff]  }
 0x7eb   : > { %3525 = vmatpush1.bf16.msra.mxu1 %v4632_v51  ;;  %v4692_v51 = vld [vmem:[%s6441_s7 + $0x3e0] ss:$8 sps:$4 sm:$0xff]  }
 0x7ec   : > { %3526 = vmatprep.subr.bf16.mxu1 %v4637_v52  ;;  %v4697_v52 = vld [vmem:[%s6441_s7 + $0x3f4] ss:$8 sps:$4 sm:$0xff]  }
 0x7ef   : > { %3527 = vmatpush1.bf16.msra.mxu1 %v4635_v53  ;;  %v4695_v53 = vld [vmem:[%s6441_s7 + $0x3f0] ss:$8 sps:$4 sm:$0xff]  }
 0x7f0   : > { %3528 = vmatprep.subr.bf16.mxu1 %v4640_v54  ;;  %v2766_v54 = vld [vmem:[#allocation12] sm:$0x3] }
 0x7f3   : > { %3529 = vmatpush1.bf16.msra.mxu1 %v4638_v57  ;;  %v2771_v57 = vrot.slane %v2766_v54, %v5442_v56 }
 0x7f4   : > { %3530 = vmatprep.subr.bf16.mxu1 %v4643_v59  ;;  %v2775_v59 = vrot.slane %v2766_v54, %v5448_v58 }
 0x7f7   : > { %v2605_v2 = vpop.f32.mrb[12].mxu0  ;;  %3531 = vmatpush1.bf16.msra.mxu1 %v4641_v63 }
 0x7f8   : > { %v2606_v10 = vadd.f32 %v2605_v2, %v1789_v43  ;;  %v2607_v3 = vpop.f32.mrb[13].mxu0  ;;  %3532 = vmatprep.subr.bf16.mxu1 %v4646_v0 }
 0x7f9   : > { %v2608_v39 = vadd.f32 %v2607_v3, %v1793_v1  ;;  %v2609_v9 = vpop.f32.mrb[14].mxu0 }
 0x7fa   : > { %v2610_v42 = vadd.f32 %v2609_v9, %v1789_v43  ;;  %v2611_v12 = vpop.f32.mrb[15].mxu0  ;;  %v2620_v16 = vmax.f32 %v2606_v10, 0.0 }
 0x7fb   : > { %v2612_v15 = vadd.f32 %v2611_v12, %v1793_v1  ;;  %3533 = vmatpush1.bf16.msra.mxu1 %v4644_v55  ;;  %v2621_v19 = vmax.f32 %v2608_v39, 0.0 }
 0x7fc   : > { %v2628_v17 = vmax.f32 %v2610_v42, 0.0  ;;  %3534 = vmatprep.subr.bf16.mxu1 %v4649_v4 }
 0x7fd   : > { %v2629_v20 = vmax.f32 %v2612_v15, 0.0 }
 0x7fe   : > { %v6219_v21 = vpack.c.bf16 %v2628_v17, %v2620_v16 }
 0x7ff   : > { %v2637_v22 = vpack.c.bf16 %v2629_v20, %v2621_v19  ;;  %3535 = vmatpush1.bf16.msra.mxu1 %v4647_v62 }
 0x800   : > { %3547 = vmatprep.subr.bf16.mxu1 %v4652_v18 }
 0x802   : > { %3537 = vmatmul.mubr.bf16.vlgmr.msra.gmra.mrb[4].mxu1 %v6014_v33  ;;  %v4661_v33 = vld [vmem:[%s6441_s7 + $0x334] ss:$8 sps:$4 sm:$0xff]  }
 0x803   : > { %3548 = vmatpush1.bf16.msra.mxu1 %v4650_v23  ;;  %3579 = vmatprep.mubr.bf16.mxu1 %v2637_v22 }
 0x804   : > { %3549 = vmatprep.subr.bf16.mxu1 %v4655_v24 }
 0x807   : > { %3550 = vmatpush1.bf16.msra.mxu1 %v4653_v25 }
 0x808   : > { %3551 = vmatprep.subr.bf16.mxu1 %v4658_v26 }
 0x80b   : > { %3552 = vmatpush1.bf16.msra.mxu1 %v4656_v27 }
 0x80c   : > { %3553 = vmatprep.subr.bf16.mxu1 %v4661_v33 }
 0x80f   : > { %3554 = vmatpush1.bf16.msra.mxu1 %v4659_v28  ;;  %v3594_v28 = vld [vmem:[#allocation13] sm:$0x3] }
 0x810   : > { %3555 = vmatprep.subr.bf16.mxu1 %v4664_v29  ;;  %v3595_v29 = vld [vmem:[#allocation15] sm:$0x3] }
 0x813   : > { %3556 = vmatpush1.bf16.msra.mxu1 %v4662_v30  ;;  %v3632_v30 = vrot.slane %v3594_v28, %v5442_v56 }
 0x814   : > { %3557 = vmatprep.subr.bf16.mxu1 %v4667_v31  ;;  %v3636_v31 = vrot.slane %v3594_v28, %v5448_v58 }
 0x817   : > { %3558 = vmatpush1.bf16.msra.mxu1 %v4665_v32 }
 0x818   : > { %3559 = vmatprep.subr.bf16.mxu1 %v4670_v34  ;;  %v3647_v34 = vrot.slane %v3595_v29, %v5442_v56 }
 0x81b   : > { %3560 = vmatpush1.bf16.msra.mxu1 %v4668_v36  ;;  %v3651_v36 = vrot.slane %v3595_v29, %v5448_v58 }
 0x81c   : > { %3561 = vmatprep.subr.bf16.mxu1 %v4673_v37 }
 0x81f   : > { %3562 = vmatpush1.bf16.msra.mxu1 %v4671_v35 }
 0x820   : > { %3563 = vmatprep.subr.bf16.mxu1 %v4676_v38 }
 0x823   : > { %3564 = vmatpush1.bf16.msra.mxu1 %v4674_v41 }
 0x824   : > { %3565 = vmatprep.subr.bf16.mxu1 %v4679_v44 }
 0x827   : > { %3566 = vmatpush1.bf16.msra.mxu1 %v4677_v45 }
 0x828   : > { %3567 = vmatprep.subr.bf16.mxu1 %v4682_v46 }
 0x82b   : > { %3568 = vmatpush1.bf16.msra.mxu1 %v4680_v8 }
 0x82c   : > { %3569 = vmatprep.subr.bf16.mxu1 %v4685_v11 }
 0x82f   : > { %3570 = vmatpush1.bf16.msra.mxu1 %v4683_v47 }
 0x830   : > { %3571 = vmatprep.subr.bf16.mxu1 %v4688_v13 }
 0x833   : > { %3572 = vmatpush1.bf16.msra.mxu1 %v4686_v14 }
 0x834   : > { %3573 = vmatprep.subr.bf16.mxu1 %v4691_v48 }
 0x837   : > { %3574 = vmatpush1.bf16.msra.mxu1 %v4689_v49 }
 0x838   : > { %3575 = vmatprep.subr.bf16.mxu1 %v4694_v50 }
 0x83b   : > { %3576 = vmatpush1.bf16.msra.mxu1 %v4692_v51 }
 0x83c   : > { %3577 = vmatprep.subr.bf16.mxu1 %v4697_v52 }
 0x83f   : > { %3578 = vmatpush1.bf16.msra.mxu1 %v4695_v53 }
 0x842   : > { %3580 = vmatmul.mubr.bf16.vlgmr.msra.gmra.mrb[4].mxu1 %v6219_v21 }
 0x915   : > { %v3581_v60 = vpop.f32.mrb[4].mxu1 }
 0x916   : > { %v4267_v61 = vadd.f32 %v3581_v60, %v2771_v57  ;;  %v3583_v63 = vpop.f32.mrb[5].mxu1 }
 0x917   : > { %v4268_v43 = vadd.f32 %v3583_v63, %v2775_v59  ;;  %v3585_v0 = vpop.f32.mrb[6].mxu1 }
 0x918   : > { %v3590_v1 = vadd.f32 %v4267_v61, %v5696_v6  ;;  %v4269_v2 = vadd.f32 %v3585_v0, %v2771_v57  ;;  %v3587_v55 = vpop.f32.mrb[7].mxu1 }
 0x919   : > { %v3591_v10 = vadd.f32 %v4268_v43, %v5692_v5  ;;  %v4270_v3 = vadd.f32 %v3587_v55, %v2775_v59 }
 0x91a   : > { %v3592_v4 = vadd.f32 %v4269_v2, %v5698_v7 }
 0x91b   : > { %v3593_v39 = vadd.f32 %v4270_v3, %v5694_v40  ;;  %v3596_v9 = vadd.f32 %v3591_v10, %v3590_v1 }
 0x91d   : > { %3597 = vadd.xlane.f32.xlu1 %v3596_v9  ;;  %v3599_v42 = vadd.f32 %v3593_v39, %v3592_v4 }
 0x91f   : > { %3600 = vadd.xlane.f32.xlu0 %v3599_v42 }
 0x9aa   : > { %v3598_v12 = vpop.xlane.xlu1 %3597 }
 0x9ab   : > { %v3602_v15 = vmul.f32 0.00390625, %v3598_v12 }
 0x9ac   : > { %v3601_v62 = vpop.xlane.xlu0 %3600 }
 0x9ad   : > { %v3604_v16 = vsub.f32 %v3590_v1, %v3602_v15  ;;  %v3605_v17 = vsub.f32 %v3591_v10, %v3602_v15  ;;  %v3603_v18 = vmul.f32 0.00390625, %v3601_v62 }
 0x9af   : > { %v3606_v6 = vsub.f32 %v3592_v4, %v3603_v18  ;;  %v3607_v19 = vsub.f32 %v3593_v39, %v3603_v18  ;;  %v3608_v20 = vmul.f32 %v3604_v16, %v3604_v16  ;;  %v3609_v21 = vmul.f32 %v3605_v17, %v3605_v17 }
 0x9b1   : > { %v3612_v5 = vadd.f32 %v3609_v21, %v3608_v20  ;;  %v3610_v22 = vmul.f32 %v3606_v6, %v3606_v6  ;;  %v3611_v23 = vmul.f32 %v3607_v19, %v3607_v19 }
 0x9b3   : > { %3613 = vadd.xlane.f32.xlu1 %v3612_v5  ;;  %v3615_v7 = vadd.f32 %v3611_v23, %v3610_v22 }
 0x9b5   : > { %3616 = vadd.xlane.f32.xlu0 %v3615_v7 }
 0xa40   : > { %v3614_v40 = vpop.xlane.xlu1 %3613 }
 0xa41   : > { %v3618_v24 = vmul.f32 0.00390625, %v3614_v40 }
 0xa42   : > { %v3617_v25 = vpop.xlane.xlu0 %3616 }
 0xa43   : > { %v3620_v26 = vadd.f32 1e-05, %v3618_v24  ;;  %v3619_v27 = vmul.f32 0.00390625, %v3617_v25 }
 0xa45   : > { %4710 = vrsqrt.f32 %v3620_v26  ;;  %v3621_v33 = vadd.f32 1e-05, %v3619_v27 }
 0xa47   : > { %4712 = vrsqrt.f32 %v3621_v33 }
 0xa4f   : > { %v4711_v32 = vpop.eup %4710 }
 0xa50   : > { %v3624_v37 = vmul.f32 %v4711_v32, %v3604_v16  ;;  %v3625_v35 = vmul.f32 %v4711_v32, %v3605_v17 }
 0xa51   : > { %v4713_v38 = vpop.eup %4712 }
 0xa52   : > { %v3639_v41 = vmul.f32 %v3632_v30, %v3624_v37  ;;  %v3640_v44 = vmul.f32 %v3636_v31, %v3625_v35  ;;  %v3626_v45 = vmul.f32 %v4713_v38, %v3606_v6  ;;  %v3627_v46 = vmul.f32 %v4713_v38, %v3607_v19 }
 0xa54   : > { %v3654_v8 = vadd.f32 %v3647_v34, %v3639_v41  ;;  %v3655_v11 = vadd.f32 %v3651_v36, %v3640_v44  ;;  %v3641_v47 = vmul.f32 %v3632_v30, %v3626_v45  ;;  %v3642_v13 = vmul.f32 %v3636_v31, %v3627_v46 }
 0xa56   : > { %v4233_v14 = vpack.c.bf16 %v3655_v11, %v3654_v8  ;;  %v3656_v48 = vadd.f32 %v3647_v34, %v3641_v47  ;;  %v3657_v49 = vadd.f32 %v3651_v36, %v3642_v13 }
 0xa58   : > { %3670 = vst [vmem:[%s5307_s18] sm:$0xff] %v4233_v14  ;;  %v4234_v56 = vpack.c.bf16 %v3657_v49, %v3656_v48 }
 0xa5a   : > { %3671 = vst [vmem:[%s5307_s18 + $0x8] sm:$0xff] %v4234_v56 }
 0xa5b PF: > { %s27_s23 = sadd.s32 1, %s4952_s23   ;;  %s6443_s10 = sld [smem:[#allocation29_spill]] }
 0xa5c   : > { %p24_p12 = scmp.ge.s32.totalorder %s27_s23, 10   ;;  %s6444_s17 = sld [smem:[#allocation28_spill]] }
 0xa5d   : > { %s6445_s26 = sld [smem:[#allocation24_spill]]  ;;  %s6446_s9 = sld [smem:[#allocation25_spill]] }
 0xa5e   : > { %s6447_s4 = sld [smem:[#allocation26_spill]]  ;;  %s6448_s29 = smov %s4916_s30 }
 0xa5f   : > { %s6450_s15 = smov %s4924_s16  ;;  %s6453_s18 = smov %s4944_s21 }
 0xa60   : > { %s6454_s19 = smov %s4948_s22  ;;  %26 = sbr.rel (!%p24_p12) target bundleno = 17 (0x11), region = 287 }
 0xa61   : > { %s6449_s30 = smov %s6443_s10 }
 0xa62   : > { %s6451_s16 = smov %s6444_s17  ;;  %s6452_s17 = smov %s4940_s20 }
 0xa63   : > { %s6455_s20 = smov %s6445_s26  ;;  %s6456_s21 = smov %s6446_s9 }
 0xa64   : > { %s6457_s22 = smov %s6447_s4 }
 0xa67   :  { %3704 = vsyncpa [#allocation9], 1 }
 0xa68   :  { %3706 = vsyncpa [#allocation9 + $0x1], 1 }
 0xa69   :  { %3707 = vsyncpa [#allocation11], 1 }
 0xa6a   :  { %3708 = vsyncpa [#allocation14], 1 }

// kernel: decoder_transformer_forward.8
= control target key start
LH: loop header
LB: loop body
LE: loop exit
PB: predicated region body
PF: predicated region fallthrough
CT: control target
= control target key end

     0   :  { %s5914_s0 = inlined_call_operand.vmem [shape: bf16[2,32,256], index: 0, kind: input, shape index: {}]   ;;  %s5915_s1 = inlined_call_operand.vmem [shape: bf16[2,2,32,128], index: 1, kind: input, shape index: {}]   ;;  %s5916_s2 = inlined_call_operand.vmem [shape: bf16[2,2,32,128], index: 2, kind: input, shape index: {}]   ;;  %s5917_s3 = inlined_call_operand.vmem [shape: bf16[2,2,32,128], index: 3, kind: input, shape index: {}]   ;;  %s5918_s4 = inlined_call_operand.vmem [shape: bf16[256,256], index: 4, kind: input, shape index: {}]   ;;  %s5919_s5 = inlined_call_operand.vmem [shape: f32[1,256], index: 5, kind: input, shape index: {}]   ;;  %s5920_s6 = inlined_call_operand.vmem [shape: f32[1,256], index: 6, kind: input, shape index: {}]   ;;  %s5921_s7 = inlined_call_operand.vmem [shape: f32[1,256], index: 7, kind: input, shape index: {}]   ;;  %s5922_s8 = inlined_call_operand.vmem [shape: bf16[256,1024], index: 8, kind: input, shape index: {}]   ;;  %s5923_s9 = inlined_call_operand.vmem [shape: f32[1,1024], index: 9, kind: input, shape index: {}]   ;;  %s5924_s10 = inlined_call_operand.vmem [shape: bf16[1024,256], index: 10, kind: input, shape index: {}]   ;;  %s5925_s11 = inlined_call_operand.vmem [shape: f32[1,256], index: 11, kind: input, shape index: {}]   ;;  %s5926_s12 = inlined_call_operand.vmem [shape: f32[1,256], index: 12, kind: input, shape index: {}]   ;;  %s5927_s13 = inlined_call_operand.vmem [shape: f32[1,256], index: 13, kind: input, shape index: {}]   ;;  %s5928_s14 = inlined_call_operand.vmem [shape: bf16[2,32,256], index: 14, kind: output, shape index: {}]  }
   0x1   :  { %5935 = sst [smem:[#allocation12_spill]] %s5915_s1 }
   0x2   :  { %5936 = sst [smem:[#allocation13_spill]] %s5919_s5 }
   0x3   :  { %5937 = sst [smem:[#allocation14_spill]] %s5920_s6 }
   0x4   :  { %5938 = sst [smem:[#allocation15_spill]] %s5921_s7 }
   0x5   :  { %5939 = sst [smem:[#allocation16_spill]] %s5922_s8 }
   0x6   :  { %5940 = sst [smem:[#allocation17_spill]] %s5923_s9 }
   0x7   :  { %5941 = sst [smem:[#allocation18_spill]] %s5924_s10 }
   0x8   :  { %5942 = sst [smem:[#allocation19_spill]] %s5925_s11 }
   0x9   :  { %5943 = sst [smem:[#allocation20_spill]] %s5926_s12 }
   0xa   :  { %5944 = sst [smem:[#allocation21_spill]] %s5927_s13 }
   0xb   :  { %s4709_s29 = smov 0   ;;  %s4711_s30 = smov 0  }
   0xc   :  { %s4713_s15 = smov 0   ;;  %s4715_s16 = smov 0  }
   0xd   :  { %s4717_s17 = smov 0   ;;  %s4719_s18 = smov 0  }
   0xe   :  { %s4721_s19 = smov 0   ;;  %s4723_s20 = smov 0  }
   0xf   :  { %s4725_s21 = smov 0   ;;  %s4727_s22 = smov 0  }
  0x10   :  { %s4729_s23 = smov 0  }
  0x11 LB: > { %5945 = sst [smem:[#allocation8_spill]] %s4618_s21  ;;  %s36_s24 = sadd.s32 1, %s4614_s20  ;;  %s4626_s23 = sphi %s4729_s23, %s24_s23   ;;  %s4622_s22 = sphi %s4727_s22, %s5973_s22   ;;  %s4618_s21 = sphi %s4725_s21, %s5972_s21   ;;  %s4614_s20 = sphi %s4723_s20, %s5971_s20   ;;  %s4610_s19 = sphi %s4721_s19, %s5970_s19   ;;  %s4606_s18 = sphi %s4719_s18, %s5961_s18   ;;  %s4602_s17 = sphi %s4717_s17, %s5969_s17   ;;  %s4598_s16 = sphi %s4715_s16, %s5968_s16   ;;  %s4594_s15 = sphi %s4713_s15, %s5967_s15   ;;  %s4590_s30 = sphi %s4711_s30, %s5966_s30   ;;  %s4586_s29 = sphi %s4709_s29, %s5965_s29  }
  0x12   : > { %p37_p0 = scmp.ge.s32.totalorder %s36_s24, 2  ;;  %s39_s25 = sadd.s32 1, %s4618_s21 }
  0x13   : > { %p87_p1 = scmp.ne.s32.totalorder %s4598_s16, %s4594_s15  ;;  %p88_p2 = scmp.eq.s32.totalorder %s4626_s23, 0 }
  0x14   : > { %s5975_s24 = smov (%p37_p0, %s36_s24), 0  ;;  %s5977_s25 = smov (!%p37_p0, %s39_s25), %s4618_s21 }
  0x15   : > { %5946 = sst [smem:[#allocation9_spill]] %s5975_s24  ;;  %p41_p3 = scmp.ge.s32.totalorder %s5977_s25, 2 }
  0x16   : > { %s43_s26 = sadd.s32 1, %s4622_s22  ;;  %p4773_p4 = por %p88_p2, %p87_p1 }
  0x17   : > { %p115_p5 = scmp.ne.s32.totalorder %s4590_s30, %s4586_s29  ;;  %s5979_s25 = smov (%p41_p3, %s5977_s25), 0 }
  0x18   : > { %5948 = sst [smem:[#allocation10_spill]] %s5979_s25  ;;  %s5981_s26 = smov (!%p41_p3, %s43_s26), %s4622_s22 }
  0x19   : > { %p4782_p6 = por %p115_p5, %p88_p2  ;;  %p45_p7 = scmp.ge.s32.totalorder %s5981_s26, 2 }
  0x1a   : > { %s76_s13 = ssub.s32 %s4618_s21, %s5979_s25  ;;  %s104_s12 = ssub.s32 %s4614_s20, %s5975_s24 }
  0x1b   : > { %s5983_s26 = smov (%p45_p7, %s5981_s26), 0  ;;  %s80_s11 = sadd.s32 1, %s4598_s16 }
  0x1c   : > { %5950 = sst [smem:[#allocation11_spill]] %s5983_s26  ;;  %s75_s9 = ssub.s32 %s4622_s22, %s5983_s26 }
  0x1d   : > { %s108_s10 = sadd.s32 1, %s4590_s30  ;;  %s77_s7 = sor.u32 %s76_s13, %s75_s9 }
  0x1e   : > { %s105_s6 = sor.u32 %s104_s12, %s75_s9  ;;  %p78_p8 = scmp.eq.s32.totalorder %s77_s7, 0 }
  0x1f   : > { %p106_p9 = scmp.eq.s32.totalorder %s105_s6, 0  ;;  %p3780_p10 = scmp.ge.s32.totalorder %s4626_s23, 8 }
  0x20   : > { %s4797_s8 = scalar_select %p78_p8, %s4598_s16, %s80_s11  }
  0x21   : > { %s4800_s5 = scalar_select %p106_p9, %s4590_s30, %s108_s10  }
  0x22   : > { %437 = sbr.rel (%p3780_p10) target bundleno = 68 (0x44), region = 56 }
  0x29   : > { %454 = sbr.rel (!%p4773_p4) target bundleno = 52 (0x34), region = 64  ;;  %s456_s25 = sand.u32 (%p4773_p4), 1, %s4598_s16  }
  0x2a   : > { %s3782_s26 = sshll.u32 (%p4773_p4), %s4618_s21, 1  ;;  %s3781_s24 = sshll.u32 (%p4773_p4), %s456_s25, 4 }
  0x2b   : > { %s3783_s13 = sshll.u32 (%p4773_p4), %s4622_s22, 3  ;;  %s5951_s1 = sld [smem:[#allocation12_spill]] (%p4773_p4) }
  0x2c   : > { %s461_s9 = sadd.s32 (%p4773_p4), %s3783_s13, %s3782_s26  ;;  %s458_s12 = scalar_lea.vmem (%p4773_p4), [#allocation5], %s3781_s24 }
  0x2d   : > { %s3784_s7 = sshll.u32 (%p4773_p4), %s461_s9, 2 }
  0x31   : > { %s463_s10 = scalar_lea.vmem %s5951_s1, %s3784_s7 }
  0x32   : > { %v479_v0 = vld [vmem:[%s463_s10] sm:$0xff]   ;;  %v483_v1 = vld [vmem:[%s463_s10 + $0x10] sm:$0xff]  }
  0x33   : > { %480 = vst [vmem:[%s458_s12] sm:$0xff] %v479_v0   ;;  %484 = vst [vmem:[%s458_s12 + $0x8] sm:$0xff] %v483_v1  }
  0x34 PF: > { %517 = sbr.rel (!%p4782_p6) target bundleno = 60 (0x3c), region = 105  ;;  %s519_s25 = sand.u32 (%p4782_p6), 1, %s4590_s30  }
  0x35   : > { %s3786_s27 = sshll.u32 (%p4782_p6), %s4614_s20, 1  ;;  %s3785_s26 = sshll.u32 (%p4782_p6), %s519_s25, 4 }
  0x36   : > { %s3787_s13 = sshll.u32 (%p4782_p6), %s4622_s22, 3  ;;  %s521_s24 = scalar_lea.vmem (%p4782_p6), [#allocation6], %s3785_s26 }
  0x37   : > { %s524_s9 = sadd.s32 (%p4782_p6), %s3787_s13, %s3786_s27 }
  0x38   : > { %s3788_s21 = sshll.u32 (%p4782_p6), %s524_s9, 2 }
  0x39   : > { %s526_s11 = scalar_lea.vmem (%p4782_p6), %s5916_s2, %s3788_s21 }
  0x3a   : > { %v542_v2 = vld [vmem:[%s526_s11] sm:$0xff] (%p4782_p6)   ;;  %v546_v3 = vld [vmem:[%s526_s11 + $0x10] sm:$0xff] (%p4782_p6)  }
  0x3b   : > { %543 = vst [vmem:[%s521_s24] sm:$0xff] %v542_v2   ;;  %547 = vst [vmem:[%s521_s24 + $0x8] sm:$0xff] %v546_v3  }
  0x3c PF: > { %580 = sbr.rel (!%p4782_p6) target bundleno = 68 (0x44), region = 146  ;;  %s582_s10 = sand.u32 (%p4782_p6), 1, %s4590_s30  }
  0x3d   : > { %s3790_s12 = sshll.u32 (%p4782_p6), %s4614_s20, 1  ;;  %s3789_s25 = sshll.u32 (%p4782_p6), %s582_s10, 4 }
  0x3e   : > { %s3791_s27 = sshll.u32 (%p4782_p6), %s4622_s22, 3  ;;  %s584_s26 = scalar_lea.vmem (%p4782_p6), [#allocation7], %s3789_s25 }
  0x3f   : > { %s587_s13 = sadd.s32 (%p4782_p6), %s3791_s27, %s3790_s12 }
  0x40   : > { %s3792_s9 = sshll.u32 (%p4782_p6), %s587_s13, 2 }
  0x41   : > { %s589_s7 = scalar_lea.vmem (%p4782_p6), %s5917_s3, %s3792_s9 }
  0x42   : > { %v605_v4 = vld [vmem:[%s589_s7] sm:$0xff] (%p4782_p6)   ;;  %v609_v5 = vld [vmem:[%s589_s7 + $0x10] sm:$0xff] (%p4782_p6)  }
  0x43   : > { %606 = vst [vmem:[%s584_s26] sm:$0xff] %v605_v4   ;;  %610 = vst [vmem:[%s584_s26 + $0x8] sm:$0xff] %v609_v5  }
  0x44 PF: > { %p3793_p11 = scmp.ge.s32.totalorder %s4626_s23, 1  ;;  %p642_p12 = scmp.lt.s32.totalorder %s4626_s23, 9 }
  0x46   : > { %p643_p13 = pnand %p3793_p11, %p642_p12 }
  0x47   : > { %s649_s28 = sand.u32 (!%p643_p13), 1, %s4594_s15   ;;  %s656_s11 = sand.u32 (!%p643_p13), 1, %s4586_s29  }
  0x48   : > { %646 = sbr.rel (%p643_p13) target bundleno = 2500 (0x9c4), region = 187  ;;  %s4831_s24 = sshll.u32 (!%p643_p13), %s649_s28, 4 }
  0x49   : > { %s4833_s10 = sshll.u32 (!%p643_p13), %s656_s11, 4  ;;  %s3797_s12 = sshll.u32 (!%p643_p13), %s4606_s18, 1 }
  0x4a   : > { %p732_p0 = scmp.lt.s32.totalorder (!%p643_p13), %s4610_s19, 1  ;;  %p734_p1 = scmp.lt.s32.totalorder (!%p643_p13), %s3797_s12, 3 }
  0x4b   : > { %s651_s28 = scalar_lea.vmem (!%p643_p13), [#allocation5], %s4831_s24  ;;  %s658_s11 = scalar_lea.vmem (!%p643_p13), [#allocation6], %s4833_s10 }
  0x4c   : > { %s665_s1 = scalar_lea.vmem (!%p643_p13), [#allocation7], %s4833_s10  ;;  %p3805_p2 = scmp.ne.s32.totalorder (!%p643_p13), %s4602_s17, 0 }
  0x4f   : > { %s5985_s19 = smov (!%p732_p0, %s4610_s19), 1  ;;  %s5987_s12 = smov (!%p734_p1, %s3797_s12), 3 }
  0x50   : > { %s3799_s25 = sshll.u32 %s5985_s19, 3  ;;  %s3798_s27 = sshll.u32 %s5987_s12, 1  ;;  %vm761_vm0 = vcmask (!%p3805_p2), 7168   ;;  %v4628_v6 = vmov (!%p3805_p2), -inf   ;;  %v4629_v7 = vmov (!%p3805_p2), 0.0  }
  0x51   : > { %s738_s13 = sadd.s32 %s3799_s25, %s3798_s27  ;;  %760 = sbr.rel (%p3805_p2) target bundleno = 88 (0x58), region = 203  ;;  %762 = vst.msk [vmem:[#allocation2] sm:$0xff] (!%p3805_p2), %vm761_vm0, %v4628_v6  ;;  %763 = vst.msk [vmem:[#allocation2 + $0x8] sm:$0xff] (!%p3805_p2), %vm761_vm0, %v4628_v6 }
  0x52   : > { %s3800_s9 = sshll.u32 %s738_s13, 2  ;;  %764 = vst.msk [vmem:[#allocation2 + $0x10] sm:$0xff] (!%p3805_p2), %vm761_vm0, %v4628_v6  ;;  %765 = vst.msk [vmem:[#allocation2 + $0x18] sm:$0xff] (!%p3805_p2), %vm761_vm0, %v4628_v6 }
  0x53   : > { %s4841_s29 = scalar_lea.vmem %s5914_s0, %s3800_s9  ;;  %s4846_s26 = scalar_lea.vmem %s5928_s14, %s3800_s9  ;;  %766 = vst.msk [vmem:[#allocation3] sm:$0xff] (!%p3805_p2), %vm761_vm0, %v4629_v7  ;;  %767 = vst.msk [vmem:[#allocation3 + $0x8] sm:$0xff] (!%p3805_p2), %vm761_vm0, %v4629_v7 }
  0x54   : > { %768 = vst.msk [vmem:[#allocation3 + $0x10] sm:$0xff] (!%p3805_p2), %vm761_vm0, %v4629_v7  ;;  %769 = vst.msk [vmem:[#allocation3 + $0x18] sm:$0xff] (!%p3805_p2), %vm761_vm0, %v4629_v7 }
  0x55   : > { %770 = vst [vmem:[#allocation4] sm:$0xff] (!%p3805_p2), %v4629_v7  ;;  %771 = vst [vmem:[#allocation4 + $0x8] sm:$0xff] (!%p3805_p2), %v4629_v7 }
  0x56   : > { %772 = vst [vmem:[#allocation4 + $0x10] sm:$0xff] (!%p3805_p2), %v4629_v7  ;;  %773 = vst [vmem:[#allocation4 + $0x18] sm:$0xff] (!%p3805_p2), %v4629_v7 }
  0x58 PF: > { %s3806_s19 = sshll.u32 %s4606_s18, 4  ;;  %s3807_s12 = sshll.u32 %s4602_s17, 4 }
  0x59   : > { %s776_s25 = sadd.s32 15, %s3806_s19 }
  0x5a   : > { %p3808_p3 = scmp.gt.s32.totalorder %s3807_s12, %s776_s25 }
  0x5b   : > { %v4260_v8 = vld [vmem:[%s658_s11] sm:$0xff] (!%p3808_p3)   ;;  %v4630_v9 = vmov (!%p3808_p3), 0.0   ;;  %v4261_v10 = vld [vmem:[%s658_s11 + $0x8] sm:$0xff] (!%p3808_p3)   ;;  %vm4631_vm1 = vmmov (!%p3808_p3), 0   ;;  %v899_v13 = vlaneseq (!%p3808_p3)  ;;  %v902_v16 = vstv (!%p3808_p3), %s3806_s19 }
  0x5c   : > { %780 = sbr.rel (%p3808_p3) target bundleno = 829 (0x33d), region = 207  ;;  %4120 = vmatprep.subr.bf16.mxu0 (!%p3808_p3), %v4630_v9  ;;  %4126 = vmatprep.subr.bf16.mxu1 (!%p3808_p3), %v4630_v9  ;;  %v4262_v11 = vld [vmem:[%s651_s28] sm:$0xff] (!%p3808_p3)   ;;  %v4263_v12 = vld [vmem:[%s651_s28 + $0x8] sm:$0xff] (!%p3808_p3)   ;;  %v907_v17 = vstv (!%p3808_p3), %s3807_s12  ;;  %vm923_vm3 = vcmask (!%p3808_p3), 130048   ;;  %v4632_v38 = vmov (!%p3808_p3), 0   ;;  %vm1008_vm5 = vcmask (!%p3808_p3), 7168  }
  0x5d   : > { %4121 = vmatpush3.bf16.xpose.msra.mxu0 (!%p3808_p3), %v4260_v8  ;;  %4122 = vmatprep.mubr.msk.bf16.mxu0 (!%p3808_p3), %vm4631_vm1, %v4630_v9  ;;  %v900_v14 = vshrl.u32 (!%p3808_p3), %v899_v13, 7  ;;  %v906_v15 = vand.u32 (!%p3808_p3), 127, %v899_v13  ;;  %v919_v39 = vld [vmem:[#allocation2] sm:$0xff] (!%p3808_p3)  ;;  %v921_v40 = vld [vmem:[#allocation2 + $0x10] sm:$0xff] (!%p3808_p3)  ;;  %v920_v45 = vld [vmem:[#allocation2 + $0x8] sm:$0xff] (!%p3808_p3) }
  0x5e   : > { %4127 = vmatpush3.bf16.xpose.msra.mxu1 (!%p3808_p3), %v4261_v10  ;;  %4128 = vmatprep.mubr.msk.bf16.mxu1 (!%p3808_p3), %vm4631_vm1, %v4630_v9  ;;  %v922_v47 = vld [vmem:[#allocation2 + $0x18] sm:$0xff] (!%p3808_p3)  ;;  %v4264_v57 = vld [vmem:[%s665_s1] sm:$0xff] (!%p3808_p3)  }
  0x5f   : > { %4132 = vmatprep.subr.bf16.mxu0 (!%p3808_p3), %v4630_v9  ;;  %4138 = vmatprep.subr.bf16.mxu1 (!%p3808_p3), %v4630_v9  ;;  %v901_v18 = vadd.s32 (!%p3808_p3), 8, %v900_v14  ;;  %v903_v19 = vadd.s32 (!%p3808_p3), %v902_v16, %v900_v14  ;;  %v908_v20 = vadd.s32 (!%p3808_p3), %v907_v17, %v906_v15  ;;  %v4265_v58 = vld [vmem:[%s665_s1 + $0x8] sm:$0xff] (!%p3808_p3)  }
  0x60   : > { %4259 = vset.pattern.permute.xlu1 (!%p3808_p3), %v4632_v38  ;;  %4258 = vset.pattern.permute.xlu0 (!%p3808_p3), %v4632_v38 }
  0x61   : > { %v904_v21 = vadd.s32 (!%p3808_p3), %v902_v16, %v901_v18  ;;  %vm909_vm2 = vcmp.le.s32.totalorder (!%p3808_p3), %v908_v20, %v903_v19 }
  0x63   : > { %vm910_vm4 = vcmp.le.s32.totalorder %v908_v20, %v904_v21 }
  0x64   : > { %4123 = vmatmul.mubr.bf16.vlgmr.msra.gmra.mrb[0].mxu0 %v4262_v11 }
  0x65   : > { %4129 = vmatmul.mubr.bf16.vlgmr.msra.gmra.mrb[0].mxu1 %v4263_v12  ;;  %4134 = vmatprep.mubr.msk.bf16.mxu0 %vm4631_vm1, %v4630_v9 }
  0x66   : > { %4140 = vmatprep.mubr.msk.bf16.mxu1 %vm4631_vm1, %v4630_v9  ;;  %4133 = vmatpush3.bf16.msra.mxu0 %v4264_v57 }
  0x67   : > { %4139 = vmatpush3.bf16.msra.mxu1 %v4265_v58 }
 0x137   : > { %v839_v22 = vpop.f32.mrb[0].mxu0 }
 0x138   : > { %v915_v23 = vsel %vm909_vm2, %v839_v22, -1e+30  ;;  %v892_v24 = vpop.f32.mrb[0].mxu1  ;;  %v4124_v25 = vpop.f32.mrb[1].mxu0 }
 0x139   : > { %v917_v26 = vsel %vm909_vm2, %v892_v24, -1e+30  ;;  %v4130_v27 = vpop.f32.mrb[1].mxu1  ;;  %v842_v28 = vpop.f32.mrb[2].mxu0  ;;  %v924_v29 = vsel %vm923_vm3, %v915_v23, -inf  ;;  %v984_v24 = vld [vmem:[#allocation3] sm:$0xff] }
 0x13a   : > { %v916_v30 = vsel %vm910_vm4, %v842_v28, -1e+30  ;;  %v895_v31 = vpop.f32.mrb[2].mxu1  ;;  %v930_v32 = vsel %vm923_vm3, %v917_v26, -inf  ;;  %925 = vmax.xlane.f32.xlu0 %v924_v29  ;;  %v4125_v33 = vpop.f32.mrb[3].mxu0  ;;  %v986_v27 = vld [vmem:[#allocation3 + $0x10] sm:$0xff] }
 0x13b   : > { %v918_v34 = vsel %vm910_vm4, %v895_v31, -1e+30  ;;  %931 = vmax.xlane.f32.xlu1 %v930_v32  ;;  %v4131_v35 = vpop.f32.mrb[3].mxu1  ;;  %v927_v36 = vsel %vm923_vm3, %v916_v30, -inf  ;;  %v985_v29 = vld [vmem:[#allocation3 + $0x8] sm:$0xff] }
 0x13c   : > { %v933_v37 = vsel %vm923_vm3, %v918_v34, -inf }
 0x13e   : > { %928 = vmax.xlane.f32.xlu0 %v927_v36 }
 0x13f   : > { %934 = vmax.xlane.f32.xlu1 %v933_v37  ;;  %v987_v37 = vld [vmem:[#allocation3 + $0x18] sm:$0xff] }
 0x1c7   : > { %v926_v41 = vpop.xlane.xlu0 %925 }
 0x1c8   : > { %v932_v42 = vpop.xlane.xlu1 %931  ;;  %v936_v43 = vmax.f32 %v919_v39, %v926_v41  ;;  %v1013_v41 = vld [vmem:[#allocation4] sm:$0xff] }
 0x1c9   : > { %v938_v44 = vmax.f32 %v921_v40, %v932_v42  ;;  %v1014_v42 = vld [vmem:[#allocation4 + $0x8] sm:$0xff] }
 0x1ca   : > { %v940_v46 = vsub.f32 %v919_v39, %v936_v43  ;;  %1151 = vst.msk [vmem:[#allocation2] sm:$0xff] %vm1008_vm5, %v936_v43  ;;  %954 = vperm.xlu0 %4258, %v936_v43  }
 0x1cb   : > { %v942_v48 = vsub.f32 %v921_v40, %v938_v44  ;;  %1153 = vst.msk [vmem:[#allocation2 + $0x10] sm:$0xff] %vm1008_vm5, %v938_v44  ;;  %964 = vperm.xlu1 %4259, %v938_v44   ;;  %v929_v49 = vpop.xlane.xlu0 %928 }
 0x1cc   : > { %v944_v50 = vmul.f32 1.442695, %v940_v46  ;;  %v935_v51 = vpop.xlane.xlu1 %934  ;;  %v937_v52 = vmax.f32 %v920_v45, %v929_v49 }
 0x1cd   : > { %v939_v53 = vmax.f32 %v922_v47, %v935_v51  ;;  %v948_v14 = vmul.f32 1.442695, %v942_v48 }
 0x1ce   : > { %4266 = vpow2.f32 %v944_v50  ;;  %v941_v54 = vsub.f32 %v920_v45, %v937_v52  ;;  %1152 = vst.msk [vmem:[#allocation2 + $0x8] sm:$0xff] %vm1008_vm5, %v937_v52  ;;  %v1015_v45 = vld [vmem:[#allocation4 + $0x10] sm:$0xff]  ;;  %v1016_v50 = vld [vmem:[#allocation4 + $0x18] sm:$0xff] }
 0x1cf   : > { %v943_v55 = vsub.f32 %v922_v47, %v939_v53  ;;  %1154 = vst.msk [vmem:[#allocation2 + $0x18] sm:$0xff] %vm1008_vm5, %v939_v53  ;;  %959 = vperm.xlu1 %4259, %v937_v52  }
 0x1d0   : > { %v946_v17 = vmul.f32 1.442695, %v941_v54 }
 0x1d1   : > { %v950_v21 = vmul.f32 1.442695, %v943_v55 }
 0x1d3   : > { %969 = vperm.xlu1 %4259, %v939_v53  }
 0x1d8   : > { %v4267_v56 = vpop.eup %4266 }
 0x1d9   : > { %1019 = vperm.xlu1 %4259, %v4267_v56   ;;  %v988_v25 = vmul.f32 %v4267_v56, %v984_v24 }
 0x249   : > { %v955_v59 = vpop.permute.xlu0 %954 }
 0x24a   : > { %v965_v60 = vpop.permute.xlu1 %964  ;;  %v972_v61 = vsub.f32 %v915_v23, %v955_v59 }
 0x24b   : > { %v974_v62 = vsub.f32 %v917_v26, %v965_v60 }
 0x24c   : > { %v976_v63 = vmul.f32 1.442695, %v972_v61 }
 0x24d   : > { %v980_v0 = vmul.f32 1.442695, %v974_v62 }
 0x24e   : > { %4268 = vpow2.f32 %v976_v63  ;;  %v960_v1 = vpop.permute.xlu1 %959 }
 0x24f   : > { %v973_v2 = vsub.f32 %v916_v30, %v960_v1  ;;  %4270 = vpow2.f32 %v980_v0 }
 0x251   : > { %v978_v3 = vmul.f32 1.442695, %v973_v2 }
 0x252   : > { %v970_v4 = vpop.permute.xlu1 %969 }
 0x253   : > { %4272 = vpow2.f32 %v978_v3  ;;  %v975_v5 = vsub.f32 %v918_v34, %v970_v4 }
 0x255   : > { %v982_v6 = vmul.f32 1.442695, %v975_v5 }
 0x257   : > { %4274 = vpow2.f32 %v982_v6 }
 0x258   : > { %v4269_v7 = vpop.eup %4268  ;;  %4276 = vpow2.f32 %v948_v14  ;;  %v1020_v23 = vpop.permute.xlu1 %1019 }
 0x259   : > { %v992_v8 = vsel %vm923_vm3, %v4269_v7, 0.0  ;;  %v4271_v9 = vpop.eup %4270  ;;  %4278 = vpow2.f32 %v946_v17  ;;  %v1037_v44 = vmul.f32 %v1020_v23, %v1013_v41 }
 0x25a   : > { %993 = vadd.xlane.f32.xlu1 %v992_v8  ;;  %v998_v11 = vsel %vm923_vm3, %v4271_v9, 0.0  ;;  %4280 = vpow2.f32 %v950_v21 }
 0x25d   : > { %v4273_v10 = vpop.eup %4272 }
 0x25e   : > { %v995_v12 = vsel %vm923_vm3, %v4273_v10, 0.0  ;;  %999 = vadd.xlane.f32.xlu1 %v998_v11  ;;  %v1041_v13 = vpack.c.bf16 %v4273_v10, %v4269_v7 }
 0x25f   : > { %996 = vadd.xlane.f32.xlu0 %v995_v12 }
 0x260   : > { %4135 = vmatmul.mubr.msk.bf16.vlgmr.msra.gmra.mrb[4].mxu0 %vm923_vm3, %v1041_v13 }
 0x261   : > { %v4275_v15 = vpop.eup %4274 }
 0x262   : > { %v1042_v16 = vpack.c.bf16 %v4275_v15, %v4271_v9  ;;  %v4277_v18 = vpop.eup %4276  ;;  %v1001_v20 = vsel %vm923_vm3, %v4275_v15, 0.0 }
 0x263   : > { %v4279_v19 = vpop.eup %4278  ;;  %v990_v30 = vmul.f32 %v4277_v18, %v986_v27 }
 0x264   : > { %4141 = vmatmul.mubr.msk.bf16.vlgmr.msra.gmra.mrb[4].mxu1 %vm923_vm3, %v1042_v16  ;;  %v4281_v22 = vpop.eup %4280  ;;  %v989_v32 = vmul.f32 %v4279_v19, %v985_v29 }
 0x265   : > { %v991_v38 = vmul.f32 %v4281_v22, %v987_v37 }
 0x26f   : > { %1029 = vperm.xlu1 %4259, %v4277_v18  }
 0x275   : > { %1024 = vperm.xlu0 %4258, %v4279_v19  }
 0x293   : > { %1002 = vadd.xlane.f32.xlu1 %v1001_v20 }
 0x2a4   : > { %1034 = vperm.xlu1 %4259, %v4281_v22  }
 0x2e7   : > { %v994_v26 = vpop.xlane.xlu1 %993 }
 0x2e8   : > { %v1004_v28 = vadd.f32 %v994_v26, %v988_v25 }
 0x2ea   : > { %1009 = vst.msk [vmem:[#allocation3] sm:$0xff] %vm1008_vm5, %v1004_v28 }
 0x2eb   : > { %v1000_v31 = vpop.xlane.xlu1 %999 }
 0x2ec   : > { %v1006_v33 = vadd.f32 %v1000_v31, %v990_v30  ;;  %v997_v34 = vpop.xlane.xlu0 %996 }
 0x2ed   : > { %v1005_v35 = vadd.f32 %v997_v34, %v989_v32 }
 0x2ee   : > { %1011 = vst.msk [vmem:[#allocation3 + $0x10] sm:$0xff] %vm1008_vm5, %v1006_v33 }
 0x2ef   : > { %1010 = vst.msk [vmem:[#allocation3 + $0x8] sm:$0xff] %vm1008_vm5, %v1005_v35  ;;  %v1030_v36 = vpop.permute.xlu1 %1029 }
 0x2f0   : > { %v1039_v53 = vmul.f32 %v1030_v36, %v1015_v45 }
 0x2f4   : > { %v1025_v43 = vpop.permute.xlu0 %1024 }
 0x2f5   : > { %v1038_v47 = vmul.f32 %v1025_v43, %v1014_v42 }
 0x320   : > { %v1003_v39 = vpop.xlane.xlu1 %1002 }
 0x321   : > { %v1007_v40 = vadd.f32 %v1003_v39, %v991_v38 }
 0x323   : > { %1012 = vst.msk [vmem:[#allocation3 + $0x18] sm:$0xff] %vm1008_vm5, %v1007_v40 }
 0x324   : > { %v1035_v51 = vpop.permute.xlu1 %1034 }
 0x325   : > { %v1040_v57 = vmul.f32 %v1035_v51, %v1016_v50 }
 0x333   : > { %v1086_v46 = vpop.f32.mrb[4].mxu0 }
 0x334   : > { %v1143_v48 = vadd.f32 %v1086_v46, %v1037_v44  ;;  %v4136_v49 = vpop.f32.mrb[5].mxu0 }
 0x335   : > { %v1089_v52 = vpop.f32.mrb[6].mxu0 }
 0x336   : > { %1147 = vst [vmem:[#allocation4] sm:$0xff] %v1143_v48  ;;  %v1144_v54 = vadd.f32 %v1089_v52, %v1038_v47  ;;  %v4137_v55 = vpop.f32.mrb[7].mxu0 }
 0x337   : > { %v1136_v56 = vpop.f32.mrb[4].mxu1 }
 0x338   : > { %1148 = vst [vmem:[#allocation4 + $0x8] sm:$0xff] %v1144_v54  ;;  %v1145_v58 = vadd.f32 %v1136_v56, %v1039_v53  ;;  %v4142_v59 = vpop.f32.mrb[5].mxu1 }
 0x339   : > { %v1139_v60 = vpop.f32.mrb[6].mxu1 }
 0x33a   : > { %1149 = vst [vmem:[#allocation4 + $0x10] sm:$0xff] %v1145_v58  ;;  %v1146_v61 = vadd.f32 %v1139_v60, %v1040_v57  ;;  %v4143_v62 = vpop.f32.mrb[7].mxu1 }
 0x33c   : > { %1150 = vst [vmem:[#allocation4 + $0x18] sm:$0xff] %v1146_v61 }
 0x33d PF: > { %p3817_p4 = scmp.ne.s32.totalorder %s4602_s17, 1 }
 0x33e   : > { %v1161_v63 = vld [vmem:[#allocation3 + $0x10] sm:$0xff] (!%p3817_p4)  ;;  %v1162_v0 = vld [vmem:[#allocation3 + $0x18] sm:$0xff] (!%p3817_p4)  ;;  %v1159_v1 = vld [vmem:[#allocation3] sm:$0xff] (!%p3817_p4)  ;;  %v4633_v2 = vmov (!%p3817_p4), 0   ;;  %v1478_v54 = vlaneseq (!%p3817_p4)  ;;  %s5952_s12 = sld [smem:[#allocation13_spill]] (!%p3817_p4)  ;;  %s5953_s1 = sld [smem:[#allocation16_spill]] (!%p3817_p4) }
 0x33f   : > { %1158 = sbr.rel (%p3817_p4) target bundleno = 2500 (0x9c4), region = 211  ;;  %4282 = vset.pattern.permute.xlu0 (!%p3817_p4), %v4633_v2  ;;  %4524 = vrcp.f32 (!%p3817_p4), %v1161_v63  ;;  %4283 = vset.pattern.permute.xlu1 (!%p3817_p4), %v4633_v2  ;;  %v1160_v3 = vld [vmem:[#allocation3 + $0x8] sm:$0xff] (!%p3817_p4)  ;;  %v4287_v6 = vld [vmem:[%s5918_s4 + $0x94] ss:$8 sps:$4 sm:$0xff] (!%p3817_p4)   ;;  %v4289_v7 = vld [vmem:[%s5918_s4 + $0x90] ss:$8 sps:$4 sm:$0xff] (!%p3817_p4)  }
 0x340   : > { %4526 = vrcp.f32 (!%p3817_p4), %v1162_v0  ;;  %v4284_v4 = vld [vmem:[%s5918_s4 + $0x84] ss:$8 sps:$4 sm:$0xff] (!%p3817_p4)   ;;  %v4286_v5 = vld [vmem:[%s5918_s4 + $0x80] ss:$8 sps:$4 sm:$0xff] (!%p3817_p4)   ;;  %1342 = vmatprep.mubr.bf16.mxu0 (!%p3817_p4), %v4633_v2  ;;  %v4293_v10 = vld [vmem:[%s5918_s4 + $0xb4] ss:$8 sps:$4 sm:$0xff] (!%p3817_p4)  }
 0x341   : > { %4528 = vrcp.f32 (!%p3817_p4), %v1159_v1  ;;  %1310 = vmatprep.subr.bf16.mxu0 (!%p3817_p4), %v4284_v4  ;;  %v4290_v8 = vld [vmem:[%s5918_s4 + $0xa4] ss:$8 sps:$4 sm:$0xff] (!%p3817_p4)   ;;  %v4292_v9 = vld [vmem:[%s5918_s4 + $0xa0] ss:$8 sps:$4 sm:$0xff] (!%p3817_p4)   ;;  %v4295_v13 = vld [vmem:[%s5918_s4 + $0xb0] ss:$8 sps:$4 sm:$0xff] (!%p3817_p4)  }
 0x342   : > { %4530 = vrcp.f32 (!%p3817_p4), %v1160_v3  ;;  %1311 = vmatpush1.bf16.msra.mxu0 (!%p3817_p4), %v4286_v5  ;;  %v4296_v15 = vld [vmem:[%s5918_s4 + $0xc4] ss:$8 sps:$4 sm:$0xff] (!%p3817_p4)   ;;  %v4298_v17 = vld [vmem:[%s5918_s4 + $0xc0] ss:$8 sps:$4 sm:$0xff] (!%p3817_p4)   ;;  %v4299_v18 = vld [vmem:[%s5918_s4 + $0xd4] ss:$8 sps:$4 sm:$0xff] (!%p3817_p4)  }
 0x343   : > { %1312 = vmatprep.subr.bf16.mxu0 (!%p3817_p4), %v4287_v6  ;;  %v4301_v19 = vld [vmem:[%s5918_s4 + $0xd0] ss:$8 sps:$4 sm:$0xff] (!%p3817_p4)   ;;  %v4302_v20 = vld [vmem:[%s5918_s4 + $0xe4] ss:$8 sps:$4 sm:$0xff] (!%p3817_p4)   ;;  %v4304_v21 = vld [vmem:[%s5918_s4 + $0xe0] ss:$8 sps:$4 sm:$0xff] (!%p3817_p4)  }
 0x344   : > { %v4305_v22 = vld [vmem:[%s5918_s4 + $0xf4] ss:$8 sps:$4 sm:$0xff] (!%p3817_p4)   ;;  %v4307_v23 = vld [vmem:[%s5918_s4 + $0xf0] ss:$8 sps:$4 sm:$0xff] (!%p3817_p4)   ;;  %v4310_v24 = vld [vmem:[%s5918_s4 + $0x4] ss:$8 sps:$4 sm:$0xff] (!%p3817_p4)  }
 0x345   : > { %v1199_v26 = vld [vmem:[#allocation4 + $0x10] sm:$0xff] (!%p3817_p4)  ;;  %v1200_v27 = vld [vmem:[#allocation4 + $0x18] sm:$0xff] (!%p3817_p4)  ;;  %v4308_v31 = vld [vmem:[%s5918_s4] ss:$8 sps:$4 sm:$0xff] (!%p3817_p4)   ;;  %v4977_v55 = vshrl.u32 (!%p3817_p4), %v1478_v54, 7  ;;  %s5954_s19 = sld [smem:[#allocation14_spill]] (!%p3817_p4) }
 0x346   : > { %1313 = vmatpush1.bf16.msra.mxu0 %v4289_v7  ;;  %v4313_v33 = vld [vmem:[%s5918_s4 + $0x14] ss:$8 sps:$4 sm:$0xff]   ;;  %v4311_v34 = vld [vmem:[%s5918_s4 + $0x10] ss:$8 sps:$4 sm:$0xff]   ;;  %v4316_v35 = vld [vmem:[%s5918_s4 + $0x24] ss:$8 sps:$4 sm:$0xff]  }
 0x347   : > { %1314 = vmatprep.subr.bf16.mxu0 %v4290_v8  ;;  %v4314_v36 = vld [vmem:[%s5918_s4 + $0x20] ss:$8 sps:$4 sm:$0xff]   ;;  %v4319_v37 = vld [vmem:[%s5918_s4 + $0x34] ss:$8 sps:$4 sm:$0xff]   ;;  %v4317_v38 = vld [vmem:[%s5918_s4 + $0x30] ss:$8 sps:$4 sm:$0xff]  }
 0x348   : > { %v4322_v39 = vld [vmem:[%s5918_s4 + $0x44] ss:$8 sps:$4 sm:$0xff]   ;;  %v4320_v40 = vld [vmem:[%s5918_s4 + $0x40] ss:$8 sps:$4 sm:$0xff]   ;;  %v4325_v41 = vld [vmem:[%s5918_s4 + $0x54] ss:$8 sps:$4 sm:$0xff]  }
 0x349   : > { %v4525_v11 = vpop.eup %4524  ;;  %v4323_v43 = vld [vmem:[%s5918_s4 + $0x50] ss:$8 sps:$4 sm:$0xff]   ;;  %v4328_v44 = vld [vmem:[%s5918_s4 + $0x64] ss:$8 sps:$4 sm:$0xff]   ;;  %v4326_v45 = vld [vmem:[%s5918_s4 + $0x60] ss:$8 sps:$4 sm:$0xff]  }
 0x34a   : > { %v4527_v12 = vpop.eup %4526  ;;  %1203 = vperm.xlu0 %4282, %v4525_v11   ;;  %1315 = vmatpush1.bf16.msra.mxu0 %v4292_v9  ;;  %v4331_v46 = vld [vmem:[%s5918_s4 + $0x74] ss:$8 sps:$4 sm:$0xff]   ;;  %v1167_v47 = vld [vmem:[#allocation4] sm:$0xff]  ;;  %v1168_v48 = vld [vmem:[#allocation4 + $0x8] sm:$0xff]  ;;  %v4980_v56 = vsub.s32 0, %v4977_v55  ;;  %v4986_v58 = vsub.s32 1, %v4977_v55 }
 0x34b   : > { %v4529_v14 = vpop.eup %4528  ;;  %1316 = vmatprep.subr.bf16.mxu0 %v4293_v10  ;;  %v4329_v50 = vld [vmem:[%s5918_s4 + $0x70] ss:$8 sps:$4 sm:$0xff]   ;;  %v1476_v57 = vld [vmem:[%s5952_s12] sm:$0x3]  ;;  %v1493_v62 = vld [vmem:[%s4841_s29 + $0x8] sm:$0xff]  ;;  %s5955_s25 = sld [smem:[#allocation15_spill]] }
 0x34c   : > { %1171 = vperm.xlu1 %4283, %v4529_v14   ;;  %v4531_v16 = vpop.eup %4530  ;;  %v1492_v59 = vld [vmem:[%s4841_s29] sm:$0xff]  ;;  %v1481_v60 = vrot.slane %v1476_v57, %v4980_v56  ;;  %v1485_v61 = vrot.slane %v1476_v57, %v4986_v58  ;;  %v1496_v4 = vunpack.c.l.bf16 %v1493_v62  ;;  %v1497_v7 = vunpack.c.h.bf16 %v1493_v62  ;;  %s5956_s7 = sld [smem:[#allocation18_spill]]  ;;  %s5957_s18 = sld [smem:[#allocation17_spill]] }
 0x34d   : > { %v1494_v63 = vunpack.c.l.bf16 %v1492_v59  ;;  %v1495_v1 = vunpack.c.h.bf16 %v1492_v59  ;;  %v1609_v57 = vld [vmem:[%s5953_s1 + $0x140] sm:$0xff]  ;;  %s5958_s24 = sld [smem:[#allocation19_spill]]  ;;  %s5959_s27 = sld [smem:[#allocation20_spill]] }
 0x34e   : > { %1208 = vperm.xlu0 %4282, %v4527_v12   ;;  %1317 = vmatpush1.bf16.msra.mxu0 %v4295_v13  ;;  %v1613_v59 = vld [vmem:[%s5953_s1 + $0x160] sm:$0xff]  ;;  %s5960_s6 = sld [smem:[#allocation21_spill]] }
 0x34f   : > { %1318 = vmatprep.subr.bf16.mxu0 %v4296_v15 }
 0x350   : > { %1176 = vperm.xlu1 %4283, %v4531_v16  }
 0x352   : > { %1319 = vmatpush1.bf16.msra.mxu0 %v4298_v17  ;;  %v1569_v17 = vld [vmem:[%s5953_s1] sm:$0xff] }
 0x353   : > { %1320 = vmatprep.subr.bf16.mxu0 %v4299_v18  ;;  %v1573_v18 = vld [vmem:[%s5953_s1 + $0x20] sm:$0xff] }
 0x356   : > { %1321 = vmatpush1.bf16.msra.mxu0 %v4301_v19  ;;  %v1571_v19 = vld [vmem:[%s5953_s1 + $0x10] sm:$0xff] }
 0x357   : > { %1322 = vmatprep.subr.bf16.mxu0 %v4302_v20  ;;  %v3850_v20 = vcombine.low %v1569_v17, %v1573_v18 }
 0x35a   : > { %1323 = vmatpush1.bf16.msra.mxu0 %v4304_v21  ;;  %v3851_v21 = vcombine.high %v1569_v17, %v1573_v18  ;;  %v1631_v17 = vld [vmem:[%s5953_s1 + $0x1f0] sm:$0xff] }
 0x35b   : > { %1324 = vmatprep.subr.bf16.mxu0 %v4305_v22  ;;  %v1575_v22 = vld [vmem:[%s5953_s1 + $0x30] sm:$0xff] }
 0x35e   : > { %1325 = vmatpush1.bf16.msra.mxu0 %v4307_v23  ;;  %v1577_v23 = vld [vmem:[%s5953_s1 + $0x40] sm:$0xff] }
 0x35f   : > { %1433 = vmatprep.subr.bf16.mxu0 %v4310_v24  ;;  %v1581_v24 = vld [vmem:[%s5953_s1 + $0x60] sm:$0xff] }
 0x3c9   : > { %v1204_v25 = vpop.permute.xlu0 %1203 }
 0x3ca   : > { %v1211_v29 = vmul.f32 %v1204_v25, %v1199_v26  ;;  %v3855_v25 = vcombine.high %v1571_v19, %v1575_v22  ;;  %v3854_v26 = vcombine.low %v1571_v19, %v1575_v22  ;;  %v1633_v22 = vld [vmem:[%s5953_s1 + $0x200] sm:$0xff] }
 0x3cb   : > { %v1172_v42 = vpop.permute.xlu1 %1171 }
 0x3cc   : > { %v1179_v51 = vmul.f32 %v1172_v42, %v1167_v47  ;;  %2465 = vmatprep.subr.bf16.mxu1 %v3855_v25  ;;  %v1599_v42 = vld [vmem:[%s5953_s1 + $0xf0] sm:$0xff]  ;;  %v1601_v47 = vld [vmem:[%s5953_s1 + $0x100] sm:$0xff] }
 0x3cd   : > { %v1209_v28 = vpop.permute.xlu0 %1208  ;;  %2466 = vmatpush1.bf16.msra.mxu1 %v3854_v26  ;;  %v1639_v25 = vld [vmem:[%s5953_s1 + $0x230] sm:$0xff] }
 0x3ce   : > { %v1212_v30 = vmul.f32 %v1209_v28, %v1200_v27  ;;  %v3859_v27 = vcombine.high %v1577_v23, %v1581_v24  ;;  %v1579_v28 = vld [vmem:[%s5953_s1 + $0x50] sm:$0xff] }
 0x3cf   : > { %v1177_v49 = vpop.permute.xlu1 %1176 }
 0x3d0   : > { %v1213_v32 = vpack.c.bf16 %v1212_v30, %v1211_v29  ;;  %v1180_v52 = vmul.f32 %v1177_v49, %v1168_v48  ;;  %v1583_v29 = vld [vmem:[%s5953_s1 + $0x70] sm:$0xff]  ;;  %v1585_v30 = vld [vmem:[%s5953_s1 + $0x80] sm:$0xff] }
 0x3d1   : > { %v1605_v48 = vld [vmem:[%s5953_s1 + $0x120] sm:$0xff]  ;;  %v1603_v49 = vld [vmem:[%s5953_s1 + $0x110] sm:$0xff] }
 0x3d2   : > { %1343 = vmatmul.mubr.bf16.vlgmr.msra.gmra.mrb[0].mxu0 %v1213_v32  ;;  %v1181_v53 = vpack.c.bf16 %v1180_v52, %v1179_v51  ;;  %v1589_v32 = vld [vmem:[%s5953_s1 + $0xa0] sm:$0xff]  ;;  %v3882_v62 = vcombine.low %v1601_v47, %v1605_v48 }
 0x3d3   : > { %1434 = vmatpush1.bf16.msra.mxu0 %v4308_v31  ;;  %1465 = vmatprep.mubr.bf16.mxu0 %v4633_v2  ;;  %v3863_v31 = vcombine.high %v1579_v28, %v1583_v29 }
 0x3d4   : > { %1435 = vmatprep.subr.bf16.mxu0 %v4313_v33  ;;  %v1587_v33 = vld [vmem:[%s5953_s1 + $0x90] sm:$0xff] }
 0x3d5   : > { %2467 = vmatprep.subr.bf16.mxu1 %v3863_v31  ;;  %v1645_v31 = vld [vmem:[%s5953_s1 + $0x260] sm:$0xff] }
 0x3d7   : > { %1436 = vmatpush1.bf16.msra.mxu0 %v4311_v34  ;;  %v1591_v34 = vld [vmem:[%s5953_s1 + $0xb0] sm:$0xff] }
 0x3d8   : > { %1437 = vmatprep.subr.bf16.mxu0 %v4316_v35  ;;  %v3858_v35 = vcombine.low %v1577_v23, %v1581_v24  ;;  %v1637_v23 = vld [vmem:[%s5953_s1 + $0x220] sm:$0xff]  ;;  %v1635_v24 = vld [vmem:[%s5953_s1 + $0x210] sm:$0xff] }
 0x3db   : > { %1438 = vmatpush1.bf16.msra.mxu0 %v4314_v36  ;;  %v3862_v36 = vcombine.low %v1579_v28, %v1583_v29  ;;  %v3915_v28 = vcombine.high %v1633_v22, %v1637_v23  ;;  %v3919_v29 = vcombine.high %v1635_v24, %v1639_v25 }
 0x3dc   : > { %1439 = vmatprep.subr.bf16.mxu0 %v4319_v37  ;;  %v3867_v37 = vcombine.high %v1585_v30, %v1589_v32 }
 0x3dd   : > { %2468 = vmatpush1.bf16.msra.mxu1 %v3862_v36 }
 0x3df   : > { %1440 = vmatpush1.bf16.msra.mxu0 %v4317_v38  ;;  %v3871_v38 = vcombine.high %v1587_v33, %v1591_v34 }
 0x3e0   : > { %1441 = vmatprep.subr.bf16.mxu0 %v4322_v39  ;;  %v1593_v39 = vld [vmem:[%s5953_s1 + $0xc0] sm:$0xff] }
 0x3e1   : > { %2469 = vmatprep.subr.bf16.mxu1 %v3871_v38 }
 0x3e3   : > { %1442 = vmatpush1.bf16.msra.mxu0 %v4320_v40  ;;  %v1597_v40 = vld [vmem:[%s5953_s1 + $0xe0] sm:$0xff] }
 0x3e4   : > { %1443 = vmatprep.subr.bf16.mxu0 %v4325_v41  ;;  %v1595_v41 = vld [vmem:[%s5953_s1 + $0xd0] sm:$0xff]  ;;  %v3874_v51 = vcombine.low %v1593_v39, %v1597_v40 }
 0x3e5   : > { %v3878_v52 = vcombine.low %v1595_v41, %v1599_v42 }
 0x3e7   : > { %1444 = vmatpush1.bf16.msra.mxu0 %v4323_v43  ;;  %v3866_v43 = vcombine.low %v1585_v30, %v1589_v32  ;;  %v1641_v30 = vld [vmem:[%s5953_s1 + $0x240] sm:$0xff]  ;;  %v3914_v32 = vcombine.low %v1633_v22, %v1637_v23 }
 0x3e8   : > { %1445 = vmatprep.subr.bf16.mxu0 %v4328_v44  ;;  %v3870_v44 = vcombine.low %v1587_v33, %v1591_v34  ;;  %v3918_v33 = vcombine.low %v1635_v24, %v1639_v25  ;;  %v3923_v34 = vcombine.high %v1641_v30, %v1645_v31  ;;  %v1681_v25 = vld [vmem:[%s5953_s1 + $0x380] sm:$0xff] }
 0x3ea   : > { %2470 = vmatpush1.bf16.msra.mxu1 %v3870_v44 }
 0x3eb   : > { %1446 = vmatpush1.bf16.msra.mxu0 %v4326_v45  ;;  %v3875_v45 = vcombine.high %v1593_v39, %v1597_v40 }
 0x3ec   : > { %1447 = vmatprep.subr.bf16.mxu0 %v4331_v46  ;;  %v3879_v46 = vcombine.high %v1595_v41, %v1599_v42 }
 0x3ee   : > { %2471 = vmatprep.subr.bf16.mxu1 %v3879_v46 }
 0x3ef   : > { %1448 = vmatpush1.bf16.msra.mxu0 %v4329_v50  ;;  %v1607_v50 = vld [vmem:[%s5953_s1 + $0x130] sm:$0xff]  ;;  %2472 = vmatpush1.bf16.msra.mxu1 %v3878_v52 }
 0x3f0   : > { %2379 = vmatprep.subr.bf16.mxu0 %v3851_v21  ;;  %v3887_v54 = vcombine.high %v1603_v49, %v1607_v50 }
 0x3f2   : > { %1466 = vmatmul.mubr.bf16.vlgmr.msra.gmra.mrb[0].mxu0 %v1181_v53  ;;  %v3883_v53 = vcombine.high %v1601_v47, %v1605_v48  ;;  %2473 = vmatprep.subr.bf16.mxu1 %v3887_v54  ;;  %v1655_v54 = vld [vmem:[%s5953_s1 + $0x2b0] sm:$0xff] }
 0x3f3   : > { %2380 = vmatpush1.bf16.msra.mxu0 %v3850_v20 }
 0x3f4   : > { %2381 = vmatprep.subr.bf16.mxu0 %v3859_v27 }
 0x3f7   : > { %2382 = vmatpush1.bf16.msra.mxu0 %v3858_v35  ;;  %v3922_v35 = vcombine.low %v1641_v30, %v1645_v31 }
 0x3f8   : > { %2383 = vmatprep.subr.bf16.mxu0 %v3867_v37 }
 0x3fb   : > { %2384 = vmatpush1.bf16.msra.mxu0 %v3866_v43 }
 0x3fc   : > { %2385 = vmatprep.subr.bf16.mxu0 %v3875_v45 }
 0x3ff   : > { %2386 = vmatpush1.bf16.msra.mxu0 %v3874_v51  ;;  %v1653_v51 = vld [vmem:[%s5953_s1 + $0x2a0] sm:$0xff] }
 0x400   : > { %2387 = vmatprep.subr.bf16.mxu0 %v3883_v53  ;;  %v1651_v53 = vld [vmem:[%s5953_s1 + $0x290] sm:$0xff] }
 0x403   : > { %2388 = vmatpush1.bf16.msra.mxu0 %v3882_v62  ;;  %v1661_v62 = vld [vmem:[%s5953_s1 + $0x2e0] sm:$0xff] }
 0x4c5   : > { %v1467_v0 = vpop.f32.mrb[0].mxu0 }
 0x4c6   : > { %v1488_v2 = vadd.f32 %v1481_v60, %v1467_v0  ;;  %v1469_v3 = vpop.f32.mrb[1].mxu0  ;;  %v3891_v0 = vcombine.high %v1609_v57, %v1613_v59 }
 0x4c7   : > { %v1489_v5 = vadd.f32 %v1485_v61, %v1469_v3  ;;  %v1471_v6 = vpop.f32.mrb[2].mxu0  ;;  %v1621_v3 = vld [vmem:[%s5953_s1 + $0x1a0] sm:$0xff] }
 0x4c8   : > { %v4992_v8 = vadd.f32 %v1494_v63, %v1488_v2  ;;  %v1490_v9 = vadd.f32 %v1481_v60, %v1471_v6  ;;  %v1473_v10 = vpop.f32.mrb[3].mxu0  ;;  %v1611_v60 = vld [vmem:[%s5953_s1 + $0x150] sm:$0xff]  ;;  %v3886_v63 = vcombine.low %v1603_v49, %v1607_v50  ;;  %v1617_v2 = vld [vmem:[%s5953_s1 + $0x180] sm:$0xff]  ;;  %v3890_v6 = vcombine.low %v1609_v57, %v1613_v59  ;;  %2389 = vmatprep.subr.bf16.mxu0 %v3891_v0 }
 0x4c9   : > { %v4994_v11 = vadd.f32 %v1495_v1, %v1489_v5  ;;  %v1491_v12 = vadd.f32 %v1485_v61, %v1473_v10  ;;  %v1615_v61 = vld [vmem:[%s5953_s1 + $0x170] sm:$0xff]  ;;  %v3898_v18 = vcombine.low %v1617_v2, %v1621_v3  ;;  %v1649_v50 = vld [vmem:[%s5953_s1 + $0x280] sm:$0xff]  ;;  %v3935_v59 = vcombine.high %v1651_v53, %v1655_v54 }
 0x4ca   : > { %v4996_v13 = vadd.f32 %v1496_v4, %v1490_v9  ;;  %v3895_v1 = vcombine.high %v1611_v60, %v1615_v61  ;;  %v1619_v4 = vld [vmem:[%s5953_s1 + $0x190] sm:$0xff]  ;;  %2474 = vmatpush1.bf16.msra.mxu1 %v3886_v63  ;;  %v3899_v9 = vcombine.high %v1617_v2, %v1621_v3  ;;  %2390 = vmatpush1.bf16.msra.mxu0 %v3890_v6  ;;  %v1669_v6 = vld [vmem:[%s5953_s1 + $0x320] sm:$0xff] }
 0x4cb   : > { %v4998_v14 = vadd.f32 %v1497_v7, %v1491_v12  ;;  %v1504_v15 = vadd.f32 %v4994_v11, %v4992_v8  ;;  %v1623_v5 = vld [vmem:[%s5953_s1 + $0x1b0] sm:$0xff]  ;;  %v3894_v7 = vcombine.low %v1611_v60, %v1615_v61  ;;  %v1625_v12 = vld [vmem:[%s5953_s1 + $0x1c0] sm:$0xff]  ;;  %v3931_v52 = vcombine.high %v1649_v50, %v1653_v51 }
 0x4cc   : > { %2475 = vmatprep.subr.bf16.mxu1 %v3895_v1  ;;  %v3903_v10 = vcombine.high %v1619_v4, %v1623_v5  ;;  %2391 = vmatprep.subr.bf16.mxu0 %v3899_v9  ;;  %v3902_v19 = vcombine.low %v1619_v4, %v1623_v5  ;;  %v3930_v57 = vcombine.low %v1649_v50, %v1653_v51  ;;  %v1657_v61 = vld [vmem:[%s5953_s1 + $0x2c0] sm:$0xff]  ;;  %v1659_v0 = vld [vmem:[%s5953_s1 + $0x2d0] sm:$0xff] }
 0x4cd   : > { %1505 = vadd.xlane.f32.xlu0 %v1504_v15  ;;  %v1507_v16 = vadd.f32 %v4998_v14, %v4996_v13  ;;  %v1629_v15 = vld [vmem:[%s5953_s1 + $0x1e0] sm:$0xff]  ;;  %v3934_v60 = vcombine.low %v1651_v53, %v1655_v54  ;;  %v3939_v63 = vcombine.high %v1657_v61, %v1661_v62  ;;  %v1663_v1 = vld [vmem:[%s5953_s1 + $0x2f0] sm:$0xff]  ;;  %v3938_v2 = vcombine.low %v1657_v61, %v1661_v62 }
 0x4ce   : > { %2476 = vmatpush1.bf16.msra.mxu1 %v3894_v7  ;;  %v3907_v20 = vcombine.high %v1625_v12, %v1629_v15  ;;  %2392 = vmatpush1.bf16.msra.mxu0 %v3898_v18  ;;  %v3906_v26 = vcombine.low %v1625_v12, %v1629_v15  ;;  %v3943_v3 = vcombine.high %v1659_v0, %v1663_v1  ;;  %v1665_v5 = vld [vmem:[%s5953_s1 + $0x300] sm:$0xff]  ;;  %v1667_v9 = vld [vmem:[%s5953_s1 + $0x310] sm:$0xff] }
 0x4cf   : > { %1508 = vadd.xlane.f32.xlu1 %v1507_v16  ;;  %v1627_v16 = vld [vmem:[%s5953_s1 + $0x1d0] sm:$0xff]  ;;  %2477 = vmatprep.subr.bf16.mxu1 %v3903_v10  ;;  %v3942_v4 = vcombine.low %v1659_v0, %v1663_v1  ;;  %v3947_v7 = vcombine.high %v1665_v5, %v1669_v6  ;;  %v3946_v12 = vcombine.low %v1665_v5, %v1669_v6  ;;  %v1677_v18 = vld [vmem:[%s5953_s1 + $0x360] sm:$0xff] }
 0x4d0   : > { %v3911_v21 = vcombine.high %v1627_v16, %v1631_v17  ;;  %2393 = vmatprep.subr.bf16.mxu0 %v3907_v20  ;;  %v3910_v27 = vcombine.low %v1627_v16, %v1631_v17  ;;  %v1671_v10 = vld [vmem:[%s5953_s1 + $0x330] sm:$0xff]  ;;  %v1673_v17 = vld [vmem:[%s5953_s1 + $0x340] sm:$0xff] }
 0x4d1   : > { %v3951_v15 = vcombine.high %v1667_v9, %v1671_v10  ;;  %v3950_v16 = vcombine.low %v1667_v9, %v1671_v10  ;;  %v1675_v20 = vld [vmem:[%s5953_s1 + $0x350] sm:$0xff]  ;;  %v3954_v22 = vcombine.low %v1673_v17, %v1677_v18  ;;  %v1502_v51 = vld [vmem:[%s5954_s19] sm:$0x3]  ;;  %v1578_v9 = vld [vmem:[%s5953_s1 + $0x48] sm:$0xff] }
 0x4d2   : > { %2478 = vmatpush1.bf16.msra.mxu1 %v3902_v19  ;;  %2394 = vmatpush1.bf16.msra.mxu0 %v3906_v26  ;;  %v3955_v19 = vcombine.high %v1673_v17, %v1677_v18  ;;  %v1685_v26 = vld [vmem:[%s5953_s1 + $0x3a0] sm:$0xff] }
 0x4d3   : > { %2479 = vmatprep.subr.bf16.mxu1 %v3911_v21  ;;  %2395 = vmatprep.subr.bf16.mxu0 %v3915_v28  ;;  %v1679_v21 = vld [vmem:[%s5953_s1 + $0x370] sm:$0xff]  ;;  %v3962_v30 = vcombine.low %v1681_v25, %v1685_v26  ;;  %v4332_v17 = vld [vmem:[%s5956_s7] ss:$8 sps:$4 sm:$0xff]   ;;  %v4334_v18 = vld [vmem:[%s5956_s7 + $0x4] ss:$8 sps:$4 sm:$0xff]  }
 0x4d4   : > { %v3959_v23 = vcombine.high %v1675_v20, %v1679_v21  ;;  %v3958_v24 = vcombine.low %v1675_v20, %v1679_v21  ;;  %v1683_v28 = vld [vmem:[%s5953_s1 + $0x390] sm:$0xff] }
 0x4d5   : > { %v4337_v20 = vld [vmem:[%s5956_s7 + $0x14] ss:$8 sps:$4 sm:$0xff]  }
 0x4d6   : > { %2480 = vmatpush1.bf16.msra.mxu1 %v3910_v27  ;;  %2396 = vmatpush1.bf16.msra.mxu0 %v3914_v32  ;;  %v3963_v27 = vcombine.high %v1681_v25, %v1685_v26  ;;  %v4340_v25 = vld [vmem:[%s5956_s7 + $0x24] ss:$8 sps:$4 sm:$0xff]  }
 0x4d7   : > { %2481 = vmatprep.subr.bf16.mxu1 %v3919_v29  ;;  %2397 = vmatprep.subr.bf16.mxu0 %v3923_v34  ;;  %v1687_v29 = vld [vmem:[%s5953_s1 + $0x3b0] sm:$0xff]  ;;  %v1693_v34 = vld [vmem:[%s5953_s1 + $0x3e0] sm:$0xff] }
 0x4d8   : > { %v3967_v31 = vcombine.high %v1683_v28, %v1687_v29  ;;  %v3966_v32 = vcombine.low %v1683_v28, %v1687_v29  ;;  %v1602_v28 = vld [vmem:[%s5953_s1 + $0x108] sm:$0xff] }
 0x4d9   : > { %v1606_v29 = vld [vmem:[%s5953_s1 + $0x128] sm:$0xff] }
 0x4da   : > { %2482 = vmatpush1.bf16.msra.mxu1 %v3918_v33  ;;  %2398 = vmatpush1.bf16.msra.mxu0 %v3922_v35  ;;  %v1689_v33 = vld [vmem:[%s5953_s1 + $0x3c0] sm:$0xff]  ;;  %v1691_v35 = vld [vmem:[%s5953_s1 + $0x3d0] sm:$0xff] }
 0x4db   : > { %2399 = vmatprep.subr.bf16.mxu0 %v3931_v52 }
 0x4de   : > { %2400 = vmatpush1.bf16.msra.mxu0 %v3930_v57  ;;  %v1503_v57 = vld [vmem:[%s5955_s25] sm:$0x3] }
 0x4df   : > { %2401 = vmatprep.subr.bf16.mxu0 %v3939_v63  ;;  %v1560_v62 = vrot.slane %v1503_v57, %v4986_v58  ;;  %v1556_v63 = vrot.slane %v1503_v57, %v4980_v56  ;;  %v4355_v57 = vld [vmem:[%s5956_s7 + $0x74] ss:$8 sps:$4 sm:$0xff]  }
 0x4e2   : > { %2402 = vmatpush1.bf16.msra.mxu0 %v3938_v2 }
 0x4e3   : > { %2403 = vmatprep.subr.bf16.mxu0 %v3947_v7 }
 0x4e6   : > { %2404 = vmatpush1.bf16.msra.mxu0 %v3946_v12 }
 0x4e7   : > { %2405 = vmatprep.subr.bf16.mxu0 %v3955_v19 }
 0x4ea   : > { %2406 = vmatpush1.bf16.msra.mxu0 %v3954_v22  ;;  %v1594_v22 = vld [vmem:[%s5953_s1 + $0xc8] sm:$0xff] }
 0x4eb   : > { %2407 = vmatprep.subr.bf16.mxu0 %v3963_v27 }
 0x4ee   : > { %2408 = vmatpush1.bf16.msra.mxu0 %v3962_v30  ;;  %v4338_v30 = vld [vmem:[%s5956_s7 + $0x20] ss:$8 sps:$4 sm:$0xff]  }
 0x55a   : > { %v1506_v36 = vpop.xlane.xlu0 %1505 }
 0x55b   : > { %v1511_v37 = vmul.f32 0.00390625, %v1506_v36  ;;  %v3970_v36 = vcombine.low %v1689_v33, %v1693_v34 }
 0x55c   : > { %v1509_v38 = vpop.xlane.xlu1 %1508 }
 0x55d   : > { %v5119_v39 = vsub.f32 %v4992_v8, %v1511_v37  ;;  %v5122_v40 = vsub.f32 %v4994_v11, %v1511_v37  ;;  %v1512_v41 = vmul.f32 0.00390625, %v1509_v38  ;;  %v3971_v37 = vcombine.high %v1689_v33, %v1693_v34  ;;  %v1695_v38 = vld [vmem:[%s5953_s1 + $0x3f0] sm:$0xff]  ;;  %v1610_v34 = vld [vmem:[%s5953_s1 + $0x148] sm:$0xff] }
 0x55e   : > { %v3885_v33 = vcombine.high %v1602_v28, %v1606_v29 }
 0x55f   : > { %v5125_v42 = vsub.f32 %v4996_v13, %v1512_v41  ;;  %v5128_v43 = vsub.f32 %v4998_v14, %v1512_v41  ;;  %v1517_v44 = vmul.f32 %v5119_v39, %v5119_v39  ;;  %v1518_v45 = vmul.f32 %v5122_v40, %v5122_v40  ;;  %v1643_v13 = vld [vmem:[%s5953_s1 + $0x250] sm:$0xff]  ;;  %2409 = vmatprep.subr.bf16.mxu0 %v3971_v37  ;;  %v4346_v37 = vld [vmem:[%s5956_s7 + $0x44] ss:$8 sps:$4 sm:$0xff]  }
 0x560   : > { %v1647_v14 = vld [vmem:[%s5953_s1 + $0x270] sm:$0xff]  ;;  %v3975_v41 = vcombine.high %v1691_v35, %v1695_v38  ;;  %2410 = vmatpush1.bf16.msra.mxu0 %v3970_v36 }
 0x561   : > { %v1521_v46 = vadd.f32 %v1518_v45, %v1517_v44  ;;  %v1519_v8 = vmul.f32 %v5125_v42, %v5125_v42  ;;  %v1520_v11 = vmul.f32 %v5128_v43, %v5128_v43  ;;  %v3927_v48 = vcombine.high %v1643_v13, %v1647_v14  ;;  %v1570_v45 = vld [vmem:[%s5953_s1 + $0x8] sm:$0xff]  ;;  %v4341_v36 = vld [vmem:[%s5956_s7 + $0x30] ss:$8 sps:$4 sm:$0xff]  }
 0x562   : > { %v3926_v49 = vcombine.low %v1643_v13, %v1647_v14  ;;  %v3974_v44 = vcombine.low %v1691_v35, %v1695_v38  ;;  %v1614_v35 = vld [vmem:[%s5953_s1 + $0x168] sm:$0xff]  ;;  %v3884_v38 = vcombine.low %v1602_v28, %v1606_v29  ;;  %v4365_v29 = vld [vmem:[%s5956_s7 + $0xb0] ss:$8 sps:$4 sm:$0xff]  }
 0x563   : > { %1522 = vadd.xlane.f32.xlu0 %v1521_v46  ;;  %v1524_v47 = vadd.f32 %v1520_v11, %v1519_v8  ;;  %2483 = vmatprep.subr.bf16.mxu1 %v3927_v48  ;;  %v1574_v46 = vld [vmem:[%s5953_s1 + $0x28] sm:$0xff] }
 0x564   : > { %2484 = vmatpush1.bf16.msra.mxu1 %v3926_v49  ;;  %v3853_v8 = vcombine.high %v1570_v45, %v1574_v46  ;;  %v3852_v11 = vcombine.low %v1570_v45, %v1574_v46  ;;  %v1622_v45 = vld [vmem:[%s5953_s1 + $0x1a8] sm:$0xff] }
 0x565   : > { %2485 = vmatprep.subr.bf16.mxu1 %v3935_v59  ;;  %v1545_v59 = vrot.slane %v1502_v51, %v4986_v58  ;;  %v4344_v46 = vld [vmem:[%s5956_s7 + $0x40] ss:$8 sps:$4 sm:$0xff]  }
 0x566   : > { %2422 = vmatprep.subr.bf16.mxu0 %v3853_v8  ;;  %v4349_v8 = vld [vmem:[%s5956_s7 + $0x54] ss:$8 sps:$4 sm:$0xff]   ;;  %v1678_v28 = vld [vmem:[%s5953_s1 + $0x368] sm:$0xff] }
 0x567   : > { %1525 = vadd.xlane.f32.xlu0 %v1524_v47 }
 0x568   : > { %2486 = vmatpush1.bf16.msra.mxu1 %v3934_v60  ;;  %v1541_v60 = vrot.slane %v1502_v51, %v4980_v56 }
 0x569   : > { %2487 = vmatprep.subr.bf16.mxu1 %v3943_v3 }
 0x56c   : > { %2488 = vmatpush1.bf16.msra.mxu1 %v3942_v4 }
 0x56d   : > { %2489 = vmatprep.subr.bf16.mxu1 %v3951_v15  ;;  %v1586_v15 = vld [vmem:[%s5953_s1 + $0x88] sm:$0xff] }
 0x570   : > { %2490 = vmatpush1.bf16.msra.mxu1 %v3950_v16  ;;  %v1590_v16 = vld [vmem:[%s5953_s1 + $0xa8] sm:$0xff] }
 0x571   : > { %2491 = vmatprep.subr.bf16.mxu1 %v3959_v23  ;;  %v3869_v21 = vcombine.high %v1586_v15, %v1590_v16  ;;  %v1598_v23 = vld [vmem:[%s5953_s1 + $0xe8] sm:$0xff]  ;;  %v3868_v26 = vcombine.low %v1586_v15, %v1590_v16 }
 0x572   : > { %v3877_v27 = vcombine.high %v1594_v22, %v1598_v23  ;;  %v1658_v15 = vld [vmem:[%s5953_s1 + $0x2c8] sm:$0xff] }
 0x573   : > { %v1662_v16 = vld [vmem:[%s5953_s1 + $0x2e8] sm:$0xff] }
 0x574   : > { %2492 = vmatpush1.bf16.msra.mxu1 %v3958_v24  ;;  %v4335_v24 = vld [vmem:[%s5956_s7 + $0x10] ss:$8 sps:$4 sm:$0xff]  }
 0x575   : > { %2493 = vmatprep.subr.bf16.mxu1 %v3967_v31  ;;  %v4343_v31 = vld [vmem:[%s5956_s7 + $0x34] ss:$8 sps:$4 sm:$0xff]  }
 0x578   : > { %2494 = vmatpush1.bf16.msra.mxu1 %v3966_v32  ;;  %v3876_v32 = vcombine.low %v1594_v22, %v1598_v23  ;;  %v1670_v22 = vld [vmem:[%s5953_s1 + $0x328] sm:$0xff] }
 0x579   : > { %2495 = vmatprep.subr.bf16.mxu1 %v3975_v41  ;;  %v3893_v41 = vcombine.high %v1610_v34, %v1614_v35  ;;  %v4362_v23 = vld [vmem:[%s5956_s7 + $0xa0] ss:$8 sps:$4 sm:$0xff]  }
 0x57c   : > { %2496 = vmatpush1.bf16.msra.mxu1 %v3974_v44  ;;  %v1618_v44 = vld [vmem:[%s5953_s1 + $0x188] sm:$0xff] }
 0x57d   : > { %3355 = vmatprep.subr.bf16.mxu1 %v4334_v18  ;;  %v4364_v18 = vld [vmem:[%s5956_s7 + $0xa4] ss:$8 sps:$4 sm:$0xff]  }
 0x5f0   : > { %v1523_v47 = vpop.xlane.xlu0 %1522 }
 0x5f1   : > { %v1527_v13 = vmul.f32 0.00390625, %v1523_v47  ;;  %v3901_v47 = vcombine.high %v1618_v44, %v1622_v45 }
 0x5f3   : > { %v1529_v14 = vadd.f32 1e-05, %v1527_v13  ;;  %v1626_v13 = vld [vmem:[%s5953_s1 + $0x1c8] sm:$0xff] }
 0x5f4   : > { %v1526_v48 = vpop.xlane.xlu0 %1525 }
 0x5f5   : > { %4532 = vrsqrt.f32 %v1529_v14  ;;  %v1528_v49 = vmul.f32 0.00390625, %v1526_v48  ;;  %v1630_v14 = vld [vmem:[%s5953_s1 + $0x1e8] sm:$0xff]  ;;  %v4347_v48 = vld [vmem:[%s5956_s7 + $0x50] ss:$8 sps:$4 sm:$0xff]  }
 0x5f6   : > { %v3909_v51 = vcombine.high %v1626_v13, %v1630_v14 }
 0x5f7   : > { %v1530_v50 = vadd.f32 1e-05, %v1528_v49  ;;  %v4352_v49 = vld [vmem:[%s5956_s7 + $0x64] ss:$8 sps:$4 sm:$0xff]  }
 0x5f9   : > { %4534 = vrsqrt.f32 %v1530_v50  ;;  %v3900_v50 = vcombine.low %v1618_v44, %v1622_v45  ;;  %v1694_v44 = vld [vmem:[%s5953_s1 + $0x3e8] sm:$0xff]  ;;  %v4371_v45 = vld [vmem:[%s5956_s7 + $0xd0] ss:$8 sps:$4 sm:$0xff]  }
 0x5ff   : > { %v4533_v52 = vpop.eup %4532 }
 0x600   : > { %v1533_v53 = vmul.f32 %v4533_v52, %v5119_v39  ;;  %v1534_v54 = vmul.f32 %v4533_v52, %v5122_v40  ;;  %v1634_v52 = vld [vmem:[%s5953_s1 + $0x208] sm:$0xff] }
 0x602   : > { %v1549_v39 = vmul.f32 %v1545_v59, %v1534_v54  ;;  %v1548_v2 = vmul.f32 %v1541_v60, %v1533_v53  ;;  %v1638_v53 = vld [vmem:[%s5953_s1 + $0x228] sm:$0xff] }
 0x603   : > { %v4535_v61 = vpop.eup %4534  ;;  %v4350_v54 = vld [vmem:[%s5956_s7 + $0x60] ss:$8 sps:$4 sm:$0xff]  }
 0x604   : > { %v1535_v0 = vmul.f32 %v4535_v61, %v5125_v42  ;;  %v1536_v1 = vmul.f32 %v4535_v61, %v5128_v43  ;;  %v5236_v4 = vadd.f32 %v1560_v62, %v1549_v39  ;;  %v5240_v6 = vadd.f32 %v1556_v63, %v1548_v2  ;;  %v1582_v42 = vld [vmem:[%s5953_s1 + $0x68] sm:$0xff] }
 0x605   : > { %v3861_v12 = vcombine.high %v1578_v9, %v1582_v42  ;;  %v3860_v19 = vcombine.low %v1578_v9, %v1582_v42  ;;  %v1642_v61 = vld [vmem:[%s5953_s1 + $0x248] sm:$0xff]  ;;  %v4361_v9 = vld [vmem:[%s5956_s7 + $0x94] ss:$8 sps:$4 sm:$0xff]  }
 0x606   : > { %v1551_v40 = vmul.f32 %v1545_v59, %v1536_v1  ;;  %v1550_v3 = vmul.f32 %v1541_v60, %v1535_v0  ;;  %v3908_v59 = vcombine.low %v1626_v13, %v1630_v14  ;;  %v3917_v60 = vcombine.high %v1634_v52, %v1638_v53  ;;  %v4358_v0 = vld [vmem:[%s5956_s7 + $0x84] ss:$8 sps:$4 sm:$0xff]  }
 0x607   : > { %v3916_v1 = vcombine.low %v1634_v52, %v1638_v53  ;;  %v1650_v2 = vld [vmem:[%s5953_s1 + $0x288] sm:$0xff]  ;;  %v1588_v52 = vld [vmem:[%s5953_s1 + $0x98] sm:$0xff] }
 0x608   : > { %v5238_v5 = vadd.f32 %v1560_v62, %v1551_v40  ;;  %v5242_v7 = vadd.f32 %v1556_v63, %v1550_v3  ;;  %v1646_v62 = vld [vmem:[%s5953_s1 + $0x268] sm:$0xff]  ;;  %v4353_v63 = vld [vmem:[%s5956_s7 + $0x70] ss:$8 sps:$4 sm:$0xff]  }
 0x609   : > { %v3925_v39 = vcombine.high %v1642_v61, %v1646_v62  ;;  %v1654_v40 = vld [vmem:[%s5953_s1 + $0x2a8] sm:$0xff]  ;;  %v3924_v42 = vcombine.low %v1642_v61, %v1646_v62  ;;  %v1592_v53 = vld [vmem:[%s5953_s1 + $0xb8] sm:$0xff] }
 0x60a   : > { %v5252_v43 = vpack.c.bf16 %v5238_v5, %v5236_v4  ;;  %v5256_v10 = vpack.c.bf16 %v5242_v7, %v5240_v6  ;;  %v4356_v3 = vld [vmem:[%s5956_s7 + $0x80] ss:$8 sps:$4 sm:$0xff]   ;;  %v3872_v61 = vcombine.low %v1588_v52, %v1592_v53 }
 0x60c   : > { %2411 = vmatprep.mubr.bf16.mxu0 %v5252_v43  ;;  %2497 = vmatprep.mubr.bf16.mxu1 %v5252_v43 }
 0x60d   : > { %2412 = vmatmul.mubr.bf16.vlgmr.msra.gmra.mrb[4].mxu0 %v5256_v10  ;;  %2498 = vmatmul.mubr.bf16.vlgmr.msra.gmra.mrb[0].mxu1 %v5256_v10 }
 0x60e   : > { %2423 = vmatpush1.bf16.msra.mxu0 %v3852_v11  ;;  %2454 = vmatprep.mubr.bf16.mxu0 %v5252_v43  ;;  %v3892_v11 = vcombine.low %v1610_v34, %v1614_v35  ;;  %v1686_v34 = vld [vmem:[%s5953_s1 + $0x3a8] sm:$0xff] }
 0x60f   : > { %2424 = vmatprep.subr.bf16.mxu0 %v3861_v12  ;;  %3356 = vmatpush1.bf16.msra.mxu1 %v4332_v17  ;;  %v3933_v12 = vcombine.high %v1650_v2, %v1654_v40  ;;  %v4359_v17 = vld [vmem:[%s5956_s7 + $0x90] ss:$8 sps:$4 sm:$0xff]   ;;  %v4368_v35 = vld [vmem:[%s5956_s7 + $0xc0] ss:$8 sps:$4 sm:$0xff]  }
 0x610   : > { %3357 = vmatprep.subr.bf16.mxu1 %v4337_v20  ;;  %v3941_v20 = vcombine.high %v1658_v15, %v1662_v16 }
 0x612   : > { %2425 = vmatpush1.bf16.msra.mxu0 %v3860_v19  ;;  %v3932_v19 = vcombine.low %v1650_v2, %v1654_v40  ;;  %v1616_v2 = vld [vmem:[%s5953_s1 + $0x178] sm:$0xff] }
 0x613   : > { %2426 = vmatprep.subr.bf16.mxu0 %v3869_v21  ;;  %3358 = vmatpush1.bf16.msra.mxu1 %v4335_v24  ;;  %v1666_v21 = vld [vmem:[%s5953_s1 + $0x308] sm:$0xff]  ;;  %v4367_v24 = vld [vmem:[%s5956_s7 + $0xb4] ss:$8 sps:$4 sm:$0xff]  }
 0x614   : > { %3359 = vmatprep.subr.bf16.mxu1 %v4340_v25  ;;  %v3940_v25 = vcombine.low %v1658_v15, %v1662_v16  ;;  %v1628_v16 = vld [vmem:[%s5953_s1 + $0x1d8] sm:$0xff] }
 0x616   : > { %2427 = vmatpush1.bf16.msra.mxu0 %v3868_v26  ;;  %v3949_v26 = vcombine.high %v1666_v21, %v1670_v22 }
 0x617   : > { %2428 = vmatprep.subr.bf16.mxu0 %v3877_v27  ;;  %3360 = vmatpush1.bf16.msra.mxu1 %v4338_v30  ;;  %v1674_v27 = vld [vmem:[%s5953_s1 + $0x348] sm:$0xff] }
 0x618   : > { %3361 = vmatprep.subr.bf16.mxu1 %v4343_v31  ;;  %v4370_v30 = vld [vmem:[%s5956_s7 + $0xc4] ss:$8 sps:$4 sm:$0xff]   ;;  %v3948_v31 = vcombine.low %v1666_v21, %v1670_v22  ;;  %v1636_v22 = vld [vmem:[%s5953_s1 + $0x218] sm:$0xff] }
 0x61a   : > { %2429 = vmatpush1.bf16.msra.mxu0 %v3876_v32  ;;  %v3957_v32 = vcombine.high %v1674_v27, %v1678_v28 }
 0x61b   : > { %2430 = vmatprep.subr.bf16.mxu0 %v3885_v33  ;;  %3362 = vmatpush1.bf16.msra.mxu1 %v4341_v36  ;;  %v1682_v33 = vld [vmem:[%s5953_s1 + $0x388] sm:$0xff]  ;;  %v4373_v36 = vld [vmem:[%s5956_s7 + $0xd4] ss:$8 sps:$4 sm:$0xff]  }
 0x61c   : > { %3363 = vmatprep.subr.bf16.mxu1 %v4346_v37  ;;  %v3956_v37 = vcombine.low %v1674_v27, %v1678_v28  ;;  %v1644_v28 = vld [vmem:[%s5953_s1 + $0x258] sm:$0xff] }
 0x61e   : > { %2431 = vmatpush1.bf16.msra.mxu0 %v3884_v38  ;;  %v3965_v38 = vcombine.high %v1682_v33, %v1686_v34 }
 0x61f   : > { %2432 = vmatprep.subr.bf16.mxu0 %v3893_v41  ;;  %3364 = vmatpush1.bf16.msra.mxu1 %v4344_v46  ;;  %v1690_v41 = vld [vmem:[%s5953_s1 + $0x3c8] sm:$0xff]  ;;  %v3964_v46 = vcombine.low %v1682_v33, %v1686_v34  ;;  %v1652_v33 = vld [vmem:[%s5953_s1 + $0x298] sm:$0xff] }
 0x620   : > { %3365 = vmatprep.subr.bf16.mxu1 %v4349_v8  ;;  %v3973_v8 = vcombine.high %v1690_v41, %v1694_v44  ;;  %v3972_v13 = vcombine.low %v1690_v41, %v1694_v44  ;;  %v1656_v34 = vld [vmem:[%s5953_s1 + $0x2b8] sm:$0xff] }
 0x621   : > { %v3936_v41 = vcombine.low %v1652_v33, %v1656_v34 }
 0x622   : > { %2433 = vmatpush1.bf16.msra.mxu0 %v3892_v11  ;;  %v1572_v11 = vld [vmem:[%s5953_s1 + $0x18] sm:$0xff] }
 0x623   : > { %2434 = vmatprep.subr.bf16.mxu0 %v3901_v47  ;;  %3366 = vmatpush1.bf16.msra.mxu1 %v4347_v48  ;;  %v1576_v47 = vld [vmem:[%s5953_s1 + $0x38] sm:$0xff] }
 0x624   : > { %3367 = vmatprep.subr.bf16.mxu1 %v4352_v49  ;;  %v3857_v14 = vcombine.high %v1572_v11, %v1576_v47  ;;  %v1580_v48 = vld [vmem:[%s5953_s1 + $0x58] sm:$0xff] }
 0x625   : > { %v1584_v49 = vld [vmem:[%s5953_s1 + $0x78] sm:$0xff] }
 0x626   : > { %2435 = vmatpush1.bf16.msra.mxu0 %v3900_v50  ;;  %v3856_v50 = vcombine.low %v1572_v11, %v1576_v47  ;;  %v1676_v47 = vld [vmem:[%s5953_s1 + $0x358] sm:$0xff] }
 0x627   : > { %2436 = vmatprep.subr.bf16.mxu0 %v3909_v51  ;;  %3368 = vmatpush1.bf16.msra.mxu1 %v4350_v54  ;;  %v3865_v51 = vcombine.high %v1580_v48, %v1584_v49  ;;  %v3864_v54 = vcombine.low %v1580_v48, %v1584_v49  ;;  %v1684_v49 = vld [vmem:[%s5953_s1 + $0x398] sm:$0xff] }
 0x628   : > { %3369 = vmatprep.subr.bf16.mxu1 %v4355_v57  ;;  %v3873_v57 = vcombine.high %v1588_v52, %v1592_v53  ;;  %v1692_v53 = vld [vmem:[%s5953_s1 + $0x3d8] sm:$0xff] }
 0x62a   : > { %2437 = vmatpush1.bf16.msra.mxu0 %v3908_v59  ;;  %v1596_v59 = vld [vmem:[%s5953_s1 + $0xd8] sm:$0xff] }
 0x62b   : > { %2438 = vmatprep.subr.bf16.mxu0 %v3917_v60  ;;  %3370 = vmatpush1.bf16.msra.mxu1 %v4353_v63  ;;  %v1600_v60 = vld [vmem:[%s5953_s1 + $0xf8] sm:$0xff] }
 0x62c   : > { %3371 = vmatprep.subr.bf16.mxu1 %v4358_v0  ;;  %v3881_v62 = vcombine.high %v1596_v59, %v1600_v60  ;;  %v1604_v63 = vld [vmem:[%s5953_s1 + $0x118] sm:$0xff]  ;;  %v3880_v0 = vcombine.low %v1596_v59, %v1600_v60 }
 0x62e   : > { %2439 = vmatpush1.bf16.msra.mxu0 %v3916_v1 }
 0x62f   : > { %2440 = vmatprep.subr.bf16.mxu0 %v3925_v39  ;;  %3372 = vmatpush1.bf16.msra.mxu1 %v4356_v3  ;;  %v1612_v39 = vld [vmem:[%s5953_s1 + $0x158] sm:$0xff] }
 0x630   : > { %3373 = vmatprep.subr.bf16.mxu1 %v4361_v9  ;;  %v3897_v3 = vcombine.high %v1612_v39, %v1616_v2  ;;  %v1620_v9 = vld [vmem:[%s5953_s1 + $0x198] sm:$0xff] }
 0x632   : > { %2441 = vmatpush1.bf16.msra.mxu0 %v3924_v42  ;;  %v1624_v42 = vld [vmem:[%s5953_s1 + $0x1b8] sm:$0xff] }
 0x633   : > { %2442 = vmatprep.subr.bf16.mxu0 %v3933_v12  ;;  %3374 = vmatpush1.bf16.msra.mxu1 %v4359_v17  ;;  %v3896_v12 = vcombine.low %v1612_v39, %v1616_v2  ;;  %v3905_v15 = vcombine.high %v1620_v9, %v1624_v42  ;;  %v1632_v17 = vld [vmem:[%s5953_s1 + $0x1f8] sm:$0xff] }
 0x634   : > { %3375 = vmatprep.subr.bf16.mxu1 %v4364_v18  ;;  %v4376_v18 = vld [vmem:[%s5956_s7 + $0xe4] ss:$8 sps:$4 sm:$0xff]   ;;  %v3913_v21 = vcombine.high %v1628_v16, %v1632_v17 }
 0x636   : > { %2443 = vmatpush1.bf16.msra.mxu0 %v3932_v19  ;;  %v3904_v19 = vcombine.low %v1620_v9, %v1624_v42 }
 0x637   : > { %2444 = vmatprep.subr.bf16.mxu0 %v3941_v20  ;;  %3376 = vmatpush1.bf16.msra.mxu1 %v4362_v23  ;;  %v4374_v20 = vld [vmem:[%s5956_s7 + $0xe0] ss:$8 sps:$4 sm:$0xff]   ;;  %v1640_v23 = vld [vmem:[%s5953_s1 + $0x238] sm:$0xff] }
 0x638   : > { %3377 = vmatprep.subr.bf16.mxu1 %v4367_v24  ;;  %v4379_v24 = vld [vmem:[%s5956_s7 + $0xf4] ss:$8 sps:$4 sm:$0xff]   ;;  %v3921_v27 = vcombine.high %v1636_v22, %v1640_v23 }
 0x63a   : > { %2445 = vmatpush1.bf16.msra.mxu0 %v3940_v25  ;;  %v3912_v25 = vcombine.low %v1628_v16, %v1632_v17 }
 0x63b   : > { %2446 = vmatprep.subr.bf16.mxu0 %v3949_v26  ;;  %3378 = vmatpush1.bf16.msra.mxu1 %v4365_v29  ;;  %v4377_v26 = vld [vmem:[%s5956_s7 + $0xf0] ss:$8 sps:$4 sm:$0xff]  }
 0x63c   : > { %3379 = vmatprep.subr.bf16.mxu1 %v4370_v30  ;;  %v1648_v29 = vld [vmem:[%s5953_s1 + $0x278] sm:$0xff]  ;;  %v4382_v30 = vld [vmem:[%s5956_s7 + $0x104] ss:$8 sps:$4 sm:$0xff]  }
 0x63e   : > { %2447 = vmatpush1.bf16.msra.mxu0 %v3948_v31  ;;  %v3920_v31 = vcombine.low %v1636_v22, %v1640_v23 }
 0x63f   : > { %2448 = vmatprep.subr.bf16.mxu0 %v3957_v32  ;;  %3380 = vmatpush1.bf16.msra.mxu1 %v4368_v35  ;;  %v3929_v32 = vcombine.high %v1644_v28, %v1648_v29  ;;  %v3928_v35 = vcombine.low %v1644_v28, %v1648_v29 }
 0x640   : > { %3381 = vmatprep.subr.bf16.mxu1 %v4373_v36  ;;  %v3937_v36 = vcombine.high %v1652_v33, %v1656_v34 }
 0x642   : > { %2449 = vmatpush1.bf16.msra.mxu0 %v3956_v37  ;;  %v1660_v37 = vld [vmem:[%s5953_s1 + $0x2d8] sm:$0xff] }
 0x643   : > { %2450 = vmatprep.subr.bf16.mxu0 %v3965_v38  ;;  %3382 = vmatpush1.bf16.msra.mxu1 %v4371_v45  ;;  %v1664_v38 = vld [vmem:[%s5953_s1 + $0x2f8] sm:$0xff] }
 0x644   : > { %3383 = vmatprep.subr.bf16.mxu1 %v4376_v18  ;;  %v3945_v44 = vcombine.high %v1660_v37, %v1664_v38  ;;  %v1668_v45 = vld [vmem:[%s5953_s1 + $0x318] sm:$0xff] }
 0x646   : > { %2451 = vmatpush1.bf16.msra.mxu0 %v3964_v46  ;;  %v1672_v46 = vld [vmem:[%s5953_s1 + $0x338] sm:$0xff] }
 0x647   : > { %2452 = vmatprep.subr.bf16.mxu0 %v3973_v8  ;;  %3384 = vmatpush1.bf16.msra.mxu1 %v4374_v20  ;;  %v3944_v8 = vcombine.low %v1660_v37, %v1664_v38  ;;  %v3953_v11 = vcombine.high %v1668_v45, %v1672_v46  ;;  %v4385_v37 = vld [vmem:[%s5956_s7 + $0x114] ss:$8 sps:$4 sm:$0xff]   ;;  %v4383_v38 = vld [vmem:[%s5956_s7 + $0x110] ss:$8 sps:$4 sm:$0xff]  }
 0x648   : > { %3385 = vmatprep.subr.bf16.mxu1 %v4379_v24 }
 0x64a   : > { %2453 = vmatpush1.bf16.msra.mxu0 %v3972_v13  ;;  %v1680_v13 = vld [vmem:[%s5953_s1 + $0x378] sm:$0xff] }
 0x64b   : > { %2508 = vmatprep.subr.bf16.mxu0 %v3857_v14  ;;  %3386 = vmatpush1.bf16.msra.mxu1 %v4377_v26  ;;  %v3952_v14 = vcombine.low %v1668_v45, %v1672_v46  ;;  %v3961_v48 = vcombine.high %v1676_v47, %v1680_v13  ;;  %v4391_v45 = vld [vmem:[%s5956_s7 + $0x134] ss:$8 sps:$4 sm:$0xff]   ;;  %v4389_v46 = vld [vmem:[%s5956_s7 + $0x130] ss:$8 sps:$4 sm:$0xff]  }
 0x64c   : > { %3398 = vmatprep.subr.bf16.mxu1 %v4382_v30 }
 0x64d   : > { %2455 = vmatmul.mubr.bf16.vlgmr.msra.gmra.mrb[8].mxu0 %v5256_v10 }
 0x64e   : > { %2509 = vmatpush1.bf16.msra.mxu0 %v3856_v50  ;;  %2540 = vmatprep.mubr.bf16.mxu0 %v5252_v43  ;;  %v1608_v43 = vld [vmem:[%s5953_s1 + $0x138] sm:$0xff] }
 0x64f   : > { %2510 = vmatprep.subr.bf16.mxu0 %v3865_v51  ;;  %v3889_v1 = vcombine.high %v1604_v63, %v1608_v43  ;;  %v3888_v40 = vcombine.low %v1604_v63, %v1608_v43  ;;  %v1688_v50 = vld [vmem:[%s5953_s1 + $0x3b8] sm:$0xff]  ;;  %v3960_v51 = vcombine.low %v1676_v47, %v1680_v13  ;;  %v1721_v63 = vsub.s32 5, %v4977_v55 }
 0x650   : > { %v3969_v52 = vcombine.high %v1684_v49, %v1688_v50  ;;  %v4397_v47 = vld [vmem:[%s5956_s7 + $0x154] ss:$8 sps:$4 sm:$0xff]   ;;  %v4395_v13 = vld [vmem:[%s5956_s7 + $0x150] ss:$8 sps:$4 sm:$0xff]  }
 0x652   : > { %2511 = vmatpush1.bf16.msra.mxu0 %v3864_v54  ;;  %v1696_v54 = vld [vmem:[%s5953_s1 + $0x3f8] sm:$0xff] }
 0x653   : > { %2512 = vmatprep.subr.bf16.mxu0 %v3873_v57  ;;  %v3968_v57 = vcombine.low %v1684_v49, %v1688_v50  ;;  %v3977_v59 = vcombine.high %v1692_v53, %v1696_v54  ;;  %v3976_v60 = vcombine.low %v1692_v53, %v1696_v54  ;;  %v4403_v49 = vld [vmem:[%s5956_s7 + $0x174] ss:$8 sps:$4 sm:$0xff]   ;;  %v4401_v50 = vld [vmem:[%s5956_s7 + $0x170] ss:$8 sps:$4 sm:$0xff]  }
 0x654   : > { %v4409_v53 = vld [vmem:[%s5956_s7 + $0x194] ss:$8 sps:$4 sm:$0xff]   ;;  %v4407_v54 = vld [vmem:[%s5956_s7 + $0x190] ss:$8 sps:$4 sm:$0xff]  }
 0x656   : > { %2513 = vmatpush1.bf16.msra.mxu0 %v3872_v61  ;;  %v1717_v61 = vsub.s32 4, %v4977_v55 }
 0x657   : > { %2514 = vmatprep.subr.bf16.mxu0 %v3881_v62  ;;  %v5549_v62 = vld [vmem:[%s5957_s18] sm:$0xff] }
 0x658   : > { %v1702_v43 = vrot.slane %v5549_v62, %v4980_v56  ;;  %v1722_v39 = vrot.slane %v5549_v62, %v1721_v63  ;;  %v4418_v63 = vld [vmem:[%s5956_s7 + $0x1c4] ss:$8 sps:$4 sm:$0xff]  }
 0x65a   : > { %2515 = vmatpush1.bf16.msra.mxu0 %v3880_v0  ;;  %v1718_v0 = vrot.slane %v5549_v62, %v1717_v61  ;;  %v4413_v61 = vld [vmem:[%s5956_s7 + $0x1b0] ss:$8 sps:$4 sm:$0xff]  }
 0x65b   : > { %2516 = vmatprep.subr.bf16.mxu0 %v3889_v1  ;;  %v1706_v1 = vrot.slane %v5549_v62, %v4986_v58 }
 0x65e   : > { %2517 = vmatpush1.bf16.msra.mxu0 %v3888_v40 }
 0x65f   : > { %2518 = vmatprep.subr.bf16.mxu0 %v3897_v3 }
 0x662   : > { %2519 = vmatpush1.bf16.msra.mxu0 %v3896_v12 }
 0x663   : > { %2520 = vmatprep.subr.bf16.mxu0 %v3905_v15 }
 0x666   : > { %2521 = vmatpush1.bf16.msra.mxu0 %v3904_v19 }
 0x667   : > { %2522 = vmatprep.subr.bf16.mxu0 %v3913_v21 }
 0x66a   : > { %2523 = vmatpush1.bf16.msra.mxu0 %v3912_v25 }
 0x66b   : > { %2524 = vmatprep.subr.bf16.mxu0 %v3921_v27 }
 0x66e   : > { %2525 = vmatpush1.bf16.msra.mxu0 %v3920_v31 }
 0x66f   : > { %2526 = vmatprep.subr.bf16.mxu0 %v3929_v32 }
 0x672   : > { %2527 = vmatpush1.bf16.msra.mxu0 %v3928_v35 }
 0x673   : > { %2528 = vmatprep.subr.bf16.mxu0 %v3937_v36  ;;  %v4380_v36 = vld [vmem:[%s5956_s7 + $0x100] ss:$8 sps:$4 sm:$0xff]  }
 0x676   : > { %2529 = vmatpush1.bf16.msra.mxu0 %v3936_v41  ;;  %v4388_v41 = vld [vmem:[%s5956_s7 + $0x124] ss:$8 sps:$4 sm:$0xff]  }
 0x677   : > { %2530 = vmatprep.subr.bf16.mxu0 %v3945_v44  ;;  %v4386_v44 = vld [vmem:[%s5956_s7 + $0x120] ss:$8 sps:$4 sm:$0xff]  }
 0x67a   : > { %2531 = vmatpush1.bf16.msra.mxu0 %v3944_v8  ;;  %v4394_v8 = vld [vmem:[%s5956_s7 + $0x144] ss:$8 sps:$4 sm:$0xff]  }
 0x67b   : > { %2532 = vmatprep.subr.bf16.mxu0 %v3953_v11  ;;  %v4392_v11 = vld [vmem:[%s5956_s7 + $0x140] ss:$8 sps:$4 sm:$0xff]  }
 0x67e   : > { %2533 = vmatpush1.bf16.msra.mxu0 %v3952_v14  ;;  %v4400_v14 = vld [vmem:[%s5956_s7 + $0x164] ss:$8 sps:$4 sm:$0xff]  }
 0x67f   : > { %2534 = vmatprep.subr.bf16.mxu0 %v3961_v48  ;;  %v4398_v48 = vld [vmem:[%s5956_s7 + $0x160] ss:$8 sps:$4 sm:$0xff]  }
 0x682   : > { %2535 = vmatpush1.bf16.msra.mxu0 %v3960_v51  ;;  %v4406_v51 = vld [vmem:[%s5956_s7 + $0x184] ss:$8 sps:$4 sm:$0xff]  }
 0x683   : > { %2536 = vmatprep.subr.bf16.mxu0 %v3969_v52  ;;  %v4404_v52 = vld [vmem:[%s5956_s7 + $0x180] ss:$8 sps:$4 sm:$0xff]  }
 0x686   : > { %2537 = vmatpush1.bf16.msra.mxu0 %v3968_v57  ;;  %v4412_v57 = vld [vmem:[%s5956_s7 + $0x1a4] ss:$8 sps:$4 sm:$0xff]  }
 0x687   : > { %2538 = vmatprep.subr.bf16.mxu0 %v3977_v59  ;;  %v4410_v59 = vld [vmem:[%s5956_s7 + $0x1a0] ss:$8 sps:$4 sm:$0xff]  }
 0x68a   : > { %2539 = vmatpush1.bf16.msra.mxu0 %v3976_v60  ;;  %v4415_v60 = vld [vmem:[%s5956_s7 + $0x1b4] ss:$8 sps:$4 sm:$0xff]  }
 0x68d   : > { %2541 = vmatmul.mubr.bf16.vlgmr.msra.gmra.mrb[12].mxu0 %v5256_v10 }
 0x6e0   : > { %v2413_v10 = vpop.f32.mrb[4].mxu0  ;;  %v2499_v2 = vpop.f32.mrb[0].mxu1 }
 0x6e1   : > { %v2414_v40 = vadd.f32 %v2413_v10, %v1702_v43  ;;  %v2500_v3 = vadd.f32 %v2499_v2, %v1718_v0  ;;  %v2415_v9 = vpop.f32.mrb[5].mxu0  ;;  %v2501_v42 = vpop.f32.mrb[1].mxu1  ;;  %v4419_v10 = vld [vmem:[%s5956_s7 + $0x1d0] ss:$8 sps:$4 sm:$0xff]  }
 0x6e2   : > { %v2416_v12 = vadd.f32 %v2415_v9, %v1706_v1  ;;  %v2502_v15 = vadd.f32 %v2501_v42, %v1722_v39  ;;  %v2417_v16 = vpop.f32.mrb[6].mxu0  ;;  %v2503_v17 = vpop.f32.mrb[2].mxu1  ;;  %v4422_v42 = vld [vmem:[%s5956_s7 + $0x1e0] ss:$8 sps:$4 sm:$0xff]  }
 0x6e3   : > { %v2418_v18 = vadd.f32 %v2417_v16, %v1702_v43  ;;  %v2504_v19 = vadd.f32 %v2503_v17, %v1718_v0  ;;  %v2419_v20 = vpop.f32.mrb[7].mxu0  ;;  %v2505_v21 = vpop.f32.mrb[3].mxu1  ;;  %v2551_v24 = vmax.f32 %v2414_v40, 0.0  ;;  %v2555_v25 = vmax.f32 %v2500_v3, 0.0  ;;  %v4416_v43 = vld [vmem:[%s5956_s7 + $0x1c0] ss:$8 sps:$4 sm:$0xff]  }
 0x6e4   : > { %v2420_v22 = vadd.f32 %v2419_v20, %v1706_v1  ;;  %v2506_v23 = vadd.f32 %v2505_v21, %v1722_v39  ;;  %v2552_v28 = vmax.f32 %v2416_v12, 0.0  ;;  %v2556_v29 = vmax.f32 %v2502_v15, 0.0  ;;  %v4421_v0 = vld [vmem:[%s5956_s7 + $0x1d4] ss:$8 sps:$4 sm:$0xff]   ;;  %v4424_v40 = vld [vmem:[%s5956_s7 + $0x1e4] ss:$8 sps:$4 sm:$0xff]  }
 0x6e5   : > { %v2559_v26 = vmax.f32 %v2418_v18, 0.0  ;;  %v2563_v27 = vmax.f32 %v2504_v19, 0.0  ;;  %v1709_v1 = vsub.s32 2, %v4977_v55  ;;  %v1713_v39 = vsub.s32 3, %v4977_v55  ;;  %v4427_v16 = vld [vmem:[%s5956_s7 + $0x1f4] ss:$8 sps:$4 sm:$0xff]  }
 0x6e6   : > { %v2560_v30 = vmax.f32 %v2420_v22, 0.0  ;;  %v2564_v31 = vmax.f32 %v2506_v23, 0.0  ;;  %v4425_v22 = vld [vmem:[%s5956_s7 + $0x1f0] ss:$8 sps:$4 sm:$0xff]  }
 0x6e7   : > { %v2567_v32 = vpack.c.bf16 %v2559_v26, %v2551_v24  ;;  %v5558_v33 = vpack.c.bf16 %v2563_v27, %v2555_v25  ;;  %v1710_v2 = vrot.slane %v5549_v62, %v1709_v1  ;;  %v1714_v3 = vrot.slane %v5549_v62, %v1713_v39  ;;  %v4430_v25 = vld [vmem:[%s5956_s7 + $0x204] ss:$8 sps:$4 sm:$0xff]  }
 0x6e8   : > { %v2568_v34 = vpack.c.bf16 %v2560_v30, %v2552_v28  ;;  %v5560_v35 = vpack.c.bf16 %v2564_v31, %v2556_v29  ;;  %v4428_v30 = vld [vmem:[%s5956_s7 + $0x200] ss:$8 sps:$4 sm:$0xff]   ;;  %v4433_v31 = vld [vmem:[%s5956_s7 + $0x214] ss:$8 sps:$4 sm:$0xff]  }
 0x6ea   : > { %3387 = vmatprep.mubr.bf16.mxu1 %v2568_v34  ;;  %v4436_v34 = vld [vmem:[%s5956_s7 + $0x224] ss:$8 sps:$4 sm:$0xff]  }
 0x6eb   : > { %3388 = vmatmul.mubr.bf16.vlgmr.msra.gmra.mrb[4].mxu1 %v2567_v32  ;;  %v4431_v32 = vld [vmem:[%s5956_s7 + $0x210] ss:$8 sps:$4 sm:$0xff]  }
 0x6ec   : > { %3399 = vmatpush1.bf16.msra.mxu1 %v4380_v36  ;;  %v4434_v36 = vld [vmem:[%s5956_s7 + $0x220] ss:$8 sps:$4 sm:$0xff]  }
 0x6ed   : > { %3400 = vmatprep.subr.bf16.mxu1 %v4385_v37  ;;  %v4439_v37 = vld [vmem:[%s5956_s7 + $0x234] ss:$8 sps:$4 sm:$0xff]  }
 0x6f0   : > { %3401 = vmatpush1.bf16.msra.mxu1 %v4383_v38  ;;  %v4442_v38 = vld [vmem:[%s5956_s7 + $0x244] ss:$8 sps:$4 sm:$0xff]  }
 0x6f1   : > { %3402 = vmatprep.subr.bf16.mxu1 %v4388_v41  ;;  %v4440_v41 = vld [vmem:[%s5956_s7 + $0x240] ss:$8 sps:$4 sm:$0xff]  }
 0x6f4   : > { %3403 = vmatpush1.bf16.msra.mxu1 %v4386_v44  ;;  %v4445_v44 = vld [vmem:[%s5956_s7 + $0x254] ss:$8 sps:$4 sm:$0xff]  }
 0x6f5   : > { %3404 = vmatprep.subr.bf16.mxu1 %v4391_v45  ;;  %v4443_v45 = vld [vmem:[%s5956_s7 + $0x250] ss:$8 sps:$4 sm:$0xff]  }
 0x6f8   : > { %3405 = vmatpush1.bf16.msra.mxu1 %v4389_v46  ;;  %v4448_v46 = vld [vmem:[%s5956_s7 + $0x264] ss:$8 sps:$4 sm:$0xff]  }
 0x6f9   : > { %3406 = vmatprep.subr.bf16.mxu1 %v4394_v8  ;;  %v4446_v8 = vld [vmem:[%s5956_s7 + $0x260] ss:$8 sps:$4 sm:$0xff]  }
 0x6fc   : > { %3407 = vmatpush1.bf16.msra.mxu1 %v4392_v11  ;;  %v4451_v11 = vld [vmem:[%s5956_s7 + $0x274] ss:$8 sps:$4 sm:$0xff]  }
 0x6fd   : > { %3408 = vmatprep.subr.bf16.mxu1 %v4397_v47  ;;  %v4449_v47 = vld [vmem:[%s5956_s7 + $0x270] ss:$8 sps:$4 sm:$0xff]  }
 0x700   : > { %3409 = vmatpush1.bf16.msra.mxu1 %v4395_v13  ;;  %v4454_v13 = vld [vmem:[%s5956_s7 + $0x284] ss:$8 sps:$4 sm:$0xff]  }
 0x701   : > { %3410 = vmatprep.subr.bf16.mxu1 %v4400_v14  ;;  %v4452_v14 = vld [vmem:[%s5956_s7 + $0x280] ss:$8 sps:$4 sm:$0xff]  }
 0x704   : > { %3411 = vmatpush1.bf16.msra.mxu1 %v4398_v48  ;;  %v4457_v48 = vld [vmem:[%s5956_s7 + $0x294] ss:$8 sps:$4 sm:$0xff]  }
 0x705   : > { %3412 = vmatprep.subr.bf16.mxu1 %v4403_v49  ;;  %v4455_v49 = vld [vmem:[%s5956_s7 + $0x290] ss:$8 sps:$4 sm:$0xff]  }
 0x708   : > { %3413 = vmatpush1.bf16.msra.mxu1 %v4401_v50  ;;  %v4460_v50 = vld [vmem:[%s5956_s7 + $0x2a4] ss:$8 sps:$4 sm:$0xff]  }
 0x709   : > { %3414 = vmatprep.subr.bf16.mxu1 %v4406_v51  ;;  %v4458_v51 = vld [vmem:[%s5956_s7 + $0x2a0] ss:$8 sps:$4 sm:$0xff]  }
 0x70c   : > { %3415 = vmatpush1.bf16.msra.mxu1 %v4404_v52  ;;  %v4463_v52 = vld [vmem:[%s5956_s7 + $0x2b4] ss:$8 sps:$4 sm:$0xff]  }
 0x70d   : > { %3416 = vmatprep.subr.bf16.mxu1 %v4409_v53  ;;  %v4461_v53 = vld [vmem:[%s5956_s7 + $0x2b0] ss:$8 sps:$4 sm:$0xff]  }
 0x710   : > { %3417 = vmatpush1.bf16.msra.mxu1 %v4407_v54  ;;  %v4466_v54 = vld [vmem:[%s5956_s7 + $0x2c4] ss:$8 sps:$4 sm:$0xff]  }
 0x711   : > { %3418 = vmatprep.subr.bf16.mxu1 %v4412_v57  ;;  %v4464_v57 = vld [vmem:[%s5956_s7 + $0x2c0] ss:$8 sps:$4 sm:$0xff]  }
 0x714   : > { %3419 = vmatpush1.bf16.msra.mxu1 %v4410_v59  ;;  %v4469_v59 = vld [vmem:[%s5956_s7 + $0x2d4] ss:$8 sps:$4 sm:$0xff]  }
 0x715   : > { %3420 = vmatprep.subr.bf16.mxu1 %v4415_v60  ;;  %v1725_v60 = vsub.s32 6, %v4977_v55 }
 0x718   : > { %3421 = vmatpush1.bf16.msra.mxu1 %v4413_v61  ;;  %v1729_v61 = vsub.s32 7, %v4977_v55  ;;  %v4470_v55 = vld [vmem:[%s5956_s7 + $0x2e0] ss:$8 sps:$4 sm:$0xff]  }
 0x719   : > { %3422 = vmatprep.subr.bf16.mxu1 %v4418_v63  ;;  %v4467_v63 = vld [vmem:[%s5956_s7 + $0x2d0] ss:$8 sps:$4 sm:$0xff]  }
 0x71a   : > { %v1730_v1 = vrot.slane %v5549_v62, %v1729_v61 }
 0x71c   : > { %3423 = vmatpush1.bf16.msra.mxu1 %v4416_v43  ;;  %v1726_v43 = vrot.slane %v5549_v62, %v1725_v60  ;;  %v4473_v62 = vld [vmem:[%s5956_s7 + $0x2f0] ss:$8 sps:$4 sm:$0xff]  }
 0x71d   : > { %3424 = vmatprep.subr.bf16.mxu1 %v4421_v0  ;;  %v4472_v0 = vld [vmem:[%s5956_s7 + $0x2e4] ss:$8 sps:$4 sm:$0xff]  }
 0x720   : > { %v2456_v9 = vpop.f32.mrb[8].mxu0  ;;  %3425 = vmatpush1.bf16.msra.mxu1 %v4419_v10 }
 0x721   : > { %v2457_v12 = vadd.f32 %v2456_v9, %v1710_v2  ;;  %v2458_v15 = vpop.f32.mrb[9].mxu0  ;;  %3426 = vmatprep.subr.bf16.mxu1 %v4424_v40  ;;  %v4475_v40 = vld [vmem:[%s5956_s7 + $0x2f4] ss:$8 sps:$4 sm:$0xff]  }
 0x722   : > { %v2459_v17 = vadd.f32 %v2458_v15, %v1714_v3  ;;  %v2460_v18 = vpop.f32.mrb[10].mxu0 }
 0x723   : > { %v2461_v19 = vadd.f32 %v2460_v18, %v1710_v2  ;;  %v2462_v20 = vpop.f32.mrb[11].mxu0  ;;  %v2553_v23 = vmax.f32 %v2457_v12, 0.0  ;;  %v4478_v18 = vld [vmem:[%s5956_s7 + $0x304] ss:$8 sps:$4 sm:$0xff]  }
 0x724   : > { %v2463_v21 = vadd.f32 %v2462_v20, %v1714_v3  ;;  %3427 = vmatpush1.bf16.msra.mxu1 %v4422_v42  ;;  %v2554_v26 = vmax.f32 %v2459_v17, 0.0 }
 0x725   : > { %v2561_v24 = vmax.f32 %v2461_v19, 0.0  ;;  %3428 = vmatprep.subr.bf16.mxu1 %v4427_v16 }
 0x726   : > { %v2562_v27 = vmax.f32 %v2463_v21, 0.0 }
 0x727   : > { %v2569_v28 = vpack.c.bf16 %v2561_v24, %v2553_v23  ;;  %v4476_v23 = vld [vmem:[%s5956_s7 + $0x300] ss:$8 sps:$4 sm:$0xff]   ;;  %v4481_v24 = vld [vmem:[%s5956_s7 + $0x314] ss:$8 sps:$4 sm:$0xff]  }
 0x728   : > { %v2570_v29 = vpack.c.bf16 %v2562_v27, %v2554_v26  ;;  %3429 = vmatpush1.bf16.msra.mxu1 %v4425_v22  ;;  %v4484_v26 = vld [vmem:[%s5956_s7 + $0x324] ss:$8 sps:$4 sm:$0xff]   ;;  %v4482_v27 = vld [vmem:[%s5956_s7 + $0x320] ss:$8 sps:$4 sm:$0xff]  }
 0x729   : > { %3441 = vmatprep.subr.bf16.mxu1 %v4430_v25  ;;  %v4479_v25 = vld [vmem:[%s5956_s7 + $0x310] ss:$8 sps:$4 sm:$0xff]  }
 0x72a   : > { %3430 = vmatprep.mubr.bf16.mxu1 %v2570_v29  ;;  %v4490_v29 = vld [vmem:[%s5956_s7 + $0x344] ss:$8 sps:$4 sm:$0xff]  }
 0x72b   : > { %3431 = vmatmul.mubr.bf16.vlgmr.msra.gmra.mrb[4].mxu1 %v2569_v28  ;;  %v4485_v28 = vld [vmem:[%s5956_s7 + $0x330] ss:$8 sps:$4 sm:$0xff]  }
 0x72c   : > { %3442 = vmatpush1.bf16.msra.mxu1 %v4428_v30  ;;  %3473 = vmatprep.mubr.bf16.mxu1 %v5560_v35  ;;  %v4437_v35 = vld [vmem:[%s5956_s7 + $0x230] ss:$8 sps:$4 sm:$0xff]   ;;  %v4488_v30 = vld [vmem:[%s5956_s7 + $0x340] ss:$8 sps:$4 sm:$0xff]  }
 0x72d   : > { %3443 = vmatprep.subr.bf16.mxu1 %v4433_v31  ;;  %v4493_v31 = vld [vmem:[%s5956_s7 + $0x354] ss:$8 sps:$4 sm:$0xff]  }
 0x730   : > { %3444 = vmatpush1.bf16.msra.mxu1 %v4431_v32  ;;  %v4491_v32 = vld [vmem:[%s5956_s7 + $0x350] ss:$8 sps:$4 sm:$0xff]  }
 0x731   : > { %3445 = vmatprep.subr.bf16.mxu1 %v4436_v34  ;;  %v4496_v34 = vld [vmem:[%s5956_s7 + $0x364] ss:$8 sps:$4 sm:$0xff]  }
 0x734   : > { %3446 = vmatpush1.bf16.msra.mxu1 %v4434_v36  ;;  %v4494_v36 = vld [vmem:[%s5956_s7 + $0x360] ss:$8 sps:$4 sm:$0xff]  }
 0x735   : > { %3447 = vmatprep.subr.bf16.mxu1 %v4439_v37  ;;  %v4499_v37 = vld [vmem:[%s5956_s7 + $0x374] ss:$8 sps:$4 sm:$0xff]  }
 0x738   : > { %3448 = vmatpush1.bf16.msra.mxu1 %v4437_v35  ;;  %v4497_v35 = vld [vmem:[%s5956_s7 + $0x370] ss:$8 sps:$4 sm:$0xff]  }
 0x739   : > { %3449 = vmatprep.subr.bf16.mxu1 %v4442_v38  ;;  %v4502_v38 = vld [vmem:[%s5956_s7 + $0x384] ss:$8 sps:$4 sm:$0xff]  }
 0x73c   : > { %3450 = vmatpush1.bf16.msra.mxu1 %v4440_v41  ;;  %v4500_v41 = vld [vmem:[%s5956_s7 + $0x380] ss:$8 sps:$4 sm:$0xff]  }
 0x73d   : > { %3451 = vmatprep.subr.bf16.mxu1 %v4445_v44  ;;  %v4505_v44 = vld [vmem:[%s5956_s7 + $0x394] ss:$8 sps:$4 sm:$0xff]  }
 0x740   : > { %3452 = vmatpush1.bf16.msra.mxu1 %v4443_v45  ;;  %v4503_v45 = vld [vmem:[%s5956_s7 + $0x390] ss:$8 sps:$4 sm:$0xff]  }
 0x741   : > { %3453 = vmatprep.subr.bf16.mxu1 %v4448_v46  ;;  %v4508_v46 = vld [vmem:[%s5956_s7 + $0x3a4] ss:$8 sps:$4 sm:$0xff]  }
 0x744   : > { %3454 = vmatpush1.bf16.msra.mxu1 %v4446_v8  ;;  %v4506_v8 = vld [vmem:[%s5956_s7 + $0x3a0] ss:$8 sps:$4 sm:$0xff]  }
 0x745   : > { %3455 = vmatprep.subr.bf16.mxu1 %v4451_v11  ;;  %v4511_v11 = vld [vmem:[%s5956_s7 + $0x3b4] ss:$8 sps:$4 sm:$0xff]  }
 0x748   : > { %3456 = vmatpush1.bf16.msra.mxu1 %v4449_v47  ;;  %v4509_v47 = vld [vmem:[%s5956_s7 + $0x3b0] ss:$8 sps:$4 sm:$0xff]  }
 0x749   : > { %3457 = vmatprep.subr.bf16.mxu1 %v4454_v13  ;;  %v4514_v13 = vld [vmem:[%s5956_s7 + $0x3c4] ss:$8 sps:$4 sm:$0xff]  }
 0x74c   : > { %3458 = vmatpush1.bf16.msra.mxu1 %v4452_v14  ;;  %v4512_v14 = vld [vmem:[%s5956_s7 + $0x3c0] ss:$8 sps:$4 sm:$0xff]  }
 0x74d   : > { %3459 = vmatprep.subr.bf16.mxu1 %v4457_v48  ;;  %v4517_v48 = vld [vmem:[%s5956_s7 + $0x3d4] ss:$8 sps:$4 sm:$0xff]  }
 0x750   : > { %3460 = vmatpush1.bf16.msra.mxu1 %v4455_v49  ;;  %v4515_v49 = vld [vmem:[%s5956_s7 + $0x3d0] ss:$8 sps:$4 sm:$0xff]  }
 0x751   : > { %3461 = vmatprep.subr.bf16.mxu1 %v4460_v50  ;;  %v4520_v50 = vld [vmem:[%s5956_s7 + $0x3e4] ss:$8 sps:$4 sm:$0xff]  }
 0x754   : > { %3462 = vmatpush1.bf16.msra.mxu1 %v4458_v51  ;;  %v4518_v51 = vld [vmem:[%s5956_s7 + $0x3e0] ss:$8 sps:$4 sm:$0xff]  }
 0x755   : > { %3463 = vmatprep.subr.bf16.mxu1 %v4463_v52  ;;  %v4523_v52 = vld [vmem:[%s5956_s7 + $0x3f4] ss:$8 sps:$4 sm:$0xff]  }
 0x758   : > { %3464 = vmatpush1.bf16.msra.mxu1 %v4461_v53  ;;  %v4521_v53 = vld [vmem:[%s5956_s7 + $0x3f0] ss:$8 sps:$4 sm:$0xff]  }
 0x759   : > { %3465 = vmatprep.subr.bf16.mxu1 %v4466_v54  ;;  %v2703_v54 = vld [vmem:[%s5958_s24] sm:$0x3] }
 0x75c   : > { %3466 = vmatpush1.bf16.msra.mxu1 %v4464_v57  ;;  %v2708_v57 = vrot.slane %v2703_v54, %v4980_v56 }
 0x75d   : > { %3467 = vmatprep.subr.bf16.mxu1 %v4469_v59  ;;  %v2712_v59 = vrot.slane %v2703_v54, %v4986_v58 }
 0x760   : > { %v2542_v39 = vpop.f32.mrb[12].mxu0  ;;  %3468 = vmatpush1.bf16.msra.mxu1 %v4467_v63 }
 0x761   : > { %v2543_v10 = vadd.f32 %v2542_v39, %v1726_v43  ;;  %v2544_v2 = vpop.f32.mrb[13].mxu0  ;;  %3469 = vmatprep.subr.bf16.mxu1 %v4472_v0 }
 0x762   : > { %v2545_v3 = vadd.f32 %v2544_v2, %v1730_v1  ;;  %v2546_v9 = vpop.f32.mrb[14].mxu0 }
 0x763   : > { %v2547_v42 = vadd.f32 %v2546_v9, %v1726_v43  ;;  %v2548_v12 = vpop.f32.mrb[15].mxu0  ;;  %v2557_v16 = vmax.f32 %v2543_v10, 0.0 }
 0x764   : > { %v2549_v15 = vadd.f32 %v2548_v12, %v1730_v1  ;;  %3470 = vmatpush1.bf16.msra.mxu1 %v4470_v55  ;;  %v2558_v19 = vmax.f32 %v2545_v3, 0.0 }
 0x765   : > { %v2565_v17 = vmax.f32 %v2547_v42, 0.0  ;;  %3471 = vmatprep.subr.bf16.mxu1 %v4475_v40 }
 0x766   : > { %v2566_v20 = vmax.f32 %v2549_v15, 0.0 }
 0x767   : > { %v5763_v21 = vpack.c.bf16 %v2565_v17, %v2557_v16 }
 0x768   : > { %v2574_v22 = vpack.c.bf16 %v2566_v20, %v2558_v19  ;;  %3472 = vmatpush1.bf16.msra.mxu1 %v4473_v62 }
 0x769   : > { %3484 = vmatprep.subr.bf16.mxu1 %v4478_v18 }
 0x76b   : > { %3474 = vmatmul.mubr.bf16.vlgmr.msra.gmra.mrb[4].mxu1 %v5558_v33  ;;  %v4487_v33 = vld [vmem:[%s5956_s7 + $0x334] ss:$8 sps:$4 sm:$0xff]  }
 0x76c   : > { %3485 = vmatpush1.bf16.msra.mxu1 %v4476_v23  ;;  %3516 = vmatprep.mubr.bf16.mxu1 %v2574_v22 }
 0x76d   : > { %3486 = vmatprep.subr.bf16.mxu1 %v4481_v24 }
 0x770   : > { %3487 = vmatpush1.bf16.msra.mxu1 %v4479_v25 }
 0x771   : > { %3488 = vmatprep.subr.bf16.mxu1 %v4484_v26 }
 0x774   : > { %3489 = vmatpush1.bf16.msra.mxu1 %v4482_v27 }
 0x775   : > { %3490 = vmatprep.subr.bf16.mxu1 %v4487_v33 }
 0x778   : > { %3491 = vmatpush1.bf16.msra.mxu1 %v4485_v28  ;;  %v3531_v28 = vld [vmem:[%s5959_s27] sm:$0x3] }
 0x779   : > { %3492 = vmatprep.subr.bf16.mxu1 %v4490_v29  ;;  %v3532_v29 = vld [vmem:[%s5960_s6] sm:$0x3] }
 0x77c   : > { %3493 = vmatpush1.bf16.msra.mxu1 %v4488_v30  ;;  %v3569_v30 = vrot.slane %v3531_v28, %v4980_v56 }
 0x77d   : > { %3494 = vmatprep.subr.bf16.mxu1 %v4493_v31  ;;  %v3573_v31 = vrot.slane %v3531_v28, %v4986_v58 }
 0x780   : > { %3495 = vmatpush1.bf16.msra.mxu1 %v4491_v32 }
 0x781   : > { %3496 = vmatprep.subr.bf16.mxu1 %v4496_v34  ;;  %v3584_v34 = vrot.slane %v3532_v29, %v4980_v56 }
 0x784   : > { %3497 = vmatpush1.bf16.msra.mxu1 %v4494_v36  ;;  %v3588_v36 = vrot.slane %v3532_v29, %v4986_v58 }
 0x785   : > { %3498 = vmatprep.subr.bf16.mxu1 %v4499_v37 }
 0x788   : > { %3499 = vmatpush1.bf16.msra.mxu1 %v4497_v35 }
 0x789   : > { %3500 = vmatprep.subr.bf16.mxu1 %v4502_v38 }
 0x78c   : > { %3501 = vmatpush1.bf16.msra.mxu1 %v4500_v41 }
 0x78d   : > { %3502 = vmatprep.subr.bf16.mxu1 %v4505_v44 }
 0x790   : > { %3503 = vmatpush1.bf16.msra.mxu1 %v4503_v45 }
 0x791   : > { %3504 = vmatprep.subr.bf16.mxu1 %v4508_v46 }
 0x794   : > { %3505 = vmatpush1.bf16.msra.mxu1 %v4506_v8 }
 0x795   : > { %3506 = vmatprep.subr.bf16.mxu1 %v4511_v11 }
 0x798   : > { %3507 = vmatpush1.bf16.msra.mxu1 %v4509_v47 }
 0x799   : > { %3508 = vmatprep.subr.bf16.mxu1 %v4514_v13 }
 0x79c   : > { %3509 = vmatpush1.bf16.msra.mxu1 %v4512_v14 }
 0x79d   : > { %3510 = vmatprep.subr.bf16.mxu1 %v4517_v48 }
 0x7a0   : > { %3511 = vmatpush1.bf16.msra.mxu1 %v4515_v49 }
 0x7a1   : > { %3512 = vmatprep.subr.bf16.mxu1 %v4520_v50 }
 0x7a4   : > { %3513 = vmatpush1.bf16.msra.mxu1 %v4518_v51 }
 0x7a5   : > { %3514 = vmatprep.subr.bf16.mxu1 %v4523_v52 }
 0x7a8   : > { %3515 = vmatpush1.bf16.msra.mxu1 %v4521_v53 }
 0x7ab   : > { %3517 = vmatmul.mubr.bf16.vlgmr.msra.gmra.mrb[4].mxu1 %v5763_v21 }
 0x87e   : > { %v3518_v60 = vpop.f32.mrb[4].mxu1 }
 0x87f   : > { %v4144_v61 = vadd.f32 %v3518_v60, %v2708_v57  ;;  %v3520_v63 = vpop.f32.mrb[5].mxu1 }
 0x880   : > { %v4145_v43 = vadd.f32 %v3520_v63, %v2712_v59  ;;  %v3522_v0 = vpop.f32.mrb[6].mxu1 }
 0x881   : > { %v3527_v1 = vadd.f32 %v4144_v61, %v5240_v6  ;;  %v4146_v39 = vadd.f32 %v3522_v0, %v2708_v57  ;;  %v3524_v55 = vpop.f32.mrb[7].mxu1 }
 0x882   : > { %v3528_v10 = vadd.f32 %v4145_v43, %v5236_v4  ;;  %v4147_v2 = vadd.f32 %v3524_v55, %v2712_v59 }
 0x883   : > { %v3529_v40 = vadd.f32 %v4146_v39, %v5242_v7 }
 0x884   : > { %v3530_v3 = vadd.f32 %v4147_v2, %v5238_v5  ;;  %v3533_v9 = vadd.f32 %v3528_v10, %v3527_v1 }
 0x886   : > { %3534 = vadd.xlane.f32.xlu1 %v3533_v9  ;;  %v3536_v42 = vadd.f32 %v3530_v3, %v3529_v40 }
 0x888   : > { %3537 = vadd.xlane.f32.xlu0 %v3536_v42 }
 0x913   : > { %v3535_v12 = vpop.xlane.xlu1 %3534 }
 0x914   : > { %v3539_v15 = vmul.f32 0.00390625, %v3535_v12 }
 0x915   : > { %v3538_v62 = vpop.xlane.xlu0 %3537 }
 0x916   : > { %v3541_v16 = vsub.f32 %v3527_v1, %v3539_v15  ;;  %v3542_v17 = vsub.f32 %v3528_v10, %v3539_v15  ;;  %v3540_v18 = vmul.f32 0.00390625, %v3538_v62 }
 0x918   : > { %v3543_v6 = vsub.f32 %v3529_v40, %v3540_v18  ;;  %v3544_v19 = vsub.f32 %v3530_v3, %v3540_v18  ;;  %v3545_v20 = vmul.f32 %v3541_v16, %v3541_v16  ;;  %v3546_v21 = vmul.f32 %v3542_v17, %v3542_v17 }
 0x91a   : > { %v3549_v4 = vadd.f32 %v3546_v21, %v3545_v20  ;;  %v3547_v22 = vmul.f32 %v3543_v6, %v3543_v6  ;;  %v3548_v23 = vmul.f32 %v3544_v19, %v3544_v19 }
 0x91c   : > { %3550 = vadd.xlane.f32.xlu1 %v3549_v4  ;;  %v3552_v7 = vadd.f32 %v3548_v23, %v3547_v22 }
 0x91e   : > { %3553 = vadd.xlane.f32.xlu0 %v3552_v7 }
 0x9a9   : > { %v3551_v5 = vpop.xlane.xlu1 %3550 }
 0x9aa   : > { %v3555_v24 = vmul.f32 0.00390625, %v3551_v5 }
 0x9ab   : > { %v3554_v25 = vpop.xlane.xlu0 %3553 }
 0x9ac   : > { %v3557_v26 = vadd.f32 1e-05, %v3555_v24  ;;  %v3556_v27 = vmul.f32 0.00390625, %v3554_v25 }
 0x9ae   : > { %4536 = vrsqrt.f32 %v3557_v26  ;;  %v3558_v33 = vadd.f32 1e-05, %v3556_v27 }
 0x9b0   : > { %4538 = vrsqrt.f32 %v3558_v33 }
 0x9b8   : > { %v4537_v32 = vpop.eup %4536 }
 0x9b9   : > { %v3561_v37 = vmul.f32 %v4537_v32, %v3541_v16  ;;  %v3562_v35 = vmul.f32 %v4537_v32, %v3542_v17 }
 0x9ba   : > { %v4539_v38 = vpop.eup %4538 }
 0x9bb   : > { %v3576_v41 = vmul.f32 %v3569_v30, %v3561_v37  ;;  %v3577_v44 = vmul.f32 %v3573_v31, %v3562_v35  ;;  %v3563_v45 = vmul.f32 %v4539_v38, %v3543_v6  ;;  %v3564_v46 = vmul.f32 %v4539_v38, %v3544_v19 }
 0x9bd   : > { %v3591_v8 = vadd.f32 %v3584_v34, %v3576_v41  ;;  %v3592_v11 = vadd.f32 %v3588_v36, %v3577_v44  ;;  %v3578_v47 = vmul.f32 %v3569_v30, %v3563_v45  ;;  %v3579_v13 = vmul.f32 %v3573_v31, %v3564_v46 }
 0x9bf   : > { %v4110_v14 = vpack.c.bf16 %v3592_v11, %v3591_v8  ;;  %v3593_v48 = vadd.f32 %v3584_v34, %v3578_v47  ;;  %v3594_v49 = vadd.f32 %v3588_v36, %v3579_v13 }
 0x9c1   : > { %3607 = vst [vmem:[%s4846_s26] sm:$0xff] %v4110_v14  ;;  %v4111_v56 = vpack.c.bf16 %v3594_v49, %v3593_v48 }
 0x9c3   : > { %3608 = vst [vmem:[%s4846_s26 + $0x8] sm:$0xff] %v4111_v56 }
 0x9c4 PF: > { %s24_s23 = sadd.s32 1, %s4626_s23   ;;  %s5961_s18 = sld [smem:[#allocation8_spill]] }
 0x9c5   : > { %p21_p5 = scmp.ge.s32.totalorder %s24_s23, 10   ;;  %s5962_s21 = sld [smem:[#allocation9_spill]] }
 0x9c6   : > { %s5963_s28 = sld [smem:[#allocation10_spill]]  ;;  %s5964_s11 = sld [smem:[#allocation11_spill]] }
 0x9c7   : > { %s5965_s29 = smov %s4590_s30  ;;  %s5966_s30 = smov %s4800_s5 }
 0x9c8   : > { %s5967_s15 = smov %s4598_s16  ;;  %s5968_s16 = smov %s4797_s8 }
 0x9c9   : > { %s5969_s17 = smov %s4614_s20  ;;  %s5970_s19 = smov %s4622_s22 }
 0x9ca   :  { %23 = sbr.rel (!%p21_p5) target bundleno = 17 (0x11), region = 266 }
 0x9cb   : > { %s5971_s20 = smov %s5962_s21 }
 0x9cc   : > { %s5972_s21 = smov %s5963_s28  ;;  %s5973_s22 = smov %s5964_s11 }

</bundles_post_ra>
